<compile_context>
chip_gen: v6e
topology: v6e:2x2x1
jax: 0.10.0
libtpu: 0.0.40
codegen_flags: <defaults>
</compile_context>

<pallas_src>
import functools

import jax
import jax.numpy as jnp
from jax.experimental import pallas as pl
from jax.experimental.pallas import tpu as pltpu

_LANE = 128
_EPS = 1e-5
_W_OFF = 16           # bf16 sublane-tile aligned interior column offset in h1
_SUBLANE_BF16 = 16


def _round_up(x, m):
    return (x + m - 1) // m * m


def _fused_double_conv_kernel(p1_ref, w1_ref, g1_ref, b1_ref,
                              w2_ref, g2_ref, b2_ref, o_ref, h1_ref):
    # p1_ref : (R, 9*Cin)        bf16  conv1 patch matrix (R = N*H*W)
    # w1_ref : (9*Cin, Cp)       bf16  K-fused conv1 weights (Cp = 128-pad Cout)
    # w2_ref : (9*Cp, Cp)        bf16  K-fused conv2 weights
    # g*/b*  : (1, Cp)           f32   BN affine params (zero on padded lanes)
    # o_ref  : (R, Cp)           f32   lane-dense output slab
    # h1_ref : (N, H+2, Wh, Cp)  bf16  layer-1 output + zero halo; interior at
    #                                  rows [1, 1+H), cols [_W_OFF, _W_OFF+W)
    n, hp, wh, cp = h1_ref.shape
    h = hp - 2
    r = p1_ref.shape[0]
    w = r // (n * h)
    a = _W_OFF

    def bn_relu(z, g_ref, b_ref):
        # Training-mode BatchNorm2d: biased stats over all N*H*W rows/channel,
        # two-pass moments in f32 (avoids E[z^2]-E[z]^2 cancellation).
        mean = jnp.mean(z, axis=0, keepdims=True)
        cen = z - mean
        var = jnp.mean(cen * cen, axis=0, keepdims=True)
        y = cen * jax.lax.rsqrt(var + _EPS)
        return jnp.maximum(y * g_ref[...] + b_ref[...], 0.0)

    # ---- layer 1: conv3x3 as a single K-fused MXU matmul -> BN -> ReLU ------
    z1 = jnp.dot(p1_ref[...], w1_ref[...], preferred_element_type=jnp.float32)
    h1 = bn_relu(z1, g1_ref, b1_ref)

    # Zero only the halo ring conv2 reads (overlapping the interior is fine:
    # the interior store below overwrites it), then store the interior bf16 at
    # a sublane-tile-aligned column offset.
    h1_ref[:, 0:1, :, :] = jnp.zeros((n, 1, wh, cp), jnp.bfloat16)
    h1_ref[:, hp - 1:hp, :, :] = jnp.zeros((n, 1, wh, cp), jnp.bfloat16)
    h1_ref[:, 1:1 + h, 0:a, :] = jnp.zeros((n, h, a, cp), jnp.bfloat16)
    h1_ref[:, 1:1 + h, a + w:wh, :] = jnp.zeros((n, h, wh - (a + w), cp),
                                                jnp.bfloat16)
    h1_ref[:, 1:1 + h, a:a + w, :] = h1.astype(jnp.bfloat16).reshape(n, h, w, cp)

    # ---- layer 2: (R, 9*Cp) patch matrix from VMEM-resident h1, one matmul --
    p2 = jnp.concatenate(
        [h1_ref[:, kh:kh + h, a - 1 + kw:a - 1 + kw + w, :].reshape(r, cp)
         for kh in range(3) for kw in range(3)],
        axis=-1)
    z2 = jnp.dot(p2, w2_ref[...], preferred_element_type=jnp.float32)
    o_ref[...] = bn_relu(z2, g2_ref, b2_ref)


def _fused_double_conv(p1, w1p, g1, b1, w2p, g2, b2, *, n, h, w):
    r, k1 = p1.shape
    cp = w2p.shape[-1]
    wh = _round_up(_W_OFF + w + 1, _SUBLANE_BF16)

    # Rough whole-in-VMEM footprint: inputs + output + h1 scratch + conv2 patch
    # matrix (and its window pieces) + f32 BN temporaries.
    est = (r * k1 * 2 + w1p.size * 2 + w2p.size * 2 + 4 * cp * 4
           + r * cp * 4                          # output slab (f32)
           + n * (h + 2) * wh * cp * 2           # h1 halo scratch (bf16)
           + 2 * r * 9 * cp * 2                  # conv2 patch matrix + pieces
           + 3 * r * cp * 4)                     # f32 BN temporaries
    # TODO(synk): row-tiled grid + cross-tile two-pass BN for shapes that do
    # not fit whole-in-VMEM (and to use both TensorCores on v7x).
    assert est < 48 * 1024 * 1024, (
        f"whole-in-VMEM fused double-conv wants ~{est >> 20} MiB of VMEM; "
        "this shape needs the row-tiled variant.")
    vmem_limit = int(min(max(32 << 20, 2 * est), 64 << 20))

    vmem = pl.BlockSpec(memory_space=pltpu.MemorySpace.VMEM)
    return pl.pallas_call(
        _fused_double_conv_kernel,
        out_shape=jax.ShapeDtypeStruct((r, cp), jnp.float32),
        in_specs=[vmem] * 7,
        out_specs=vmem,
        scratch_shapes=[pltpu.VMEM((n, h + 2, wh, cp), jnp.bfloat16)],
        compiler_params=pltpu.CompilerParams(vmem_limit_bytes=vmem_limit),
    )(p1, w1p, g1, b1, w2p, g2, b2)


def pack_params(params):
    """One-time (outside jit) repack of conv weights / BN params into the
    K-fused, lane-padded, bf16 layouts the kernel consumes."""
    w1, g1, b1, w2, g2, b2 = params
    c_out, c_in = w1.shape[0], w1.shape[1]
    cp = _round_up(c_out, _LANE)

    # (Cout, Cin, 3, 3) -> (kh, kw, Cin, Cout) -> (9*Cin, Cp): the K order
    # matches the (kh, kw, channel) layout of the patch matrices.
    w1p = jnp.transpose(w1, (2, 3, 1, 0)).reshape(9 * c_in, c_out)
    w1p = jnp.pad(w1p, ((0, 0), (0, cp - c_out))).astype(jnp.bfloat16)

    w2t = jnp.transpose(w2, (2, 3, 1, 0))                    # (3, 3, Cout, Cout)
    w2t = jnp.pad(w2t, ((0, 0), (0, 0), (0, cp - c_out), (0, cp - c_out)))
    w2p = w2t.reshape(9 * cp, cp).astype(jnp.bfloat16)

    def vec(v):
        return jnp.pad(v.reshape(1, -1),
                       ((0, 0), (0, cp - c_out))).astype(jnp.float32)

    return w1p, vec(g1), vec(b1), w2p, vec(g2), vec(b2)


@functools.partial(jax.jit, static_argnames=("c_out",))
def double_convolution_block(x_nchw, packed, *, c_out):
    """Forward pass of the PyTorch DoubleConvolutionBlock (training-mode BN)."""
    w1p, g1, b1, w2p, g2, b2 = packed
    n, c_in, h, w = x_nchw.shape

    # NCHW -> NHWC (bf16) + spatial zero pad.
    # TODO(synk): accept/return NHWC at the block boundary to drop the transposes.
    x = jnp.transpose(x_nchw, (0, 2, 3, 1)).astype(jnp.bfloat16)
    xp = jnp.pad(x, ((0, 0), (1, 1), (1, 1), (0, 0)))

    # conv1 patch matrix (R, 9*Cin), built wrapper-side: negligible HBM traffic
    # at small Cin and avoids sub-128-lane concatenation inside the kernel.
    # TODO(synk): for large Cin build this in-kernel (pieces are then
    # lane-tile multiples) to avoid the 9x HBM expansion.
    p1 = jnp.concatenate(
        [xp[:, kh:kh + h, kw:kw + w, :] for kh in range(3) for kw in range(3)],
        axis=-1).reshape(n * h * w, 9 * c_in)

    out = _fused_double_conv(p1, w1p, g1, b1, w2p, g2, b2, n=n, h=h, w=w)
    out = out[:, :c_out].reshape(n, h, w, c_out)
    return jnp.transpose(out, (0, 3, 1, 2))                   # back to NCHW


def _reference(x_nchw, params):
    # Pure-JAX f32 reference of the PyTorch forward (training-mode BN).
    w1, g1, b1, w2, g2, b2 = params

    def conv(x, wt):
        return jax.lax.conv_general_dilated(
            x, wt, window_strides=(1, 1), padding=((1, 1), (1, 1)),
            dimension_numbers=("NCHW", "OIHW", "NCHW"))

    def bn_relu(x, g, b):
        mean = jnp.mean(x, axis=(0, 2, 3), keepdims=True)
        var = jnp.mean((x - mean) ** 2, axis=(0, 2, 3), keepdims=True)
        y = (x - mean) * jax.lax.rsqrt(var + _EPS)
        y = y * g.reshape(1, -1, 1, 1) + b.reshape(1, -1, 1, 1)
        return jnp.maximum(y, 0.0)

    return bn_relu(conv(bn_relu(conv(x_nchw, w1), g1, b1), w2), g2, b2)


if __name__ == "__main__":
    key = jax.random.PRNGKey(0)
    N, Cin, Cout, H, W = 2, 4, 8, 16, 16
    k = jax.random.split(key, 7)

    x = jax.random.normal(k[0], (N, Cin, H, W), jnp.float32)
    # deterministic synthetic parameters (conv weights + BN affine), no checkpoint
    w1 = 0.1 * jax.random.normal(k[1], (Cout, Cin, 3, 3), jnp.float32)
    w2 = 0.1 * jax.random.normal(k[2], (Cout, Cout, 3, 3), jnp.float32)
    g1 = 1.0 + 0.1 * jax.random.normal(k[3], (Cout,), jnp.float32)
    b1 = 0.1 * jax.random.normal(k[4], (Cout,), jnp.float32)
    g2 = 1.0 + 0.1 * jax.random.normal(k[5], (Cout,), jnp.float32)
    b2 = 0.1 * jax.random.normal(k[6], (Cout,), jnp.float32)
    params = (w1, g1, b1, w2, g2, b2)

    packed = pack_params(params)            # one-time weight repack (not jitted)
    out = jax.block_until_ready(double_convolution_block(x, packed, c_out=Cout))
    ref = jax.block_until_ready(_reference(x, params))

    assert out.shape == (N, Cout, H, W), out.shape
    max_err = float(jnp.max(jnp.abs(out - ref)))
    # bf16 MXU operands (f32 accumulation) through two conv+BN layers give
    # ~1e-2 worst-case deviation from the exact-f32 reference; 3e-2 has margin.
    assert jnp.allclose(out, ref, atol=3e-2, rtol=3e-2), f"max_err={max_err}"
    print("KERNEL_OK")
</pallas_src>

<mosaic_0001>
module attributes {stable_mosaic.version = 11 : i64} {
  func.func @_fused_double_conv_kernel(%arg0: memref<512x36xbf16, #tpu.memory_space<vmem>>, %arg1: memref<36x128xbf16, #tpu.memory_space<vmem>>, %arg2: memref<1x128xf32, #tpu.memory_space<vmem>>, %arg3: memref<1x128xf32, #tpu.memory_space<vmem>>, %arg4: memref<1152x128xbf16, #tpu.memory_space<vmem>>, %arg5: memref<1x128xf32, #tpu.memory_space<vmem>>, %arg6: memref<1x128xf32, #tpu.memory_space<vmem>>, %arg7: memref<512x128xf32, #tpu.memory_space<vmem>>, %arg8: memref<2x18x48x128xbf16, #tpu.memory_space<vmem>>) attributes {dimension_semantics = [], scalar_prefetch = 0 : i64, scratch_operands = 1 : i64, tpu.core_type = #tpu.core_type<tc>} {
    %c0 = arith.constant 0 : index
    %c0_0 = arith.constant 0 : index
    %0 = vector.load %arg0[%c0, %c0_0] : memref<512x36xbf16, #tpu.memory_space<vmem>>, vector<512x36xbf16>
    %c0_1 = arith.constant 0 : index
    %c0_2 = arith.constant 0 : index
    %1 = vector.load %arg1[%c0_1, %c0_2] : memref<36x128xbf16, #tpu.memory_space<vmem>>, vector<36x128xbf16>
    %cst = arith.constant dense<0.000000e+00> : vector<512x128xf32>
    %2 = tpu.matmul %0, %1, %cst {dimension_numbers = #tpu.dot_dimension_numbers<[1], [0], [0], [1], [0, 0, 1, 1], [], []>} : vector<512x36xbf16>, vector<36x128xbf16>, vector<512x128xf32> -> vector<512x128xf32>
    %cst_3 = arith.constant dense<0.000000e+00> : vector<128xf32>
    %3 = vector.multi_reduction <add>, %2, %cst_3 [0] : vector<512x128xf32> to vector<128xf32>
    %4 = vector.shape_cast %3 : vector<128xf32> to vector<1x128xf32>
    %cst_4 = arith.constant 5.120000e+02 : f32
    %5 = vector.broadcast %cst_4 : f32 to vector<1x128xf32>
    %6 = arith.divf %4, %5 : vector<1x128xf32>
    %7 = vector.broadcast %6 : vector<1x128xf32> to vector<512x128xf32>
    %8 = arith.subf %2, %7 : vector<512x128xf32>
    %9 = arith.mulf %8, %8 : vector<512x128xf32>
    %cst_5 = arith.constant dense<0.000000e+00> : vector<128xf32>
    %10 = vector.multi_reduction <add>, %9, %cst_5 [0] : vector<512x128xf32> to vector<128xf32>
    %11 = vector.shape_cast %10 : vector<128xf32> to vector<1x128xf32>
    %cst_6 = arith.constant 5.120000e+02 : f32
    %12 = vector.broadcast %cst_6 : f32 to vector<1x128xf32>
    %13 = arith.divf %11, %12 : vector<1x128xf32>
    %cst_7 = arith.constant 9.99999974E-6 : f32
    %14 = vector.broadcast %cst_7 : f32 to vector<1x128xf32>
    %15 = arith.addf %13, %14 : vector<1x128xf32>
    %16 = math.rsqrt %15 : vector<1x128xf32>
    %17 = vector.broadcast %16 : vector<1x128xf32> to vector<512x128xf32>
    %18 = arith.mulf %8, %17 : vector<512x128xf32>
    %c0_8 = arith.constant 0 : index
    %c0_9 = arith.constant 0 : index
    %19 = vector.load %arg2[%c0_8, %c0_9] : memref<1x128xf32, #tpu.memory_space<vmem>>, vector<1x128xf32>
    %20 = vector.broadcast %19 : vector<1x128xf32> to vector<512x128xf32>
    %21 = arith.mulf %18, %20 : vector<512x128xf32>
    %c0_10 = arith.constant 0 : index
    %c0_11 = arith.constant 0 : index
    %22 = vector.load %arg3[%c0_10, %c0_11] : memref<1x128xf32, #tpu.memory_space<vmem>>, vector<1x128xf32>
    %23 = vector.broadcast %22 : vector<1x128xf32> to vector<512x128xf32>
    %24 = arith.addf %21, %23 : vector<512x128xf32>
    %cst_12 = arith.constant 0.000000e+00 : f32
    %25 = vector.broadcast %cst_12 : f32 to vector<512x128xf32>
    %26 = arith.maximumf %24, %25 : vector<512x128xf32>
    %cst_13 = arith.constant 0.000000e+00 : bf16
    %27 = vector.broadcast %cst_13 : bf16 to vector<2x1x48x128xbf16>
    %c0_14 = arith.constant 0 : index
    %c0_15 = arith.constant 0 : index
    %c0_16 = arith.constant 0 : index
    %c0_17 = arith.constant 0 : index
    %28 = vector.load %arg8[%c0_14, %c0_15, %c0_16, %c0_17] : memref<2x18x48x128xbf16, #tpu.memory_space<vmem>>, vector<2x1x48x128xbf16>
    tpu.vector_store %arg8[%c0_14, %c0_15, %c0_16, %c0_17], %27 {strides = array<i32>} : memref<2x18x48x128xbf16, #tpu.memory_space<vmem>>, vector<2x1x48x128xbf16>,
    %cst_18 = arith.constant 0.000000e+00 : bf16
    %29 = vector.broadcast %cst_18 : bf16 to vector<2x1x48x128xbf16>
    %c0_19 = arith.constant 0 : index
    %c17 = arith.constant 17 : index
    %c0_20 = arith.constant 0 : index
    %c0_21 = arith.constant 0 : index
    %30 = vector.load %arg8[%c0_19, %c17, %c0_20, %c0_21] : memref<2x18x48x128xbf16, #tpu.memory_space<vmem>>, vector<2x1x48x128xbf16>
    tpu.vector_store %arg8[%c0_19, %c17, %c0_20, %c0_21], %29 {strides = array<i32>} : memref<2x18x48x128xbf16, #tpu.memory_space<vmem>>, vector<2x1x48x128xbf16>,
    %cst_22 = arith.constant 0.000000e+00 : bf16
    %31 = vector.broadcast %cst_22 : bf16 to vector<2x16x16x128xbf16>
    %c0_23 = arith.constant 0 : index
    %c1 = arith.constant 1 : index
    %c0_24 = arith.constant 0 : index
    %c0_25 = arith.constant 0 : index
    %32 = vector.load %arg8[%c0_23, %c1, %c0_24, %c0_25] : memref<2x18x48x128xbf16, #tpu.memory_space<vmem>>, vector<2x16x16x128xbf16>
    tpu.vector_store %arg8[%c0_23, %c1, %c0_24, %c0_25], %31 {strides = array<i32>} : memref<2x18x48x128xbf16, #tpu.memory_space<vmem>>, vector<2x16x16x128xbf16>,
    %cst_26 = arith.constant 0.000000e+00 : bf16
    %33 = vector.broadcast %cst_26 : bf16 to vector<2x16x16x128xbf16>
    %c0_27 = arith.constant 0 : index
    %c1_28 = arith.constant 1 : index
    %c32 = arith.constant 32 : index
    %c0_29 = arith.constant 0 : index
    %34 = vector.load %arg8[%c0_27, %c1_28, %c32, %c0_29] : memref<2x18x48x128xbf16, #tpu.memory_space<vmem>>, vector<2x16x16x128xbf16>
    tpu.vector_store %arg8[%c0_27, %c1_28, %c32, %c0_29], %33 {strides = array<i32>} : memref<2x18x48x128xbf16, #tpu.memory_space<vmem>>, vector<2x16x16x128xbf16>,
    %35 = arith.truncf %26 : vector<512x128xf32> to vector<512x128xbf16>
    %36 = vector.shape_cast %35 : vector<512x128xbf16> to vector<2x16x16x128xbf16>
    %c0_30 = arith.constant 0 : index
    %c1_31 = arith.constant 1 : index
    %c16 = arith.constant 16 : index
    %c0_32 = arith.constant 0 : index
    %37 = vector.load %arg8[%c0_30, %c1_31, %c16, %c0_32] : memref<2x18x48x128xbf16, #tpu.memory_space<vmem>>, vector<2x16x16x128xbf16>
    tpu.vector_store %arg8[%c0_30, %c1_31, %c16, %c0_32], %36 {strides = array<i32>} : memref<2x18x48x128xbf16, #tpu.memory_space<vmem>>, vector<2x16x16x128xbf16>,
    %c0_33 = arith.constant 0 : index
    %c0_34 = arith.constant 0 : index
    %c15 = arith.constant 15 : index
    %c0_35 = arith.constant 0 : index
    %38 = vector.load %arg8[%c0_33, %c0_34, %c15, %c0_35] : memref<2x18x48x128xbf16, #tpu.memory_space<vmem>>, vector<2x16x16x128xbf16>
    %39 = vector.shape_cast %38 : vector<2x16x16x128xbf16> to vector<512x128xbf16>
    %c0_36 = arith.constant 0 : index
    %c0_37 = arith.constant 0 : index
    %c16_38 = arith.constant 16 : index
    %c0_39 = arith.constant 0 : index
    %40 = vector.load %arg8[%c0_36, %c0_37, %c16_38, %c0_39] : memref<2x18x48x128xbf16, #tpu.memory_space<vmem>>, vector<2x16x16x128xbf16>
    %41 = vector.shape_cast %40 : vector<2x16x16x128xbf16> to vector<512x128xbf16>
    %c0_40 = arith.constant 0 : index
    %c0_41 = arith.constant 0 : index
    %c17_42 = arith.constant 17 : index
    %c0_43 = arith.constant 0 : index
    %42 = vector.load %arg8[%c0_40, %c0_41, %c17_42, %c0_43] : memref<2x18x48x128xbf16, #tpu.memory_space<vmem>>, vector<2x16x16x128xbf16>
    %43 = vector.shape_cast %42 : vector<2x16x16x128xbf16> to vector<512x128xbf16>
    %c0_44 = arith.constant 0 : index
    %c1_45 = arith.constant 1 : index
    %c15_46 = arith.constant 15 : index
    %c0_47 = arith.constant 0 : index
    %44 = vector.load %arg8[%c0_44, %c1_45, %c15_46, %c0_47] : memref<2x18x48x128xbf16, #tpu.memory_space<vmem>>, vector<2x16x16x128xbf16>
    %45 = vector.shape_cast %44 : vector<2x16x16x128xbf16> to vector<512x128xbf16>
    %c0_48 = arith.constant 0 : index
    %c1_49 = arith.constant 1 : index
    %c16_50 = arith.constant 16 : index
    %c0_51 = arith.constant 0 : index
    %46 = vector.load %arg8[%c0_48, %c1_49, %c16_50, %c0_51] : memref<2x18x48x128xbf16, #tpu.memory_space<vmem>>, vector<2x16x16x128xbf16>
    %47 = vector.shape_cast %46 : vector<2x16x16x128xbf16> to vector<512x128xbf16>
    %c0_52 = arith.constant 0 : index
    %c1_53 = arith.constant 1 : index
    %c17_54 = arith.constant 17 : index
    %c0_55 = arith.constant 0 : index
    %48 = vector.load %arg8[%c0_52, %c1_53, %c17_54, %c0_55] : memref<2x18x48x128xbf16, #tpu.memory_space<vmem>>, vector<2x16x16x128xbf16>
    %49 = vector.shape_cast %48 : vector<2x16x16x128xbf16> to vector<512x128xbf16>
    %c0_56 = arith.constant 0 : index
    %c2 = arith.constant 2 : index
    %c15_57 = arith.constant 15 : index
    %c0_58 = arith.constant 0 : index
    %50 = vector.load %arg8[%c0_56, %c2, %c15_57, %c0_58] : memref<2x18x48x128xbf16, #tpu.memory_space<vmem>>, vector<2x16x16x128xbf16>
    %51 = vector.shape_cast %50 : vector<2x16x16x128xbf16> to vector<512x128xbf16>
    %c0_59 = arith.constant 0 : index
    %c2_60 = arith.constant 2 : index
    %c16_61 = arith.constant 16 : index
    %c0_62 = arith.constant 0 : index
    %52 = vector.load %arg8[%c0_59, %c2_60, %c16_61, %c0_62] : memref<2x18x48x128xbf16, #tpu.memory_space<vmem>>, vector<2x16x16x128xbf16>
    %53 = vector.shape_cast %52 : vector<2x16x16x128xbf16> to vector<512x128xbf16>
    %c0_63 = arith.constant 0 : index
    %c2_64 = arith.constant 2 : index
    %c17_65 = arith.constant 17 : index
    %c0_66 = arith.constant 0 : index
    %54 = vector.load %arg8[%c0_63, %c2_64, %c17_65, %c0_66] : memref<2x18x48x128xbf16, #tpu.memory_space<vmem>>, vector<2x16x16x128xbf16>
    %55 = vector.shape_cast %54 : vector<2x16x16x128xbf16> to vector<512x128xbf16>
    %56 = tpu.concatenate %39, %41, %43, %45, %47, %49, %51, %53, %55 in 1 : vector<512x128xbf16>, vector<512x128xbf16>, vector<512x128xbf16>, vector<512x128xbf16>, vector<512x128xbf16>, vector<512x128xbf16>, vector<512x128xbf16>, vector<512x128xbf16>, vector<512x128xbf16> -> vector<512x1152xbf16>
    %c0_67 = arith.constant 0 : index
    %c0_68 = arith.constant 0 : index
    %57 = vector.load %arg4[%c0_67, %c0_68] : memref<1152x128xbf16, #tpu.memory_space<vmem>>, vector<1152x128xbf16>
    %cst_69 = arith.constant dense<0.000000e+00> : vector<512x128xf32>
    %58 = tpu.matmul %56, %57, %cst_69 {dimension_numbers = #tpu.dot_dimension_numbers<[1], [0], [0], [1], [0, 0, 1, 1], [], []>} : vector<512x1152xbf16>, vector<1152x128xbf16>, vector<512x128xf32> -> vector<512x128xf32>
    %cst_70 = arith.constant dense<0.000000e+00> : vector<128xf32>
    %59 = vector.multi_reduction <add>, %58, %cst_70 [0] : vector<512x128xf32> to vector<128xf32>
    %60 = vector.shape_cast %59 : vector<128xf32> to vector<1x128xf32>
    %cst_71 = arith.constant 5.120000e+02 : f32
    %61 = vector.broadcast %cst_71 : f32 to vector<1x128xf32>
    %62 = arith.divf %60, %61 : vector<1x128xf32>
    %63 = vector.broadcast %62 : vector<1x128xf32> to vector<512x128xf32>
    %64 = arith.subf %58, %63 : vector<512x128xf32>
    %65 = arith.mulf %64, %64 : vector<512x128xf32>
    %cst_72 = arith.constant dense<0.000000e+00> : vector<128xf32>
    %66 = vector.multi_reduction <add>, %65, %cst_72 [0] : vector<512x128xf32> to vector<128xf32>
    %67 = vector.shape_cast %66 : vector<128xf32> to vector<1x128xf32>
    %cst_73 = arith.constant 5.120000e+02 : f32
    %68 = vector.broadcast %cst_73 : f32 to vector<1x128xf32>
    %69 = arith.divf %67, %68 : vector<1x128xf32>
    %cst_74 = arith.constant 9.99999974E-6 : f32
    %70 = vector.broadcast %cst_74 : f32 to vector<1x128xf32>
    %71 = arith.addf %69, %70 : vector<1x128xf32>
    %72 = math.rsqrt %71 : vector<1x128xf32>
    %73 = vector.broadcast %72 : vector<1x128xf32> to vector<512x128xf32>
    %74 = arith.mulf %64, %73 : vector<512x128xf32>
    %c0_75 = arith.constant 0 : index
    %c0_76 = arith.constant 0 : index
    %75 = vector.load %arg5[%c0_75, %c0_76] : memref<1x128xf32, #tpu.memory_space<vmem>>, vector<1x128xf32>
    %76 = vector.broadcast %75 : vector<1x128xf32> to vector<512x128xf32>
    %77 = arith.mulf %74, %76 : vector<512x128xf32>
    %c0_77 = arith.constant 0 : index
    %c0_78 = arith.constant 0 : index
    %78 = vector.load %arg6[%c0_77, %c0_78] : memref<1x128xf32, #tpu.memory_space<vmem>>, vector<1x128xf32>
    %79 = vector.broadcast %78 : vector<1x128xf32> to vector<512x128xf32>
    %80 = arith.addf %77, %79 : vector<512x128xf32>
    %cst_79 = arith.constant 0.000000e+00 : f32
    %81 = vector.broadcast %cst_79 : f32 to vector<512x128xf32>
    %82 = arith.maximumf %80, %81 : vector<512x128xf32>
    %c0_80 = arith.constant 0 : index
    %c0_81 = arith.constant 0 : index
    %83 = vector.load %arg7[%c0_80, %c0_81] : memref<512x128xf32, #tpu.memory_space<vmem>>, vector<512x128xf32>
    tpu.vector_store %arg7[%c0_80, %c0_81], %82 {strides = array<i32>} : memref<512x128xf32, #tpu.memory_space<vmem>>, vector<512x128xf32>,
    return
  }
}

</mosaic_0001>

<bundles_post_ra>
// kernel: double_convolution_block.1
= control target key start
LH: loop header
LB: loop body
LE: loop exit
PB: predicated region body
PF: predicated region fallthrough
CT: control target
= control target key end

     0   :  { %vm368_vm0 = vcmask 1041408   ;;  %vm271_vm1 = vcmask 293888   ;;  %vm2511_vm2 = vsmask.f32 3328  ;;  %vm2512_vm3 = vsmask.f32 7440  ;;  %s18263_s1 = inlined_call_operand.vmem [shape: bf16[36,128], index: 1, kind: input, shape index: {}]   ;;  %s18264_s0 = inlined_call_operand.vmem [shape: bf16[512,36], index: 0, kind: input, shape index: {}]   ;;  %s18265_s4 = inlined_call_operand.vmem [shape: bf16[1152,128], index: 4, kind: input, shape index: {}]   ;;  %s18266_s2 = inlined_call_operand.vmem [shape: f32[1,128], index: 2, kind: input, shape index: {}]   ;;  %s18267_s3 = inlined_call_operand.vmem [shape: f32[1,128], index: 3, kind: input, shape index: {}]   ;;  %s18268_s5 = inlined_call_operand.vmem [shape: f32[1,128], index: 5, kind: input, shape index: {}]   ;;  %s18269_s6 = inlined_call_operand.vmem [shape: f32[1,128], index: 6, kind: input, shape index: {}]   ;;  %s18270_s7 = inlined_call_operand.vmem [shape: f32[512,128], index: 7, kind: output, shape index: {}]  }
   0x1   :  { %v10586_v0 = vld [vmem:[%s18263_s1 + $0x10] ss:$0 sps:$4 sm:$0x33]   ;;  %v10587_v1 = vld [vmem:[%s18263_s1 + $0x8] sm:$0xff]   ;;  %v10589_v3 = vld [vmem:[%s18264_s0] sm:$0xff]  }
   0x2   :  { %10584 = vmatprep.subr.msk.bf16.mxu0 %vm368_vm0, %v10586_v0  ;;  %v370_v2 = vsel %vm368_vm0, %v10586_v0, 0  ;;  %v10588_v4 = vld [vmem:[%s18263_s1] sm:$0xff]   ;;  %10424 = vmatprep.mubr.msk.bf16.mxu0 %vm271_vm1, %v10589_v3  ;;  %v10590_v5 = vld [vmem:[%s18264_s0 + $0x8] sm:$0xff]   ;;  %v10591_v6 = vld [vmem:[%s18264_s0 + $0x10] sm:$0xff]   ;;  %vm1772_vm4 = vsmask.f32 256 }
   0x3   :  { %10419 = vmatpush3.bf16.msra.mxu0 %v370_v2  ;;  %v10592_v7 = vld [vmem:[%s18264_s0 + $0x18] sm:$0xff]   ;;  %v10593_v8 = vld [vmem:[%s18264_s0 + $0x20] sm:$0xff]   ;;  %v10594_v9 = vld [vmem:[%s18264_s0 + $0x28] sm:$0xff]   ;;  %vm1773_vm6 = vsmask.f32 4368 }
   0x4   :  { %10420 = vmatprep.subr.bf16.mxu0 %v10587_v1  ;;  %v10595_v10 = vld [vmem:[%s18264_s0 + $0x30] sm:$0xff]   ;;  %v10596_v11 = vld [vmem:[%s18264_s0 + $0x38] sm:$0xff]   ;;  %v10597_v12 = vld [vmem:[%s18264_s0 + $0x40] sm:$0xff]  }
   0x5   :  { %v10598_v13 = vld [vmem:[%s18264_s0 + $0x48] sm:$0xff]   ;;  %v10599_v14 = vld [vmem:[%s18264_s0 + $0x50] sm:$0xff]   ;;  %v10600_v15 = vld [vmem:[%s18264_s0 + $0x58] sm:$0xff]  }
   0x6   :  { %v10601_v16 = vld [vmem:[%s18264_s0 + $0x60] sm:$0xff]   ;;  %v10602_v17 = vld [vmem:[%s18264_s0 + $0x68] sm:$0xff]   ;;  %v10603_v18 = vld [vmem:[%s18264_s0 + $0x70] sm:$0xff]  }
   0x7   :  { %10421 = vmatpush3.bf16.msra.mxu0 %v10587_v1  ;;  %v10604_v19 = vld [vmem:[%s18264_s0 + $0x78] sm:$0xff]   ;;  %v10605_v20 = vld [vmem:[%s18264_s0 + $0x80] sm:$0xff]   ;;  %v10606_v21 = vld [vmem:[%s18264_s0 + $0x88] sm:$0xff]  }
   0x8   :  { %10422 = vmatprep.subr.bf16.mxu0 %v10588_v4  ;;  %v10607_v22 = vld [vmem:[%s18264_s0 + $0x90] sm:$0xff]   ;;  %v10608_v23 = vld [vmem:[%s18264_s0 + $0x98] sm:$0xff]   ;;  %v10609_v24 = vld [vmem:[%s18264_s0 + $0xa0] sm:$0xff]  }
   0x9   :  { %v10610_v25 = vld [vmem:[%s18264_s0 + $0xa8] sm:$0xff]   ;;  %v10611_v26 = vld [vmem:[%s18264_s0 + $0xb0] sm:$0xff]   ;;  %v10612_v27 = vld [vmem:[%s18264_s0 + $0xb8] sm:$0xff]  }
   0xa   :  { %v10613_v28 = vld [vmem:[%s18264_s0 + $0xc0] sm:$0xff]   ;;  %v10614_v29 = vld [vmem:[%s18264_s0 + $0xc8] sm:$0xff]   ;;  %v10615_v30 = vld [vmem:[%s18264_s0 + $0xd0] sm:$0xff]  }
   0xb   :  { %10423 = vmatpush3.bf16.msra.mxu0 %v10588_v4  ;;  %v10616_v31 = vld [vmem:[%s18264_s0 + $0xd8] sm:$0xff]   ;;  %v10617_v32 = vld [vmem:[%s18264_s0 + $0xe0] sm:$0xff]   ;;  %v10618_v33 = vld [vmem:[%s18264_s0 + $0xe8] sm:$0xff]  }
   0xc   :  { %v10619_v34 = vld [vmem:[%s18264_s0 + $0xf0] sm:$0xff]   ;;  %v10620_v35 = vld [vmem:[%s18264_s0 + $0xf8] sm:$0xff]   ;;  %vm11748_vm5 = vmor %vm2511_vm2, %vm2512_vm3 }
   0xd   :  { %vm11752_vm7 = vmor %vm1772_vm4, %vm1773_vm6 }
   0xe   :  { %10425 = vmatmul.mubr.msk.bf16.vlgmr.msra.gmra.mxu0 %vm271_vm1, %v10590_v5 }
   0xf   :  { %10428 = vmatprep.mubr.msk.bf16.mxu0 %vm271_vm1, %v10591_v6 }
  0x16   :  { %10429 = vmatmul.mubr.msk.bf16.gmra.mxu0 %vm271_vm1, %v10592_v7 }
  0x17   :  { %10432 = vmatprep.mubr.msk.bf16.mxu0 %vm271_vm1, %v10593_v8 }
  0x1e   :  { %10433 = vmatmul.mubr.msk.bf16.gmra.mxu0 %vm271_vm1, %v10594_v9 }
  0x1f   :  { %10436 = vmatprep.mubr.msk.bf16.mxu0 %vm271_vm1, %v10595_v10 }
  0x26   :  { %10437 = vmatmul.mubr.msk.bf16.gmra.mxu0 %vm271_vm1, %v10596_v11 }
  0x27   :  { %10440 = vmatprep.mubr.msk.bf16.mxu0 %vm271_vm1, %v10597_v12 }
  0x2e   :  { %10441 = vmatmul.mubr.msk.bf16.gmra.mxu0 %vm271_vm1, %v10598_v13 }
  0x2f   :  { %10444 = vmatprep.mubr.msk.bf16.mxu0 %vm271_vm1, %v10599_v14 }
  0x36   :  { %10445 = vmatmul.mubr.msk.bf16.gmra.mxu0 %vm271_vm1, %v10600_v15 }
  0x37   :  { %10448 = vmatprep.mubr.msk.bf16.mxu0 %vm271_vm1, %v10601_v16 }
  0x3e   :  { %10449 = vmatmul.mubr.msk.bf16.gmra.mxu0 %vm271_vm1, %v10602_v17 }
  0x3f   :  { %10452 = vmatprep.mubr.msk.bf16.mxu0 %vm271_vm1, %v10603_v18 }
  0x46   :  { %10453 = vmatmul.mubr.msk.bf16.gmra.mxu0 %vm271_vm1, %v10604_v19 }
  0x47   :  { %10456 = vmatprep.mubr.msk.bf16.mxu0 %vm271_vm1, %v10605_v20 }
  0x4e   :  { %10457 = vmatmul.mubr.msk.bf16.gmra.mxu0 %vm271_vm1, %v10606_v21 }
  0x4f   :  { %10460 = vmatprep.mubr.msk.bf16.mxu0 %vm271_vm1, %v10607_v22 }
  0x56   :  { %10461 = vmatmul.mubr.msk.bf16.gmra.mxu0 %vm271_vm1, %v10608_v23 }
  0x57   :  { %10464 = vmatprep.mubr.msk.bf16.mxu0 %vm271_vm1, %v10609_v24 }
  0x5e   :  { %10465 = vmatmul.mubr.msk.bf16.gmra.mxu0 %vm271_vm1, %v10610_v25 }
  0x5f   :  { %10468 = vmatprep.mubr.msk.bf16.mxu0 %vm271_vm1, %v10611_v26 }
  0x66   :  { %10469 = vmatmul.mubr.msk.bf16.gmra.mxu0 %vm271_vm1, %v10612_v27 }
  0x67   :  { %10472 = vmatprep.mubr.msk.bf16.mxu0 %vm271_vm1, %v10613_v28 }
  0x6e   :  { %10473 = vmatmul.mubr.msk.bf16.gmra.mxu0 %vm271_vm1, %v10614_v29 }
  0x6f   :  { %10476 = vmatprep.mubr.msk.bf16.mxu0 %vm271_vm1, %v10615_v30 }
  0x76   :  { %10477 = vmatmul.mubr.msk.bf16.gmra.mxu0 %vm271_vm1, %v10616_v31 }
  0x77   :  { %10480 = vmatprep.mubr.msk.bf16.mxu0 %vm271_vm1, %v10617_v32 }
  0x7e   :  { %10481 = vmatmul.mubr.msk.bf16.gmra.mxu0 %vm271_vm1, %v10618_v33 }
  0x7f   :  { %10484 = vmatprep.mubr.msk.bf16.mxu0 %vm271_vm1, %v10619_v34 }
  0x86   :  { %10485 = vmatmul.mubr.msk.bf16.gmra.mxu0 %vm271_vm1, %v10620_v35 }
  0xce   :  { %v11034_v36 = vpop.f32.mrf.mxu0 }
  0xd0   :  { %v11036_v37 = vpop.f32.mrf.mxu0 }
  0xd2   :  { %v11038_v38 = vpop.f32.mrf.mxu0 }
  0xd4   :  { %v11040_v39 = vpop.f32.mrf.mxu0 }
  0xd5   :  { %v661_v40 = vadd.f32 %v11040_v39, %v11036_v37 }
  0xd6   :  { %v11044_v41 = vpop.f32.mrf.mxu0 }
  0xd7   :  { %v662_v42 = vadd.f32 %v11034_v36, %v661_v40 }
  0xd8   :  { %v11047_v43 = vpop.f32.mrf.mxu0 }
  0xd9   :  { %v663_v44 = vadd.f32 %v11038_v38, %v662_v42 }
  0xda   :  { %v11050_v45 = vpop.f32.mrf.mxu0 }
  0xdb   :  { %v664_v46 = vadd.f32 %v663_v44, %v11047_v43 }
  0xdc   :  { %v11053_v47 = vpop.f32.mrf.mxu0 }
  0xdd   :  { %v665_v48 = vadd.f32 %v664_v46, %v11053_v47 }
  0xde   :  { %v11056_v49 = vpop.f32.mrf.mxu0 }
  0xdf   :  { %v666_v50 = vadd.f32 %v11044_v41, %v665_v48 }
  0xe0   :  { %v11059_v51 = vpop.f32.mrf.mxu0 }
  0xe1   :  { %v667_v52 = vadd.f32 %v11050_v45, %v666_v50 }
  0xe2   :  { %v11062_v53 = vpop.f32.mrf.mxu0 }
  0xe3   :  { %v668_v54 = vadd.f32 %v667_v52, %v11059_v51 }
  0xe4   :  { %v11065_v55 = vpop.f32.mrf.mxu0 }
  0xe5   :  { %v669_v56 = vadd.f32 %v668_v54, %v11065_v55 }
  0xe6   :  { %v11068_v57 = vpop.f32.mrf.mxu0 }
  0xe7   :  { %v670_v58 = vadd.f32 %v11056_v49, %v669_v56 }
  0xe8   :  { %v11071_v59 = vpop.f32.mrf.mxu0 }
  0xe9   :  { %v671_v60 = vadd.f32 %v11062_v53, %v670_v58 }
  0xea   :  { %v11074_v61 = vpop.f32.mrf.mxu0 }
  0xeb   :  { %v672_v62 = vadd.f32 %v671_v60, %v11071_v59 }
  0xec   :  { %v11077_v63 = vpop.f32.mrf.mxu0 }
  0xed   :  { %v673_v0 = vadd.f32 %v672_v62, %v11077_v63 }
  0xee   :  { %v11080_v1 = vpop.f32.mrf.mxu0 }
  0xef   :  { %v674_v2 = vadd.f32 %v11068_v57, %v673_v0 }
  0xf0   :  { %v11083_v3 = vpop.f32.mrf.mxu0 }
  0xf1   :  { %v675_v4 = vadd.f32 %v11074_v61, %v674_v2 }
  0xf2   :  { %v11086_v5 = vpop.f32.mrf.mxu0 }
  0xf3   :  { %v676_v6 = vadd.f32 %v675_v4, %v11083_v3 }
  0xf4   :  { %v11089_v7 = vpop.f32.mrf.mxu0 }
  0xf5   :  { %v677_v8 = vadd.f32 %v676_v6, %v11089_v7 }
  0xf6   :  { %v11092_v9 = vpop.f32.mrf.mxu0 }
  0xf7   :  { %v678_v10 = vadd.f32 %v11080_v1, %v677_v8 }
  0xf8   :  { %v11095_v11 = vpop.f32.mrf.mxu0 }
  0xf9   :  { %v679_v12 = vadd.f32 %v11086_v5, %v678_v10 }
  0xfa   :  { %v11098_v13 = vpop.f32.mrf.mxu0 }
  0xfb   :  { %v680_v14 = vadd.f32 %v679_v12, %v11095_v11 }
  0xfc   :  { %v11101_v15 = vpop.f32.mrf.mxu0 }
  0xfd   :  { %v681_v16 = vadd.f32 %v680_v14, %v11101_v15 }
  0xfe   :  { %v11104_v17 = vpop.f32.mrf.mxu0 }
  0xff   :  { %v682_v18 = vadd.f32 %v11092_v9, %v681_v16 }
 0x100   :  { %v11107_v19 = vpop.f32.mrf.mxu0 }
 0x101   :  { %v683_v20 = vadd.f32 %v11098_v13, %v682_v18 }
 0x102   :  { %v11110_v21 = vpop.f32.mrf.mxu0 }
 0x103   :  { %v684_v22 = vadd.f32 %v683_v20, %v11107_v19 }
 0x104   :  { %v11113_v23 = vpop.f32.mrf.mxu0 }
 0x105   :  { %v685_v24 = vadd.f32 %v684_v22, %v11113_v23 }
 0x106   :  { %v11116_v25 = vpop.f32.mrf.mxu0 }
 0x107   :  { %v686_v26 = vadd.f32 %v11104_v17, %v685_v24 }
 0x108   :  { %v11119_v27 = vpop.f32.mrf.mxu0 }
 0x109   :  { %v687_v28 = vadd.f32 %v11110_v21, %v686_v26 }
 0x10a   :  { %v11122_v29 = vpop.f32.mrf.mxu0 }
 0x10b   :  { %v688_v30 = vadd.f32 %v687_v28, %v11119_v27 }
 0x10c   :  { %v11125_v31 = vpop.f32.mrf.mxu0 }
 0x10d   :  { %v689_v32 = vadd.f32 %v688_v30, %v11125_v31 }
 0x10e   :  { %v11128_v33 = vpop.f32.mrf.mxu0 }
 0x10f   :  { %18666 = vst [vmem:[#allocation3_spill] sm:$0xff] %v11128_v33  ;;  %v690_v34 = vadd.f32 %v11116_v25, %v689_v32 }
 0x110   :  { %v11131_v35 = vpop.f32.mrf.mxu0 }
 0x111   :  { %v691_v40 = vadd.f32 %v11122_v29, %v690_v34 }
 0x112   :  { %v11134_v42 = vpop.f32.mrf.mxu0 }
 0x113   :  { %18667 = vst [vmem:[#allocation4_spill] sm:$0xff] %v11134_v42  ;;  %v692_v44 = vadd.f32 %v691_v40, %v11131_v35 }
 0x114   :  { %v11137_v46 = vpop.f32.mrf.mxu0 }
 0x115   :  { %v693_v48 = vadd.f32 %v692_v44, %v11137_v46 }
 0x116   :  { %v11140_v50 = vpop.f32.mrf.mxu0 }
 0x117   :  { %18668 = vst [vmem:[#allocation5_spill] sm:$0xff] %v11140_v50  ;;  %v694_v52 = vadd.f32 %v11128_v33, %v693_v48 }
 0x118   :  { %v11143_v54 = vpop.f32.mrf.mxu0 }
 0x119   :  { %18669 = vst [vmem:[#allocation6_spill] sm:$0xff] %v11143_v54  ;;  %v695_v56 = vadd.f32 %v11134_v42, %v694_v52 }
 0x11a   :  { %v11146_v58 = vpop.f32.mrf.mxu0 }
 0x11b   :  { %18670 = vst [vmem:[#allocation7_spill] sm:$0xff] %v11146_v58  ;;  %v696_v60 = vadd.f32 %v695_v56, %v11143_v54 }
 0x11c   :  { %v11149_v62 = vpop.f32.mrf.mxu0 }
 0x11d   :  { %18671 = vst [vmem:[#allocation8_spill] sm:$0xff] %v11149_v62  ;;  %v697_v0 = vadd.f32 %v696_v60, %v11149_v62 }
 0x11e   :  { %v11152_v2 = vpop.f32.mrf.mxu0 }
 0x11f   :  { %18672 = vst [vmem:[#allocation9_spill] sm:$0xff] %v11152_v2  ;;  %v698_v4 = vadd.f32 %v11140_v50, %v697_v0 }
 0x120   :  { %v11155_v6 = vpop.f32.mrf.mxu0 }
 0x121   :  { %18673 = vst [vmem:[#allocation10_spill] sm:$0xff] %v11155_v6  ;;  %v699_v8 = vadd.f32 %v11146_v58, %v698_v4 }
 0x122   :  { %v11158_v10 = vpop.f32.mrf.mxu0 }
 0x123   :  { %18674 = vst [vmem:[#allocation11_spill] sm:$0xff] %v11158_v10  ;;  %v700_v12 = vadd.f32 %v699_v8, %v11155_v6 }
 0x124   :  { %v11161_v14 = vpop.f32.mrf.mxu0 }
 0x125   :  { %18675 = vst [vmem:[#allocation12_spill] sm:$0xff] %v11161_v14  ;;  %v701_v16 = vadd.f32 %v700_v12, %v11161_v14 }
 0x126   :  { %v11164_v18 = vpop.f32.mrf.mxu0 }
 0x127   :  { %18676 = vst [vmem:[#allocation13_spill] sm:$0xff] %v11164_v18  ;;  %v702_v20 = vadd.f32 %v11152_v2, %v701_v16 }
 0x128   :  { %v11167_v22 = vpop.f32.mrf.mxu0 }
 0x129   :  { %18677 = vst [vmem:[#allocation14_spill] sm:$0xff] %v11167_v22  ;;  %v703_v24 = vadd.f32 %v11158_v10, %v702_v20 }
 0x12a   :  { %v10471_v26 = vpop.f32.mrf.mxu0 }
 0x12b   :  { %v704_v28 = vadd.f32 %v703_v24, %v11167_v22 }
 0x12c   :  { %v11171_v30 = vpop.f32.mrf.mxu0 }
 0x12d   :  { %18678 = vst [vmem:[#allocation15_spill] sm:$0xff] %v11171_v30  ;;  %v705_v32 = vadd.f32 %v704_v28, %v11171_v30 }
 0x12e   :  { %v10474_v34 = vpop.f32.mrf.mxu0 }
 0x12f   :  { %v706_v40 = vadd.f32 %v11164_v18, %v705_v32 }
 0x130   :  { %v598_v44 = vpop.f32.mrf.mxu0 }
 0x131   :  { %v707_v48 = vadd.f32 %v10471_v26, %v706_v40 }
 0x132   :  { %v10475_v52 = vpop.f32.mrf.mxu0 }
 0x133   :  { %v708_v56 = vadd.f32 %v707_v48, %v598_v44 }
 0x134   :  { %v11175_v60 = vpop.f32.mrf.mxu0 }
 0x135   :  { %18679 = vst [vmem:[#allocation16_spill] sm:$0xff] %v11175_v60  ;;  %v709_v0 = vadd.f32 %v708_v56, %v11175_v60 }
 0x136   :  { %v10478_v4 = vpop.f32.mrf.mxu0 }
 0x137   :  { %v710_v8 = vadd.f32 %v10474_v34, %v709_v0 }
 0x138   :  { %v614_v12 = vpop.f32.mrf.mxu0 }
 0x139   :  { %v711_v16 = vadd.f32 %v10475_v52, %v710_v8 }
 0x13a   :  { %v10479_v20 = vpop.f32.mrf.mxu0 }
 0x13b   :  { %v712_v24 = vadd.f32 %v711_v16, %v614_v12 }
 0x13c   :  { %v11178_v22 = vpop.f32.mrf.mxu0 }
 0x13d   :  { %18680 = vst [vmem:[#allocation17_spill] sm:$0xff] %v11178_v22  ;;  %v713_v28 = vadd.f32 %v712_v24, %v11178_v22 }
 0x13e   :  { %v10482_v30 = vpop.f32.mrf.mxu0 }
 0x13f   :  { %v714_v32 = vadd.f32 %v10478_v4, %v713_v28 }
 0x140   :  { %v630_v18 = vpop.f32.mrf.mxu0 }
 0x141   :  { %v715_v40 = vadd.f32 %v10479_v20, %v714_v32 }
 0x142   :  { %v10483_v10 = vpop.f32.mrf.mxu0 }
 0x143   :  { %v716_v48 = vadd.f32 %v715_v40, %v630_v18 }
 0x144   :  { %v11181_v2 = vpop.f32.mrf.mxu0 }
 0x145   :  { %v717_v56 = vadd.f32 %v716_v48, %v11181_v2 }
 0x146   :  { %v10486_v60 = vpop.f32.mrf.mxu0 }
 0x147   :  { %v718_v0 = vadd.f32 %v10482_v30, %v717_v56 }
 0x148   :  { %v646_v14 = vpop.f32.mrf.mxu0 }
 0x149   :  { %v719_v8 = vadd.f32 %v10483_v10, %v718_v0 }
 0x14a   :  { %v10487_v6 = vpop.f32.mrf.mxu0 }
 0x14b   :  { %v720_v16 = vadd.f32 %v719_v8, %v646_v14 }
 0x14c   :  { %v11184_v58 = vpop.f32.mrf.mxu0 }
 0x14d   :  { %v721_v24 = vadd.f32 %v720_v16, %v11184_v58 }
 0x14f   :  { %v722_v22 = vadd.f32 %v10486_v60, %v721_v24 }
 0x151   :  { %v723_v28 = vadd.f32 %v10487_v6, %v722_v22 }
 0x153   :  { %v724_v50 = vrot.slane %v723_v28, 4 }
 0x155   :  { %v725_v32 = vadd.f32 %v724_v50, %v723_v28 }
 0x157   :  { %v726_v62 = vrot.slane %v725_v32, 2 }
 0x159   :  { %v727_v40 = vadd.f32 %v726_v62, %v725_v32 }
 0x15b   :  { %v728_v54 = vrot.slane %v727_v40, 1 }
 0x15d   :  { %v729_v42 = vadd.f32 %v728_v54, %v727_v40 }
 0x15f   :  { %v11187_v33 = vmul.f32 0.001953125, %v729_v42 }
 0x161   :  { %v11190_v48 = vsub.f32 %v10471_v26, %v11187_v33  ;;  %v11193_v56 = vsub.f32 %v598_v44, %v11187_v33  ;;  %v11196_v0 = vsub.f32 %v10474_v34, %v11187_v33  ;;  %v11199_v8 = vsub.f32 %v10475_v52, %v11187_v33 }
 0x162   :  { %v11202_v50 = vsub.f32 %v614_v12, %v11187_v33  ;;  %v11205_v62 = vsub.f32 %v10478_v4, %v11187_v33  ;;  %v11208_v42 = vsub.f32 %v10479_v20, %v11187_v33  ;;  %v11211_v54 = vsub.f32 %v630_v18, %v11187_v33 }
 0x163   :  { %18681 = vst [vmem:[#allocation18_spill] sm:$0xff] %v11190_v48  ;;  %18682 = vst [vmem:[#allocation19_spill] sm:$0xff] %v11193_v56  ;;  %v11214_v22 = vsub.f32 %v10482_v30, %v11187_v33  ;;  %v11217_v26 = vsub.f32 %v10483_v10, %v11187_v33  ;;  %v11220_v34 = vsub.f32 %v646_v14, %v11187_v33 }
 0x164   :  { %18683 = vst [vmem:[#allocation20_spill] sm:$0xff] %v11196_v0  ;;  %18684 = vst [vmem:[#allocation21_spill] sm:$0xff] %v11199_v8  ;;  %v11223_v44 = vsub.f32 %v10486_v60, %v11187_v33  ;;  %v11226_v52 = vsub.f32 %v10487_v6, %v11187_v33  ;;  %v11230_v4 = vsub.f32 %v11036_v37, %v11187_v33  ;;  %v18286_v60 = vmov 0  }
 0x165   :  { %18685 = vst [vmem:[#allocation22_spill] sm:$0xff] %v11202_v50  ;;  %18686 = vst [vmem:[#allocation23_spill] sm:$0xff] %v11205_v62  ;;  %v11234_v18 = vsub.f32 %v11040_v39, %v11187_v33  ;;  %v11238_v10 = vsub.f32 %v11034_v36, %v11187_v33  ;;  %v11246_v6 = vsub.f32 %v11038_v38, %v11187_v33  ;;  %7732 = vmatprep.subr.bf16.mxu0 %v18286_v60 }
 0x166   :  { %18687 = vst [vmem:[#allocation24_spill] sm:$0xff] %v11208_v42  ;;  %18688 = vst [vmem:[#allocation25_spill] sm:$0xff] %v11211_v54  ;;  %v796_v14 = vmul.f32 %v11230_v4, %v11230_v4  ;;  %v11250_v37 = vsub.f32 %v11047_v43, %v11187_v33  ;;  %7443 = vmatprep.subr.bf16.mxu1 %v18286_v60  ;;  %v11342_v38 = vsub.f32 %v11053_v47, %v11187_v33 }
 0x167   :  { %18689 = vst [vmem:[#allocation26_spill] sm:$0xff] %v11214_v22  ;;  %18690 = vst [vmem:[#allocation27_spill] sm:$0xff] %v11217_v26  ;;  %v797_v30 = vmul.f32 %v11234_v18, %v11234_v18  ;;  %v11254_v39 = vmul.f32 %v11238_v10, %v11238_v10  ;;  %v799_v43 = vmul.f32 %v11246_v6, %v11246_v6 }
 0x168   :  { %18691 = vst [vmem:[#allocation28_spill] sm:$0xff] %v11223_v44  ;;  %18692 = vst [vmem:[#allocation29_spill] sm:$0xff] %v11226_v52  ;;  %v11350_v20 = vsub.f32 %v11044_v41, %v11187_v33  ;;  %v800_v16 = vmul.f32 %v11250_v37, %v11250_v37  ;;  %v11356_v28 = vsub.f32 %v11050_v45, %v11187_v33 }
 0x169   :  { %v11256_v36 = vadd.f32 %v797_v30, %v796_v14  ;;  %1203 = vst [vmem:[#allocation2 + $0x4] sm:$0xf] %v18286_v60  ;;  %1204 = vst [vmem:[#allocation2 + $0x8] sm:$0xf] %v18286_v60  ;;  %v801_v47 = vmul.f32 %v11342_v38, %v11342_v38  ;;  %v11362_v40 = vsub.f32 %v11059_v51, %v11187_v33 }
 0x16a   :  { %1205 = vst [vmem:[#allocation2 + $0xc] sm:$0xf] %v18286_v60  ;;  %1206 = vst [vmem:[#allocation2 + $0x10] sm:$0xf] %v18286_v60  ;;  %v802_v41 = vmul.f32 %v11350_v20, %v11350_v20  ;;  %v11368_v30 = vsub.f32 %v11065_v55, %v11187_v33  ;;  %v803_v45 = vmul.f32 %v11356_v28, %v11356_v28 }
 0x16b   :  { %1209 = vst [vmem:[#allocation2 + $0x1b4] sm:$0xf] %v18286_v60  ;;  %1210 = vst [vmem:[#allocation2 + $0x1b8] sm:$0xf] %v18286_v60  ;;  %v861_v12 = vadd.f32 %v11256_v36, %v11254_v39  ;;  %v11374_v36 = vsub.f32 %v11056_v49, %v11187_v33  ;;  %v804_v51 = vmul.f32 %v11362_v40, %v11362_v40 }
 0x16c   :  { %1211 = vst [vmem:[#allocation2 + $0x1bc] sm:$0xf] %v18286_v60  ;;  %1212 = vst [vmem:[#allocation2 + $0x1c0] sm:$0xf] %v18286_v60  ;;  %v805_v55 = vmul.f32 %v11368_v30, %v11368_v30 }
 0x16d   :  { %1216 = vst [vmem:[#allocation2 + $0x19c] sm:$0xf] %v18286_v60  ;;  %1217 = vst [vmem:[#allocation2 + $0x1a0] sm:$0xf] %v18286_v60  ;;  %v862_v24 = vadd.f32 %v861_v12, %v799_v43  ;;  %v11380_v12 = vsub.f32 %v11062_v53, %v11187_v33  ;;  %v806_v49 = vmul.f32 %v11374_v36, %v11374_v36 }
 0x16e   :  { %1218 = vst [vmem:[#allocation2 + $0x1a4] sm:$0xf] %v18286_v60  ;;  %1219 = vst [vmem:[#allocation2 + $0x1a8] sm:$0xf] %v18286_v60 }
 0x16f   :  { %1222 = vst [vmem:[#allocation2 + $0x34c] sm:$0xf] %v18286_v60  ;;  %1223 = vst [vmem:[#allocation2 + $0x350] sm:$0xf] %v18286_v60  ;;  %v863_v32 = vadd.f32 %v862_v24, %v800_v16  ;;  %v11386_v24 = vsub.f32 %v11071_v59, %v11187_v33  ;;  %v807_v53 = vmul.f32 %v11380_v12, %v11380_v12 }
 0x170   :  { %1224 = vst [vmem:[#allocation2 + $0x354] sm:$0xf] %v18286_v60  ;;  %1225 = vst [vmem:[#allocation2 + $0x358] sm:$0xf] %v18286_v60 }
 0x171   :  { %1229 = vst [vmem:[#allocation2 + $0x1c] sm:$0xf] %v18286_v60  ;;  %1231 = vst [vmem:[#allocation2 + $0x34] sm:$0xf] %v18286_v60  ;;  %v864_v14 = vadd.f32 %v863_v32, %v801_v47  ;;  %v11392_v32 = vsub.f32 %v11077_v63, %v11187_v33  ;;  %v808_v59 = vmul.f32 %v11386_v24, %v11386_v24 }
 0x172   :  { %1233 = vst [vmem:[#allocation2 + $0x4c] sm:$0xf] %v18286_v60  ;;  %1235 = vst [vmem:[#allocation2 + $0x64] sm:$0xf] %v18286_v60 }
 0x173   :  { %1237 = vst [vmem:[#allocation2 + $0x7c] sm:$0xf] %v18286_v60  ;;  %1239 = vst [vmem:[#allocation2 + $0x94] sm:$0xf] %v18286_v60  ;;  %v865_v39 = vadd.f32 %v864_v14, %v802_v41  ;;  %v11398_v14 = vsub.f32 %v11068_v57, %v11187_v33  ;;  %v809_v63 = vmul.f32 %v11392_v32, %v11392_v32 }
 0x174   :  { %1241 = vst [vmem:[#allocation2 + $0xac] sm:$0xf] %v18286_v60  ;;  %1243 = vst [vmem:[#allocation2 + $0xc4] sm:$0xf] %v18286_v60  ;;  %v11413_v57 = vsub.f32 %v11083_v3, %v11187_v33 }
 0x175   :  { %1245 = vst [vmem:[#allocation2 + $0xdc] sm:$0xf] %v18286_v60  ;;  %1247 = vst [vmem:[#allocation2 + $0xf4] sm:$0xf] %v18286_v60  ;;  %v866_v43 = vadd.f32 %v865_v39, %v803_v45  ;;  %v11404_v39 = vsub.f32 %v11074_v61, %v11187_v33  ;;  %v11420_v61 = vsub.f32 %v11089_v7, %v11187_v33 }
 0x176   :  { %1249 = vst [vmem:[#allocation2 + $0x10c] sm:$0xf] %v18286_v60  ;;  %1251 = vst [vmem:[#allocation2 + $0x124] sm:$0xf] %v18286_v60  ;;  %v812_v3 = vmul.f32 %v11413_v57, %v11413_v57 }
 0x177   :  { %1253 = vst [vmem:[#allocation2 + $0x13c] sm:$0xf] %v18286_v60  ;;  %1255 = vst [vmem:[#allocation2 + $0x154] sm:$0xf] %v18286_v60  ;;  %v867_v16 = vadd.f32 %v866_v43, %v804_v51  ;;  %v10621_v43 = vld [vmem:[%s18265_s4 + $0xb8] sm:$0xff]   ;;  %v813_v7 = vmul.f32 %v11420_v61, %v11420_v61 }
 0x178   :  { %1257 = vst [vmem:[#allocation2 + $0x16c] sm:$0xf] %v18286_v60  ;;  %1259 = vst [vmem:[#allocation2 + $0x184] sm:$0xf] %v18286_v60  ;;  %7733 = vmatpush1.bf16.msra.mxu0 %v10621_v43  ;;  %v11444_v43 = vsub.f32 %v11101_v15, %v11187_v33 }
 0x179   :  { %1261 = vst [vmem:[#allocation2 + $0x1cc] sm:$0xf] %v18286_v60  ;;  %1263 = vst [vmem:[#allocation2 + $0x1e4] sm:$0xf] %v18286_v60  ;;  %v868_v47 = vadd.f32 %v867_v16, %v805_v55  ;;  %v810_v55 = vmul.f32 %v11398_v14, %v11398_v14  ;;  %7734 = vmatprep.subr.bf16.mxu0 %v18286_v60 }
 0x17a   :  { %1265 = vst [vmem:[#allocation2 + $0x1fc] sm:$0xf] %v18286_v60  ;;  %1267 = vst [vmem:[#allocation2 + $0x214] sm:$0xf] %v18286_v60  ;;  %v817_v15 = vmul.f32 %v11444_v43, %v11444_v43 }
 0x17b   :  { %1269 = vst [vmem:[#allocation2 + $0x22c] sm:$0xf] %v18286_v60  ;;  %1271 = vst [vmem:[#allocation2 + $0x244] sm:$0xf] %v18286_v60  ;;  %v869_v41 = vadd.f32 %v868_v47, %v806_v49  ;;  %v811_v49 = vmul.f32 %v11404_v39, %v11404_v39 }
 0x17c   :  { %1273 = vst [vmem:[#allocation2 + $0x25c] sm:$0xf] %v18286_v60  ;;  %1275 = vst [vmem:[#allocation2 + $0x274] sm:$0xf] %v18286_v60 }
 0x17d   :  { %1277 = vst [vmem:[#allocation2 + $0x28c] sm:$0xf] %v18286_v60  ;;  %1279 = vst [vmem:[#allocation2 + $0x2a4] sm:$0xf] %v18286_v60  ;;  %v870_v45 = vadd.f32 %v869_v41, %v807_v53  ;;  %v11426_v53 = vsub.f32 %v11080_v1, %v11187_v33 }
 0x17e   :  { %1281 = vst [vmem:[#allocation2 + $0x2bc] sm:$0xf] %v18286_v60  ;;  %1283 = vst [vmem:[#allocation2 + $0x2d4] sm:$0xf] %v18286_v60 }
 0x17f   :  { %1285 = vst [vmem:[#allocation2 + $0x2ec] sm:$0xf] %v18286_v60  ;;  %1287 = vst [vmem:[#allocation2 + $0x304] sm:$0xf] %v18286_v60  ;;  %v871_v51 = vadd.f32 %v870_v45, %v808_v59  ;;  %v11432_v59 = vsub.f32 %v11086_v5, %v11187_v33  ;;  %v814_v1 = vmul.f32 %v11426_v53, %v11426_v53 }
 0x180   :  { %1289 = vst [vmem:[#allocation2 + $0x31c] sm:$0xf] %v18286_v60  ;;  %1291 = vst [vmem:[#allocation2 + $0x334] sm:$0xf] %v18286_v60 }
 0x181   :  { %1292 = vst [vmem:[#allocation2 + $0x28] sm:$0xf] %v18286_v60  ;;  %1294 = vst [vmem:[#allocation2 + $0x40] sm:$0xf] %v18286_v60  ;;  %v872_v16 = vadd.f32 %v871_v51, %v809_v63  ;;  %v11438_v63 = vsub.f32 %v11095_v11, %v11187_v33  ;;  %v815_v5 = vmul.f32 %v11432_v59, %v11432_v59 }
 0x182   :  { %1296 = vst [vmem:[#allocation2 + $0x58] sm:$0xf] %v18286_v60  ;;  %1298 = vst [vmem:[#allocation2 + $0x70] sm:$0xf] %v18286_v60 }
 0x183   :  { %1300 = vst [vmem:[#allocation2 + $0x88] sm:$0xf] %v18286_v60  ;;  %1302 = vst [vmem:[#allocation2 + $0xa0] sm:$0xf] %v18286_v60  ;;  %v873_v47 = vadd.f32 %v872_v16, %v810_v55  ;;  %v11450_v16 = vsub.f32 %v11092_v9, %v11187_v33  ;;  %v816_v11 = vmul.f32 %v11438_v63, %v11438_v63 }
 0x184   :  { %1304 = vst [vmem:[#allocation2 + $0xb8] sm:$0xf] %v18286_v60  ;;  %1306 = vst [vmem:[#allocation2 + $0xd0] sm:$0xf] %v18286_v60 }
 0x185   :  { %1308 = vst [vmem:[#allocation2 + $0xe8] sm:$0xf] %v18286_v60  ;;  %1310 = vst [vmem:[#allocation2 + $0x100] sm:$0xf] %v18286_v60  ;;  %v874_v41 = vadd.f32 %v873_v47, %v811_v49  ;;  %v11456_v47 = vsub.f32 %v11098_v13, %v11187_v33  ;;  %v818_v9 = vmul.f32 %v11450_v16, %v11450_v16 }
 0x186   :  { %1312 = vst [vmem:[#allocation2 + $0x118] sm:$0xf] %v18286_v60  ;;  %1314 = vst [vmem:[#allocation2 + $0x130] sm:$0xf] %v18286_v60 }
 0x187   :  { %1316 = vst [vmem:[#allocation2 + $0x148] sm:$0xf] %v18286_v60  ;;  %1318 = vst [vmem:[#allocation2 + $0x160] sm:$0xf] %v18286_v60  ;;  %v875_v45 = vadd.f32 %v874_v41, %v812_v3  ;;  %v11462_v41 = vsub.f32 %v11107_v19, %v11187_v33  ;;  %v819_v13 = vmul.f32 %v11456_v47, %v11456_v47 }
 0x188   :  { %1320 = vst [vmem:[#allocation2 + $0x178] sm:$0xf] %v18286_v60  ;;  %1322 = vst [vmem:[#allocation2 + $0x190] sm:$0xf] %v18286_v60 }
 0x189   :  { %1324 = vst [vmem:[#allocation2 + $0x1d8] sm:$0xf] %v18286_v60  ;;  %1326 = vst [vmem:[#allocation2 + $0x1f0] sm:$0xf] %v18286_v60  ;;  %v876_v51 = vadd.f32 %v875_v45, %v813_v7  ;;  %v11468_v45 = vsub.f32 %v11113_v23, %v11187_v33  ;;  %v820_v19 = vmul.f32 %v11462_v41, %v11462_v41 }
 0x18a   :  { %1328 = vst [vmem:[#allocation2 + $0x208] sm:$0xf] %v18286_v60  ;;  %1330 = vst [vmem:[#allocation2 + $0x220] sm:$0xf] %v18286_v60  ;;  %v11483_v23 = vsub.f32 %v11110_v21, %v11187_v33  ;;  %v10630_v21 = vld [vmem:[%s18265_s4 + $0x30] sm:$0xff]  }
 0x18b   :  { %1332 = vst [vmem:[#allocation2 + $0x238] sm:$0xf] %v18286_v60  ;;  %1334 = vst [vmem:[#allocation2 + $0x250] sm:$0xf] %v18286_v60  ;;  %v877_v55 = vadd.f32 %v876_v51, %v814_v1  ;;  %v11474_v51 = vsub.f32 %v11104_v17, %v11187_v33  ;;  %v11489_v17 = vsub.f32 %v11119_v27, %v11187_v33 }
 0x18c   :  { %1336 = vst [vmem:[#allocation2 + $0x268] sm:$0xf] %v18286_v60  ;;  %1338 = vst [vmem:[#allocation2 + $0x280] sm:$0xf] %v18286_v60  ;;  %v11505_v27 = vsub.f32 %v11116_v25, %v11187_v33 }
 0x18d   :  { %1340 = vst [vmem:[#allocation2 + $0x298] sm:$0xf] %v18286_v60  ;;  %1342 = vst [vmem:[#allocation2 + $0x2b0] sm:$0xf] %v18286_v60  ;;  %v878_v49 = vadd.f32 %v877_v55, %v815_v5  ;;  %v10628_v55 = vld [vmem:[%s18265_s4 + $0x38] sm:$0xff]  }
 0x18e   :  { %1344 = vst [vmem:[#allocation2 + $0x2c8] sm:$0xf] %v18286_v60  ;;  %1346 = vst [vmem:[#allocation2 + $0x2e0] sm:$0xf] %v18286_v60  ;;  %7444 = vmatpush1.bf16.msra.mxu1 %v10628_v55  ;;  %v11518_v55 = vsub.f32 %v11122_v29, %v11187_v33  ;;  %v10633_v29 = vld [vmem:[%s18265_s4 + $0x20] sm:$0xff]  }
 0x18f   :  { %1348 = vst [vmem:[#allocation2 + $0x2f8] sm:$0xf] %v18286_v60  ;;  %1350 = vst [vmem:[#allocation2 + $0x310] sm:$0xf] %v18286_v60  ;;  %v879_v3 = vadd.f32 %v878_v49, %v816_v11  ;;  %v821_v11 = vmul.f32 %v11468_v45, %v11468_v45  ;;  %7445 = vmatprep.subr.bf16.mxu1 %v18286_v60 }
 0x190   :  { %1352 = vst [vmem:[#allocation2 + $0x328] sm:$0xf] %v18286_v60  ;;  %1354 = vst [vmem:[#allocation2 + $0x340] sm:$0xf] %v18286_v60 }
 0x191   :  { %v880_v7 = vadd.f32 %v879_v3, %v817_v15  ;;  %v822_v15 = vmul.f32 %v11474_v51, %v11474_v51  ;;  %18693 = vst [vmem:[#allocation30_spill] sm:$0xff] %v11505_v27  ;;  %18694 = vst [vmem:[#allocation31_spill] sm:$0xff] %v11518_v55 }
 0x192   :  { %7446 = vmatpush1.bf16.msra.mxu1 %v10630_v21  ;;  %v11535_v21 = vsub.f32 %v11137_v46, %v11187_v33  ;;  %v10634_v46 = vld [vmem:[%s18265_s4 + $0x18] sm:$0xff]  }
 0x193   :  { %v881_v1 = vadd.f32 %v880_v7, %v818_v9  ;;  %v11499_v9 = vsub.f32 %v11125_v31, %v11187_v33  ;;  %v823_v7 = vmul.f32 %v11483_v23, %v11483_v23  ;;  %7447 = vmatprep.subr.bf16.mxu1 %v18286_v60  ;;  %v10622_v31 = vld [vmem:[%s18265_s4 + $0xb0] sm:$0xff]  }
 0x194   :  { %7735 = vmatpush1.bf16.msra.mxu0 %v10622_v31  ;;  %18696 = vst [vmem:[#allocation33_spill] sm:$0xff] %v11535_v21 }
 0x195   :  { %v882_v5 = vadd.f32 %v881_v1, %v819_v13  ;;  %v824_v1 = vmul.f32 %v11489_v17, %v11489_v17  ;;  %v825_v25 = vmul.f32 %v11499_v9, %v11499_v9  ;;  %7736 = vmatprep.subr.bf16.mxu0 %v18286_v60 }
 0x197   :  { %v883_v49 = vadd.f32 %v882_v5, %v820_v19  ;;  %v10631_v5 = vld [vmem:[%s18265_s4 + $0x28] sm:$0xff]  }
 0x198   :  { %7448 = vmatpush1.bf16.msra.mxu1 %v10631_v5  ;;  %v18699_v5 = vld [vmem:[#allocation4_spill] sm:$0xff] }
 0x199   :  { %v884_v3 = vadd.f32 %v883_v49, %v821_v11  ;;  %v11524_v49 = vsub.f32 %v11131_v35, %v11187_v33  ;;  %7449 = vmatprep.subr.bf16.mxu1 %v18286_v60  ;;  %v827_v35 = vmul.f32 %v11518_v55, %v11518_v55  ;;  %v18732_v55 = vmov 0 }
 0x19a   :  { %v18733_v55 = vsel %vm11752_vm7, 4294967295, %v18732_v55 }
 0x19b   :  { %v885_v13 = vadd.f32 %v884_v3, %v822_v15  ;;  %18695 = vst [vmem:[#allocation32_spill] sm:$0xff] %v11524_v49  ;;  %v826_v15 = vmul.f32 %v11505_v27, %v11505_v27  ;;  %18734 = vst [vmem:[#allocation36_spill] sm:$0xff] %v18733_v55 }
 0x19c   :  { %7450 = vmatpush1.bf16.msra.mxu1 %v10633_v29  ;;  %v18701_v29 = vld [vmem:[#allocation6_spill] sm:$0xff] }
 0x19d   :  { %v886_v19 = vadd.f32 %v885_v13, %v823_v7  ;;  %v18697_v13 = vld [vmem:[#allocation3_spill] sm:$0xff]  ;;  %7451 = vmatprep.subr.bf16.mxu1 %v18286_v60 }
 0x19f   :  { %v887_v11 = vadd.f32 %v886_v19, %v824_v1  ;;  %v11541_v1 = vsub.f32 %v18697_v13, %v11187_v33  ;;  %v828_v19 = vmul.f32 %v11524_v49, %v11524_v49 }
 0x1a0   :  { %7452 = vmatpush1.bf16.msra.mxu1 %v10634_v46 }
 0x1a1   :  { %v888_v3 = vadd.f32 %v887_v11, %v825_v25  ;;  %18698 = vst [vmem:[#allocation3_spill] sm:$0xff] %v11541_v1  ;;  %v11551_v25 = vsub.f32 %v18699_v5, %v11187_v33  ;;  %v829_v11 = vmul.f32 %v11535_v21, %v11535_v21  ;;  %7453 = vmatprep.subr.bf16.mxu1 %v18286_v60 }
 0x1a3   :  { %v889_v7 = vadd.f32 %v888_v3, %v826_v15  ;;  %18700 = vst [vmem:[#allocation4_spill] sm:$0xff] %v11551_v25  ;;  %v10623_v3 = vld [vmem:[%s18265_s4 + $0xa8] sm:$0xff]   ;;  %v831_v5 = vmul.f32 %v11551_v25, %v11551_v25 }
 0x1a4   :  { %7737 = vmatpush1.bf16.msra.mxu0 %v10623_v3 }
 0x1a5   :  { %v890_v31 = vadd.f32 %v889_v7, %v827_v35  ;;  %v11560_v35 = vsub.f32 %v18701_v29, %v11187_v33  ;;  %v830_v7 = vmul.f32 %v11541_v1, %v11541_v1  ;;  %7738 = vmatprep.subr.bf16.mxu0 %v18286_v60 }
 0x1a7   :  { %v891_v15 = vadd.f32 %v890_v31, %v828_v19  ;;  %18702 = vst [vmem:[#allocation6_spill] sm:$0xff] %v11560_v35  ;;  %v10636_v19 = vld [vmem:[%s18265_s4 + $0x10] sm:$0xff]   ;;  %v18703_v31 = vld [vmem:[#allocation8_spill] sm:$0xff]  ;;  %v832_v60 = vmul.f32 %v11560_v35, %v11560_v35 }
 0x1a8   :  { %v11571_v46 = vsub.f32 %v18703_v31, %v11187_v33  ;;  %7454 = vmatpush1.bf16.msra.mxu1 %v10636_v19  ;;  %v18707_v31 = vmov 0  }
 0x1a9   :  { %v892_v13 = vadd.f32 %v891_v15, %v829_v11  ;;  %v10624_v11 = vld [vmem:[%s18265_s4 + $0xa0] sm:$0xff]   ;;  %v18705_v15 = vld [vmem:[#allocation5_spill] sm:$0xff]  ;;  %7455 = vmatprep.subr.bf16.mxu1 %v18707_v31 }
 0x1aa   :  { %18704 = vst [vmem:[#allocation8_spill] sm:$0xff] %v11571_v46  ;;  %v11580_v3 = vsub.f32 %v18705_v15, %v11187_v33  ;;  %7739 = vmatpush1.bf16.msra.mxu0 %v10624_v11  ;;  %v833_v15 = vmul.f32 %v11571_v46, %v11571_v46 }
 0x1ab   :  { %v893_v29 = vadd.f32 %v892_v13, %v830_v7  ;;  %7740 = vmatprep.subr.bf16.mxu0 %v18707_v31  ;;  %v10637_v7 = vld [vmem:[%s18265_s4 + $0x8] sm:$0xff]   ;;  %v18708_v13 = vld [vmem:[#allocation7_spill] sm:$0xff] }
 0x1ac   :  { %18706 = vst [vmem:[#allocation5_spill] sm:$0xff] %v11580_v3  ;;  %v11591_v19 = vsub.f32 %v18708_v13, %v11187_v33  ;;  %7456 = vmatpush1.bf16.msra.mxu1 %v10637_v7  ;;  %v834_v35 = vmul.f32 %v11580_v3, %v11580_v3 }
 0x1ad   :  { %v894_v1 = vadd.f32 %v893_v29, %v831_v5  ;;  %v10625_v5 = vld [vmem:[%s18265_s4 + $0x98] sm:$0xff]   ;;  %7457 = vmatprep.subr.bf16.mxu1 %v18707_v31 }
 0x1ae   :  { %18709 = vst [vmem:[#allocation7_spill] sm:$0xff] %v11591_v19  ;;  %v18710_v29 = vld [vmem:[#allocation10_spill] sm:$0xff]  ;;  %7741 = vmatpush1.bf16.msra.mxu0 %v10625_v5  ;;  %v835_v13 = vmul.f32 %v11591_v19, %v11591_v19 }
 0x1af   :  { %v895_v25 = vadd.f32 %v894_v1, %v832_v60  ;;  %v11600_v11 = vsub.f32 %v18710_v29, %v11187_v33  ;;  %7742 = vmatprep.subr.bf16.mxu0 %v18707_v31  ;;  %v10639_v60 = vld [vmem:[%s18265_s4] sm:$0xff]   ;;  %v18712_v1 = vld [vmem:[#allocation12_spill] sm:$0xff] }
 0x1b0   :  { %v11611_v7 = vsub.f32 %v18712_v1, %v11187_v33  ;;  %7458 = vmatpush1.bf16.msra.mxu1 %v10639_v60 }
 0x1b1   :  { %18711 = vst [vmem:[#allocation10_spill] sm:$0xff] %v11600_v11  ;;  %v896_v21 = vadd.f32 %v895_v25, %v833_v15  ;;  %v10626_v25 = vld [vmem:[%s18265_s4 + $0x90] sm:$0xff]   ;;  %v836_v3 = vmul.f32 %v11600_v11, %v11600_v11  ;;  %7459 = vmatprep.subr.bf16.mxu1 %v18707_v31 }
 0x1b2   :  { %18713 = vst [vmem:[#allocation12_spill] sm:$0xff] %v11611_v7  ;;  %v18714_v15 = vld [vmem:[#allocation9_spill] sm:$0xff]  ;;  %7743 = vmatpush1.bf16.msra.mxu0 %v10626_v25  ;;  %v837_v1 = vmul.f32 %v11611_v7, %v11611_v7 }
 0x1b3   :  { %v897_v29 = vadd.f32 %v896_v21, %v834_v35  ;;  %v11620_v5 = vsub.f32 %v18714_v15, %v11187_v33  ;;  %7744 = vmatprep.subr.bf16.mxu0 %v18707_v31  ;;  %v10640_v21 = vld [vmem:[%s18265_s4 + $0x78] sm:$0xff]   ;;  %v18716_v35 = vld [vmem:[#allocation11_spill] sm:$0xff] }
 0x1b4   :  { %v11631_v60 = vsub.f32 %v18716_v35, %v11187_v33  ;;  %7460 = vmatpush2.bf16.msra.mxu1 %v10640_v21 }
 0x1b5   :  { %18715 = vst [vmem:[#allocation9_spill] sm:$0xff] %v11620_v5  ;;  %v898_v46 = vadd.f32 %v897_v29, %v835_v13  ;;  %v10627_v13 = vld [vmem:[%s18265_s4 + $0x88] sm:$0xff]   ;;  %v18718_v29 = vld [vmem:[#allocation14_spill] sm:$0xff]  ;;  %v838_v11 = vmul.f32 %v11620_v5, %v11620_v5  ;;  %7461 = vmatprep.subr.bf16.mxu1 %v18707_v31 }
 0x1b6   :  { %18717 = vst [vmem:[#allocation11_spill] sm:$0xff] %v11631_v60  ;;  %v11640_v25 = vsub.f32 %v18718_v29, %v11187_v33  ;;  %7745 = vmatpush1.bf16.msra.mxu0 %v10627_v13  ;;  %v839_v35 = vmul.f32 %v11631_v60, %v11631_v60  ;;  %v10647_v60 = vld [vmem:[%s18265_s4 + $0xd0] sm:$0xff]  }
 0x1b7   :  { %v899_v15 = vadd.f32 %v898_v46, %v836_v3  ;;  %7746 = vmatprep.subr.bf16.mxu0 %v18707_v31  ;;  %v10642_v46 = vld [vmem:[%s18265_s4 + $0x70] sm:$0xff]   ;;  %v18720_v3 = vld [vmem:[#allocation15_spill] sm:$0xff] }
 0x1b8   :  { %18719 = vst [vmem:[#allocation14_spill] sm:$0xff] %v11640_v25  ;;  %v11651_v21 = vsub.f32 %v18720_v3, %v11187_v33  ;;  %7462 = vmatpush2.bf16.msra.mxu1 %v10642_v46  ;;  %v840_v5 = vmul.f32 %v11640_v25, %v11640_v25  ;;  %v10632_v3 = vld [vmem:[%s18265_s4 + $0xf8] sm:$0xff]  }
 0x1b9   :  { %v900_v19 = vadd.f32 %v899_v15, %v837_v1  ;;  %v10629_v1 = vld [vmem:[%s18265_s4 + $0x80] sm:$0xff]   ;;  %v18722_v15 = vld [vmem:[#allocation13_spill] sm:$0xff]  ;;  %7463 = vmatprep.subr.bf16.mxu1 %v18707_v31 }
 0x1ba   :  { %18721 = vst [vmem:[#allocation15_spill] sm:$0xff] %v11651_v21  ;;  %v11660_v13 = vsub.f32 %v18722_v15, %v11187_v33  ;;  %7747 = vmatpush1.bf16.msra.mxu0 %v10629_v1  ;;  %v10645_v1 = vld [vmem:[%s18265_s4 + $0x60] sm:$0xff]   ;;  %v843_v15 = vmul.f32 %v11190_v48, %v11190_v48 }
 0x1bb   :  { %v901_v29 = vadd.f32 %v900_v19, %v838_v11  ;;  %7748 = vmatprep.subr.bf16.mxu0 %v18707_v31  ;;  %v10643_v19 = vld [vmem:[%s18265_s4 + $0x68] sm:$0xff]   ;;  %v841_v11 = vmul.f32 %v11651_v21, %v11651_v21 }
 0x1bc   :  { %18723 = vst [vmem:[#allocation13_spill] sm:$0xff] %v11660_v13  ;;  %7464 = vmatpush2.bf16.msra.mxu1 %v10643_v19 }
 0x1bd   :  { %v902_v7 = vadd.f32 %v901_v29, %v839_v35  ;;  %v842_v35 = vmul.f32 %v11660_v13, %v11660_v13  ;;  %7465 = vmatprep.subr.bf16.mxu1 %v18707_v31 }
 0x1be   :  { %7749 = vmatpush2.bf16.msra.mxu0 %v10632_v3 }
 0x1bf   :  { %v903_v46 = vadd.f32 %v902_v7, %v840_v5  ;;  %7750 = vmatprep.subr.bf16.mxu0 %v18707_v31  ;;  %v18724_v7 = vld [vmem:[#allocation16_spill] sm:$0xff] }
 0x1c0   :  { %v11683_v5 = vsub.f32 %v18724_v7, %v11187_v33  ;;  %7466 = vmatpush2.bf16.msra.mxu1 %v10645_v1  ;;  %v10646_v7 = vld [vmem:[%s18265_s4 + $0x58] sm:$0xff]   ;;  %v10638_v1 = vld [vmem:[%s18265_s4 + $0xe8] sm:$0xff]  }
 0x1c1   :  { %v904_v29 = vadd.f32 %v903_v46, %v841_v11  ;;  %v10635_v11 = vld [vmem:[%s18265_s4 + $0xf0] sm:$0xff]   ;;  %v844_v46 = vmul.f32 %v11193_v56, %v11193_v56  ;;  %7467 = vmatprep.subr.bf16.mxu1 %v18707_v31 }
 0x1c2   :  { %18725 = vst [vmem:[#allocation16_spill] sm:$0xff] %v11683_v5  ;;  %7751 = vmatpush2.bf16.msra.mxu0 %v10635_v11  ;;  %v846_v11 = vmul.f32 %v11196_v0, %v11196_v0 }
 0x1c3   :  { %v905_v19 = vadd.f32 %v904_v29, %v842_v35  ;;  %7752 = vmatprep.subr.bf16.mxu0 %v18707_v31  ;;  %v845_v35 = vmul.f32 %v11683_v5, %v11683_v5 }
 0x1c4   :  { %7468 = vmatpush2.bf16.msra.mxu1 %v10646_v7 }
 0x1c5   :  { %v906_v3 = vadd.f32 %v905_v19, %v843_v15  ;;  %v18726_v15 = vld [vmem:[#allocation17_spill] sm:$0xff]  ;;  %7469 = vmatprep.subr.bf16.mxu1 %v18707_v31 }
 0x1c6   :  { %v11704_v19 = vsub.f32 %v18726_v15, %v11187_v33  ;;  %7753 = vmatpush2.bf16.msra.mxu0 %v10638_v1  ;;  %v10641_v15 = vld [vmem:[%s18265_s4 + $0xe0] sm:$0xff]  }
 0x1c7   :  { %v907_v29 = vadd.f32 %v906_v3, %v844_v46  ;;  %7754 = vmatprep.subr.bf16.mxu0 %v18707_v31  ;;  %v10648_v46 = vld [vmem:[%s18265_s4 + $0x50] sm:$0xff]   ;;  %v847_v3 = vmul.f32 %v11199_v8, %v11199_v8  ;;  %v850_v8 = vmul.f32 %v11205_v62, %v11205_v62  ;;  %v10651_v62 = vld [vmem:[%s18265_s4 + $0x40] sm:$0xff]  }
 0x1c8   :  { %18727 = vst [vmem:[#allocation17_spill] sm:$0xff] %v11704_v19  ;;  %7470 = vmatpush2.bf16.msra.mxu1 %v10648_v46  ;;  %v849_v1 = vmul.f32 %v11704_v19, %v11704_v19  ;;  %v10649_v46 = vld [vmem:[%s18265_s4 + $0x48] sm:$0xff]  }
 0x1c9   :  { %v908_v56 = vadd.f32 %v907_v29, %v845_v35  ;;  %v11720_v35 = vsub.f32 %v11181_v2, %v11187_v33  ;;  %v848_v29 = vmul.f32 %v11202_v50, %v11202_v50  ;;  %7471 = vmatprep.subr.bf16.mxu1 %v18707_v31  ;;  %v10644_v2 = vld [vmem:[%s18265_s4 + $0xd8] sm:$0xff]  }
 0x1ca   :  { %7755 = vmatpush2.bf16.msra.mxu0 %v10641_v15 }
 0x1cb   :  { %v909_v7 = vadd.f32 %v908_v56, %v846_v11  ;;  %18728 = vst [vmem:[#allocation34_spill] sm:$0xff] %v11720_v35  ;;  %v1677_v56 = vld [vmem:[#allocation2 + $0x8] sm:$0xf]  ;;  %v1678_v11 = vld [vmem:[#allocation2 + $0xc] sm:$0xf]  ;;  %7756 = vmatprep.subr.bf16.mxu0 %v18707_v31 }
 0x1cc   :  { %v1781_v19 = vshrl.u32 %v1677_v56, 16  ;;  %v1784_v50 = vshll.u32 %v1677_v56, 16  ;;  %v1793_v5 = vshll.u32 %v1678_v11, 16  ;;  %7472 = vmatpush2.bf16.msra.mxu1 %v10649_v46  ;;  %v851_v46 = vmul.f32 %v11208_v42, %v11208_v42 }
 0x1cd   :  { %v910_v0 = vadd.f32 %v909_v7, %v847_v3  ;;  %v1790_v3 = vshrl.u32 %v1678_v11, 16  ;;  %v9757_v7 = vcombine.low %v1677_v56, %v1678_v11  ;;  %7473 = vmatprep.subr.bf16.mxu1 %v18707_v31  ;;  %v1676_v11 = vld [vmem:[#allocation2 + $0x4] sm:$0x8] }
 0x1ce   :  { %v1783_v48 = vrot.slane %v1781_v19, 7  ;;  %v2514_v21 = vrot.slane %v1781_v19, 4  ;;  %7757 = vmatpush2.bf16.msra.mxu0 %v10644_v2  ;;  %v18729_v2 = vmov 0  ;;  %v1776_v42 = vshrl.u32 %v1676_v11, 16 }
 0x1cf   :  { %v911_v15 = vadd.f32 %v910_v0, %v848_v29  ;;  %v1792_v13 = vrot.slane %v1790_v3, 7  ;;  %7475 = vmatprep.mubr.bf16.mxu1 %v9757_v7  ;;  %v2515_v0 = vrot.slane %v1784_v50, 5  ;;  %v2518_v29 = vrot.slane %v1793_v5, 5  ;;  %7758 = vmatprep.subr.bf16.mxu0 %v18707_v31 }
 0x1d0   :  { %v2520_v56 = vrot.slane %v1790_v3, 4  ;;  %v1788_v49 = vrot.slane %v1783_v48, 4  ;;  %v18730_v2 = vsel %vm11748_vm5, 4294967295, %v18729_v2  ;;  %7474 = vmatpush2.bf16.msra.mxu1 %v10651_v62  ;;  %v1786_v3 = vor.u32 %v1784_v50, %v1783_v48 }
 0x1d1   :  { %v912_v25 = vadd.f32 %v911_v15, %v849_v1  ;;  %v1795_v19 = vor.u32 %v1793_v5, %v1792_v13  ;;  %18731 = vst [vmem:[#allocation35_spill] sm:$0xff] %v18730_v2  ;;  %v2516_v7 = vor.u32 %v2515_v0, %v2514_v21  ;;  %v852_v13 = vmul.f32 %v11211_v54, %v11211_v54  ;;  %v2480_v2 = vld [vmem:[#allocation2 + $0x28] sm:$0x1] }
 0x1d2   :  { %v2521_v15 = vor.u32 %v2520_v56, %v2518_v29  ;;  %7759 = vmatpush2.bf16.msra.mxu0 %v10647_v60  ;;  %8021 = vmatprep.subr.bf16.mxu1 %v18707_v31  ;;  %v9629_v48 = vrot.slane %v1776_v42, 11  ;;  %v853_v62 = vmul.f32 %v11720_v35, %v11720_v35  ;;  %v854_v56 = vmul.f32 %v11214_v22, %v11214_v22  ;;  %v10654_v42 = vld [vmem:[%s18265_s4 + $0xc0] sm:$0xff]  }
 0x1d3   :  { %v913_v1 = vadd.f32 %v912_v25, %v850_v8  ;;  %v10650_v25 = vld [vmem:[%s18265_s4 + $0xc8] sm:$0xff]   ;;  %v2517_v5 = vrot.slane %v2516_v7, 4  ;;  %7760 = vmatprep.subr.bf16.mxu0 %v18707_v31  ;;  %v1796_v50 = vsel %vm11752_vm7, %v1788_v49, %v1795_v19  ;;  %v11778_v49 = vsub.f32 %v11184_v58, %v11187_v33 }
 0x1d4   :  { %v1787_v0 = vsel %vm11752_vm7, %v9629_v48, %v1786_v3  ;;  %v855_v19 = vmul.f32 %v11217_v26, %v11217_v26  ;;  %v2522_v7 = vrot.slane %v2521_v15, 4  ;;  %v858_v15 = vmul.f32 %v11223_v44, %v11223_v44 }
 0x1d5   :  { %v914_v8 = vadd.f32 %v913_v1, %v851_v46  ;;  %v2519_v60 = vsel %vm11748_vm5, %v2517_v5, %v2518_v29  ;;  %v9725_v46 = vcombine.low %v1787_v0, %v1796_v50  ;;  %v2479_v29 = vld [vmem:[#allocation2 + $0x10] sm:$0x1]  ;;  %v857_v33 = vmul.f32 %v11778_v49, %v11778_v49 }
 0x1d6   :  { %7761 = vmatpush2.bf16.msra.mxu0 %v10650_v25  ;;  %v2524_v3 = vshll.u32 %v2479_v29, 16 }
 0x1d7   :  { %v915_v21 = vadd.f32 %v914_v8, %v852_v13  ;;  %7762 = vmatprep.subr.bf16.mxu0 %v18707_v31  ;;  %7476 = vmatmul.mubr.bf16.vlgmr.msra.gmra.mxu1 %v9725_v46  ;;  %v856_v13 = vmul.f32 %v11220_v34, %v11220_v34 }
 0x1d8   :  { %v2526_v25 = vrot.slane %v2524_v3, 5 }
 0x1d9   :  { %v916_v11 = vadd.f32 %v915_v21, %v853_v62  ;;  %v859_v62 = vmul.f32 %v11226_v52, %v11226_v52 }
 0x1da   :  { %7763 = vmatpush2.bf16.msra.mxu0 %v10654_v42  ;;  %v2527_v5 = vsel %vm11748_vm5, %v2522_v7, %v2526_v25  ;;  %v1679_v7 = vld [vmem:[#allocation2 + $0x1c] sm:$0x8] }
 0x1db   :  { %v917_v1 = vadd.f32 %v916_v11, %v854_v56  ;;  %8310 = vmatprep.subr.bf16.mxu0 %v18707_v31  ;;  %v11790_v48 = vcombine.low %v2519_v60, %v2527_v5  ;;  %v2962_v60 = vld [vmem:[#allocation2 + $0x1c] sm:$0x8]  ;;  %v1798_v25 = vshrl.u32 %v1679_v7, 16  ;;  %v2968_v5 = vld [vmem:[#allocation2 + $0x4c] sm:$0x8] }
 0x1dc   :  { %v3103_v7 = vshrl.u32 %v2968_v5, 16 }
 0x1dd   :  { %v918_v8 = vadd.f32 %v917_v1, %v855_v19  ;;  %18735 = vst [vmem:[#allocation37_spill] sm:$0xff] %v11790_v48  ;;  %v11800_v54 = vrot.slane %v1798_v25, 11 }
 0x1df   :  { %v919_v58 = vadd.f32 %v918_v8, %v856_v13  ;;  %v2965_v13 = vld [vmem:[#allocation2 + $0x34] sm:$0x8]  ;;  %18736 = vst [vmem:[#allocation38_spill] sm:$0xff] %v11800_v54  ;;  %v18780_v54 = vld [vmem:[#allocation23_spill] sm:$0xff] }
 0x1e0   :  { %v1682_v8 = vld [vmem:[#allocation2 + $0x34] sm:$0x8] }
 0x1e1   :  { %v920_v50 = vadd.f32 %v919_v58, %v857_v33  ;;  %v3059_v33 = vshrl.u32 %v2962_v60, 16  ;;  %v3081_v58 = vshrl.u32 %v2965_v13, 16 }
 0x1e3   :  { %v921_v21 = vadd.f32 %v920_v50, %v858_v15  ;;  %v1685_v15 = vld [vmem:[#allocation2 + $0x4c] sm:$0x8]  ;;  %v2971_v50 = vld [vmem:[#allocation2 + $0x64] sm:$0x8]  ;;  %v11804_v27 = vrot.slane %v3081_v58, 11 }
 0x1e4   :  { %v1842_v60 = vshrl.u32 %v1685_v15, 16  ;;  %v3125_v13 = vshrl.u32 %v2971_v50, 16  ;;  %v11810_v15 = vrot.slane %v3103_v7, 11 }
 0x1e5   :  { %v922_v0 = vadd.f32 %v921_v21, %v859_v62  ;;  %v1820_v62 = vshrl.u32 %v1682_v8, 16  ;;  %v2481_v21 = vld [vmem:[#allocation2 + $0x40] sm:$0x1]  ;;  %18738 = vst [vmem:[#allocation40_spill] sm:$0xff] %v11804_v27  ;;  %v18774_v27 = vld [vmem:[#allocation21_spill] sm:$0xff] }
 0x1e6   :  { %v2552_v8 = vshll.u32 %v2481_v21, 16  ;;  %18741 = vst [vmem:[#allocation43_spill] sm:$0xff] %v11810_v15  ;;  %v11812_v50 = vrot.slane %v1842_v60, 11  ;;  %v11814_v21 = vrot.slane %v3125_v13, 11 }
 0x1e7   :  { %v923_v56 = vrot.slane %v922_v0, 4 }
 0x1e8   :  { %18742 = vst [vmem:[#allocation44_spill] sm:$0xff] %v11812_v50  ;;  %18743 = vst [vmem:[#allocation45_spill] sm:$0xff] %v11814_v21  ;;  %v18767_v21 = vld [vmem:[#allocation14_spill] sm:$0xff] }
 0x1e9   :  { %v924_v11 = vadd.f32 %v923_v56, %v922_v0  ;;  %v1688_v0 = vld [vmem:[#allocation2 + $0x64] sm:$0x8]  ;;  %v10662_v56 = vld [vmem:[%s18265_s4 + $0x138] sm:$0xff]  }
 0x1ea   :  { %8022 = vmatpush1.bf16.msra.mxu1 %v10662_v56  ;;  %v1864_v48 = vshrl.u32 %v1688_v0, 16  ;;  %v11802_v56 = vrot.slane %v3059_v33, 11  ;;  %v11816_v0 = vrot.slane %v2552_v8, 5 }
 0x1eb   :  { %v925_v46 = vrot.slane %v924_v11, 2  ;;  %8023 = vmatprep.subr.bf16.mxu1 %v18707_v31 }
 0x1ec   :  { %18737 = vst [vmem:[#allocation39_spill] sm:$0xff] %v11802_v56  ;;  %18744 = vst [vmem:[#allocation46_spill] sm:$0xff] %v11816_v0  ;;  %v18768_v0 = vld [vmem:[#allocation15_spill] sm:$0xff]  ;;  %v18778_v56 = vld [vmem:[#allocation17_spill] sm:$0xff] }
 0x1ed   :  { %v926_v42 = vadd.f32 %v925_v46, %v924_v11  ;;  %v2482_v11 = vld [vmem:[#allocation2 + $0x58] sm:$0x1]  ;;  %v2974_v46 = vld [vmem:[#allocation2 + $0x7c] sm:$0x8] }
 0x1ee   :  { %v2566_v55 = vshll.u32 %v2482_v11, 16  ;;  %v3147_v52 = vshrl.u32 %v2974_v46, 16  ;;  %v11818_v11 = vrot.slane %v1864_v48, 11 }
 0x1ef   :  { %v927_v29 = vrot.slane %v926_v42, 1 }
 0x1f0   :  { %18745 = vst [vmem:[#allocation47_spill] sm:$0xff] %v11818_v11  ;;  %v11820_v25 = vrot.slane %v2566_v55, 5  ;;  %v11822_v33 = vrot.slane %v3147_v52, 11 }
 0x1f1   :  { %v928_v19 = vadd.f32 %v927_v29, %v926_v42  ;;  %v1691_v42 = vld [vmem:[#allocation2 + $0x7c] sm:$0x8]  ;;  %v2483_v29 = vld [vmem:[#allocation2 + $0x70] sm:$0x1] }
 0x1f2   :  { %v1886_v44 = vshrl.u32 %v1691_v42, 16  ;;  %v2580_v26 = vshll.u32 %v2483_v29, 16  ;;  %18746 = vst [vmem:[#allocation48_spill] sm:$0xff] %v11820_v25  ;;  %18747 = vst [vmem:[#allocation49_spill] sm:$0xff] %v11822_v33  ;;  %v18765_v33 = vld [vmem:[#allocation9_spill] sm:$0xff] }
 0x1f3   :  { %v929_v1 = vmul.f32 0.001953125, %v928_v19  ;;  %v2977_v19 = vld [vmem:[#allocation2 + $0x94] sm:$0x8] }
 0x1f4   :  { %v3169_v22 = vshrl.u32 %v2977_v19, 16  ;;  %v11831_v46 = vrot.slane %v1886_v44, 11  ;;  %v11833_v42 = vrot.slane %v2580_v26, 5 }
 0x1f5   :  { %v930_v3 = vadd.f32 1e-05, %v929_v1  ;;  %v1694_v1 = vld [vmem:[#allocation2 + $0x94] sm:$0x8] }
 0x1f6   :  { %v1908_v35 = vshrl.u32 %v1694_v1, 16  ;;  %18748 = vst [vmem:[#allocation50_spill] sm:$0xff] %v11831_v46  ;;  %18749 = vst [vmem:[#allocation51_spill] sm:$0xff] %v11833_v42  ;;  %v11835_v29 = vrot.slane %v3169_v22, 11  ;;  %v11854_v22 = vld [vmem:[%s18267_s3] ss:$0 sm:$0xff] }
 0x1f7   :  { %10789 = vrsqrt.f32 %v930_v3  ;;  %v2538_v3 = vshll.u32 %v2480_v2, 16  ;;  %v11806_v2 = vrot.slane %v1820_v62, 11  ;;  %v11829_v62 = vld [vmem:[%s18266_s2] ss:$0 sm:$0xff]  ;;  %18752 = vst [vmem:[#allocation54_spill] sm:$0xff] %v11854_v22  ;;  %v18763_v42 = vld [vmem:[#allocation10_spill] sm:$0xff] }
 0x1f8   :  { %18750 = vst [vmem:[#allocation52_spill] sm:$0xff] %v11835_v29  ;;  %v11837_v19 = vrot.slane %v1908_v35, 11  ;;  %v18761_v29 = vld [vmem:[#allocation5_spill] sm:$0xff] }
 0x1f9   :  { %18739 = vst [vmem:[#allocation41_spill] sm:$0xff] %v11806_v2  ;;  %v11808_v5 = vrot.slane %v2538_v3, 5  ;;  %v18776_v2 = vld [vmem:[#allocation22_spill] sm:$0xff] }
 0x1fa   :  { %18751 = vst [vmem:[#allocation53_spill] sm:$0xff] %v11837_v19  ;;  %v18764_v19 = vld [vmem:[#allocation12_spill] sm:$0xff] }
 0x1fb   :  { %18740 = vst [vmem:[#allocation42_spill] sm:$0xff] %v11808_v5  ;;  %v18771_v5 = vld [vmem:[#allocation19_spill] sm:$0xff] }
 0x204   :  { %v11824_v58 = vpop.eup %10789 }
 0x205   :  { %v992_v55 = vmul.f32 %v11824_v58, %v11220_v34  ;;  %v993_v52 = vmul.f32 %v11824_v58, %v11778_v49  ;;  %v11845_v48 = vmul.f32 %v11824_v58, %v11230_v4  ;;  %v11849_v44 = vmul.f32 %v11824_v58, %v11234_v18 }
 0x206   :  { %v11858_v26 = vmul.f32 %v11824_v58, %v11238_v10  ;;  %v11862_v34 = vmul.f32 %v11824_v58, %v11246_v6  ;;  %v11866_v4 = vmul.f32 %v11824_v58, %v11250_v37  ;;  %v11870_v18 = vmul.f32 %v11824_v58, %v11342_v38 }
 0x207   :  { %v1063_v35 = vmul.f32 %v11829_v62, %v992_v55  ;;  %v1064_v49 = vmul.f32 %v11829_v62, %v993_v52  ;;  %v11876_v10 = vmul.f32 %v11824_v58, %v11350_v20  ;;  %v11880_v6 = vmul.f32 %v11824_v58, %v11356_v28  ;;  %v18753_v55 = vld [vmem:[#allocation30_spill] sm:$0xff]  ;;  %v18754_v52 = vld [vmem:[#allocation31_spill] sm:$0xff] }
 0x208   :  { %v11884_v37 = vmul.f32 %v11824_v58, %v11362_v40  ;;  %v11888_v38 = vmul.f32 %v11824_v58, %v11368_v30  ;;  %v11892_v1 = vmul.f32 %v11824_v58, %v11374_v36  ;;  %v11896_v20 = vmul.f32 %v11824_v58, %v11380_v12 }
 0x209   :  { %v1134_v3 = vadd.f32 %v11854_v22, %v1063_v35  ;;  %v1135_v28 = vadd.f32 %v11854_v22, %v1064_v49  ;;  %v11902_v40 = vmul.f32 %v11824_v58, %v11386_v24  ;;  %v11906_v30 = vmul.f32 %v11824_v58, %v11392_v32  ;;  %v18755_v49 = vld [vmem:[#allocation32_spill] sm:$0xff] }
 0x20a   :  { %v11910_v36 = vmul.f32 %v11824_v58, %v11398_v14  ;;  %v11914_v12 = vmul.f32 %v11824_v58, %v11404_v39  ;;  %v11918_v7 = vmul.f32 %v11824_v58, %v11413_v57  ;;  %v11922_v24 = vmul.f32 %v11824_v58, %v11420_v61  ;;  %v18782_v22 = vld [vmem:[#allocation24_spill] sm:$0xff] }
 0x20b   :  { %v1198_v60 = vmax.f32 %v1134_v3, 0.0  ;;  %v1199_v13 = vmax.f32 %v1135_v28, 0.0  ;;  %v11926_v32 = vmul.f32 %v11824_v58, %v11426_v53  ;;  %v11930_v14 = vmul.f32 %v11824_v58, %v11432_v59  ;;  %v18756_v3 = vld [vmem:[#allocation33_spill] sm:$0xff]  ;;  %v18757_v28 = vld [vmem:[#allocation3_spill] sm:$0xff] }
 0x20c   :  { %v11934_v39 = vmul.f32 %v11824_v58, %v11438_v63  ;;  %v11938_v57 = vmul.f32 %v11824_v58, %v11444_v43  ;;  %v11942_v61 = vmul.f32 %v11824_v58, %v11450_v16  ;;  %v11946_v53 = vmul.f32 %v11824_v58, %v11456_v47  ;;  %v10666_v16 = vld [vmem:[%s18265_s4 + $0x130] sm:$0xff]  }
 0x20d   :  { %v10304_v8 = vpack.c.bf16 %v1199_v13, %v1198_v60  ;;  %v11950_v59 = vmul.f32 %v11824_v58, %v11462_v41  ;;  %v11954_v63 = vmul.f32 %v11824_v58, %v11468_v45  ;;  %v11958_v43 = vmul.f32 %v11824_v58, %v11474_v51  ;;  %8024 = vmatpush1.bf16.msra.mxu1 %v10666_v16  ;;  %v18758_v60 = vld [vmem:[#allocation4_spill] sm:$0xff] }
 0x20e   :  { %v11965_v47 = vmul.f32 %v11824_v58, %v11483_v23  ;;  %v11969_v41 = vmul.f32 %v11824_v58, %v11489_v17  ;;  %v11973_v45 = vmul.f32 %v11824_v58, %v11499_v9  ;;  %v11977_v51 = vmul.f32 %v11824_v58, %v18753_v55  ;;  %8025 = vmatprep.subr.bf16.mxu1 %v18707_v31  ;;  %v18784_v31 = vld [vmem:[#allocation25_spill] sm:$0xff] }
 0x20f   :  { %10341 = vst [vmem:[#allocation2 + $0x320] sm:$0xff] %v10304_v8   ;;  %v11981_v35 = vmul.f32 %v11824_v58, %v18754_v52  ;;  %v11985_v23 = vmul.f32 %v11824_v58, %v18755_v49  ;;  %v11989_v17 = vmul.f32 %v11824_v58, %v18756_v3  ;;  %v11993_v9 = vmul.f32 %v11824_v58, %v18757_v28  ;;  %v18759_v8 = vld [vmem:[#allocation6_spill] sm:$0xff]  ;;  %v18760_v52 = vld [vmem:[#allocation8_spill] sm:$0xff]  ;;  %v18762_v28 = vld [vmem:[#allocation7_spill] sm:$0xff] }
 0x210   :  { %v11997_v13 = vmul.f32 %v11824_v58, %v18758_v60  ;;  %v12001_v55 = vmul.f32 %v11824_v58, %v18759_v8  ;;  %v12005_v49 = vmul.f32 %v11824_v58, %v18760_v52  ;;  %v12009_v3 = vmul.f32 %v11824_v58, %v18761_v29  ;;  %v18766_v52 = vld [vmem:[#allocation11_spill] sm:$0xff] }
 0x211   :  { %v971_v16 = vmul.f32 %v11824_v58, %v18762_v28  ;;  %v972_v60 = vmul.f32 %v11824_v58, %v18763_v42  ;;  %v973_v8 = vmul.f32 %v11824_v58, %v18764_v19  ;;  %v974_v25 = vmul.f32 %v11824_v58, %v18765_v33  ;;  %v18769_v28 = vld [vmem:[#allocation13_spill] sm:$0xff]  ;;  %v18770_v42 = vld [vmem:[#allocation18_spill] sm:$0xff] }
 0x212   :  { %v975_v46 = vmul.f32 %v11824_v58, %v18766_v52  ;;  %v976_v29 = vmul.f32 %v11824_v58, %v18767_v21  ;;  %v12026_v11 = vmul.f32 %v11824_v58, %v18768_v0  ;;  %v12030_v15 = vmul.f32 %v11824_v58, %v18769_v28  ;;  %v18772_v52 = vld [vmem:[#allocation16_spill] sm:$0xff] }
 0x213   :  { %v12034_v19 = vmul.f32 %v11824_v58, %v18770_v42  ;;  %v12038_v33 = vmul.f32 %v11824_v58, %v18771_v5  ;;  %v12042_v50 = vmul.f32 %v11824_v58, %v18772_v52  ;;  %v18773_v21 = vld [vmem:[#allocation20_spill] sm:$0xff]  ;;  %v12050_v28 = vmul.f32 %v11824_v58, %v18774_v27 }
 0x214   :  { %v12046_v0 = vmul.f32 %v11824_v58, %v18773_v21  ;;  %v12054_v42 = vmul.f32 %v11824_v58, %v18776_v2  ;;  %v12058_v5 = vmul.f32 %v11824_v58, %v18778_v56  ;;  %v12062_v52 = vmul.f32 %v11824_v58, %v18780_v54 }
 0x215   :  { %18775 = vst [vmem:[#allocation30_spill] sm:$0xff] %v12050_v28  ;;  %v12066_v21 = vmul.f32 %v11824_v58, %v18782_v22  ;;  %v12070_v27 = vmul.f32 %v11824_v58, %v18784_v31  ;;  %v18785_v28 = vld [vmem:[#allocation34_spill] sm:$0xff] }
 0x216   :  { %18777 = vst [vmem:[#allocation31_spill] sm:$0xff] %v12054_v42  ;;  %18779 = vst [vmem:[#allocation32_spill] sm:$0xff] %v12058_v5  ;;  %v12074_v2 = vmul.f32 %v11824_v58, %v18785_v28  ;;  %v18786_v42 = vld [vmem:[#allocation26_spill] sm:$0xff]  ;;  %v18787_v5 = vld [vmem:[#allocation27_spill] sm:$0xff]  ;;  %v12094_v28 = vmul.f32 %v11829_v62, %v11845_v48  ;;  %v12114_v48 = vmul.f32 %v11829_v62, %v11870_v18 }
 0x217   :  { %18781 = vst [vmem:[#allocation33_spill] sm:$0xff] %v12062_v52  ;;  %18783 = vst [vmem:[#allocation3_spill] sm:$0xff] %v12066_v21  ;;  %v12078_v56 = vmul.f32 %v11824_v58, %v18786_v42  ;;  %v12082_v54 = vmul.f32 %v11824_v58, %v18787_v5  ;;  %v18788_v52 = vld [vmem:[#allocation28_spill] sm:$0xff]  ;;  %v18789_v21 = vld [vmem:[#allocation29_spill] sm:$0xff]  ;;  %v12098_v42 = vmul.f32 %v11829_v62, %v11849_v44 }
 0x218   :  { %v12086_v22 = vmul.f32 %v11824_v58, %v18788_v52  ;;  %v12090_v31 = vmul.f32 %v11824_v58, %v18789_v21  ;;  %v12102_v5 = vmul.f32 %v11829_v62, %v11858_v26  ;;  %v12106_v52 = vmul.f32 %v11829_v62, %v11862_v34 }
 0x219   :  { %v12110_v58 = vmul.f32 %v11829_v62, %v11866_v4  ;;  %v12118_v44 = vmul.f32 %v11829_v62, %v11876_v10  ;;  %v12122_v26 = vmul.f32 %v11829_v62, %v11880_v6  ;;  %v12126_v34 = vmul.f32 %v11829_v62, %v11884_v37 }
 0x21a   :  { %v12130_v4 = vmul.f32 %v11829_v62, %v11888_v38  ;;  %v12134_v18 = vmul.f32 %v11829_v62, %v11892_v1  ;;  %v12138_v10 = vmul.f32 %v11829_v62, %v11896_v20  ;;  %v12142_v6 = vmul.f32 %v11829_v62, %v11902_v40 }
 0x21b   :  { %v12146_v37 = vmul.f32 %v11829_v62, %v11906_v30  ;;  %v12150_v38 = vmul.f32 %v11829_v62, %v11910_v36  ;;  %v12154_v1 = vmul.f32 %v11829_v62, %v11914_v12  ;;  %v12158_v20 = vmul.f32 %v11829_v62, %v11918_v7 }
 0x21c   :  { %v12162_v40 = vmul.f32 %v11829_v62, %v11922_v24  ;;  %v12166_v30 = vmul.f32 %v11829_v62, %v11926_v32  ;;  %v12170_v36 = vmul.f32 %v11829_v62, %v11930_v14  ;;  %v12174_v12 = vmul.f32 %v11829_v62, %v11934_v39 }
 0x21d   :  { %v12178_v7 = vmul.f32 %v11829_v62, %v11938_v57  ;;  %v12182_v24 = vmul.f32 %v11829_v62, %v11942_v61  ;;  %v12186_v32 = vmul.f32 %v11829_v62, %v11946_v53  ;;  %v12190_v14 = vmul.f32 %v11829_v62, %v11950_v59 }
 0x21e   :  { %v12194_v39 = vmul.f32 %v11829_v62, %v11954_v63  ;;  %v12198_v57 = vmul.f32 %v11829_v62, %v11958_v43  ;;  %v12202_v61 = vmul.f32 %v11829_v62, %v11965_v47  ;;  %v12206_v53 = vmul.f32 %v11829_v62, %v11969_v41 }
 0x21f   :  { %v12210_v59 = vmul.f32 %v11829_v62, %v11973_v45  ;;  %v12214_v63 = vmul.f32 %v11829_v62, %v11977_v51  ;;  %v12218_v43 = vmul.f32 %v11829_v62, %v11981_v35  ;;  %v12222_v47 = vmul.f32 %v11829_v62, %v11985_v23 }
 0x220   :  { %v12226_v41 = vmul.f32 %v11829_v62, %v11989_v17  ;;  %v12230_v45 = vmul.f32 %v11829_v62, %v11993_v9  ;;  %v12234_v51 = vmul.f32 %v11829_v62, %v11997_v13  ;;  %v12238_v35 = vmul.f32 %v11829_v62, %v12001_v55 }
 0x221   :  { %v12242_v23 = vmul.f32 %v11829_v62, %v12005_v49  ;;  %v12246_v17 = vmul.f32 %v11829_v62, %v12009_v3  ;;  %v12249_v21 = vmul.f32 %v11829_v62, %v971_v16  ;;  %v12252_v9 = vmul.f32 %v11829_v62, %v972_v60  ;;  %v10670_v3 = vld [vmem:[%s18265_s4 + $0x128] sm:$0xff]  }
 0x222   :  { %18790 = vst [vmem:[#allocation4_spill] sm:$0xff] %v12238_v35  ;;  %v12255_v13 = vmul.f32 %v11829_v62, %v973_v8  ;;  %v12258_v55 = vmul.f32 %v11829_v62, %v974_v25  ;;  %v12261_v35 = vmul.f32 %v11829_v62, %v975_v46  ;;  %v12264_v49 = vmul.f32 %v11829_v62, %v976_v29  ;;  %v18795_v29 = vld [vmem:[#allocation30_spill] sm:$0xff] }
 0x223   :  { %v12271_v16 = vmul.f32 %v11829_v62, %v12026_v11  ;;  %v12275_v60 = vmul.f32 %v11829_v62, %v12030_v15  ;;  %v12279_v25 = vmul.f32 %v11829_v62, %v12034_v19  ;;  %v12283_v46 = vmul.f32 %v11829_v62, %v12038_v33  ;;  %8026 = vmatpush1.bf16.msra.mxu1 %v10670_v3 }
 0x224   :  { %v12287_v8 = vmul.f32 %v11829_v62, %v12042_v50  ;;  %v12291_v11 = vmul.f32 %v11829_v62, %v12046_v0  ;;  %v12295_v15 = vmul.f32 %v11829_v62, %v18795_v29  ;;  %v12315_v29 = vmul.f32 %v11829_v62, %v12070_v27  ;;  %v18803_v27 = vld [vmem:[#allocation54_spill] sm:$0xff] }
 0x225   :  { %18791 = vst [vmem:[#allocation6_spill] sm:$0xff] %v12275_v60  ;;  %18792 = vst [vmem:[#allocation8_spill] sm:$0xff] %v12279_v25  ;;  %v18797_v60 = vld [vmem:[#allocation31_spill] sm:$0xff]  ;;  %v18798_v25 = vld [vmem:[#allocation32_spill] sm:$0xff]  ;;  %v1060_v3 = vmul.f32 %v11829_v62, %v12074_v2  ;;  %v12338_v2 = vadd.f32 %v18803_v27, %v12102_v5  ;;  %v12370_v5 = vadd.f32 %v18803_v27, %v12134_v18 }
 0x226   :  { %18793 = vst [vmem:[#allocation5_spill] sm:$0xff] %v12283_v46  ;;  %18794 = vst [vmem:[#allocation7_spill] sm:$0xff] %v12287_v8  ;;  %v12299_v19 = vmul.f32 %v11829_v62, %v18797_v60  ;;  %v12303_v33 = vmul.f32 %v11829_v62, %v18798_v25  ;;  %v18799_v46 = vld [vmem:[#allocation33_spill] sm:$0xff]  ;;  %v18800_v8 = vld [vmem:[#allocation3_spill] sm:$0xff]  ;;  %v1061_v60 = vmul.f32 %v11829_v62, %v12078_v56 }
 0x227   :  { %18796 = vst [vmem:[#allocation10_spill] sm:$0xff] %v12295_v15  ;;  %v12307_v50 = vmul.f32 %v11829_v62, %v18799_v46  ;;  %v12311_v0 = vmul.f32 %v11829_v62, %v18800_v8  ;;  %18801 = vst [vmem:[#allocation12_spill] sm:$0xff] %v12315_v29  ;;  %v18802_v15 = vmov 0   ;;  %v1062_v25 = vmul.f32 %v11829_v62, %v12082_v54 }
 0x228   :  { %8027 = vmatprep.subr.bf16.mxu1 %v18802_v15  ;;  %v1065_v46 = vmul.f32 %v11829_v62, %v12086_v22  ;;  %v1066_v8 = vmul.f32 %v11829_v62, %v12090_v31  ;;  %v12330_v29 = vadd.f32 %v18803_v27, %v12094_v28  ;;  %v12334_v15 = vadd.f32 %v18803_v27, %v12098_v42 }
 0x229   :  { %18806 = vst [vmem:[#allocation14_spill] sm:$0xff] %v12338_v2  ;;  %v12342_v56 = vadd.f32 %v18803_v27, %v12106_v52  ;;  %v12346_v54 = vadd.f32 %v18803_v27, %v12110_v58  ;;  %v12350_v62 = vadd.f32 %v18803_v27, %v12114_v48  ;;  %v12354_v22 = vadd.f32 %v18803_v27, %v12118_v44 }
 0x22a   :  { %18804 = vst [vmem:[#allocation9_spill] sm:$0xff] %v12330_v29  ;;  %18805 = vst [vmem:[#allocation11_spill] sm:$0xff] %v12334_v15  ;;  %v12358_v31 = vadd.f32 %v18803_v27, %v12122_v26  ;;  %v12362_v28 = vadd.f32 %v18803_v27, %v12126_v34  ;;  %v12366_v42 = vadd.f32 %v18803_v27, %v12130_v4 }
 0x22b   :  { %18807 = vst [vmem:[#allocation15_spill] sm:$0xff] %v12342_v56  ;;  %18808 = vst [vmem:[#allocation13_spill] sm:$0xff] %v12346_v54  ;;  %v12374_v52 = vadd.f32 %v18803_v27, %v12138_v10  ;;  %v12378_v58 = vadd.f32 %v18803_v27, %v12142_v6  ;;  %v12382_v48 = vadd.f32 %v18803_v27, %v12146_v37 }
 0x22c   :  { %v12386_v44 = vadd.f32 %v18803_v27, %v12150_v38  ;;  %v12390_v26 = vadd.f32 %v18803_v27, %v12154_v1  ;;  %v12394_v34 = vadd.f32 %v18803_v27, %v12158_v20  ;;  %v12398_v4 = vadd.f32 %v18803_v27, %v12162_v40 }
 0x22d   :  { %v12402_v18 = vadd.f32 %v18803_v27, %v12166_v30  ;;  %v12406_v10 = vadd.f32 %v18803_v27, %v12170_v36  ;;  %v12410_v6 = vadd.f32 %v18803_v27, %v12174_v12  ;;  %v12414_v37 = vadd.f32 %v18803_v27, %v12178_v7 }
 0x22e   :  { %v12418_v38 = vadd.f32 %v18803_v27, %v12182_v24  ;;  %v12422_v1 = vadd.f32 %v18803_v27, %v12186_v32  ;;  %v12426_v20 = vadd.f32 %v18803_v27, %v12190_v14  ;;  %v12430_v40 = vadd.f32 %v18803_v27, %v12194_v39 }
 0x22f   :  { %v12434_v30 = vadd.f32 %v18803_v27, %v12198_v57  ;;  %v12438_v36 = vadd.f32 %v18803_v27, %v12202_v61  ;;  %v12442_v12 = vadd.f32 %v18803_v27, %v12206_v53  ;;  %v12446_v7 = vadd.f32 %v18803_v27, %v12210_v59  ;;  %v18809_v53 = vld [vmem:[#allocation4_spill] sm:$0xff] }
 0x230   :  { %v12450_v24 = vadd.f32 %v18803_v27, %v12214_v63  ;;  %v12454_v32 = vadd.f32 %v18803_v27, %v12218_v43  ;;  %v12458_v14 = vadd.f32 %v18803_v27, %v12222_v47  ;;  %v12462_v39 = vadd.f32 %v18803_v27, %v12226_v41 }
 0x231   :  { %v12466_v57 = vadd.f32 %v18803_v27, %v12230_v45  ;;  %v12470_v61 = vadd.f32 %v18803_v27, %v12234_v51  ;;  %v12474_v59 = vadd.f32 %v18803_v27, %v18809_v53  ;;  %v12478_v63 = vadd.f32 %v18803_v27, %v12242_v23  ;;  %v18814_v53 = vld [vmem:[#allocation8_spill] sm:$0xff] }
 0x232   :  { %v12482_v43 = vadd.f32 %v18803_v27, %v12246_v17  ;;  %v12486_v47 = vadd.f32 %v18803_v27, %v12249_v21  ;;  %v12490_v41 = vadd.f32 %v18803_v27, %v12252_v9  ;;  %v12494_v45 = vadd.f32 %v18803_v27, %v12255_v13  ;;  %v18813_v9 = vld [vmem:[#allocation6_spill] sm:$0xff] }
 0x233   :  { %v12498_v51 = vadd.f32 %v18803_v27, %v12258_v55  ;;  %v12502_v23 = vadd.f32 %v18803_v27, %v12261_v35  ;;  %v12506_v17 = vadd.f32 %v18803_v27, %v12264_v49  ;;  %v12510_v21 = vadd.f32 %v18803_v27, %v12271_v16 }
 0x234   :  { %v12514_v13 = vadd.f32 %v18803_v27, %v18813_v9  ;;  %v12518_v55 = vadd.f32 %v18803_v27, %v18814_v53  ;;  %v12530_v16 = vadd.f32 %v18803_v27, %v12291_v11  ;;  %v12538_v53 = vadd.f32 %v18803_v27, %v12299_v19 }
 0x235   :  { %18810 = vst [vmem:[#allocation18_spill] sm:$0xff] %v12498_v51  ;;  %18811 = vst [vmem:[#allocation19_spill] sm:$0xff] %v12502_v23  ;;  %v18815_v51 = vld [vmem:[#allocation5_spill] sm:$0xff]  ;;  %v18816_v23 = vld [vmem:[#allocation7_spill] sm:$0xff]  ;;  %v12550_v11 = vadd.f32 %v18803_v27, %v12311_v0  ;;  %v12560_v19 = vadd.f32 %v18803_v27, %v1061_v60  ;;  %v1150_v60 = vmax.f32 %v12378_v58, 0.0  ;;  %v1151_v0 = vmax.f32 %v12382_v48, 0.0 }
 0x236   :  { %18812 = vst [vmem:[#allocation16_spill] sm:$0xff] %v12510_v21  ;;  %v12522_v35 = vadd.f32 %v18803_v27, %v18815_v51  ;;  %v12526_v49 = vadd.f32 %v18803_v27, %v18816_v23  ;;  %18817 = vst [vmem:[#allocation20_spill] sm:$0xff] %v12530_v16  ;;  %v18818_v21 = vld [vmem:[#allocation10_spill] sm:$0xff]  ;;  %v12542_v51 = vadd.f32 %v18803_v27, %v12303_v33  ;;  %v18821_v16 = vld [vmem:[#allocation12_spill] sm:$0xff]  ;;  %v1152_v54 = vmax.f32 %v12386_v44, 0.0 }
 0x237   :  { %v12534_v9 = vadd.f32 %v18803_v27, %v18818_v21  ;;  %v12546_v23 = vadd.f32 %v18803_v27, %v12307_v50  ;;  %v12554_v21 = vadd.f32 %v18803_v27, %v18821_v16  ;;  %v12563_v33 = vadd.f32 %v18803_v27, %v1062_v25  ;;  %v10674_v25 = vld [vmem:[%s18265_s4 + $0x120] sm:$0xff]  }
 0x238   :  { %v12566_v50 = vadd.f32 %v18803_v27, %v1065_v46  ;;  %v1143_v46 = vmax.f32 %v12350_v62, 0.0  ;;  %v1147_v16 = vmax.f32 %v12366_v42, 0.0  ;;  %8028 = vmatpush1.bf16.msra.mxu1 %v10674_v25  ;;  %v1153_v62 = vmax.f32 %v12390_v26, 0.0 }
 0x239   :  { %18819 = vst [vmem:[#allocation21_spill] sm:$0xff] %v12534_v9  ;;  %18820 = vst [vmem:[#allocation22_spill] sm:$0xff] %v12546_v23  ;;  %v12557_v9 = vadd.f32 %v18803_v27, %v1060_v3  ;;  %v12569_v23 = vadd.f32 %v18803_v27, %v1066_v8  ;;  %v1145_v8 = vmax.f32 %v12358_v31, 0.0  ;;  %v1146_v27 = vmax.f32 %v12362_v28, 0.0 }
 0x23a   :  { %18822 = vst [vmem:[#allocation17_spill] sm:$0xff] %v12554_v21  ;;  %18823 = vst [vmem:[#allocation23_spill] sm:$0xff] %v12563_v33  ;;  %v1148_v21 = vmax.f32 %v12370_v5, 0.0  ;;  %v1149_v3 = vmax.f32 %v12374_v52, 0.0  ;;  %v18826_v31 = vmov 0   ;;  %v1155_v28 = vmax.f32 %v12398_v4, 0.0 }
 0x23b   :  { %18824 = vst [vmem:[#allocation24_spill] sm:$0xff] %v12566_v50  ;;  %18825 = vst [vmem:[#allocation25_spill] sm:$0xff] %v12569_v23  ;;  %v1144_v50 = vmax.f32 %v12354_v22, 0.0  ;;  %v1154_v22 = vmax.f32 %v12394_v34, 0.0  ;;  %8029 = vmatprep.subr.bf16.mxu1 %v18826_v31  ;;  %v1156_v42 = vmax.f32 %v12402_v18, 0.0  ;;  %v1157_v5 = vmax.f32 %v12406_v10, 0.0 }
 0x23c   :  { %v1158_v52 = vmax.f32 %v12410_v6, 0.0  ;;  %v1159_v58 = vmax.f32 %v12414_v37, 0.0  ;;  %v1160_v48 = vmax.f32 %v12418_v38, 0.0  ;;  %v1161_v44 = vmax.f32 %v12422_v1, 0.0  ;;  %v18827_v31 = vld [vmem:[#allocation18_spill] sm:$0xff]  ;;  %v18828_v56 = vld [vmem:[#allocation19_spill] sm:$0xff] }
 0x23d   :  { %v1162_v26 = vmax.f32 %v12426_v20, 0.0  ;;  %v1163_v34 = vmax.f32 %v12430_v40, 0.0  ;;  %v1164_v25 = vmax.f32 %v12434_v30, 0.0  ;;  %v1165_v4 = vmax.f32 %v12438_v36, 0.0  ;;  %v18829_v2 = vld [vmem:[#allocation16_spill] sm:$0xff] }
 0x23e   :  { %v1166_v18 = vmax.f32 %v12442_v12, 0.0  ;;  %v1167_v10 = vmax.f32 %v12446_v7, 0.0  ;;  %v1168_v6 = vmax.f32 %v12450_v24, 0.0  ;;  %v1169_v37 = vmax.f32 %v12454_v32, 0.0  ;;  %v18830_v15 = vld [vmem:[#allocation20_spill] sm:$0xff] }
 0x23f   :  { %v1170_v38 = vmax.f32 %v12458_v14, 0.0  ;;  %v1171_v1 = vmax.f32 %v12462_v39, 0.0  ;;  %v1172_v20 = vmax.f32 %v12466_v57, 0.0  ;;  %v1173_v40 = vmax.f32 %v12470_v61, 0.0 }
 0x240   :  { %v1174_v30 = vmax.f32 %v12474_v59, 0.0  ;;  %v1175_v36 = vmax.f32 %v12478_v63, 0.0  ;;  %v1176_v12 = vmax.f32 %v12482_v43, 0.0  ;;  %v1177_v7 = vmax.f32 %v12486_v47, 0.0  ;;  %v18831_v29 = vld [vmem:[#allocation21_spill] sm:$0xff]  ;;  %v18832_v23 = vld [vmem:[#allocation22_spill] sm:$0xff] }
 0x241   :  { %v1178_v24 = vmax.f32 %v12490_v41, 0.0  ;;  %v1179_v32 = vmax.f32 %v12494_v45, 0.0  ;;  %v1180_v14 = vmax.f32 %v18827_v31, 0.0  ;;  %v1181_v39 = vmax.f32 %v18828_v56, 0.0  ;;  %v18833_v33 = vld [vmem:[#allocation17_spill] sm:$0xff] }
 0x242   :  { %v1182_v57 = vmax.f32 %v12506_v17, 0.0  ;;  %v1183_v61 = vmax.f32 %v18829_v2, 0.0  ;;  %v1184_v59 = vmax.f32 %v12514_v13, 0.0  ;;  %v1185_v63 = vmax.f32 %v12518_v55, 0.0 }
 0x243   :  { %v1186_v43 = vmax.f32 %v12522_v35, 0.0  ;;  %v1187_v47 = vmax.f32 %v12526_v49, 0.0  ;;  %v1188_v41 = vmax.f32 %v18830_v15, 0.0  ;;  %v1189_v45 = vmax.f32 %v18831_v29, 0.0  ;;  %v18834_v49 = vld [vmem:[#allocation23_spill] sm:$0xff]  ;;  %v18835_v29 = vld [vmem:[#allocation24_spill] sm:$0xff] }
 0x244   :  { %v1190_v31 = vmax.f32 %v12538_v53, 0.0  ;;  %v1191_v56 = vmax.f32 %v12542_v51, 0.0  ;;  %v1192_v17 = vmax.f32 %v18832_v23, 0.0  ;;  %v1193_v2 = vmax.f32 %v12550_v11, 0.0  ;;  %v18836_v51 = vld [vmem:[#allocation25_spill] sm:$0xff] }
 0x245   :  { %v1194_v13 = vmax.f32 %v18833_v33, 0.0  ;;  %v1195_v55 = vmax.f32 %v12557_v9, 0.0  ;;  %v1196_v35 = vmax.f32 %v12560_v19, 0.0  ;;  %v1197_v15 = vmax.f32 %v18834_v49, 0.0  ;;  %v18837_v11 = vld [vmem:[#allocation9_spill] sm:$0xff]  ;;  %v18839_v9 = vld [vmem:[#allocation11_spill] sm:$0xff] }
 0x246   :  { %v1200_v53 = vmax.f32 %v18835_v29, 0.0  ;;  %v1201_v23 = vmax.f32 %v18836_v51, 0.0  ;;  %v18838_v33 = vmax.f32 %v18837_v11, 0.0  ;;  %v18840_v19 = vmax.f32 %v18839_v9, 0.0  ;;  %v18841_v29 = vld [vmem:[#allocation14_spill] sm:$0xff]  ;;  %v18843_v11 = vld [vmem:[#allocation15_spill] sm:$0xff] }
 0x247   :  { %v18842_v51 = vmax.f32 %v18841_v29, 0.0  ;;  %v18844_v9 = vmax.f32 %v18843_v11, 0.0 }
 0x248   :  { %v10154_v49 = vpack.c.bf16 %v18840_v19, %v18838_v33  ;;  %v18845_v33 = vld [vmem:[#allocation13_spill] sm:$0xff] }
 0x249   :  { %v10159_v19 = vpack.c.bf16 %v18844_v9, %v18842_v51  ;;  %v18846_v29 = vmax.f32 %v18845_v33, 0.0  ;;  %v10169_v9 = vpack.c.bf16 %v1145_v8, %v1144_v50  ;;  %v10174_v51 = vpack.c.bf16 %v1147_v16, %v1146_v27 }
 0x24a   :  { %v10179_v33 = vpack.c.bf16 %v1149_v3, %v1148_v21  ;;  %v10194_v8 = vpack.c.bf16 %v1155_v28, %v1154_v22  ;;  %v10199_v50 = vpack.c.bf16 %v1157_v5, %v1156_v42  ;;  %v10204_v16 = vpack.c.bf16 %v1159_v58, %v1158_v52  ;;  %10311 = vst [vmem:[#allocation2 + $0x20] sm:$0xff] %v10154_v49   ;;  %v12647_v28 = vld [vmem:[#allocation2 + $0xac] sm:$0x8] }
 0x24b   :  { %v10164_v11 = vpack.c.bf16 %v1143_v46, %v18846_v29  ;;  %v10184_v29 = vpack.c.bf16 %v1151_v0, %v1150_v60  ;;  %v10189_v46 = vpack.c.bf16 %v1153_v62, %v1152_v54  ;;  %10312 = vst [vmem:[#allocation2 + $0x38] sm:$0xff] %v10159_v19   ;;  %v10209_v27 = vpack.c.bf16 %v1161_v44, %v1160_v48  ;;  %v12649_v48 = vld [vmem:[#allocation2 + $0x88] sm:$0x1]  ;;  %v12651_v44 = vld [vmem:[#allocation2 + $0xac] sm:$0x8] }
 0x24c   :  { %v10214_v3 = vpack.c.bf16 %v1163_v34, %v1162_v26  ;;  %v10219_v21 = vpack.c.bf16 %v1165_v4, %v1164_v25  ;;  %v10224_v0 = vpack.c.bf16 %v1167_v10, %v1166_v18  ;;  %10314 = vst [vmem:[#allocation2 + $0x68] sm:$0xff] %v10169_v9   ;;  %10315 = vst [vmem:[#allocation2 + $0x80] sm:$0xff] %v10174_v51   ;;  %v12653_v26 = vld [vmem:[#allocation2 + $0xa0] sm:$0x1] }
 0x24d   :  { %10313 = vst [vmem:[#allocation2 + $0x50] sm:$0xff] %v10164_v11   ;;  %10316 = vst [vmem:[#allocation2 + $0x98] sm:$0xff] %v10179_v33   ;;  %v10229_v60 = vpack.c.bf16 %v1169_v37, %v1168_v6  ;;  %v10234_v54 = vpack.c.bf16 %v1171_v1, %v1170_v38  ;;  %v10239_v62 = vpack.c.bf16 %v1173_v40, %v1172_v20  ;;  %v10678_v1 = vld [vmem:[%s18265_s4 + $0x118] sm:$0xff]   ;;  %v2594_v20 = vshll.u32 %v12649_v48, 16 }
 0x24e   :  { %10317 = vst [vmem:[#allocation2 + $0xb0] sm:$0xff] %v10184_v29   ;;  %v10244_v22 = vpack.c.bf16 %v1175_v36, %v1174_v30  ;;  %10318 = vst [vmem:[#allocation2 + $0xc8] sm:$0xff] %v10189_v46   ;;  %v10249_v42 = vpack.c.bf16 %v1177_v7, %v1176_v12  ;;  %v10254_v5 = vpack.c.bf16 %v1179_v32, %v1178_v24  ;;  %v3191_v40 = vshrl.u32 %v12647_v28, 16  ;;  %v18848_v46 = vld [vmem:[#allocation38_spill] sm:$0xff] }
 0x24f   :  { %10319 = vst [vmem:[#allocation2 + $0xe0] sm:$0xff] %v10194_v8   ;;  %10320 = vst [vmem:[#allocation2 + $0xf8] sm:$0xff] %v10199_v50   ;;  %v10259_v52 = vpack.c.bf16 %v1181_v39, %v1180_v14  ;;  %v10264_v58 = vpack.c.bf16 %v1183_v61, %v1182_v57  ;;  %v10269_v34 = vpack.c.bf16 %v1185_v63, %v1184_v59  ;;  %v1930_v30 = vshrl.u32 %v12651_v44, 16 }
 0x250   :  { %10321 = vst [vmem:[#allocation2 + $0x110] sm:$0xff] %v10204_v16   ;;  %10322 = vst [vmem:[#allocation2 + $0x128] sm:$0xff] %v10209_v27   ;;  %v10274_v25 = vpack.c.bf16 %v1187_v47, %v1186_v43  ;;  %v10279_v4 = vpack.c.bf16 %v1189_v45, %v1188_v41  ;;  %v10284_v18 = vpack.c.bf16 %v1191_v56, %v1190_v31  ;;  %v2608_v36 = vshll.u32 %v12653_v26, 16 }
 0x251   :  { %10323 = vst [vmem:[#allocation2 + $0x140] sm:$0xff] %v10214_v3   ;;  %10324 = vst [vmem:[#allocation2 + $0x158] sm:$0xff] %v10219_v21   ;;  %v10289_v10 = vpack.c.bf16 %v1193_v2, %v1192_v17  ;;  %v10294_v6 = vpack.c.bf16 %v1195_v55, %v1194_v13  ;;  %v10299_v37 = vpack.c.bf16 %v1197_v15, %v1196_v35  ;;  %v1680_v12 = vld [vmem:[#allocation2 + $0x20] sm:$0xf]  ;;  %v12662_v7 = vld [vmem:[#allocation2 + $0x24] sm:$0xf]  ;;  %8030 = vmatpush1.bf16.msra.mxu1 %v10678_v1 }
 0x252   :  { %10325 = vst [vmem:[#allocation2 + $0x170] sm:$0xff] %v10224_v0   ;;  %10326 = vst [vmem:[#allocation2 + $0x188] sm:$0xff] %v10229_v60   ;;  %v10309_v38 = vpack.c.bf16 %v1201_v23, %v1200_v53  ;;  %v12664_v24 = vld [vmem:[#allocation2 + $0x20] sm:$0xf]  ;;  %v1803_v32 = vshrl.u32 %v1680_v12, 16  ;;  %v1806_v14 = vshll.u32 %v1680_v12, 16  ;;  %v9758_v63 = vcombine.low %v1680_v12, %v12662_v7 }
 0x253   :  { %10327 = vst [vmem:[#allocation2 + $0x1d0] sm:$0xff] %v10234_v54   ;;  %10328 = vst [vmem:[#allocation2 + $0x1e8] sm:$0xff] %v10239_v62   ;;  %v1812_v39 = vshrl.u32 %v12662_v7, 16  ;;  %v1815_v57 = vshll.u32 %v12662_v7, 16  ;;  %v12668_v61 = vld [vmem:[#allocation2 + $0x24] sm:$0xf] }
 0x254   :  { %10329 = vst [vmem:[#allocation2 + $0x200] sm:$0xff] %v10244_v22   ;;  %10330 = vst [vmem:[#allocation2 + $0x218] sm:$0xff] %v10249_v42   ;;  %v18847_v59 = vmov 0   ;;  %v18379_v43 = vshrl.u32 %v12664_v24, 16  ;;  %v18375_v47 = vshll.u32 %v12664_v24, 16  ;;  %v18372_v41 = vshrl.u32 %v12668_v61, 16  ;;  %7483 = vmatprep.mubr.bf16.mxu1 %v9758_v63 }
 0x255   :  { %10331 = vst [vmem:[#allocation2 + $0x230] sm:$0xff] %v10254_v5   ;;  %10332 = vst [vmem:[#allocation2 + $0x248] sm:$0xff] %v10259_v52   ;;  %8031 = vmatprep.subr.bf16.mxu1 %v18847_v59  ;;  %v1805_v45 = vrot.slane %v1803_v32, 7  ;;  %v1814_v31 = vrot.slane %v1812_v39, 7  ;;  %v12675_v56 = vrot.slane %v1803_v32, 4  ;;  %v12677_v17 = vrot.slane %v1806_v14, 5 }
 0x256   :  { %10333 = vst [vmem:[#allocation2 + $0x260] sm:$0xff] %v10264_v58   ;;  %10334 = vst [vmem:[#allocation2 + $0x278] sm:$0xff] %v10269_v34   ;;  %v1683_v2 = vld [vmem:[#allocation2 + $0x38] sm:$0xf]  ;;  %v12679_v13 = vrot.slane %v1812_v39, 4  ;;  %v3066_v55 = vrot.slane %v18379_v43, 7 }
 0x257   :  { %10335 = vst [vmem:[#allocation2 + $0x290] sm:$0xff] %v10274_v25   ;;  %10336 = vst [vmem:[#allocation2 + $0x2a8] sm:$0xff] %v10279_v4   ;;  %v3075_v35 = vrot.slane %v18372_v41, 7  ;;  %v18374_v15 = vshll.u32 %v12668_v61, 16  ;;  %v12686_v53 = vld [vmem:[#allocation2 + $0x3c] sm:$0xf]  ;;  %v1808_v23 = vor.u32 %v1806_v14, %v1805_v45  ;;  %v1817_v19 = vor.u32 %v1815_v57, %v1814_v31 }
 0x258   :  { %10337 = vst [vmem:[#allocation2 + $0x2c0] sm:$0xff] %v10284_v18   ;;  %10338 = vst [vmem:[#allocation2 + $0x2d8] sm:$0xff] %v10289_v10   ;;  %v1810_v49 = vrot.slane %v1805_v45, 4  ;;  %v3069_v9 = vor.u32 %v18375_v47, %v3066_v55  ;;  %v3071_v51 = vrot.slane %v3066_v55, 4  ;;  %v1825_v29 = vshrl.u32 %v1683_v2, 16  ;;  %v18850_v60 = vld [vmem:[#allocation39_spill] sm:$0xff] }
 0x259   :  { %10339 = vst [vmem:[#allocation2 + $0x2f0] sm:$0xff] %v10294_v6   ;;  %10340 = vst [vmem:[#allocation2 + $0x308] sm:$0xff] %v10299_v37   ;;  %v3078_v33 = vor.u32 %v18374_v15, %v3075_v35  ;;  %v1809_v50 = vsel %vm11752_vm7, %v18848_v46, %v1808_v23  ;;  %v1828_v27 = vshll.u32 %v1683_v2, 16  ;;  %v1834_v3 = vshrl.u32 %v12686_v53, 16  ;;  %v12702_v21 = vld [vmem:[#allocation2 + $0x38] sm:$0xf] }
 0x25a   :  { %10342 = vst [vmem:[#allocation2 + $0x338] sm:$0xff] %v10309_v38   ;;  %v1818_v16 = vsel %vm11752_vm7, %v1810_v49, %v1817_v19  ;;  %v3070_v54 = vsel %vm11752_vm7, %v18850_v60, %v3069_v9  ;;  %v1827_v22 = vrot.slane %v1825_v29, 7  ;;  %v12709_v42 = vld [vmem:[#allocation2 + $0x3c] sm:$0xf]  ;;  %v1837_v58 = vshll.u32 %v12686_v53, 16  ;;  %v18852_v39 = vld [vmem:[#allocation37_spill] sm:$0xff] }
 0x25b   :  { %v9726_v0 = vcombine.low %v1809_v50, %v1818_v16  ;;  %v3079_v62 = vsel %vm11752_vm7, %v3071_v51, %v3078_v33  ;;  %18851 = vst [vmem:[#allocation34_spill] sm:$0xff] %v12709_v42  ;;  %v1836_v52 = vrot.slane %v1834_v3, 7  ;;  %v12712_v34 = vrot.slane %v1825_v29, 4  ;;  %v10657_v25 = vld [vmem:[%s18265_s4 + $0x1b8] sm:$0xff]   ;;  %v1686_v4 = vld [vmem:[#allocation2 + $0x50] sm:$0xf] }
 0x25c   :  { %v9821_v5 = vcombine.low %v3070_v54, %v3079_v62  ;;  %v12717_v18 = vrot.slane %v1828_v27, 5  ;;  %v12719_v10 = vrot.slane %v1834_v3, 4  ;;  %v9759_v6 = vcombine.low %v1683_v2, %v12686_v53  ;;  %v12723_v38 = vld [vmem:[#allocation2 + $0x54] sm:$0xf]  ;;  %v18856_v54 = vld [vmem:[#allocation40_spill] sm:$0xff] }
 0x25d   :  { %7484 = vmatmul.mubr.bf16.gmra.mxu1 %v9726_v0  ;;  %v18351_v37 = vshrl.u32 %v12702_v21, 16  ;;  %v18346_v1 = vshll.u32 %v12702_v21, 16  ;;  %v18344_v12 = vshrl.u32 %v12709_v42, 16  ;;  %v18345_v32 = vshll.u32 %v12709_v42, 16  ;;  %v18853_v35 = vld [vmem:[#allocation41_spill] sm:$0xff] }
 0x25e   :  { %7764 = vmatprep.mubr.bf16.mxu0 %v9821_v5  ;;  %v1830_v14 = vor.u32 %v1828_v27, %v1827_v22  ;;  %7491 = vmatprep.mubr.bf16.mxu1 %v9759_v6  ;;  %v1832_v45 = vrot.slane %v1827_v22, 4  ;;  %v1839_v31 = vor.u32 %v1837_v58, %v1836_v52  ;;  %v1847_v2 = vshrl.u32 %v1686_v4, 16  ;;  %v10660_v9 = vld [vmem:[%s18265_s4 + $0x1b0] sm:$0xff]  }
 0x25f   :  { %7765 = vmatmul.mubr.bf16.vlgmr.msra.gmra.mxu0 %v18852_v39  ;;  %v3088_v63 = vrot.slane %v18351_v37, 7  ;;  %v3097_v55 = vrot.slane %v18344_v12, 7  ;;  %v1850_v49 = vshll.u32 %v1686_v4, 16  ;;  %v1856_v19 = vshrl.u32 %v12723_v38, 16  ;;  %v12750_v0 = vld [vmem:[#allocation2 + $0x50] sm:$0xf] }
 0x260   :  { %8311 = vmatpush1.bf16.msra.mxu0 %v10657_v25  ;;  %v1831_v23 = vsel %vm11752_vm7, %v18853_v35, %v1830_v14  ;;  %v1840_v29 = vsel %vm11752_vm7, %v1832_v45, %v1839_v31  ;;  %v1849_v46 = vrot.slane %v1847_v2, 7  ;;  %v1859_v3 = vshll.u32 %v12723_v38, 16  ;;  %18854 = vst [vmem:[#allocation26_spill] sm:$0xff] %v12750_v0  ;;  %v12752_v60 = vld [vmem:[#allocation2 + $0x54] sm:$0xf] }
 0x261   :  { %v3091_v51 = vor.u32 %v18346_v1, %v3088_v63  ;;  %v3093_v33 = vrot.slane %v3088_v63, 4  ;;  %8312 = vmatprep.subr.bf16.mxu0 %v18847_v59  ;;  %v3100_v50 = vor.u32 %v18345_v32, %v3097_v55  ;;  %v9727_v16 = vcombine.low %v1831_v23, %v1840_v29  ;;  %18855 = vst [vmem:[#allocation27_spill] sm:$0xff] %v12752_v60  ;;  %v10664_v63 = vld [vmem:[%s18265_s4 + $0x1a8] sm:$0xff]   ;;  %v10682_v7 = vld [vmem:[%s18265_s4 + $0x110] sm:$0xff]  }
 0x262   :  { %v1858_v27 = vrot.slane %v1856_v19, 7  ;;  %v12757_v22 = vrot.slane %v1847_v2, 4  ;;  %v12759_v5 = vrot.slane %v1850_v49, 5  ;;  %v12761_v52 = vrot.slane %v1856_v19, 4  ;;  %8032 = vmatpush1.bf16.msra.mxu1 %v10682_v7  ;;  %v12991_v37 = vld [vmem:[#allocation2 + $0xb4] sm:$0xf] }
 0x263   :  { %v3092_v62 = vsel %vm11752_vm7, %v18856_v54, %v3091_v51  ;;  %v3101_v25 = vsel %vm11752_vm7, %v3093_v33, %v3100_v50  ;;  %v9760_v6 = vcombine.low %v1686_v4, %v12723_v38  ;;  %v2530_v14 = vor.u32 %v12677_v17, %v12675_v56  ;;  %v1689_v4 = vld [vmem:[#allocation2 + $0x68] sm:$0xf]  ;;  %8033 = vmatprep.subr.bf16.mxu1 %v18847_v59 }
 0x264   :  { %v2532_v39 = vrot.slane %v1815_v57, 5  ;;  %8313 = vmatpush1.bf16.msra.mxu0 %v10660_v9  ;;  %v9822_v45 = vcombine.low %v3092_v62, %v3101_v25  ;;  %v18339_v31 = vshrl.u32 %v12750_v0, 16  ;;  %v18338_v2 = vshll.u32 %v12750_v0, 16  ;;  %18877 = vst [vmem:[#allocation54_spill] sm:$0xff] %v12991_v37 }
 0x265   :  { %7492 = vmatmul.mubr.bf16.gmra.mxu1 %v9727_v16  ;;  %v18334_v55 = vshrl.u32 %v12752_v60, 16  ;;  %8314 = vmatprep.subr.bf16.mxu0 %v18847_v59  ;;  %v2531_v57 = vrot.slane %v2530_v14, 4  ;;  %v18335_v17 = vshll.u32 %v12752_v60, 16  ;;  %v1852_v35 = vor.u32 %v1850_v49, %v1849_v46  ;;  %v12793_v16 = vld [vmem:[#allocation2 + $0x6c] sm:$0xf]  ;;  %v18859_v14 = vld [vmem:[#allocation42_spill] sm:$0xff] }
 0x266   :  { %7499 = vmatprep.mubr.bf16.mxu1 %v9760_v6  ;;  %v2535_v56 = vor.u32 %v12679_v13, %v2532_v39  ;;  %7772 = vmatprep.mubr.bf16.mxu0 %v9822_v45  ;;  %v3110_v23 = vrot.slane %v18339_v31, 7  ;;  %v1854_v9 = vrot.slane %v1849_v46, 4  ;;  %v1861_v51 = vor.u32 %v1859_v3, %v1858_v27  ;;  %v18858_v13 = vld [vmem:[#allocation44_spill] sm:$0xff]  ;;  %v10668_v46 = vld [vmem:[%s18265_s4 + $0x1a0] sm:$0xff]  }
 0x267   :  { %v3119_v19 = vrot.slane %v18334_v55, 7  ;;  %v2533_v29 = vsel %vm11748_vm5, %v2531_v57, %v2532_v39  ;;  %v1853_v49 = vsel %vm11752_vm7, %v18858_v13, %v1852_v35  ;;  %v1869_v54 = vshrl.u32 %v1689_v4, 16 }
 0x268   :  { %v2536_v50 = vrot.slane %v2535_v56, 4  ;;  %8315 = vmatpush1.bf16.msra.mxu0 %v10664_v63  ;;  %v3113_v27 = vor.u32 %v18338_v2, %v3110_v23  ;;  %v3115_v62 = vrot.slane %v3110_v23, 4  ;;  %v1862_v6 = vsel %vm11752_vm7, %v1854_v9, %v1861_v51  ;;  %v18860_v56 = vld [vmem:[#allocation43_spill] sm:$0xff]  ;;  %v12815_v9 = vld [vmem:[#allocation2 + $0x68] sm:$0xf] }
 0x269   :  { %v3122_v25 = vor.u32 %v18335_v17, %v3119_v19  ;;  %8316 = vmatprep.subr.bf16.mxu0 %v18847_v59  ;;  %v9728_v63 = vcombine.low %v1853_v49, %v1862_v6  ;;  %v1871_v45 = vrot.slane %v1869_v54, 7  ;;  %v1872_v7 = vshll.u32 %v1689_v4, 16  ;;  %18861 = vst [vmem:[#allocation28_spill] sm:$0xff] %v12815_v9  ;;  %v12817_v51 = vld [vmem:[#allocation2 + $0x6c] sm:$0xf] }
 0x26a   :  { %v2541_v39 = vsel %vm11748_vm5, %v2536_v50, %v18859_v14  ;;  %v3114_v35 = vsel %vm11752_vm7, %v18860_v56, %v3113_v27  ;;  %v1878_v19 = vshrl.u32 %v12793_v16, 16  ;;  %18862 = vst [vmem:[#allocation29_spill] sm:$0xff] %v12817_v51  ;;  %v1881_v50 = vshll.u32 %v12793_v16, 16 }
 0x26b   :  { %v9790_v57 = vcombine.low %v2533_v29, %v2541_v39  ;;  %v3123_v23 = vsel %vm11752_vm7, %v3115_v62, %v3122_v25  ;;  %v12820_v49 = vrot.slane %v1869_v54, 4  ;;  %v12822_v6 = vrot.slane %v1872_v7, 5  ;;  %v10672_v29 = vld [vmem:[%s18265_s4 + $0x198] sm:$0xff]  }
 0x26c   :  { %v9823_v13 = vcombine.low %v3114_v35, %v3123_v23  ;;  %8317 = vmatpush1.bf16.msra.mxu0 %v10668_v46  ;;  %v1880_v27 = vrot.slane %v1878_v19, 7  ;;  %v12827_v62 = vrot.slane %v1878_v19, 4  ;;  %v9761_v25 = vcombine.low %v1689_v4, %v12793_v16  ;;  %v12846_v19 = vld [vmem:[#allocation2 + $0x84] sm:$0xf] }
 0x26d   :  { %7773 = vmatmul.mubr.bf16.gmra.mxu0 %v9790_v57  ;;  %7500 = vmatmul.mubr.bf16.gmra.mxu1 %v9728_v63  ;;  %v2544_v14 = vor.u32 %v12717_v18, %v12712_v34  ;;  %v2546_v54 = vrot.slane %v1837_v58, 5  ;;  %v18333_v46 = vshrl.u32 %v12815_v9, 16  ;;  %v18336_v39 = vshll.u32 %v12815_v9, 16  ;;  %v1692_v57 = vld [vmem:[#allocation2 + $0x80] sm:$0xf] }
 0x26e   :  { %7780 = vmatprep.mubr.bf16.mxu0 %v9823_v13  ;;  %v18332_v56 = vshrl.u32 %v12817_v51, 16  ;;  %8318 = vmatprep.subr.bf16.mxu0 %v18847_v59  ;;  %v18337_v4 = vshll.u32 %v12817_v51, 16  ;;  %v1874_v35 = vor.u32 %v1872_v7, %v1871_v45  ;;  %v1876_v23 = vrot.slane %v1871_v45, 4  ;;  %v10676_v13 = vld [vmem:[%s18265_s4 + $0x190] sm:$0xff]  }
 0x26f   :  { %7507 = vmatprep.mubr.bf16.mxu1 %v9761_v25  ;;  %v2545_v63 = vrot.slane %v2544_v14, 4  ;;  %v2549_v34 = vor.u32 %v12719_v10, %v2546_v54  ;;  %v3132_v53 = vrot.slane %v18333_v46, 7  ;;  %v1883_v18 = vor.u32 %v1881_v50, %v1880_v27  ;;  %v18863_v10 = vld [vmem:[#allocation47_spill] sm:$0xff] }
 0x270   :  { %v3141_v58 = vrot.slane %v18332_v56, 7  ;;  %8319 = vmatpush1.bf16.msra.mxu0 %v10672_v29  ;;  %v1875_v7 = vsel %vm11752_vm7, %v18863_v10, %v1874_v35  ;;  %v1891_v25 = vshrl.u32 %v1692_v57, 16  ;;  %v1894_v14 = vshll.u32 %v1692_v57, 16  ;;  %v18864_v10 = vld [vmem:[#allocation46_spill] sm:$0xff] }
 0x271   :  { %v2547_v45 = vsel %vm11748_vm5, %v2545_v63, %v2546_v54  ;;  %8320 = vmatprep.subr.bf16.mxu0 %v18847_v59  ;;  %v2550_v56 = vrot.slane %v2549_v34, 4  ;;  %v3135_v27 = vor.u32 %v18336_v39, %v3132_v53  ;;  %v3137_v29 = vrot.slane %v3132_v53, 4  ;;  %v18865_v34 = vld [vmem:[#allocation45_spill] sm:$0xff] }
 0x272   :  { %v3144_v46 = vor.u32 %v18337_v4, %v3141_v58  ;;  %v1884_v55 = vsel %vm11752_vm7, %v1876_v23, %v1883_v18  ;;  %v1893_v54 = vrot.slane %v1891_v25, 7  ;;  %v1900_v63 = vshrl.u32 %v12846_v19, 16  ;;  %v12873_v4 = vld [vmem:[#allocation2 + $0x80] sm:$0xf]  ;;  %v12875_v23 = vld [vmem:[#allocation2 + $0x84] sm:$0xf] }
 0x273   :  { %v1903_v35 = vshll.u32 %v12846_v19, 16  ;;  %v2555_v17 = vsel %vm11748_vm5, %v2550_v56, %v18864_v10  ;;  %v3136_v39 = vsel %vm11752_vm7, %v18865_v34, %v3135_v27  ;;  %v9729_v58 = vcombine.low %v1875_v7, %v1884_v55  ;;  %18866 = vst [vmem:[#allocation30_spill] sm:$0xff] %v12873_v4  ;;  %18867 = vst [vmem:[#allocation31_spill] sm:$0xff] %v12875_v23  ;;  %v10680_v56 = vld [vmem:[%s18265_s4 + $0x188] sm:$0xff]   ;;  %v12903_v34 = vld [vmem:[#allocation2 + $0x9c] sm:$0xf] }
 0x274   :  { %v3145_v53 = vsel %vm11752_vm7, %v3137_v29, %v3144_v46  ;;  %8321 = vmatpush1.bf16.msra.mxu0 %v10676_v13  ;;  %v9791_v18 = vcombine.low %v2547_v45, %v2555_v17  ;;  %v1902_v31 = vrot.slane %v1900_v63, 7  ;;  %v12877_v11 = vrot.slane %v1891_v25, 4  ;;  %v1695_v25 = vld [vmem:[#allocation2 + $0x98] sm:$0xf] }
 0x275   :  { %v9824_v2 = vcombine.low %v3136_v39, %v3145_v53  ;;  %8322 = vmatprep.subr.bf16.mxu0 %v18847_v59  ;;  %7508 = vmatmul.mubr.bf16.gmra.mxu1 %v9729_v58  ;;  %v12883_v27 = vrot.slane %v1894_v14, 5  ;;  %v12885_v55 = vrot.slane %v1900_v63, 4  ;;  %v9762_v46 = vcombine.low %v1692_v57, %v12846_v19 }
 0x276   :  { %v2558_v17 = vor.u32 %v12759_v5, %v12757_v22  ;;  %7781 = vmatmul.mubr.bf16.gmra.mxu0 %v9791_v18  ;;  %v2560_v39 = vrot.slane %v1859_v3, 5  ;;  %v18343_v13 = vshrl.u32 %v12873_v4, 16  ;;  %v18342_v45 = vshll.u32 %v12873_v4, 16  ;;  %v1751_v4 = vld [vmem:[#allocation2 + $0x28c] sm:$0x8] }
 0x277   :  { %v18340_v7 = vshrl.u32 %v12875_v23, 16  ;;  %7788 = vmatprep.mubr.bf16.mxu0 %v9824_v2  ;;  %7515 = vmatprep.mubr.bf16.mxu1 %v9762_v46  ;;  %v18341_v63 = vshll.u32 %v12875_v23, 16  ;;  %v1896_v57 = vor.u32 %v1894_v14, %v1893_v54  ;;  %v1898_v10 = vrot.slane %v1893_v54, 4  ;;  %v10683_v2 = vld [vmem:[%s18265_s4 + $0x180] sm:$0xff]  }
 0x278   :  { %v2559_v29 = vrot.slane %v2558_v17, 4  ;;  %v2563_v22 = vor.u32 %v12761_v52, %v2560_v39  ;;  %v3154_v38 = vrot.slane %v18343_v13, 7  ;;  %v1905_v5 = vor.u32 %v1903_v35, %v1902_v31  ;;  %8323 = vmatpush1.bf16.msra.mxu0 %v10680_v56  ;;  %v18868_v52 = vld [vmem:[#allocation50_spill] sm:$0xff] }
 0x279   :  { %v3163_v3 = vrot.slane %v18340_v7, 7  ;;  %v1897_v54 = vsel %vm11752_vm7, %v18868_v52, %v1896_v57  ;;  %v1913_v53 = vshrl.u32 %v1695_v25, 16  ;;  %v1916_v58 = vshll.u32 %v1695_v25, 16  ;;  %8324 = vmatprep.subr.bf16.mxu0 %v18847_v59  ;;  %v10686_v52 = vld [vmem:[%s18265_s4 + $0x108] sm:$0xff]  }
 0x27a   :  { %v2561_v14 = vsel %vm11748_vm5, %v2559_v29, %v2560_v39  ;;  %v2564_v18 = vrot.slane %v2563_v22, 4  ;;  %v3157_v31 = vor.u32 %v18342_v45, %v3154_v38  ;;  %v3159_v56 = vrot.slane %v3154_v38, 4  ;;  %v18869_v22 = vld [vmem:[#allocation48_spill] sm:$0xff]  ;;  %v18870_v38 = vld [vmem:[#allocation49_spill] sm:$0xff]  ;;  %v12935_v45 = vld [vmem:[#allocation2 + $0x9c] sm:$0xf]  ;;  %8034 = vmatpush1.bf16.msra.mxu1 %v10686_v52 }
 0x27b   :  { %v3166_v46 = vor.u32 %v18341_v63, %v3163_v3  ;;  %v1906_v17 = vsel %vm11752_vm7, %v1898_v10, %v1905_v5  ;;  %v1915_v39 = vrot.slane %v1913_v53, 7  ;;  %v1922_v29 = vshrl.u32 %v12903_v34, 16  ;;  %v12933_v63 = vld [vmem:[#allocation2 + $0x98] sm:$0xf]  ;;  %18872 = vst [vmem:[#allocation33_spill] sm:$0xff] %v12935_v45  ;;  %8035 = vmatprep.subr.bf16.mxu1 %v18847_v59 }
 0x27c   :  { %v1925_v57 = vshll.u32 %v12903_v34, 16  ;;  %v2569_v7 = vsel %vm11748_vm5, %v2564_v18, %v18869_v22  ;;  %v3158_v3 = vsel %vm11752_vm7, %v18870_v38, %v3157_v31  ;;  %v9730_v5 = vcombine.low %v1897_v54, %v1906_v17  ;;  %18871 = vst [vmem:[#allocation32_spill] sm:$0xff] %v12933_v63  ;;  %8325 = vmatpush1.bf16.msra.mxu0 %v10683_v2  ;;  %v12961_v52 = vld [vmem:[#allocation2 + $0xb4] sm:$0xf] }
 0x27d   :  { %v3167_v10 = vsel %vm11752_vm7, %v3159_v56, %v3166_v46  ;;  %v9792_v13 = vcombine.low %v2561_v14, %v2569_v7  ;;  %v1924_v32 = vrot.slane %v1922_v29, 7  ;;  %v12937_v1 = vrot.slane %v1913_v53, 4  ;;  %8326 = vmatprep.subr.bf16.mxu0 %v18847_v59  ;;  %v1698_v46 = vld [vmem:[#allocation2 + $0xb0] sm:$0xf] }
 0x27e   :  { %v9825_v12 = vcombine.low %v3158_v3, %v3167_v10  ;;  %7516 = vmatmul.mubr.bf16.gmra.mxu1 %v9730_v5  ;;  %v12940_v18 = vrot.slane %v1916_v58, 5  ;;  %v12942_v31 = vrot.slane %v1922_v29, 4  ;;  %v9763_v54 = vcombine.low %v1695_v25, %v12903_v34  ;;  %v18873_v22 = vld [vmem:[#allocation53_spill] sm:$0xff] }
 0x27f   :  { %v2572_v56 = vor.u32 %v12822_v6, %v12820_v49  ;;  %7789 = vmatmul.mubr.bf16.gmra.mxu0 %v9792_v13  ;;  %v2574_v7 = vrot.slane %v1881_v50, 5  ;;  %v18350_v2 = vshrl.u32 %v12933_v63, 16  ;;  %v18349_v14 = vshll.u32 %v12933_v63, 16 }
 0x280   :  { %v18347_v53 = vshrl.u32 %v12935_v45, 16  ;;  %7796 = vmatprep.mubr.bf16.mxu0 %v9825_v12  ;;  %7523 = vmatprep.mubr.bf16.mxu1 %v9763_v54  ;;  %v18348_v25 = vshll.u32 %v12935_v45, 16  ;;  %v1918_v29 = vor.u32 %v1916_v58, %v1915_v39  ;;  %v1920_v49 = vrot.slane %v1915_v39, 4 }
 0x281   :  { %v2573_v17 = vrot.slane %v2572_v56, 4  ;;  %v2577_v6 = vor.u32 %v12827_v62, %v2574_v7  ;;  %v3176_v16 = vrot.slane %v18350_v2, 7  ;;  %v1927_v13 = vor.u32 %v1925_v57, %v1924_v32 }
 0x282   :  { %v3185_v50 = vrot.slane %v18347_v53, 7  ;;  %v1919_v58 = vsel %vm11752_vm7, %v18873_v22, %v1918_v29  ;;  %v1935_v39 = vshrl.u32 %v1698_v46, 16  ;;  %v1938_v62 = vshll.u32 %v1698_v46, 16  ;;  %v18874_v29 = vld [vmem:[#allocation51_spill] sm:$0xff]  ;;  %v12987_v22 = vld [vmem:[#allocation2 + $0xb0] sm:$0xf] }
 0x283   :  { %v2575_v12 = vsel %vm11748_vm5, %v2573_v17, %v2574_v7  ;;  %v2578_v38 = vrot.slane %v2577_v6, 4  ;;  %v3179_v3 = vor.u32 %v18349_v14, %v3176_v16  ;;  %v3181_v10 = vrot.slane %v3176_v16, 4  ;;  %v10688_v17 = vld [vmem:[%s18265_s4 + $0x1f8] sm:$0xff]   ;;  %v18875_v16 = vld [vmem:[#allocation52_spill] sm:$0xff]  ;;  %18876 = vst [vmem:[#allocation3_spill] sm:$0xff] %v12987_v22 }
 0x284   :  { %v3188_v5 = vor.u32 %v18348_v25, %v3185_v50  ;;  %v1928_v32 = vsel %vm11752_vm7, %v1920_v49, %v1927_v13  ;;  %v1937_v54 = vrot.slane %v1935_v39, 7  ;;  %v1944_v56 = vshrl.u32 %v12961_v52, 16  ;;  %8327 = vmatpush2.bf16.msra.mxu0 %v10688_v17  ;;  %v13022_v17 = vld [vmem:[#allocation2 + $0xcc] sm:$0xf] }
 0x285   :  { %v1947_v7 = vshll.u32 %v12961_v52, 16  ;;  %v2583_v6 = vsel %vm11748_vm5, %v2578_v38, %v18874_v29  ;;  %v3180_v50 = vsel %vm11752_vm7, %v18875_v16, %v3179_v3  ;;  %v9731_v13 = vcombine.low %v1919_v58, %v1928_v32  ;;  %8328 = vmatprep.subr.bf16.mxu0 %v18847_v59 }
 0x286   :  { %v3189_v49 = vsel %vm11752_vm7, %v3181_v10, %v3188_v5  ;;  %v9793_v53 = vcombine.low %v2575_v12, %v2583_v6  ;;  %v1946_v14 = vrot.slane %v1944_v56, 7  ;;  %v12989_v2 = vrot.slane %v1935_v39, 4 }
 0x287   :  { %v9826_v25 = vcombine.low %v3180_v50, %v3189_v49  ;;  %7524 = vmatmul.mubr.bf16.gmra.mxu1 %v9731_v13  ;;  %v12993_v38 = vrot.slane %v1938_v62, 5  ;;  %v12995_v29 = vrot.slane %v1944_v56, 4  ;;  %v9764_v3 = vcombine.low %v1698_v46, %v12961_v52 }
 0x288   :  { %v2586_v58 = vor.u32 %v12883_v27, %v12877_v11  ;;  %7797 = vmatmul.mubr.bf16.gmra.mxu0 %v9793_v53  ;;  %v2588_v12 = vrot.slane %v1903_v35, 5  ;;  %v2596_v39 = vrot.slane %v2594_v20, 5  ;;  %v9667_v10 = vrot.slane %v3191_v40, 11  ;;  %v1701_v40 = vld [vmem:[#allocation2 + $0xc8] sm:$0xf] }
 0x289   :  { %v18368_v5 = vshrl.u32 %v12987_v22, 16  ;;  %7804 = vmatprep.mubr.bf16.mxu0 %v9826_v25  ;;  %7531 = vmatprep.mubr.bf16.mxu1 %v9764_v3  ;;  %v18366_v32 = vshll.u32 %v12987_v22, 16  ;;  %v18360_v11 = vshrl.u32 %v12991_v37, 16  ;;  %v18361_v27 = vshll.u32 %v12991_v37, 16 }
 0x28a   :  { %v2587_v46 = vrot.slane %v2586_v58, 4  ;;  %v2591_v19 = vor.u32 %v12885_v55, %v2588_v12  ;;  %v9636_v28 = vrot.slane %v1930_v30, 11  ;;  %v1940_v20 = vor.u32 %v1938_v62, %v1937_v54  ;;  %v10690_v58 = vld [vmem:[%s18265_s4 + $0x100] sm:$0xff]  }
 0x28b   :  { %v3198_v48 = vrot.slane %v18368_v5, 7  ;;  %v3207_v53 = vrot.slane %v18360_v11, 7  ;;  %v1942_v25 = vrot.slane %v1937_v54, 4  ;;  %v1949_v56 = vor.u32 %v1947_v7, %v1946_v14  ;;  %8036 = vmatpush1.bf16.msra.mxu1 %v10690_v58 }
 0x28c   :  { %v2589_v35 = vsel %vm11748_vm5, %v2587_v46, %v2588_v12  ;;  %v2592_v55 = vrot.slane %v2591_v19, 4  ;;  %v1941_v30 = vsel %vm11752_vm7, %v9636_v28, %v1940_v20  ;;  %v1957_v54 = vshrl.u32 %v1701_v40, 16  ;;  %v2983_v28 = vld [vmem:[#allocation2 + $0xc4] sm:$0x8]  ;;  %v13043_v20 = vld [vmem:[#allocation2 + $0xc8] sm:$0xf]  ;;  %8037 = vmatprep.subr.bf16.mxu1 %v18847_v59 }
 0x28d   :  { %v3201_v6 = vor.u32 %v18366_v32, %v3198_v48  ;;  %v3203_v44 = vrot.slane %v3198_v48, 4  ;;  %v3210_v62 = vor.u32 %v18361_v27, %v3207_v53  ;;  %v1950_v16 = vsel %vm11752_vm7, %v1942_v25, %v1949_v56  ;;  %18878 = vst [vmem:[#allocation4_spill] sm:$0xff] %v13043_v20  ;;  %v13049_v56 = vld [vmem:[#allocation2 + $0xcc] sm:$0xf] }
 0x28e   :  { %v1960_v50 = vshll.u32 %v1701_v40, 16  ;;  %v2597_v14 = vsel %vm11748_vm5, %v2592_v55, %v2596_v39  ;;  %v9732_v13 = vcombine.low %v1941_v30, %v1950_v16  ;;  %v1966_v3 = vshrl.u32 %v13022_v17, 16  ;;  %18879 = vst [vmem:[#allocation6_spill] sm:$0xff] %v13049_v56  ;;  %v1700_v30 = vld [vmem:[#allocation2 + $0xc4] sm:$0x8] }
 0x28f   :  { %v3202_v49 = vsel %vm11752_vm7, %v9667_v10, %v3201_v6  ;;  %v9794_v12 = vcombine.low %v2589_v35, %v2597_v14  ;;  %v3211_v46 = vsel %vm11752_vm7, %v3203_v44, %v3210_v62  ;;  %v1959_v19 = vrot.slane %v1957_v54, 7 }
 0x290   :  { %v1969_v48 = vshll.u32 %v13022_v17, 16  ;;  %v9827_v39 = vcombine.low %v3202_v49, %v3211_v46  ;;  %7532 = vmatmul.mubr.bf16.gmra.mxu1 %v9732_v13  ;;  %v1968_v10 = vrot.slane %v1966_v3, 7  ;;  %v13045_v53 = vrot.slane %v1957_v54, 4  ;;  %v1704_v13 = vld [vmem:[#allocation2 + $0xe0] sm:$0xf] }
 0x291   :  { %v13047_v25 = vrot.slane %v1960_v50, 5  ;;  %7805 = vmatmul.mubr.bf16.gmra.mxu0 %v9794_v12  ;;  %v13051_v35 = vrot.slane %v1966_v3, 4  ;;  %v9765_v55 = vcombine.low %v1701_v40, %v13022_v17  ;;  %v2600_v6 = vor.u32 %v12940_v18, %v12937_v1 }
 0x292   :  { %v2602_v44 = vrot.slane %v1925_v57, 5  ;;  %7812 = vmatprep.mubr.bf16.mxu0 %v9827_v39  ;;  %v2610_v62 = vrot.slane %v2608_v36, 5  ;;  %v3213_v16 = vshrl.u32 %v2983_v28, 16  ;;  %v18356_v54 = vshrl.u32 %v13043_v20, 16 }
 0x293   :  { %v18354_v14 = vshll.u32 %v13043_v20, 16  ;;  %7539 = vmatprep.mubr.bf16.mxu1 %v9765_v55  ;;  %v2601_v40 = vrot.slane %v2600_v6, 4  ;;  %v18352_v34 = vshrl.u32 %v13049_v56, 16  ;;  %v18353_v57 = vshll.u32 %v13049_v56, 16  ;;  %v13076_v6 = vld [vmem:[#allocation2 + $0xe4] sm:$0xf] }
 0x294   :  { %v2605_v1 = vor.u32 %v12942_v31, %v2602_v44  ;;  %v9668_v18 = vrot.slane %v3213_v16, 11  ;;  %v3220_v26 = vrot.slane %v18356_v54, 7  ;;  %v1952_v36 = vshrl.u32 %v1700_v30, 16 }
 0x295   :  { %v1962_v49 = vor.u32 %v1960_v50, %v1959_v19  ;;  %v2603_v3 = vsel %vm11748_vm5, %v2601_v40, %v2602_v44  ;;  %v3229_v12 = vrot.slane %v18352_v34, 7  ;;  %v1964_v46 = vrot.slane %v1959_v19, 4 }
 0x296   :  { %v2606_v58 = vrot.slane %v2605_v1, 4  ;;  %v3223_v31 = vor.u32 %v18354_v14, %v3220_v26  ;;  %v3225_v28 = vrot.slane %v3220_v26, 4  ;;  %v9637_v39 = vrot.slane %v1952_v36, 11  ;;  %v2986_v26 = vld [vmem:[#allocation2 + $0xdc] sm:$0x8] }
 0x297   :  { %v1971_v55 = vor.u32 %v1969_v48, %v1968_v10  ;;  %v3232_v44 = vor.u32 %v18353_v57, %v3229_v12  ;;  %v1979_v30 = vshrl.u32 %v1704_v13, 16  ;;  %v1982_v16 = vshll.u32 %v1704_v13, 16  ;;  %v13122_v57 = vld [vmem:[#allocation2 + $0xfc] sm:$0xf] }
 0x298   :  { %v2611_v50 = vsel %vm11748_vm5, %v2606_v58, %v2610_v62  ;;  %v3224_v19 = vsel %vm11752_vm7, %v9668_v18, %v3223_v31  ;;  %v1963_v1 = vsel %vm11752_vm7, %v9637_v39, %v1962_v49  ;;  %v10692_v62 = vld [vmem:[%s18265_s4 + $0x1f0] sm:$0xff]   ;;  %v13094_v18 = vld [vmem:[#allocation2 + $0xe0] sm:$0xf]  ;;  %v1991_v31 = vshll.u32 %v13076_v6, 16 }
 0x299   :  { %v9795_v40 = vcombine.low %v2603_v3, %v2611_v50  ;;  %v1972_v10 = vsel %vm11752_vm7, %v1964_v46, %v1971_v55  ;;  %v3233_v36 = vsel %vm11752_vm7, %v3225_v28, %v3232_v44  ;;  %v1981_v12 = vrot.slane %v1979_v30, 7  ;;  %v2486_v50 = vld [vmem:[#allocation2 + $0xb8] sm:$0x1]  ;;  %18880 = vst [vmem:[#allocation8_spill] sm:$0xff] %v13094_v18  ;;  %v13101_v55 = vld [vmem:[#allocation2 + $0xe4] sm:$0xf]  ;;  %8329 = vmatpush2.bf16.msra.mxu0 %v10692_v62 }
 0x29a   :  { %v9733_v58 = vcombine.low %v1963_v1, %v1972_v10  ;;  %v1988_v3 = vshrl.u32 %v13076_v6, 16  ;;  %v9828_v49 = vcombine.low %v3224_v19, %v3233_v36  ;;  %v13097_v46 = vrot.slane %v1979_v30, 4  ;;  %18881 = vst [vmem:[#allocation5_spill] sm:$0xff] %v13101_v55  ;;  %v1703_v36 = vld [vmem:[#allocation2 + $0xdc] sm:$0x8]  ;;  %8330 = vmatprep.subr.bf16.mxu0 %v18847_v59 }
 0x29b   :  { %7813 = vmatmul.mubr.bf16.gmra.mxu0 %v9795_v40  ;;  %v13099_v39 = vrot.slane %v1982_v16, 5  ;;  %v9766_v44 = vcombine.low %v1704_v13, %v13076_v6  ;;  %v2614_v1 = vor.u32 %v12993_v38, %v12989_v2  ;;  %v2616_v40 = vrot.slane %v1947_v7, 5 }
 0x29c   :  { %7540 = vmatmul.mubr.bf16.gmra.mxu1 %v9733_v58  ;;  %v1990_v34 = vrot.slane %v1988_v3, 7  ;;  %v13103_v28 = vrot.slane %v1988_v3, 4  ;;  %7820 = vmatprep.mubr.bf16.mxu0 %v9828_v49  ;;  %v2622_v30 = vshll.u32 %v2486_v50, 16  ;;  %v3235_v19 = vshrl.u32 %v2986_v26, 16  ;;  %v1707_v26 = vld [vmem:[#allocation2 + $0xf8] sm:$0xf] }
 0x29d   :  { %v18355_v10 = vshrl.u32 %v13094_v18, 16  ;;  %7547 = vmatprep.mubr.bf16.mxu1 %v9766_v44  ;;  %v2615_v58 = vrot.slane %v2614_v1, 4  ;;  %v18358_v3 = vshll.u32 %v13094_v18, 16  ;;  %v18357_v13 = vshrl.u32 %v13101_v55, 16 }
 0x29e   :  { %v18359_v2 = vshll.u32 %v13101_v55, 16  ;;  %v2619_v38 = vor.u32 %v12995_v29, %v2616_v40  ;;  %v2624_v62 = vrot.slane %v2622_v30, 5  ;;  %v9669_v52 = vrot.slane %v3235_v19, 11  ;;  %v13905_v55 = vld [vmem:[#allocation2 + $0x278] sm:$0xf] }
 0x29f   :  { %v3242_v7 = vrot.slane %v18355_v10, 7  ;;  %v2617_v50 = vsel %vm11748_vm5, %v2615_v58, %v2616_v40  ;;  %v3251_v49 = vrot.slane %v18357_v13, 7  ;;  %v1974_v44 = vshrl.u32 %v1703_v36, 16 }
 0x2a0   :  { %v1984_v1 = vor.u32 %v1982_v16, %v1981_v12  ;;  %v2620_v14 = vrot.slane %v2619_v38, 4  ;;  %v1986_v19 = vrot.slane %v1981_v12, 4  ;;  %v1993_v40 = vor.u32 %v1991_v31, %v1990_v34 }
 0x2a1   :  { %v3245_v29 = vor.u32 %v18358_v3, %v3242_v7  ;;  %v3247_v30 = vrot.slane %v3242_v7, 4  ;;  %v3254_v10 = vor.u32 %v18359_v2, %v3251_v49  ;;  %v9638_v54 = vrot.slane %v1974_v44, 11  ;;  %v2487_v49 = vld [vmem:[#allocation2 + $0xd0] sm:$0x1]  ;;  %v2989_v44 = vld [vmem:[#allocation2 + $0xf4] sm:$0x8] }
 0x2a2   :  { %v2001_v58 = vshrl.u32 %v1707_v26, 16  ;;  %v2625_v36 = vsel %vm11748_vm5, %v2620_v14, %v2624_v62  ;;  %v2004_v38 = vshll.u32 %v1707_v26, 16  ;;  %v2010_v13 = vshrl.u32 %v13122_v57, 16  ;;  %v10694_v14 = vld [vmem:[%s18265_s4 + $0x178] sm:$0xff]  }
 0x2a3   :  { %v3246_v16 = vsel %vm11752_vm7, %v9669_v52, %v3245_v29  ;;  %v9796_v3 = vcombine.low %v2617_v50, %v2625_v36  ;;  %v3255_v12 = vsel %vm11752_vm7, %v3247_v30, %v3254_v10  ;;  %v1985_v7 = vsel %vm11752_vm7, %v9638_v54, %v1984_v1  ;;  %v13144_v50 = vld [vmem:[#allocation2 + $0xf8] sm:$0xf]  ;;  %v13146_v36 = vld [vmem:[#allocation2 + $0xfc] sm:$0xf]  ;;  %8038 = vmatpush2.bf16.msra.mxu1 %v10694_v14 }
 0x2a4   :  { %v1994_v34 = vsel %vm11752_vm7, %v1986_v19, %v1993_v40  ;;  %v9829_v62 = vcombine.low %v3246_v16, %v3255_v12  ;;  %v2003_v29 = vrot.slane %v2001_v58, 7  ;;  %v2012_v2 = vrot.slane %v2010_v13, 7  ;;  %18882 = vst [vmem:[#allocation7_spill] sm:$0xff] %v13144_v50  ;;  %18883 = vst [vmem:[#allocation10_spill] sm:$0xff] %v13146_v36  ;;  %v1706_v12 = vld [vmem:[#allocation2 + $0xf4] sm:$0x8]  ;;  %8039 = vmatprep.subr.bf16.mxu1 %v18847_v59 }
 0x2a5   :  { %v9734_v52 = vcombine.low %v1985_v7, %v1994_v34  ;;  %7821 = vmatmul.mubr.bf16.gmra.mxu0 %v9796_v3  ;;  %v2013_v54 = vshll.u32 %v13122_v57, 16  ;;  %v13149_v10 = vrot.slane %v2001_v58, 4  ;;  %v13151_v1 = vrot.slane %v2004_v38, 5 }
 0x2a6   :  { %v13153_v30 = vrot.slane %v2010_v13, 4  ;;  %7828 = vmatprep.mubr.bf16.mxu0 %v9829_v62  ;;  %v9767_v19 = vcombine.low %v1707_v26, %v13122_v57  ;;  %v2628_v40 = vor.u32 %v13047_v25, %v13045_v53  ;;  %v2630_v16 = vrot.slane %v1969_v48, 5 }
 0x2a7   :  { %7548 = vmatmul.mubr.bf16.gmra.mxu1 %v9734_v52  ;;  %v2636_v3 = vshll.u32 %v2487_v49, 16  ;;  %v3257_v7 = vshrl.u32 %v2989_v44, 16  ;;  %v18362_v58 = vshrl.u32 %v13144_v50, 16  ;;  %v18365_v34 = vshll.u32 %v13144_v50, 16  ;;  %v1710_v44 = vld [vmem:[#allocation2 + $0x110] sm:$0xf] }
 0x2a8   :  { %v18363_v13 = vshrl.u32 %v13146_v36, 16  ;;  %7555 = vmatprep.mubr.bf16.mxu1 %v9767_v19  ;;  %v2629_v14 = vrot.slane %v2628_v40, 4  ;;  %v2633_v26 = vor.u32 %v13051_v35, %v2630_v16  ;;  %v18364_v53 = vshll.u32 %v13146_v36, 16 }
 0x2a9   :  { %v2638_v62 = vrot.slane %v2636_v3, 5  ;;  %v9670_v17 = vrot.slane %v3257_v7, 11  ;;  %v3264_v48 = vrot.slane %v18362_v58, 7  ;;  %v1996_v49 = vshrl.u32 %v1706_v12, 16  ;;  %v13176_v58 = vld [vmem:[#allocation2 + $0x114] sm:$0xf] }
 0x2aa   :  { %v3273_v25 = vrot.slane %v18363_v13, 7  ;;  %v2631_v52 = vsel %vm11748_vm5, %v2629_v14, %v2630_v16  ;;  %v2634_v11 = vrot.slane %v2633_v26, 4  ;;  %v2006_v19 = vor.u32 %v2004_v38, %v2003_v29 }
 0x2ab   :  { %v2008_v40 = vrot.slane %v2003_v29, 4  ;;  %v3267_v35 = vor.u32 %v18365_v34, %v3264_v48  ;;  %v3269_v3 = vrot.slane %v3264_v48, 4  ;;  %v9639_v27 = vrot.slane %v1996_v49, 11  ;;  %v13224_v34 = vld [vmem:[#allocation2 + $0x12c] sm:$0xf] }
 0x2ac   :  { %v3276_v7 = vor.u32 %v18364_v53, %v3273_v25  ;;  %v2639_v12 = vsel %vm11748_vm5, %v2634_v11, %v2638_v62  ;;  %v2015_v13 = vor.u32 %v2013_v54, %v2012_v2  ;;  %v2023_v16 = vshrl.u32 %v1710_v44, 16  ;;  %v2992_v25 = vld [vmem:[#allocation2 + $0x10c] sm:$0x8] }
 0x2ad   :  { %v2026_v14 = vshll.u32 %v1710_v44, 16  ;;  %v9797_v38 = vcombine.low %v2631_v52, %v2639_v12  ;;  %v3268_v29 = vsel %vm11752_vm7, %v9670_v17, %v3267_v35  ;;  %v2007_v48 = vsel %vm11752_vm7, %v9639_v27, %v2006_v19  ;;  %v10696_v11 = vld [vmem:[%s18265_s4 + $0x1e8] sm:$0xff]   ;;  %v13194_v17 = vld [vmem:[#allocation2 + $0x110] sm:$0xf] }
 0x2ae   :  { %v3277_v26 = vsel %vm11752_vm7, %v3269_v3, %v3276_v7  ;;  %v2016_v2 = vsel %vm11752_vm7, %v2008_v40, %v2015_v13  ;;  %v2025_v49 = vrot.slane %v2023_v16, 7  ;;  %v2032_v52 = vshrl.u32 %v13176_v58, 16  ;;  %v2488_v12 = vld [vmem:[#allocation2 + $0xe8] sm:$0x1]  ;;  %18884 = vst [vmem:[#allocation12_spill] sm:$0xff] %v13194_v17  ;;  %8331 = vmatpush2.bf16.msra.mxu0 %v10696_v11 }
 0x2af   :  { %v9830_v62 = vcombine.low %v3268_v29, %v3277_v26  ;;  %7829 = vmatmul.mubr.bf16.gmra.mxu0 %v9797_v38  ;;  %v9735_v35 = vcombine.low %v2007_v48, %v2016_v2  ;;  %v2035_v3 = vshll.u32 %v13176_v58, 16  ;;  %v13197_v27 = vrot.slane %v2023_v16, 4  ;;  %v13201_v7 = vld [vmem:[#allocation2 + $0x114] sm:$0xf]  ;;  %v1709_v53 = vld [vmem:[#allocation2 + $0x10c] sm:$0x8]  ;;  %8332 = vmatprep.subr.bf16.mxu0 %v18847_v59 }
 0x2b0   :  { %v13199_v19 = vrot.slane %v2026_v14, 5  ;;  %18885 = vst [vmem:[#allocation18_spill] sm:$0xff] %v13201_v7  ;;  %v2034_v29 = vrot.slane %v2032_v52, 7  ;;  %v13203_v26 = vrot.slane %v2032_v52, 4  ;;  %v9768_v13 = vcombine.low %v1710_v44, %v13176_v58 }
 0x2b1   :  { %7836 = vmatprep.mubr.bf16.mxu0 %v9830_v62  ;;  %v2642_v40 = vor.u32 %v13099_v39, %v13097_v46  ;;  %7556 = vmatmul.mubr.bf16.gmra.mxu1 %v9735_v35  ;;  %v2644_v38 = vrot.slane %v1991_v31, 5  ;;  %v2650_v16 = vshll.u32 %v2488_v12, 16  ;;  %v3279_v48 = vshrl.u32 %v2992_v25, 16  ;;  %v13218_v25 = vld [vmem:[#allocation2 + $0x128] sm:$0xf] }
 0x2b2   :  { %v18367_v2 = vshrl.u32 %v13194_v17, 16  ;;  %7563 = vmatprep.mubr.bf16.mxu1 %v9768_v13  ;;  %v18371_v52 = vshll.u32 %v13194_v17, 16  ;;  %v18369_v44 = vshrl.u32 %v13201_v7, 16  ;;  %v18370_v46 = vshll.u32 %v13201_v7, 16  ;;  %v1742_v7 = vld [vmem:[#allocation2 + $0x244] sm:$0x8] }
 0x2b3   :  { %v2643_v62 = vrot.slane %v2642_v40, 4  ;;  %v2647_v39 = vor.u32 %v13103_v28, %v2644_v38  ;;  %v2652_v11 = vrot.slane %v2650_v16, 5  ;;  %v9671_v6 = vrot.slane %v3279_v48, 11 }
 0x2b4   :  { %v3286_v31 = vrot.slane %v18367_v2, 7  ;;  %v3295_v35 = vrot.slane %v18369_v44, 7  ;;  %v2018_v13 = vshrl.u32 %v1709_v53, 16  ;;  %v2028_v40 = vor.u32 %v2026_v14, %v2025_v49  ;;  %v2489_v44 = vld [vmem:[#allocation2 + $0x100] sm:$0x1] }
 0x2b5   :  { %v2645_v12 = vsel %vm11748_vm5, %v2643_v62, %v2644_v38  ;;  %v2648_v32 = vrot.slane %v2647_v39, 4  ;;  %v2030_v48 = vrot.slane %v2025_v49, 4  ;;  %v2037_v38 = vor.u32 %v2035_v3, %v2034_v29 }
 0x2b6   :  { %v3289_v28 = vor.u32 %v18371_v52, %v3286_v31  ;;  %v3291_v16 = vrot.slane %v3286_v31, 4  ;;  %v3298_v2 = vor.u32 %v18370_v46, %v3295_v35  ;;  %v9640_v5 = vrot.slane %v2018_v13, 11  ;;  %v2995_v52 = vld [vmem:[#allocation2 + $0x124] sm:$0x8] }
 0x2b7   :  { %v2045_v62 = vshrl.u32 %v13218_v25, 16  ;;  %v2653_v53 = vsel %vm11748_vm5, %v2648_v32, %v2652_v11  ;;  %v2048_v39 = vshll.u32 %v13218_v25, 16  ;;  %v2054_v31 = vshrl.u32 %v13224_v34, 16  ;;  %v10698_v32 = vld [vmem:[%s18265_s4 + $0x170] sm:$0xff]  }
 0x2b8   :  { %v3290_v14 = vsel %vm11752_vm7, %v9671_v6, %v3289_v28  ;;  %v9798_v49 = vcombine.low %v2645_v12, %v2653_v53  ;;  %v3299_v35 = vsel %vm11752_vm7, %v3291_v16, %v3298_v2  ;;  %v2029_v13 = vsel %vm11752_vm7, %v9640_v5, %v2028_v40  ;;  %v13248_v12 = vld [vmem:[#allocation2 + $0x128] sm:$0xf]  ;;  %8040 = vmatpush2.bf16.msra.mxu1 %v10698_v32 }
 0x2b9   :  { %v2038_v29 = vsel %vm11752_vm7, %v2030_v48, %v2037_v38  ;;  %v9831_v11 = vcombine.low %v3290_v14, %v3299_v35  ;;  %v2047_v28 = vrot.slane %v2045_v62, 7  ;;  %v2056_v46 = vrot.slane %v2054_v31, 7  ;;  %18886 = vst [vmem:[#allocation19_spill] sm:$0xff] %v13248_v12  ;;  %8041 = vmatprep.subr.bf16.mxu1 %v18847_v59 }
 0x2ba   :  { %v9736_v6 = vcombine.low %v2029_v13, %v2038_v29  ;;  %7837 = vmatmul.mubr.bf16.gmra.mxu0 %v9798_v49  ;;  %v2057_v2 = vshll.u32 %v13224_v34, 16  ;;  %v13251_v16 = vrot.slane %v2045_v62, 4  ;;  %v13253_v5 = vrot.slane %v2048_v39, 5  ;;  %v13263_v49 = vld [vmem:[#allocation2 + $0x12c] sm:$0xf] }
 0x2bb   :  { %v13255_v40 = vrot.slane %v2054_v31, 4  ;;  %7844 = vmatprep.mubr.bf16.mxu0 %v9831_v11  ;;  %v9769_v48 = vcombine.low %v13218_v25, %v13224_v34  ;;  %v2656_v38 = vor.u32 %v13151_v1, %v13149_v10  ;;  %v2658_v53 = vrot.slane %v2013_v54, 5  ;;  %18887 = vst [vmem:[#allocation16_spill] sm:$0xff] %v13263_v49  ;;  %v1712_v29 = vld [vmem:[#allocation2 + $0x124] sm:$0x8] }
 0x2bc   :  { %7564 = vmatmul.mubr.bf16.gmra.mxu1 %v9736_v6  ;;  %v2664_v14 = vshll.u32 %v2489_v44, 16  ;;  %v13267_v31 = vrot.slane %v2057_v2, 5  ;;  %v3301_v35 = vshrl.u32 %v2995_v52, 16  ;;  %v18373_v13 = vshrl.u32 %v13248_v12, 16 }
 0x2bd   :  { %7571 = vmatprep.mubr.bf16.mxu1 %v9769_v48  ;;  %v2657_v34 = vrot.slane %v2656_v38, 4  ;;  %v2661_v10 = vor.u32 %v13153_v30, %v2658_v53  ;;  %v18376_v54 = vshll.u32 %v13248_v12, 16  ;;  %v18377_v52 = vshrl.u32 %v13263_v49, 16  ;;  %v13281_v30 = vld [vmem:[#allocation2 + $0x140] sm:$0xf] }
 0x2be   :  { %v2666_v57 = vrot.slane %v2664_v14, 5  ;;  %v9672_v44 = vrot.slane %v3301_v35, 11  ;;  %v3308_v25 = vrot.slane %v18373_v13, 7  ;;  %v18378_v6 = vshll.u32 %v13263_v49, 16  ;;  %v13287_v13 = vld [vmem:[#allocation2 + $0x144] sm:$0xf] }
 0x2bf   :  { %v2659_v32 = vsel %vm11748_vm5, %v2657_v34, %v2658_v53  ;;  %v2662_v11 = vrot.slane %v2661_v10, 4  ;;  %v2040_v48 = vshrl.u32 %v1712_v29, 16  ;;  %v3317_v35 = vrot.slane %v18377_v52, 7 }
 0x2c0   :  { %v3311_v38 = vor.u32 %v18376_v54, %v3308_v25  ;;  %v3313_v14 = vrot.slane %v3308_v25, 4  ;;  %v2050_v41 = vor.u32 %v2048_v39, %v2047_v28  ;;  %v2052_v34 = vrot.slane %v2047_v28, 4  ;;  %v10700_v39 = vld [vmem:[%s18265_s4 + $0x1e0] sm:$0xff]  }
 0x2c1   :  { %v2667_v15 = vsel %vm11748_vm5, %v2662_v11, %v2666_v57  ;;  %v9641_v53 = vrot.slane %v2040_v48, 11  ;;  %v2059_v10 = vor.u32 %v2057_v2, %v2056_v46  ;;  %v3320_v54 = vor.u32 %v18378_v6, %v3317_v35  ;;  %v2490_v11 = vld [vmem:[#allocation2 + $0x118] sm:$0x1]  ;;  %v2998_v48 = vld [vmem:[#allocation2 + $0x13c] sm:$0x8]  ;;  %8333 = vmatpush2.bf16.msra.mxu0 %v10700_v39 }
 0x2c2   :  { %v9799_v47 = vcombine.low %v2659_v32, %v2667_v15  ;;  %v3312_v29 = vsel %vm11752_vm7, %v9672_v44, %v3311_v38  ;;  %v2067_v25 = vshrl.u32 %v13281_v30, 16  ;;  %v2070_v15 = vshll.u32 %v13281_v30, 16  ;;  %8334 = vmatprep.subr.bf16.mxu0 %v18847_v59 }
 0x2c3   :  { %v2051_v52 = vsel %vm11752_vm7, %v9641_v53, %v2050_v41  ;;  %v2060_v28 = vsel %vm11752_vm7, %v2052_v34, %v2059_v10  ;;  %v2076_v46 = vshrl.u32 %v13287_v13, 16  ;;  %v3321_v2 = vsel %vm11752_vm7, %v3313_v14, %v3320_v54  ;;  %v13312_v34 = vld [vmem:[#allocation2 + $0x140] sm:$0xf]  ;;  %v13322_v14 = vld [vmem:[#allocation2 + $0x144] sm:$0xf] }
 0x2c4   :  { %7845 = vmatmul.mubr.bf16.gmra.mxu0 %v9799_v47  ;;  %v9737_v57 = vcombine.low %v2051_v52, %v2060_v28  ;;  %v2069_v44 = vrot.slane %v2067_v25, 7  ;;  %v2079_v32 = vshll.u32 %v13287_v13, 16  ;;  %v9832_v38 = vcombine.low %v3312_v29, %v3321_v2  ;;  %18888 = vst [vmem:[#allocation20_spill] sm:$0xff] %v13312_v34  ;;  %18889 = vst [vmem:[#allocation21_spill] sm:$0xff] %v13322_v14  ;;  %v13324_v29 = vpop.f32.mrf.mxu1  ;;  %v1715_v2 = vld [vmem:[#allocation2 + $0x13c] sm:$0x8] }
 0x2c5   :  { %v2078_v35 = vrot.slane %v2076_v46, 7  ;;  %v13308_v41 = vrot.slane %v2067_v25, 4  ;;  %v13310_v53 = vrot.slane %v2070_v15, 5  ;;  %v13316_v10 = vrot.slane %v2076_v46, 4 }
 0x2c6   :  { %7572 = vmatmul.mubr.bf16.gmra.mxu1 %v9737_v57  ;;  %v13314_v47 = vrot.slane %v2079_v32, 5  ;;  %v9770_v54 = vcombine.low %v13281_v30, %v13287_v13  ;;  %v2670_v52 = vor.u32 %v13199_v19, %v13197_v27  ;;  %7852 = vmatprep.mubr.bf16.mxu0 %v9832_v38  ;;  %v2672_v39 = vrot.slane %v2035_v3, 5  ;;  %v7479_v57 = vpop.f32.mrf.mxu1 }
 0x2c7   :  { %v2678_v28 = vshll.u32 %v2490_v11, 16  ;;  %v3323_v46 = vshrl.u32 %v2998_v48, 16  ;;  %v18380_v19 = vshrl.u32 %v13312_v34, 16  ;;  %v18383_v30 = vshll.u32 %v13312_v34, 16 }
 0x2c8   :  { %7579 = vmatprep.mubr.bf16.mxu1 %v9770_v54  ;;  %v2671_v27 = vrot.slane %v2670_v52, 4  ;;  %v2675_v38 = vor.u32 %v13203_v26, %v2672_v39  ;;  %v18381_v58 = vshrl.u32 %v13322_v14, 16  ;;  %v18382_v48 = vshll.u32 %v13322_v14, 16  ;;  %v1719_v52 = vld [vmem:[#allocation2 + $0x158] sm:$0xf] }
 0x2c9   :  { %v2680_v6 = vrot.slane %v2678_v28, 5  ;;  %v9673_v43 = vrot.slane %v3323_v46, 11  ;;  %v3330_v11 = vrot.slane %v18380_v19, 7  ;;  %v2062_v54 = vshrl.u32 %v1715_v2, 16 }
 0x2ca   :  { %v2673_v3 = vsel %vm11748_vm5, %v2671_v27, %v2672_v39  ;;  %v2676_v13 = vrot.slane %v2675_v38, 4  ;;  %v3339_v57 = vrot.slane %v18381_v58, 7  ;;  %v2072_v25 = vor.u32 %v2070_v15, %v2069_v44  ;;  %v1720_v39 = vld [vmem:[#allocation2 + $0x15c] sm:$0xf]  ;;  %v10702_v15 = vld [vmem:[%s18265_s4 + $0x168] sm:$0xff]  }
 0x2cb   :  { %v2074_v26 = vrot.slane %v2069_v44, 4  ;;  %v3333_v28 = vor.u32 %v18383_v30, %v3330_v11  ;;  %v3335_v46 = vrot.slane %v3330_v11, 4  ;;  %v9642_v1 = vrot.slane %v2062_v54, 11  ;;  %8042 = vmatpush2.bf16.msra.mxu1 %v10702_v15 }
 0x2cc   :  { %v2081_v62 = vor.u32 %v2079_v32, %v2078_v35  ;;  %v2681_v27 = vsel %vm11748_vm5, %v2676_v13, %v2680_v6  ;;  %v3342_v2 = vor.u32 %v18382_v48, %v3339_v57  ;;  %v2089_v19 = vshrl.u32 %v1719_v52, 16  ;;  %v2491_v57 = vld [vmem:[#allocation2 + $0x130] sm:$0x1]  ;;  %v3001_v48 = vld [vmem:[#allocation2 + $0x154] sm:$0x8]  ;;  %8043 = vmatprep.subr.bf16.mxu1 %v18847_v59 }
 0x2cd   :  { %v2092_v38 = vshll.u32 %v1719_v52, 16  ;;  %v9800_v44 = vcombine.low %v2673_v3, %v2681_v27  ;;  %v3334_v58 = vsel %vm11752_vm7, %v9673_v43, %v3333_v28  ;;  %v2073_v32 = vsel %vm11752_vm7, %v9642_v1, %v2072_v25  ;;  %v13365_v1 = vld [vmem:[#allocation2 + $0x158] sm:$0xf]  ;;  %v13367_v25 = vpop.f32.mrf.mxu1 }
 0x2ce   :  { %v2082_v35 = vsel %vm11752_vm7, %v2074_v26, %v2081_v62  ;;  %v3343_v6 = vsel %vm11752_vm7, %v3335_v46, %v3342_v2  ;;  %v2091_v11 = vrot.slane %v2089_v19, 7  ;;  %v2098_v54 = vshrl.u32 %v1720_v39, 16  ;;  %18890 = vst [vmem:[#allocation22_spill] sm:$0xff] %v13365_v1  ;;  %v13375_v2 = vld [vmem:[#allocation2 + $0x15c] sm:$0xf] }
 0x2cf   :  { %v9738_v13 = vcombine.low %v2073_v32, %v2082_v35  ;;  %7853 = vmatmul.mubr.bf16.gmra.mxu0 %v9800_v44  ;;  %v9833_v3 = vcombine.low %v3334_v58, %v3343_v6  ;;  %v2101_v27 = vshll.u32 %v1720_v39, 16  ;;  %v13361_v30 = vrot.slane %v2089_v19, 4  ;;  %18892 = vst [vmem:[#allocation17_spill] sm:$0xff] %v13375_v2  ;;  %v1718_v6 = vld [vmem:[#allocation2 + $0x154] sm:$0x8] }
 0x2d0   :  { %v13363_v43 = vrot.slane %v2092_v38, 5  ;;  %v2100_v62 = vrot.slane %v2098_v54, 7  ;;  %v13370_v26 = vrot.slane %v2098_v54, 4  ;;  %v9771_v28 = vcombine.low %v1719_v52, %v1720_v39 }
 0x2d1   :  { %7580 = vmatmul.mubr.bf16.gmra.mxu1 %v9738_v13  ;;  %v18891_v46 = vor.u32 %v13253_v5, %v13251_v16  ;;  %7860 = vmatprep.mubr.bf16.mxu0 %v9833_v3  ;;  %v13379_v15 = vrot.slane %v2101_v27, 5  ;;  %v18893_v44 = vor.u32 %v13255_v40, %v13267_v31  ;;  %v2692_v35 = vshll.u32 %v2491_v57, 16  ;;  %v7482_v13 = vpop.f32.mrf.mxu1 }
 0x2d2   :  { %7587 = vmatprep.mubr.bf16.mxu1 %v9771_v28  ;;  %v3345_v5 = vshrl.u32 %v3001_v48, 16  ;;  %v18388_v52 = vshrl.u32 %v13365_v1, 16  ;;  %v18389_v40 = vshrl.u32 %v13375_v2, 16  ;;  %v2094_v13 = vor.u32 %v2092_v38, %v2091_v11  ;;  %v10704_v38 = vld [vmem:[%s18265_s4 + $0x1d8] sm:$0xff]  }
 0x2d3   :  { %v2685_v58 = vrot.slane %v18891_v46, 4  ;;  %v2690_v32 = vrot.slane %v18893_v44, 4  ;;  %v2694_v3 = vrot.slane %v2692_v35, 5  ;;  %v2084_v44 = vshrl.u32 %v1718_v6, 16  ;;  %v1723_v35 = vld [vmem:[#allocation2 + $0x174] sm:$0xf]  ;;  %8335 = vmatpush2.bf16.msra.mxu0 %v10704_v38 }
 0x2d4   :  { %v9674_v46 = vrot.slane %v3345_v5, 11  ;;  %v3352_v28 = vrot.slane %v18388_v52, 7  ;;  %v2096_v19 = vrot.slane %v2091_v11, 4  ;;  %v2103_v54 = vor.u32 %v2101_v27, %v2100_v62  ;;  %8336 = vmatprep.subr.bf16.mxu0 %v18847_v59 }
 0x2d5   :  { %v2687_v16 = vsel %vm11748_vm5, %v2685_v58, %v13267_v31  ;;  %v1722_v31 = vld [vmem:[#allocation2 + $0x170] sm:$0xf]  ;;  %v2695_v48 = vsel %vm11748_vm5, %v2690_v32, %v2694_v3  ;;  %v3361_v58 = vrot.slane %v18389_v40, 7  ;;  %v18894_v14 = vshll.u32 %v13365_v1, 16 }
 0x2d6   :  { %v9801_v39 = vcombine.low %v2687_v16, %v2695_v48  ;;  %v3357_v5 = vrot.slane %v3352_v28, 4  ;;  %v9643_v34 = vrot.slane %v2084_v44, 11  ;;  %v18895_v6 = vshll.u32 %v13375_v2, 16 }
 0x2d7   :  { %v3355_v57 = vor.u32 %v18894_v14, %v3352_v28  ;;  %v2104_v32 = vsel %vm11752_vm7, %v2096_v19, %v2103_v54  ;;  %v2111_v3 = vshrl.u32 %v1722_v31, 16  ;;  %v2114_v11 = vshll.u32 %v1722_v31, 16  ;;  %v2492_v28 = vld [vmem:[#allocation2 + $0x148] sm:$0x1]  ;;  %v3004_v19 = vld [vmem:[#allocation2 + $0x16c] sm:$0x8] }
 0x2d8   :  { %v3364_v52 = vor.u32 %v18895_v6, %v3361_v58  ;;  %7861 = vmatmul.mubr.bf16.gmra.mxu0 %v9801_v39  ;;  %v2095_v14 = vsel %vm11752_vm7, %v9643_v34, %v2094_v13  ;;  %v2120_v62 = vshrl.u32 %v1723_v35, 16  ;;  %v2123_v16 = vshll.u32 %v1723_v35, 16  ;;  %v13416_v54 = vld [vmem:[#allocation2 + $0x170] sm:$0xf]  ;;  %v13422_v34 = vld [vmem:[#allocation2 + $0x174] sm:$0xf] }
 0x2d9   :  { %v3356_v27 = vsel %vm11752_vm7, %v9674_v46, %v3355_v57  ;;  %v9739_v48 = vcombine.low %v2095_v14, %v2104_v32  ;;  %v2113_v58 = vrot.slane %v2111_v3, 7  ;;  %v13414_v6 = vrot.slane %v2111_v3, 4  ;;  %18896 = vst [vmem:[#allocation23_spill] sm:$0xff] %v13416_v54  ;;  %18897 = vst [vmem:[#allocation24_spill] sm:$0xff] %v13422_v34 }
 0x2da   :  { %v3365_v44 = vsel %vm11752_vm7, %v3357_v5, %v3364_v52  ;;  %v2122_v40 = vrot.slane %v2120_v62, 7  ;;  %v13418_v57 = vrot.slane %v2114_v11, 5  ;;  %v13420_v46 = vrot.slane %v2123_v16, 5 }
 0x2db   :  { %v9834_v39 = vcombine.low %v3356_v27, %v3365_v44  ;;  %7588 = vmatmul.mubr.bf16.gmra.mxu1 %v9739_v48  ;;  %v13425_v52 = vrot.slane %v2120_v62, 4  ;;  %v9772_v13 = vcombine.low %v1722_v31, %v1723_v35  ;;  %v18898_v5 = vor.u32 %v13310_v53, %v13308_v41  ;;  %v1721_v48 = vld [vmem:[#allocation2 + $0x16c] sm:$0x8]  ;;  %v2493_v31 = vld [vmem:[#allocation2 + $0x160] sm:$0x1] }
 0x2dc   :  { %v18899_v38 = vor.u32 %v13316_v10, %v13314_v47  ;;  %v2706_v14 = vshll.u32 %v2492_v28, 16  ;;  %v3367_v44 = vshrl.u32 %v3004_v19, 16  ;;  %v18394_v2 = vshrl.u32 %v13416_v54, 16  ;;  %v3007_v27 = vld [vmem:[#allocation2 + $0x184] sm:$0x8] }
 0x2dd   :  { %v2699_v32 = vrot.slane %v18898_v5, 4  ;;  %7868 = vmatprep.mubr.bf16.mxu0 %v9834_v39  ;;  %7595 = vmatprep.mubr.bf16.mxu1 %v9772_v13  ;;  %v18403_v53 = vshll.u32 %v13416_v54, 16  ;;  %v18401_v10 = vshrl.u32 %v13422_v34, 16  ;;  %v18402_v19 = vshll.u32 %v13422_v34, 16 }
 0x2de   :  { %v2704_v3 = vrot.slane %v18899_v38, 4  ;;  %v2708_v35 = vrot.slane %v2706_v14, 5  ;;  %v9675_v62 = vrot.slane %v3367_v44, 11  ;;  %v3374_v28 = vrot.slane %v18394_v2, 7 }
 0x2df   :  { %v2701_v41 = vsel %vm11748_vm5, %v2699_v32, %v13314_v47  ;;  %v3383_v39 = vrot.slane %v18401_v10, 7  ;;  %v2106_v5 = vshrl.u32 %v1721_v48, 16  ;;  %v2116_v13 = vor.u32 %v2114_v11, %v2113_v58 }
 0x2e0   :  { %v2118_v38 = vrot.slane %v2113_v58, 4  ;;  %v2709_v47 = vsel %vm11748_vm5, %v2704_v3, %v2708_v35  ;;  %v3377_v32 = vor.u32 %v18403_v53, %v3374_v28  ;;  %v3379_v14 = vrot.slane %v3374_v28, 4  ;;  %v13457_v58 = vld [vmem:[#allocation2 + $0x188] sm:$0xf]  ;;  %v10706_v3 = vld [vmem:[%s18265_s4 + $0x160] sm:$0xff]  }
 0x2e1   :  { %v2125_v44 = vor.u32 %v2123_v16, %v2122_v40  ;;  %v9802_v1 = vcombine.low %v2701_v41, %v2709_v47  ;;  %v3386_v2 = vor.u32 %v18402_v19, %v3383_v39  ;;  %v9644_v49 = vrot.slane %v2106_v5, 11  ;;  %18901 = vst [vmem:[#allocation25_spill] sm:$0xff] %v13457_v58  ;;  %v13469_v39 = vld [vmem:[#allocation2 + $0x18c] sm:$0xf]  ;;  %8044 = vmatpush2.bf16.msra.mxu1 %v10706_v3 }
 0x2e2   :  { %v18900_v48 = vor.u32 %v13363_v43, %v13361_v30  ;;  %v3378_v35 = vsel %vm11752_vm7, %v9675_v62, %v3377_v32  ;;  %v18902_v16 = vor.u32 %v13370_v26, %v13379_v15  ;;  %v2720_v28 = vshll.u32 %v2493_v31, 16  ;;  %18903 = vst [vmem:[#allocation9_spill] sm:$0xff] %v13469_v39  ;;  %8045 = vmatprep.subr.bf16.mxu1 %v18847_v59 }
 0x2e3   :  { %v2126_v40 = vsel %vm11752_vm7, %v2118_v38, %v2125_v44  ;;  %7869 = vmatmul.mubr.bf16.gmra.mxu0 %v9802_v1  ;;  %v3387_v30 = vsel %vm11752_vm7, %v3379_v14, %v3386_v2  ;;  %v2117_v43 = vsel %vm11752_vm7, %v9644_v49, %v2116_v13  ;;  %v3389_v5 = vshrl.u32 %v3007_v27, 16  ;;  %v1725_v38 = vld [vmem:[#allocation2 + $0x1b8] sm:$0xf]  ;;  %v1726_v44 = vld [vmem:[#allocation2 + $0x1bc] sm:$0xf] }
 0x2e4   :  { %v2713_v11 = vrot.slane %v18900_v48, 4  ;;  %v2718_v41 = vrot.slane %v18902_v16, 4  ;;  %v9835_v47 = vcombine.low %v3378_v35, %v3387_v30  ;;  %v9740_v26 = vcombine.low %v2117_v43, %v2126_v40  ;;  %v1724_v16 = vld [vmem:[#allocation2 + $0x1b4] sm:$0x8] }
 0x2e5   :  { %v2722_v32 = vrot.slane %v2720_v28, 5  ;;  %v18398_v31 = vshrl.u32 %v13457_v58, 16  ;;  %v9676_v1 = vrot.slane %v3389_v5, 11  ;;  %v18399_v2 = vshll.u32 %v13457_v58, 16 }
 0x2e6   :  { %v2715_v62 = vsel %vm11748_vm5, %v2713_v11, %v13379_v15  ;;  %v18397_v49 = vshrl.u32 %v13469_v39, 16  ;;  %v18400_v13 = vshll.u32 %v13469_v39, 16  ;;  %7876 = vmatprep.mubr.bf16.mxu0 %v9835_v47  ;;  %7596 = vmatmul.mubr.bf16.gmra.mxu1 %v9740_v26  ;;  %v2133_v14 = vshrl.u32 %v1725_v38, 16 }
 0x2e7   :  { %v2723_v15 = vsel %vm11748_vm5, %v2718_v41, %v2722_v32  ;;  %v3396_v27 = vrot.slane %v18398_v31, 7  ;;  %v2136_v48 = vshll.u32 %v1725_v38, 16  ;;  %v2142_v35 = vshrl.u32 %v1726_v44, 16 }
 0x2e8   :  { %v9803_v11 = vcombine.low %v2715_v62, %v2723_v15  ;;  %v3405_v3 = vrot.slane %v18397_v49, 7  ;;  %v2145_v40 = vshll.u32 %v1726_v44, 16  ;;  %v2135_v43 = vrot.slane %v2133_v14, 7 }
 0x2e9   :  { %v3399_v28 = vor.u32 %v18399_v2, %v3396_v27  ;;  %v3401_v30 = vrot.slane %v3396_v27, 4  ;;  %v13491_v5 = vrot.slane %v2133_v14, 4  ;;  %v2144_v47 = vrot.slane %v2142_v35, 7  ;;  %v1728_v2 = vld [vmem:[#allocation2 + $0x1d0] sm:$0xf] }
 0x2ea   :  { %v3408_v41 = vor.u32 %v18400_v13, %v3405_v3  ;;  %v13495_v26 = vrot.slane %v2136_v48, 5  ;;  %v13497_v62 = vrot.slane %v2145_v40, 5  ;;  %v13501_v15 = vrot.slane %v2142_v35, 4  ;;  %v1729_v27 = vld [vmem:[#allocation2 + $0x1d4] sm:$0xf] }
 0x2eb   :  { %v3400_v32 = vsel %vm11752_vm7, %v9676_v1, %v3399_v28  ;;  %v9773_v49 = vcombine.low %v1725_v38, %v1726_v44  ;;  %v2128_v31 = vshrl.u32 %v1724_v16, 16  ;;  %7877 = vmatmul.mubr.bf16.gmra.mxu0 %v9803_v11  ;;  %v2138_v13 = vor.u32 %v2136_v48, %v2135_v43  ;;  %v2494_v38 = vld [vmem:[#allocation2 + $0x178] sm:$0x1] }
 0x2ec   :  { %v3409_v14 = vsel %vm11752_vm7, %v3401_v30, %v3408_v41  ;;  %v2140_v10 = vrot.slane %v2135_v43, 4  ;;  %v2147_v35 = vor.u32 %v2145_v40, %v2144_v47  ;;  %v2155_v44 = vshrl.u32 %v1728_v2, 16  ;;  %v10708_v30 = vld [vmem:[%s18265_s4 + $0x1d0] sm:$0xff]   ;;  %v3010_v40 = vld [vmem:[#allocation2 + $0x1cc] sm:$0x8] }
 0x2ed   :  { %v9836_v19 = vcombine.low %v3400_v32, %v3409_v14  ;;  %7603 = vmatprep.mubr.bf16.mxu1 %v9773_v49  ;;  %v9645_v1 = vrot.slane %v2128_v31, 11  ;;  %v2158_v16 = vshll.u32 %v1728_v2, 16  ;;  %v2164_v28 = vshrl.u32 %v1729_v27, 16  ;;  %v13519_v47 = vld [vmem:[#allocation2 + $0x1d0] sm:$0xf]  ;;  %8337 = vmatpush2.bf16.msra.mxu0 %v10708_v30 }
 0x2ee   :  { %v2167_v11 = vshll.u32 %v1729_v27, 16  ;;  %v2148_v43 = vsel %vm11752_vm7, %v2140_v10, %v2147_v35  ;;  %v9774_v41 = vcombine.low %v1728_v2, %v1729_v27  ;;  %v18904_v31 = vor.u32 %v13418_v57, %v13414_v6  ;;  %18905 = vst [vmem:[#allocation11_spill] sm:$0xff] %v13519_v47  ;;  %8338 = vmatprep.subr.bf16.mxu0 %v18847_v59  ;;  %v1727_v30 = vld [vmem:[#allocation2 + $0x1cc] sm:$0x8] }
 0x2ef   :  { %7884 = vmatprep.mubr.bf16.mxu0 %v9836_v19  ;;  %v2139_v48 = vsel %vm11752_vm7, %v9645_v1, %v2138_v13  ;;  %v2157_v14 = vrot.slane %v2155_v44, 7  ;;  %v2166_v53 = vrot.slane %v2164_v28, 7  ;;  %v13521_v3 = vrot.slane %v2155_v44, 4  ;;  %v13523_v19 = vld [vmem:[#allocation2 + $0x1d4] sm:$0xf] }
 0x2f0   :  { %v2727_v49 = vrot.slane %v18904_v31, 4  ;;  %v9741_v32 = vcombine.low %v2139_v48, %v2148_v43  ;;  %18906 = vst [vmem:[#allocation14_spill] sm:$0xff] %v13523_v19  ;;  %v13525_v13 = vrot.slane %v2158_v16, 5  ;;  %v13527_v1 = vrot.slane %v2167_v11, 5  ;;  %v1732_v48 = vld [vmem:[#allocation2 + $0x1ec] sm:$0xf] }
 0x2f1   :  { %v13529_v10 = vrot.slane %v2164_v28, 4  ;;  %v18907_v57 = vor.u32 %v13425_v52, %v13420_v46  ;;  %v2734_v27 = vshll.u32 %v2494_v38, 16  ;;  %v3411_v35 = vshrl.u32 %v3010_v40, 16  ;;  %v1731_v38 = vld [vmem:[#allocation2 + $0x1e8] sm:$0xf] }
 0x2f2   :  { %v2729_v6 = vsel %vm11748_vm5, %v2727_v49, %v13420_v46  ;;  %7604 = vmatmul.mubr.bf16.gmra.mxu1 %v9741_v32  ;;  %v18410_v44 = vshrl.u32 %v13519_v47, 16  ;;  %v18417_v43 = vshll.u32 %v13519_v47, 16  ;;  %v18415_v31 = vshrl.u32 %v13523_v19, 16 }
 0x2f3   :  { %v2732_v2 = vrot.slane %v18907_v57, 4  ;;  %7611 = vmatprep.mubr.bf16.mxu1 %v9774_v41  ;;  %v2736_v49 = vrot.slane %v2734_v27, 5  ;;  %v9677_v32 = vrot.slane %v3411_v35, 11  ;;  %v18416_v52 = vshll.u32 %v13523_v19, 16 }
 0x2f4   :  { %v3418_v46 = vrot.slane %v18410_v44, 7  ;;  %v3427_v40 = vrot.slane %v18415_v31, 7  ;;  %v2150_v57 = vshrl.u32 %v1727_v30, 16  ;;  %v2160_v28 = vor.u32 %v2158_v16, %v2157_v14 }
 0x2f5   :  { %v2162_v39 = vrot.slane %v2157_v14, 4  ;;  %v2737_v41 = vsel %vm11748_vm5, %v2732_v2, %v2736_v49  ;;  %v2169_v58 = vor.u32 %v2167_v11, %v2166_v53  ;;  %v2177_v12 = vshrl.u32 %v1731_v38, 16  ;;  %v2495_v2 = vld [vmem:[#allocation2 + $0x1c0] sm:$0x1] }
 0x2f6   :  { %v3421_v27 = vor.u32 %v18417_v43, %v3418_v46  ;;  %v3423_v35 = vrot.slane %v3418_v46, 4  ;;  %v9804_v34 = vcombine.low %v2729_v6, %v2737_v41  ;;  %v3430_v44 = vor.u32 %v18416_v52, %v3427_v40  ;;  %v3013_v46 = vld [vmem:[#allocation2 + $0x1e4] sm:$0x8]  ;;  %v13569_v41 = vld [vmem:[#allocation2 + $0x1e8] sm:$0xf] }
 0x2f7   :  { %v9646_v54 = vrot.slane %v2150_v57, 11  ;;  %v2170_v16 = vsel %vm11752_vm7, %v2162_v39, %v2169_v58  ;;  %v2180_v14 = vshll.u32 %v1731_v38, 16  ;;  %v2186_v31 = vshrl.u32 %v1732_v48, 16  ;;  %18908 = vst [vmem:[#allocation15_spill] sm:$0xff] %v13569_v41  ;;  %v1730_v52 = vld [vmem:[#allocation2 + $0x1e4] sm:$0x8] }
 0x2f8   :  { %v3422_v30 = vsel %vm11752_vm7, %v9677_v32, %v3421_v27  ;;  %7885 = vmatmul.mubr.bf16.gmra.mxu0 %v9804_v34  ;;  %v3431_v49 = vsel %vm11752_vm7, %v3423_v35, %v3430_v44  ;;  %v2179_v11 = vrot.slane %v2177_v12, 7  ;;  %v2189_v6 = vshll.u32 %v1732_v48, 16  ;;  %v10710_v32 = vld [vmem:[%s18265_s4 + $0x158] sm:$0xff]  }
 0x2f9   :  { %v2161_v53 = vsel %vm11752_vm7, %v9646_v54, %v2160_v28  ;;  %v9837_v40 = vcombine.low %v3422_v30, %v3431_v49  ;;  %v2188_v58 = vrot.slane %v2186_v31, 7  ;;  %v13567_v39 = vrot.slane %v2177_v12, 4  ;;  %v13577_v28 = vld [vmem:[#allocation2 + $0x1ec] sm:$0xf]  ;;  %8046 = vmatpush2.bf16.msra.mxu1 %v10710_v32 }
 0x2fa   :  { %v9742_v57 = vcombine.low %v2161_v53, %v2170_v16  ;;  %v13571_v34 = vrot.slane %v2180_v14, 5  ;;  %v13573_v44 = vrot.slane %v2189_v6, 5  ;;  %v13575_v27 = vrot.slane %v2186_v31, 4  ;;  %18909 = vst [vmem:[#allocation13_spill] sm:$0xff] %v13577_v28  ;;  %8047 = vmatprep.subr.bf16.mxu1 %v18847_v59 }
 0x2fb   :  { %v9775_v54 = vcombine.low %v1731_v38, %v1732_v48  ;;  %7892 = vmatprep.mubr.bf16.mxu0 %v9837_v40  ;;  %v18910_v35 = vor.u32 %v13495_v26, %v13491_v5  ;;  %v18911_v12 = vor.u32 %v13501_v15, %v13497_v62  ;;  %v2748_v49 = vshll.u32 %v2495_v2, 16 }
 0x2fc   :  { %7612 = vmatmul.mubr.bf16.gmra.mxu1 %v9742_v57  ;;  %v3433_v53 = vshrl.u32 %v3013_v46, 16  ;;  %v18418_v38 = vshrl.u32 %v13569_v41, 16  ;;  %v18423_v32 = vshll.u32 %v13569_v41, 16  ;;  %v18421_v2 = vshrl.u32 %v13577_v28, 16 }
 0x2fd   :  { %v2741_v30 = vrot.slane %v18910_v35, 4  ;;  %v2746_v16 = vrot.slane %v18911_v12, 4  ;;  %7619 = vmatprep.mubr.bf16.mxu1 %v9775_v54  ;;  %v2750_v26 = vrot.slane %v2748_v49, 5  ;;  %v18422_v40 = vshll.u32 %v13577_v28, 16  ;;  %v1734_v35 = vld [vmem:[#allocation2 + $0x200] sm:$0xf] }
 0x2fe   :  { %v9678_v15 = vrot.slane %v3433_v53, 11  ;;  %v3440_v46 = vrot.slane %v18418_v38, 7  ;;  %v2172_v57 = vshrl.u32 %v1730_v52, 16  ;;  %v2182_v54 = vor.u32 %v2180_v14, %v2179_v11 }
 0x2ff   :  { %v2743_v5 = vsel %vm11748_vm5, %v2741_v30, %v13497_v62  ;;  %v2751_v12 = vsel %vm11748_vm5, %v2746_v16, %v2750_v26  ;;  %v3449_v43 = vrot.slane %v18421_v2, 7  ;;  %v2184_v48 = vrot.slane %v2179_v11, 4  ;;  %v1735_v30 = vld [vmem:[#allocation2 + $0x204] sm:$0xf]  ;;  %v2496_v26 = vld [vmem:[#allocation2 + $0x1d8] sm:$0x1] }
 0x300   :  { %v2191_v62 = vor.u32 %v2189_v6, %v2188_v58  ;;  %v9805_v49 = vcombine.low %v2743_v5, %v2751_v12  ;;  %v3443_v53 = vor.u32 %v18423_v32, %v3440_v46  ;;  %v3445_v31 = vrot.slane %v3440_v46, 4  ;;  %v3016_v46 = vld [vmem:[#allocation2 + $0x1fc] sm:$0x8] }
 0x301   :  { %v9647_v38 = vrot.slane %v2172_v57, 11  ;;  %v3452_v52 = vor.u32 %v18422_v40, %v3449_v43  ;;  %v2199_v19 = vshrl.u32 %v1734_v35, 16  ;;  %v2202_v16 = vshll.u32 %v1734_v35, 16 }
 0x302   :  { %v2192_v14 = vsel %vm11752_vm7, %v2184_v48, %v2191_v62  ;;  %7893 = vmatmul.mubr.bf16.gmra.mxu0 %v9805_v49  ;;  %v3444_v11 = vsel %vm11752_vm7, %v9678_v15, %v3443_v53  ;;  %v2208_v58 = vshrl.u32 %v1735_v30, 16  ;;  %v2211_v5 = vshll.u32 %v1735_v30, 16  ;;  %v13617_v48 = vld [vmem:[#allocation2 + $0x200] sm:$0xf]  ;;  %v10712_v15 = vld [vmem:[%s18265_s4 + $0x1c8] sm:$0xff]  }
 0x303   :  { %v2183_v6 = vsel %vm11752_vm7, %v9647_v38, %v2182_v54  ;;  %v3453_v57 = vsel %vm11752_vm7, %v3445_v31, %v3452_v52  ;;  %v2201_v12 = vrot.slane %v2199_v19, 7  ;;  %v13615_v2 = vrot.slane %v2199_v19, 4  ;;  %18912 = vst [vmem:[#allocation38_spill] sm:$0xff] %v13617_v48  ;;  %v13626_v53 = vld [vmem:[#allocation2 + $0x204] sm:$0xf]  ;;  %8339 = vmatpush2.bf16.msra.mxu0 %v10712_v15 }
 0x304   :  { %v9743_v43 = vcombine.low %v2183_v6, %v2192_v14  ;;  %v9838_v62 = vcombine.low %v3444_v11, %v3453_v57  ;;  %v2210_v49 = vrot.slane %v2208_v58, 7  ;;  %v13622_v38 = vrot.slane %v2202_v16, 5  ;;  %18913 = vst [vmem:[#allocation36_spill] sm:$0xff] %v13626_v53  ;;  %8340 = vmatprep.subr.bf16.mxu0 %v18847_v59  ;;  %v1738_v11 = vld [vmem:[#allocation2 + $0x21c] sm:$0xf] }
 0x305   :  { %v13624_v54 = vrot.slane %v2211_v5, 5  ;;  %v13628_v31 = vrot.slane %v2208_v58, 4  ;;  %v9776_v52 = vcombine.low %v1734_v35, %v1735_v30  ;;  %v18914_v19 = vor.u32 %v13525_v13, %v13521_v3  ;;  %v1733_v58 = vld [vmem:[#allocation2 + $0x1fc] sm:$0x8] }
 0x306   :  { %7620 = vmatmul.mubr.bf16.gmra.mxu1 %v9743_v43  ;;  %v18915_v6 = vor.u32 %v13529_v10, %v13527_v1  ;;  %7900 = vmatprep.mubr.bf16.mxu0 %v9838_v62  ;;  %v2762_v57 = vshll.u32 %v2496_v26, 16  ;;  %v3455_v32 = vshrl.u32 %v3016_v46, 16  ;;  %v18426_v43 = vshrl.u32 %v13617_v48, 16  ;;  %v1737_v62 = vld [vmem:[#allocation2 + $0x218] sm:$0xf] }
 0x307   :  { %v2755_v14 = vrot.slane %v18914_v19, 4  ;;  %7627 = vmatprep.mubr.bf16.mxu1 %v9776_v52  ;;  %v18433_v10 = vshll.u32 %v13617_v48, 16  ;;  %v18431_v35 = vshrl.u32 %v13626_v53, 16  ;;  %v18432_v15 = vshll.u32 %v13626_v53, 16 }
 0x308   :  { %v2760_v40 = vrot.slane %v18915_v6, 4  ;;  %v2764_v30 = vrot.slane %v2762_v57, 5  ;;  %v9679_v26 = vrot.slane %v3455_v32, 11  ;;  %v3462_v46 = vrot.slane %v18426_v43, 7 }
 0x309   :  { %v2757_v13 = vsel %vm11748_vm5, %v2755_v14, %v13527_v1  ;;  %v3471_v19 = vrot.slane %v18431_v35, 7  ;;  %v2194_v52 = vshrl.u32 %v1733_v58, 16  ;;  %v2204_v6 = vor.u32 %v2202_v16, %v2201_v12 }
 0x30a   :  { %v2206_v3 = vrot.slane %v2201_v12, 4  ;;  %v2765_v1 = vsel %vm11748_vm5, %v2760_v40, %v2764_v30  ;;  %v3465_v14 = vor.u32 %v18433_v10, %v3462_v46  ;;  %v3467_v32 = vrot.slane %v3462_v46, 4  ;;  %v2497_v30 = vld [vmem:[#allocation2 + $0x1f0] sm:$0x1]  ;;  %v3019_v46 = vld [vmem:[#allocation2 + $0x214] sm:$0x8] }
 0x30b   :  { %v2213_v57 = vor.u32 %v2211_v5, %v2210_v49  ;;  %v9806_v28 = vcombine.low %v2757_v13, %v2765_v1  ;;  %v3474_v43 = vor.u32 %v18432_v15, %v3471_v19  ;;  %v9648_v41 = vrot.slane %v2194_v52, 11  ;;  %v1736_v15 = vld [vmem:[#allocation2 + $0x214] sm:$0x8] }
 0x30c   :  { %v2221_v47 = vshrl.u32 %v1737_v62, 16  ;;  %v3466_v58 = vsel %vm11752_vm7, %v9679_v26, %v3465_v14  ;;  %v2224_v12 = vshll.u32 %v1737_v62, 16  ;;  %v2230_v35 = vshrl.u32 %v1738_v11, 16  ;;  %v13668_v14 = vld [vmem:[#allocation2 + $0x218] sm:$0xf] }
 0x30d   :  { %v2214_v16 = vsel %vm11752_vm7, %v2206_v3, %v2213_v57  ;;  %7901 = vmatmul.mubr.bf16.gmra.mxu0 %v9806_v28  ;;  %v3475_v40 = vsel %vm11752_vm7, %v3467_v32, %v3474_v43  ;;  %v2205_v5 = vsel %vm11752_vm7, %v9648_v41, %v2204_v6  ;;  %v2233_v13 = vshll.u32 %v1738_v11, 16  ;;  %18916 = vst [vmem:[#allocation39_spill] sm:$0xff] %v13668_v14  ;;  %v10714_v28 = vld [vmem:[%s18265_s4 + $0x150] sm:$0xff]   ;;  %v13679_v32 = vld [vmem:[#allocation2 + $0x21c] sm:$0xf] }
 0x30e   :  { %v2223_v49 = vrot.slane %v2221_v47, 7  ;;  %v9839_v19 = vcombine.low %v3466_v58, %v3475_v40  ;;  %v9744_v52 = vcombine.low %v2205_v5, %v2214_v16  ;;  %v2232_v1 = vrot.slane %v2230_v35, 7  ;;  %18917 = vst [vmem:[#allocation37_spill] sm:$0xff] %v13679_v32  ;;  %8048 = vmatpush2.bf16.msra.mxu1 %v10714_v28 }
 0x30f   :  { %v13666_v26 = vrot.slane %v2221_v47, 4  ;;  %v13673_v3 = vrot.slane %v2224_v12, 5  ;;  %v13675_v43 = vrot.slane %v2233_v13, 5  ;;  %v13677_v41 = vrot.slane %v2230_v35, 4  ;;  %8049 = vmatprep.subr.bf16.mxu1 %v18847_v59 }
 0x310   :  { %v9777_v6 = vcombine.low %v1737_v62, %v1738_v11  ;;  %7908 = vmatprep.mubr.bf16.mxu0 %v9839_v19  ;;  %7628 = vmatmul.mubr.bf16.gmra.mxu1 %v9744_v52  ;;  %v18918_v47 = vor.u32 %v13571_v34, %v13567_v39  ;;  %v18919_v58 = vor.u32 %v13575_v27, %v13573_v44  ;;  %v2776_v40 = vshll.u32 %v2497_v30, 16 }
 0x311   :  { %v3477_v5 = vshrl.u32 %v3019_v46, 16  ;;  %v18434_v62 = vshrl.u32 %v13668_v14, 16  ;;  %v18437_v19 = vshll.u32 %v13668_v14, 16  ;;  %v18435_v30 = vshrl.u32 %v13679_v32, 16 }
 0x312   :  { %v2769_v57 = vrot.slane %v18918_v47, 4  ;;  %v2774_v16 = vrot.slane %v18919_v58, 4  ;;  %7635 = vmatprep.mubr.bf16.mxu1 %v9777_v6  ;;  %v2778_v34 = vrot.slane %v2776_v40, 5  ;;  %v18436_v52 = vshll.u32 %v13679_v32, 16  ;;  %v13701_v58 = vld [vmem:[#allocation2 + $0x230] sm:$0xf] }
 0x313   :  { %v9680_v27 = vrot.slane %v3477_v5, 11  ;;  %v3484_v46 = vrot.slane %v18434_v62, 7  ;;  %v2216_v6 = vshrl.u32 %v1736_v15, 16  ;;  %v2226_v47 = vor.u32 %v2224_v12, %v2223_v49  ;;  %v13707_v5 = vld [vmem:[#allocation2 + $0x234] sm:$0xf] }
 0x314   :  { %v2771_v39 = vsel %vm11748_vm5, %v2769_v57, %v13573_v44  ;;  %v2779_v28 = vsel %vm11748_vm5, %v2774_v16, %v2778_v34  ;;  %v3493_v44 = vrot.slane %v18435_v30, 7  ;;  %v2228_v57 = vrot.slane %v2223_v49, 4  ;;  %v10715_v49 = vld [vmem:[%s18265_s4 + $0x148] sm:$0xff]  }
 0x315   :  { %v2235_v40 = vor.u32 %v2233_v13, %v2232_v1  ;;  %v9807_v10 = vcombine.low %v2771_v39, %v2779_v28  ;;  %v3487_v62 = vor.u32 %v18437_v19, %v3484_v46  ;;  %v3489_v11 = vrot.slane %v3484_v46, 4  ;;  %v3022_v30 = vld [vmem:[#allocation2 + $0x22c] sm:$0x8]  ;;  %8050 = vmatpush2.bf16.msra.mxu1 %v10715_v49  ;;  %v10716_v19 = vld [vmem:[%s18265_s4 + $0x1c0] sm:$0xff]  }
 0x316   :  { %v9649_v35 = vrot.slane %v2216_v6, 11  ;;  %v3496_v15 = vor.u32 %v18436_v52, %v3493_v44  ;;  %v2243_v16 = vshrl.u32 %v13701_v58, 16  ;;  %v2246_v34 = vshll.u32 %v13701_v58, 16  ;;  %v13726_v6 = vld [vmem:[#allocation2 + $0x230] sm:$0xf]  ;;  %8051 = vmatprep.subr.bf16.mxu1 %v18847_v59  ;;  %8341 = vmatpush2.bf16.msra.mxu0 %v10716_v19 }
 0x317   :  { %v2236_v12 = vsel %vm11752_vm7, %v2228_v57, %v2235_v40  ;;  %7909 = vmatmul.mubr.bf16.gmra.mxu0 %v9807_v10  ;;  %v3488_v13 = vsel %vm11752_vm7, %v9680_v27, %v3487_v62  ;;  %v2252_v39 = vshrl.u32 %v13707_v5, 16  ;;  %v2255_v46 = vshll.u32 %v13707_v5, 16  ;;  %18920 = vst [vmem:[#allocation41_spill] sm:$0xff] %v13726_v6  ;;  %v2498_v10 = vld [vmem:[#allocation2 + $0x208] sm:$0x1] }
 0x318   :  { %v2227_v1 = vsel %vm11752_vm7, %v9649_v35, %v2226_v47  ;;  %v3497_v28 = vsel %vm11752_vm7, %v3489_v11, %v3496_v15  ;;  %v2245_v57 = vrot.slane %v2243_v16, 7  ;;  %v13730_v40 = vrot.slane %v2243_v16, 4  ;;  %v13736_v47 = vld [vmem:[#allocation2 + $0x234] sm:$0xf] }
 0x319   :  { %v9745_v44 = vcombine.low %v2227_v1, %v2236_v12  ;;  %v9840_v62 = vcombine.low %v3488_v13, %v3497_v28  ;;  %v2254_v27 = vrot.slane %v2252_v39, 7  ;;  %v13732_v52 = vrot.slane %v2246_v34, 5  ;;  %18921 = vst [vmem:[#allocation40_spill] sm:$0xff] %v13736_v47 }
 0x31a   :  { %v13734_v35 = vrot.slane %v2255_v46, 5  ;;  %v13742_v11 = vrot.slane %v2252_v39, 4  ;;  %v9778_v15 = vcombine.low %v13701_v58, %v13707_v5  ;;  %v18922_v12 = vor.u32 %v13622_v38, %v13615_v2 }
 0x31b   :  { %7636 = vmatmul.mubr.bf16.gmra.mxu1 %v9745_v44  ;;  %v18923_v49 = vor.u32 %v13628_v31, %v13624_v54  ;;  %7916 = vmatprep.mubr.bf16.mxu0 %v9840_v62  ;;  %v2790_v28 = vshll.u32 %v2498_v10, 16  ;;  %v3499_v59 = vshrl.u32 %v3022_v30, 16  ;;  %v18440_v39 = vshrl.u32 %v13726_v6, 16  ;;  %v1739_v44 = vld [vmem:[#allocation2 + $0x22c] sm:$0x8]  ;;  %v10717_v30 = vld [vmem:[%s18265_s4 + $0x140] sm:$0xff]  }
 0x31c   :  { %v2783_v16 = vrot.slane %v18922_v12, 4  ;;  %7643 = vmatprep.mubr.bf16.mxu1 %v9778_v15  ;;  %v18447_v58 = vshrl.u32 %v13736_v47, 16  ;;  %v13770_v15 = vld [vmem:[#allocation2 + $0x248] sm:$0xf]  ;;  %v2248_v2 = vor.u32 %v2246_v34, %v2245_v57  ;;  %v2250_v1 = vrot.slane %v2245_v57, 4  ;;  %8052 = vmatpush2.bf16.msra.mxu1 %v10717_v30 }
 0x31d   :  { %v2788_v13 = vrot.slane %v18923_v49, 4  ;;  %v13755_v32 = vpop.f32.mrf.mxu1  ;;  %v2792_v5 = vrot.slane %v2790_v28, 5  ;;  %v9681_v10 = vrot.slane %v3499_v59, 11  ;;  %v3506_v19 = vrot.slane %v18440_v39, 7  ;;  %v13776_v31 = vld [vmem:[#allocation2 + $0x24c] sm:$0xf] }
 0x31e   :  { %v2785_v38 = vsel %vm11748_vm5, %v2783_v16, %v13624_v54  ;;  %v3515_v16 = vrot.slane %v18447_v58, 7  ;;  %v2238_v49 = vshrl.u32 %v1739_v44, 16  ;;  %v18924_v59 = vshll.u32 %v13726_v6, 16 }
 0x31f   :  { %v13772_v12 = vpop.f32.mrf.mxu0  ;;  %v7487_v54 = vpop.f32.mrf.mxu1  ;;  %v2793_v28 = vsel %vm11748_vm5, %v2788_v13, %v2792_v5  ;;  %v3511_v62 = vrot.slane %v3506_v19, 4  ;;  %v2257_v14 = vor.u32 %v2255_v46, %v2254_v27  ;;  %v18925_v58 = vshll.u32 %v13736_v47, 16 }
 0x320   :  { %v3509_v39 = vor.u32 %v18924_v59, %v3506_v19  ;;  %v9808_v54 = vcombine.low %v2785_v38, %v2793_v28  ;;  %v9650_v34 = vrot.slane %v2238_v49, 11  ;;  %v2265_v57 = vshrl.u32 %v13770_v15, 16  ;;  %v13802_v59 = vld [vmem:[#allocation2 + $0x248] sm:$0xf] }
 0x321   :  { %v7768_v53 = vpop.f32.mrf.mxu0  ;;  %v13782_v48 = vpop.f32.mrf.mxu1  ;;  %v3518_v44 = vor.u32 %v18925_v58, %v3515_v16  ;;  %v2258_v13 = vsel %vm11752_vm7, %v2250_v1, %v2257_v14  ;;  %v2268_v5 = vshll.u32 %v13770_v15, 16  ;;  %v2274_v46 = vshrl.u32 %v13776_v31, 16  ;;  %v3025_v16 = vld [vmem:[#allocation2 + $0x244] sm:$0x8]  ;;  %18926 = vst [vmem:[#allocation35_spill] sm:$0xff] %v13802_v59 }
 0x322   :  { %v3510_v30 = vsel %vm11752_vm7, %v9681_v10, %v3509_v39  ;;  %7917 = vmatmul.mubr.bf16.gmra.mxu0 %v9808_v54  ;;  %v2249_v58 = vsel %vm11752_vm7, %v9650_v34, %v2248_v2  ;;  %v2267_v19 = vrot.slane %v2265_v57, 7  ;;  %v2277_v39 = vshll.u32 %v13776_v31, 16  ;;  %v2499_v10 = vld [vmem:[#allocation2 + $0x220] sm:$0x1] }
 0x323   :  { %v13793_v53 = vpop.f32.mrf.mxu0  ;;  %v7490_v27 = vpop.f32.mrf.mxu1  ;;  %v3519_v38 = vsel %vm11752_vm7, %v3511_v62, %v3518_v44  ;;  %v9746_v1 = vcombine.low %v2249_v58, %v2258_v13  ;;  %v2276_v49 = vrot.slane %v2274_v46, 7  ;;  %v13800_v28 = vrot.slane %v2265_v57, 4  ;;  %v10720_v62 = vld [vmem:[%s18265_s4 + $0x238] sm:$0xff]   ;;  %v13817_v57 = vld [vmem:[#allocation2 + $0x24c] sm:$0xf] }
 0x324   :  { %v9841_v14 = vcombine.low %v3510_v30, %v3519_v38  ;;  %v13809_v2 = vrot.slane %v2268_v5, 5  ;;  %v13811_v44 = vrot.slane %v2277_v39, 5  ;;  %v13813_v34 = vrot.slane %v2274_v46, 4  ;;  %18927 = vst [vmem:[#allocation44_spill] sm:$0xff] %v13817_v57  ;;  %10488 = vmatprep.subr.bf16.mxu0 %v10720_v62  ;;  %10568 = vmatprep.subr.bf16.mxu1 %v10720_v62 }
 0x325   :  { %v7771_v27 = vpop.f32.mrf.mxu0  ;;  %v13804_v54 = vpop.f32.mrf.mxu1  ;;  %v9779_v30 = vcombine.low %v13770_v15, %v13776_v31  ;;  %7644 = vmatmul.mubr.bf16.gmra.mxu1 %v9746_v1  ;;  %v18928_v13 = vor.u32 %v13673_v3, %v13666_v26  ;;  %v18929_v58 = vor.u32 %v13677_v41, %v13675_v43  ;;  %v2804_v47 = vshll.u32 %v2499_v10, 16 }
 0x326   :  { %7924 = vmatprep.mubr.bf16.mxu0 %v9841_v14  ;;  %v3521_v6 = vshrl.u32 %v3025_v16, 16  ;;  %v18456_v15 = vshrl.u32 %v13802_v59, 16  ;;  %v18460_v26 = vshll.u32 %v13802_v59, 16  ;;  %v18459_v16 = vshrl.u32 %v13817_v57, 16  ;;  %v13876_v59 = vld [vmem:[#allocation2 + $0x264] sm:$0xf] }
 0x327   :  { %v2797_v38 = vrot.slane %v18928_v13, 4  ;;  %v2802_v27 = vrot.slane %v18929_v58, 4  ;;  %v7495_v46 = vpop.f32.mrf.mxu1  ;;  %7651 = vmatprep.mubr.bf16.mxu1 %v9779_v30  ;;  %v2806_v41 = vrot.slane %v2804_v47, 5  ;;  %v2260_v13 = vshrl.u32 %v1742_v7, 16  ;;  %18932 = vst [vmem:[#allocation43_spill] sm:$0xff] %v13876_v59 }
 0x328   :  { %v9682_v10 = vrot.slane %v3521_v6, 11  ;;  %v3528_v1 = vrot.slane %v18456_v15, 7  ;;  %v2270_v58 = vor.u32 %v2268_v5, %v2267_v19  ;;  %v13840_v46 = vld [vmem:[#allocation2 + $0x260] sm:$0xf]  ;;  %v2272_v6 = vrot.slane %v2267_v19, 4 }
 0x329   :  { %v2799_v3 = vsel %vm11748_vm5, %v2797_v38, %v13675_v43  ;;  %v13835_v14 = vpop.f32.mrf.mxu1  ;;  %v2807_v31 = vsel %vm11748_vm5, %v2802_v27, %v2806_v41  ;;  %v3537_v43 = vrot.slane %v18459_v16, 7  ;;  %v2279_v47 = vor.u32 %v2277_v39, %v2276_v49  ;;  %v13846_v38 = vld [vmem:[#allocation2 + $0x264] sm:$0xf]  ;;  %v3028_v16 = vld [vmem:[#allocation2 + $0x25c] sm:$0x8] }
 0x32a   :  { %v9809_v17 = vcombine.low %v2799_v3, %v2807_v31  ;;  %v3531_v15 = vor.u32 %v18460_v26, %v3528_v1  ;;  %v3533_v30 = vrot.slane %v3528_v1, 4  ;;  %v9651_v7 = vrot.slane %v2260_v13, 11 }
 0x32b   :  { %v7498_v62 = vpop.f32.mrf.mxu1  ;;  %v18930_v5 = vshll.u32 %v13817_v57, 16  ;;  %v2280_v27 = vsel %vm11752_vm7, %v2272_v6, %v2279_v47  ;;  %v2287_v41 = vshrl.u32 %v13840_v46, 16  ;;  %v2290_v19 = vshll.u32 %v13840_v46, 16 }
 0x32c   :  { %7925 = vmatmul.mubr.bf16.gmra.mxu0 %v9809_v17  ;;  %v3532_v31 = vsel %vm11752_vm7, %v9682_v10, %v3531_v15  ;;  %v2271_v3 = vsel %vm11752_vm7, %v9651_v7, %v2270_v58  ;;  %v2296_v1 = vshrl.u32 %v13846_v38, 16  ;;  %v2299_v13 = vshll.u32 %v13846_v38, 16  ;;  %v2500_v17 = vld [vmem:[#allocation2 + $0x238] sm:$0x1] }
 0x32d   :  { %v3540_v36 = vor.u32 %v18930_v5, %v3537_v43  ;;  %v13856_v39 = vpop.f32.mrf.mxu0  ;;  %v13858_v49 = vpop.f32.mrf.mxu1  ;;  %v13866_v43 = vld [vmem:[#allocation2 + $0x260] sm:$0xf]  ;;  %v9747_v47 = vcombine.low %v2271_v3, %v2280_v27  ;;  %v2289_v62 = vrot.slane %v2287_v41, 7  ;;  %v13870_v5 = vrot.slane %v2287_v41, 4 }
 0x32e   :  { %18931 = vst [vmem:[#allocation42_spill] sm:$0xff] %v13866_v43  ;;  %v2298_v57 = vrot.slane %v2296_v1, 7  ;;  %v13872_v58 = vrot.slane %v2290_v19, 5  ;;  %v13874_v7 = vrot.slane %v2299_v13, 5  ;;  %v13878_v50 = vrot.slane %v2296_v1, 4 }
 0x32f   :  { %v3541_v6 = vsel %vm11752_vm7, %v3533_v30, %v3540_v36  ;;  %v7776_v26 = vpop.f32.mrf.mxu0  ;;  %v7503_v15 = vpop.f32.mrf.mxu1  ;;  %7652 = vmatmul.mubr.bf16.gmra.mxu1 %v9747_v47  ;;  %v9780_v36 = vcombine.low %v13840_v46, %v13846_v38  ;;  %v18933_v30 = vor.u32 %v13732_v52, %v13730_v40  ;;  %v3543_v47 = vshrl.u32 %v3028_v16, 16  ;;  %v1745_v38 = vld [vmem:[#allocation2 + $0x25c] sm:$0x8] }
 0x330   :  { %v9842_v10 = vcombine.low %v3532_v31, %v3541_v6  ;;  %v18934_v26 = vor.u32 %v13742_v11, %v13734_v35  ;;  %v2818_v6 = vshll.u32 %v2500_v17, 16  ;;  %v18469_v46 = vshrl.u32 %v13866_v43, 16  ;;  %v13909_v11 = vld [vmem:[#allocation2 + $0x27c] sm:$0xf] }
 0x331   :  { %v2811_v27 = vrot.slane %v18933_v30, 4  ;;  %v13888_v31 = vpop.f32.mrf.mxu0  ;;  %v13890_v3 = vpop.f32.mrf.mxu1  ;;  %7659 = vmatprep.mubr.bf16.mxu1 %v9780_v36  ;;  %v18476_v15 = vshrl.u32 %v13876_v59, 16  ;;  %v9683_v17 = vrot.slane %v3543_v47, 11  ;;  %v2282_v52 = vshrl.u32 %v1745_v38, 16 }
 0x332   :  { %v2816_v41 = vrot.slane %v18934_v26, 4  ;;  %7932 = vmatprep.mubr.bf16.mxu0 %v9842_v10  ;;  %v2820_v26 = vrot.slane %v2818_v6, 5  ;;  %v3550_v16 = vrot.slane %v18469_v46, 7  ;;  %v18935_v6 = vshll.u32 %v13866_v43, 16  ;;  %v1748_v43 = vld [vmem:[#allocation2 + $0x274] sm:$0x8] }
 0x333   :  { %v2813_v40 = vsel %vm11748_vm5, %v2811_v27, %v13734_v35  ;;  %v7779_v10 = vpop.f32.mrf.mxu0  ;;  %v7506_v30 = vpop.f32.mrf.mxu1  ;;  %v3559_v36 = vrot.slane %v18476_v15, 7  ;;  %v2292_v35 = vor.u32 %v2290_v19, %v2289_v62  ;;  %v2294_v27 = vrot.slane %v2289_v62, 4 }
 0x334   :  { %v2821_v10 = vsel %vm11748_vm5, %v2816_v41, %v2820_v26  ;;  %v3553_v47 = vor.u32 %v18935_v6, %v3550_v16  ;;  %v3555_v30 = vrot.slane %v3550_v16, 4  ;;  %v2301_v46 = vor.u32 %v2299_v13, %v2298_v57 }
 0x335   :  { %v13915_v18 = vpop.f32.mrf.mxu1  ;;  %v9810_v1 = vcombine.low %v2813_v40, %v2821_v10  ;;  %v18936_v56 = vshll.u32 %v13876_v59, 16  ;;  %v9652_v15 = vrot.slane %v2282_v52, 11  ;;  %v2309_v19 = vshrl.u32 %v13905_v55, 16  ;;  %v13935_v59 = vld [vmem:[#allocation2 + $0x278] sm:$0xf] }
 0x336   :  { %v13920_v62 = vpop.f32.mrf.mxu0  ;;  %v3554_v38 = vsel %vm11752_vm7, %v9683_v17, %v3553_v47  ;;  %v2302_v41 = vsel %vm11752_vm7, %v2294_v27, %v2301_v46  ;;  %v2312_v26 = vshll.u32 %v13905_v55, 16  ;;  %v2318_v57 = vshrl.u32 %v13909_v11, 16  ;;  %v3031_v17 = vld [vmem:[#allocation2 + $0x274] sm:$0x8]  ;;  %18937 = vst [vmem:[#allocation47_spill] sm:$0xff] %v13935_v59 }
 0x337   :  { %v3562_v20 = vor.u32 %v18936_v56, %v3559_v36  ;;  %v7511_v13 = vpop.f32.mrf.mxu1  ;;  %7933 = vmatmul.mubr.bf16.gmra.mxu0 %v9810_v1  ;;  %v2293_v52 = vsel %vm11752_vm7, %v9652_v15, %v2292_v35  ;;  %v2311_v40 = vrot.slane %v2309_v19, 7  ;;  %v2321_v16 = vshll.u32 %v13909_v11, 16  ;;  %v2501_v36 = vld [vmem:[#allocation2 + $0x250] sm:$0x1] }
 0x338   :  { %v7784_v10 = vpop.f32.mrf.mxu0  ;;  %v9748_v46 = vcombine.low %v2293_v52, %v2302_v41  ;;  %v2320_v27 = vrot.slane %v2318_v57, 7  ;;  %v13933_v47 = vrot.slane %v2309_v19, 4  ;;  %v13939_v13 = vrot.slane %v2312_v26, 5 }
 0x339   :  { %v3563_v56 = vsel %vm11752_vm7, %v3555_v30, %v3562_v20  ;;  %v13937_v1 = vpop.f32.mrf.mxu1  ;;  %v13941_v20 = vrot.slane %v2321_v16, 5  ;;  %v13943_v15 = vrot.slane %v2318_v57, 4  ;;  %v9781_v35 = vcombine.low %v13905_v55, %v13909_v11  ;;  %v13947_v30 = vld [vmem:[#allocation2 + $0x27c] sm:$0xf]  ;;  %v13970_v11 = vld [vmem:[#allocation2 + $0x290] sm:$0xf] }
 0x33a   :  { %v9843_v6 = vcombine.low %v3554_v38, %v3563_v56  ;;  %18938 = vst [vmem:[#allocation46_spill] sm:$0xff] %v13947_v30  ;;  %v13949_v38 = vpop.f32.mrf.mxu0  ;;  %7660 = vmatmul.mubr.bf16.gmra.mxu1 %v9748_v46  ;;  %v18939_v19 = vor.u32 %v13809_v2, %v13800_v28  ;;  %v18940_v56 = vor.u32 %v13813_v34, %v13811_v44  ;;  %v2832_v10 = vshll.u32 %v2501_v36, 16 }
 0x33b   :  { %v3565_v57 = vshrl.u32 %v3031_v17, 16  ;;  %v7514_v37 = vpop.f32.mrf.mxu1  ;;  %7667 = vmatprep.mubr.bf16.mxu1 %v9781_v35  ;;  %v2314_v35 = vor.u32 %v2312_v26, %v2311_v40  ;;  %v18942_v63 = vshll.u32 %v13947_v30, 16 }
 0x33c   :  { %7940 = vmatprep.mubr.bf16.mxu0 %v9843_v6  ;;  %v2825_v41 = vrot.slane %v18939_v19, 4  ;;  %v2830_v52 = vrot.slane %v18940_v56, 4  ;;  %v18483_v6 = vshrl.u32 %v13935_v59, 16  ;;  %v7787_v2 = vpop.f32.mrf.mxu0  ;;  %v2834_v36 = vrot.slane %v2832_v10, 5 }
 0x33d   :  { %v9684_v17 = vrot.slane %v3565_v57, 11  ;;  %v18492_v37 = vshrl.u32 %v13947_v30, 16  ;;  %v2304_v56 = vshrl.u32 %v1748_v43, 16  ;;  %v2323_v10 = vor.u32 %v2321_v16, %v2320_v27  ;;  %v13978_v57 = vld [vmem:[#allocation2 + $0x294] sm:$0xf] }
 0x33e   :  { %v2827_v34 = vsel %vm11748_vm5, %v2825_v41, %v13811_v44  ;;  %v3572_v46 = vrot.slane %v18483_v6, 7  ;;  %v13972_v55 = vpop.f32.mrf.mxu1  ;;  %v2835_v2 = vsel %vm11748_vm5, %v2830_v52, %v2834_v36  ;;  %v2316_v41 = vrot.slane %v2311_v40, 4 }
 0x33f   :  { %v3581_v44 = vrot.slane %v18492_v37, 7  ;;  %v13980_v28 = vpop.f32.mrf.mxu0  ;;  %v9811_v6 = vcombine.low %v2827_v34, %v2835_v2  ;;  %v18941_v43 = vshll.u32 %v13935_v59, 16  ;;  %v9653_v22 = vrot.slane %v2304_v56, 11  ;;  %v14010_v37 = vld [vmem:[#allocation2 + $0x294] sm:$0xf] }
 0x340   :  { %v3577_v19 = vrot.slane %v3572_v46, 4  ;;  %v7519_v45 = vpop.f32.mrf.mxu1  ;;  %v2324_v52 = vsel %vm11752_vm7, %v2316_v41, %v2323_v10  ;;  %v2331_v40 = vshrl.u32 %v13970_v11, 16  ;;  %v2334_v16 = vshll.u32 %v13970_v11, 16  ;;  %v2502_v10 = vld [vmem:[#allocation2 + $0x268] sm:$0x1]  ;;  %18944 = vst [vmem:[#allocation50_spill] sm:$0xff] %v14010_v37 }
 0x341   :  { %v3575_v26 = vor.u32 %v18941_v43, %v3572_v46  ;;  %v3584_v23 = vor.u32 %v18942_v63, %v3581_v44  ;;  %v7792_v27 = vpop.f32.mrf.mxu0  ;;  %7941 = vmatmul.mubr.bf16.gmra.mxu0 %v9811_v6  ;;  %v2315_v36 = vsel %vm11752_vm7, %v9653_v22, %v2314_v35  ;;  %v2340_v45 = vshrl.u32 %v13978_v57, 16  ;;  %v13996_v63 = vld [vmem:[#allocation2 + $0x290] sm:$0xf] }
 0x342   :  { %v2343_v46 = vshll.u32 %v13978_v57, 16  ;;  %18943 = vst [vmem:[#allocation45_spill] sm:$0xff] %v13996_v63  ;;  %v13998_v56 = vpop.f32.mrf.mxu1  ;;  %v9749_v44 = vcombine.low %v2315_v36, %v2324_v52  ;;  %v2333_v41 = vrot.slane %v2331_v40, 7  ;;  %v14002_v6 = vrot.slane %v2331_v40, 4 }
 0x343   :  { %v3576_v34 = vsel %vm11752_vm7, %v9684_v17, %v3575_v26  ;;  %v3585_v2 = vsel %vm11752_vm7, %v3577_v19, %v3584_v23  ;;  %v3034_v17 = vld [vmem:[#allocation2 + $0x28c] sm:$0x8]  ;;  %v14004_v43 = vpop.f32.mrf.mxu0  ;;  %v2342_v35 = vrot.slane %v2340_v45, 7  ;;  %v14006_v26 = vrot.slane %v2334_v16, 5 }
 0x344   :  { %v9844_v22 = vcombine.low %v3576_v34, %v3585_v2  ;;  %v14008_v27 = vrot.slane %v2343_v46, 5  ;;  %v7522_v30 = vpop.f32.mrf.mxu1  ;;  %7668 = vmatmul.mubr.bf16.gmra.mxu1 %v9749_v44  ;;  %v14012_v59 = vrot.slane %v2340_v45, 4  ;;  %v9782_v23 = vcombine.low %v13970_v11, %v13978_v57  ;;  %v14043_v2 = vld [vmem:[#allocation2 + $0x2ac] sm:$0xf] }
 0x345   :  { %v18945_v19 = vor.u32 %v13872_v58, %v13870_v5  ;;  %v18946_v40 = vor.u32 %v13878_v50, %v13874_v7  ;;  %v7795_v36 = vpop.f32.mrf.mxu0  ;;  %v2846_v30 = vshll.u32 %v2502_v10, 16  ;;  %v3587_v44 = vshrl.u32 %v3034_v17, 16 }
 0x346   :  { %7948 = vmatprep.mubr.bf16.mxu0 %v9844_v22  ;;  %v18499_v45 = vshrl.u32 %v13996_v63, 16  ;;  %7675 = vmatprep.mubr.bf16.mxu1 %v9782_v23  ;;  %v18510_v58 = vshrl.u32 %v14010_v37, 16  ;;  %v2336_v36 = vor.u32 %v2334_v16, %v2333_v41  ;;  %v2338_v11 = vrot.slane %v2333_v41, 4 }
 0x347   :  { %v2839_v52 = vrot.slane %v18945_v19, 4  ;;  %v2844_v34 = vrot.slane %v18946_v40, 4  ;;  %v14032_v57 = vpop.f32.mrf.mxu1  ;;  %v2848_v22 = vrot.slane %v2846_v30, 5  ;;  %v9685_v10 = vrot.slane %v3587_v44, 11  ;;  %v14037_v40 = vld [vmem:[#allocation2 + $0x2a8] sm:$0xf] }
 0x348   :  { %v3594_v17 = vrot.slane %v18499_v45, 7  ;;  %v14039_v23 = vpop.f32.mrf.mxu0  ;;  %v18947_v44 = vshll.u32 %v13996_v63, 16  ;;  %v2345_v51 = vor.u32 %v2343_v46, %v2342_v35  ;;  %v18948_v0 = vshll.u32 %v14010_v37, 16 }
 0x349   :  { %v2841_v5 = vsel %vm11748_vm5, %v2839_v52, %v13874_v7  ;;  %v3603_v7 = vrot.slane %v18510_v58, 7  ;;  %v2326_v52 = vshrl.u32 %v1751_v4, 16  ;;  %v7527_v50 = vpop.f32.mrf.mxu1  ;;  %v2849_v30 = vsel %vm11748_vm5, %v2844_v34, %v2848_v22  ;;  %v2503_v22 = vld [vmem:[#allocation2 + $0x280] sm:$0x1] }
 0x34a   :  { %v3597_v45 = vor.u32 %v18947_v44, %v3594_v17  ;;  %v3599_v19 = vrot.slane %v3594_v17, 4  ;;  %v7800_v9 = vpop.f32.mrf.mxu0  ;;  %v9812_v60 = vcombine.low %v2841_v5, %v2849_v30  ;;  %v2353_v4 = vshrl.u32 %v14037_v40, 16  ;;  %v14071_v30 = vld [vmem:[#allocation2 + $0x2a8] sm:$0xf] }
 0x34b   :  { %v3606_v42 = vor.u32 %v18948_v0, %v3603_v7  ;;  %v9654_v58 = vrot.slane %v2326_v52, 11  ;;  %v14052_v16 = vpop.f32.mrf.mxu1  ;;  %v2346_v34 = vsel %vm11752_vm7, %v2338_v11, %v2345_v51  ;;  %v2356_v50 = vshll.u32 %v14037_v40, 16  ;;  %v3037_v52 = vld [vmem:[#allocation2 + $0x2a4] sm:$0x8]  ;;  %18949 = vst [vmem:[#allocation48_spill] sm:$0xff] %v14071_v30 }
 0x34c   :  { %v3598_v41 = vsel %vm11752_vm7, %v9685_v10, %v3597_v45  ;;  %v2362_v46 = vshrl.u32 %v14043_v2, 16  ;;  %v14060_v9 = vpop.f32.mrf.mxu0  ;;  %7949 = vmatmul.mubr.bf16.gmra.mxu0 %v9812_v60  ;;  %v14066_v5 = vrot.slane %v2353_v4, 7  ;;  %v2365_v45 = vshll.u32 %v14043_v2, 16 }
 0x34d   :  { %v3607_v0 = vsel %vm11752_vm7, %v3599_v19, %v3606_v42  ;;  %v2337_v35 = vsel %vm11752_vm7, %v9654_v58, %v2336_v36  ;;  %v7530_v10 = vpop.f32.mrf.mxu1  ;;  %v14069_v7 = vrot.slane %v2353_v4, 4  ;;  %v14073_v44 = vrot.slane %v2356_v50, 5  ;;  %v14081_v36 = vld [vmem:[#allocation2 + $0x2ac] sm:$0xf] }
 0x34e   :  { %v9845_v51 = vcombine.low %v3598_v41, %v3607_v0  ;;  %v9750_v11 = vcombine.low %v2337_v35, %v2346_v34  ;;  %v2364_v17 = vrot.slane %v2362_v46, 7  ;;  %v7803_v60 = vpop.f32.mrf.mxu0  ;;  %v14075_v42 = vrot.slane %v2365_v45, 5  ;;  %18950 = vst [vmem:[#allocation49_spill] sm:$0xff] %v14081_v36 }
 0x34f   :  { %v14077_v58 = vrot.slane %v2362_v46, 4  ;;  %v9783_v19 = vcombine.low %v14037_v40, %v14043_v2  ;;  %v14085_v4 = vadd.f32 %v13772_v12, %v13324_v29  ;;  %v18952_v41 = vor.u32 %v13939_v13, %v13933_v47  ;;  %v14114_v40 = vld [vmem:[#allocation2 + $0x2c0] sm:$0xf] }
 0x350   :  { %7956 = vmatprep.mubr.bf16.mxu0 %v9845_v51  ;;  %7676 = vmatmul.mubr.bf16.gmra.mxu1 %v9750_v11  ;;  %v18953_v0 = vor.u32 %v13943_v15, %v13941_v20  ;;  %v2860_v35 = vshll.u32 %v2503_v22, 16  ;;  %v14093_v10 = vpop.f32.mrf.mxu1  ;;  %v3609_v29 = vshrl.u32 %v3037_v52, 16  ;;  %v18511_v12 = vshrl.u32 %v14071_v30, 16  ;;  %v1754_v51 = vld [vmem:[#allocation2 + $0x2a4] sm:$0x8] }
 0x351   :  { %18951 = vst [vmem:[#allocation53_spill] sm:$0xff] %v14085_v4  ;;  %v2853_v34 = vrot.slane %v18952_v41, 4  ;;  %7683 = vmatprep.mubr.bf16.mxu1 %v9783_v19  ;;  %v14100_v47 = vpop.f32.mrf.mxu0  ;;  %v18513_v22 = vshll.u32 %v14071_v30, 16  ;;  %v18512_v11 = vshrl.u32 %v14081_v36, 16  ;;  %v14148_v30 = vld [vmem:[#allocation2 + $0x2c0] sm:$0xf] }
 0x352   :  { %v2858_v46 = vrot.slane %v18953_v0, 4  ;;  %v2862_v15 = vrot.slane %v2860_v35, 5  ;;  %v7535_v60 = vpop.f32.mrf.mxu1  ;;  %v9686_v41 = vrot.slane %v3609_v29, 11  ;;  %v3616_v19 = vrot.slane %v18511_v12, 7  ;;  %18956 = vst [vmem:[#allocation52_spill] sm:$0xff] %v14148_v30 }
 0x353   :  { %v2855_v13 = vsel %vm11748_vm5, %v2853_v34, %v13941_v20  ;;  %v14112_v0 = vadd.f32 %v13793_v53, %v13367_v25  ;;  %v7808_v2 = vpop.f32.mrf.mxu0  ;;  %v3625_v34 = vrot.slane %v18512_v11, 7  ;;  %v2348_v35 = vshrl.u32 %v1754_v51, 16  ;;  %v14121_v60 = vld [vmem:[#allocation2 + $0x2c4] sm:$0xf] }
 0x354   :  { %v2863_v20 = vsel %vm11748_vm5, %v2858_v46, %v2862_v15  ;;  %v2358_v29 = vor.u32 %v2356_v50, %v14066_v5  ;;  %v14123_v12 = vpop.f32.mrf.mxu1  ;;  %v3619_v25 = vor.u32 %v18513_v22, %v3616_v19  ;;  %v3621_v53 = vrot.slane %v3616_v19, 4 }
 0x355   :  { %18954 = vst [vmem:[#allocation51_spill] sm:$0xff] %v14112_v0  ;;  %v9813_v52 = vcombine.low %v2855_v13, %v2863_v20  ;;  %v2360_v2 = vrot.slane %v14066_v5, 4  ;;  %v14128_v0 = vpop.f32.mrf.mxu0  ;;  %v18955_v46 = vshll.u32 %v14081_v36, 16  ;;  %v9655_v11 = vrot.slane %v2348_v35, 11 }
 0x356   :  { %v2367_v51 = vor.u32 %v2365_v45, %v2364_v17  ;;  %v2375_v50 = vshrl.u32 %v14114_v40, 16  ;;  %v7538_v4 = vpop.f32.mrf.mxu1  ;;  %v3620_v13 = vsel %vm11752_vm7, %v9686_v41, %v3619_v25  ;;  %v2378_v20 = vshll.u32 %v14114_v40, 16 }
 0x357   :  { %v3628_v15 = vor.u32 %v18955_v46, %v3625_v34  ;;  %7957 = vmatmul.mubr.bf16.gmra.mxu0 %v9813_v52  ;;  %v2384_v19 = vshrl.u32 %v14121_v60, 16  ;;  %v2387_v5 = vshll.u32 %v14121_v60, 16  ;;  %v7811_v22 = vpop.f32.mrf.mxu0  ;;  %v2359_v45 = vsel %vm11752_vm7, %v9655_v11, %v2358_v29  ;;  %v2504_v52 = vld [vmem:[#allocation2 + $0x298] sm:$0x1]  ;;  %v3040_v46 = vld [vmem:[#allocation2 + $0x2bc] sm:$0x8] }
 0x358   :  { %v2368_v17 = vsel %vm11752_vm7, %v2360_v2, %v2367_v51  ;;  %v14144_v4 = vrot.slane %v2375_v50, 7  ;;  %v14146_v25 = vrot.slane %v2375_v50, 4  ;;  %v14150_v22 = vrot.slane %v2378_v20, 5  ;;  %v14158_v29 = vld [vmem:[#allocation2 + $0x2c4] sm:$0xf] }
 0x359   :  { %v3629_v36 = vsel %vm11752_vm7, %v3621_v53, %v3628_v15  ;;  %v9751_v34 = vcombine.low %v2359_v45, %v2368_v17  ;;  %v2386_v35 = vrot.slane %v2384_v19, 7  ;;  %v14152_v53 = vrot.slane %v2387_v5, 5  ;;  %18957 = vst [vmem:[#allocation55_spill] sm:$0xff] %v14158_v29 }
 0x35a   :  { %v9846_v41 = vcombine.low %v3620_v13, %v3629_v36  ;;  %v14154_v15 = vrot.slane %v2384_v19, 4  ;;  %v9784_v11 = vcombine.low %v14114_v40, %v14121_v60  ;;  %v14164_v36 = vadd.f32 %v13856_v39, %v13755_v32 }
 0x35b   :  { %v14160_v2 = vpop.f32.mrf.mxu0  ;;  %7684 = vmatmul.mubr.bf16.gmra.mxu1 %v9751_v34  ;;  %v18959_v51 = vor.u32 %v14006_v26, %v14002_v6  ;;  %v18960_v13 = vor.u32 %v14012_v59, %v14008_v27  ;;  %v2874_v45 = vshll.u32 %v2504_v52, 16  ;;  %v3631_v32 = vshrl.u32 %v3040_v46, 16 }
 0x35c   :  { %7964 = vmatprep.mubr.bf16.mxu0 %v9846_v41  ;;  %18958 = vst [vmem:[#allocation56_spill] sm:$0xff] %v14164_v36  ;;  %v14172_v40 = vpop.f32.mrf.mxu1  ;;  %7691 = vmatprep.mubr.bf16.mxu1 %v9784_v11  ;;  %v18518_v39 = vshrl.u32 %v14148_v30, 16  ;;  %v1757_v41 = vld [vmem:[#allocation2 + $0x2bc] sm:$0x8]  ;;  %v18524_v52 = vshll.u32 %v14148_v30, 16  ;;  %v18523_v34 = vshrl.u32 %v14158_v29, 16  ;;  %v14189_v11 = vadd.f32 %v13888_v31, %v13782_v48 }
 0x35d   :  { %v2867_v50 = vrot.slane %v18959_v51, 4  ;;  %v2872_v19 = vrot.slane %v18960_v13, 4  ;;  %v7816_v6 = vpop.f32.mrf.mxu0  ;;  %v2876_v26 = vrot.slane %v2874_v45, 5  ;;  %v9687_v13 = vrot.slane %v3631_v32, 11 }
 0x35e   :  { %v7543_v51 = vpop.f32.mrf.mxu1  ;;  %v3638_v17 = vrot.slane %v18518_v39, 7  ;;  %18961 = vst [vmem:[#allocation57_spill] sm:$0xff] %v14189_v11  ;;  %v1761_v6 = vld [vmem:[#allocation2 + $0x2d8] sm:$0xf]  ;;  %v2370_v45 = vshrl.u32 %v1757_v41, 16  ;;  %v2380_v32 = vor.u32 %v2378_v20, %v14144_v4  ;;  %v2382_v11 = vrot.slane %v14144_v4, 4 }
 0x35f   :  { %v2869_v59 = vsel %vm11748_vm5, %v2867_v50, %v14008_v27  ;;  %v14191_v60 = vpop.f32.mrf.mxu0  ;;  %v2877_v27 = vsel %vm11748_vm5, %v2872_v19, %v2876_v26  ;;  %v3647_v50 = vrot.slane %v18523_v34, 7  ;;  %v1762_v51 = vld [vmem:[#allocation2 + $0x2dc] sm:$0xf]  ;;  %v18963_v37 = vshll.u32 %v14158_v29, 16 }
 0x360   :  { %v14198_v39 = vpop.f32.mrf.mxu1  ;;  %v9814_v46 = vcombine.low %v2869_v59, %v2877_v27  ;;  %v3641_v48 = vor.u32 %v18524_v52, %v3638_v17  ;;  %v3643_v31 = vrot.slane %v3638_v17, 4  ;;  %v9656_v26 = vrot.slane %v2370_v45, 11  ;;  %v2505_v45 = vld [vmem:[#allocation2 + $0x2b0] sm:$0x1] }
 0x361   :  { %18962 = vst [vmem:[#allocation58_spill] sm:$0xff] %v14198_v39  ;;  %v7819_v36 = vpop.f32.mrf.mxu0  ;;  %v3650_v19 = vor.u32 %v18963_v37, %v3647_v50  ;;  %v2389_v63 = vor.u32 %v2387_v5, %v2386_v35  ;;  %v2397_v34 = vshrl.u32 %v1761_v6, 16  ;;  %v2400_v39 = vshll.u32 %v1761_v6, 16 }
 0x362   :  { %v7546_v41 = vpop.f32.mrf.mxu1  ;;  %7965 = vmatmul.mubr.bf16.gmra.mxu0 %v9814_v46  ;;  %v3642_v20 = vsel %vm11752_vm7, %v9687_v13, %v3641_v48  ;;  %v2406_v59 = vshrl.u32 %v1762_v51, 16  ;;  %v2409_v27 = vshll.u32 %v1762_v51, 16  ;;  %v2381_v4 = vsel %vm11752_vm7, %v9656_v26, %v2380_v32  ;;  %v14215_v13 = vld [vmem:[#allocation2 + $0x2d8] sm:$0xf] }
 0x363   :  { %v3651_v17 = vsel %vm11752_vm7, %v3643_v31, %v3650_v19  ;;  %v2390_v37 = vsel %vm11752_vm7, %v2382_v11, %v2389_v63  ;;  %v2399_v36 = vrot.slane %v2397_v34, 7  ;;  %v14213_v46 = vrot.slane %v2397_v34, 4  ;;  %18964 = vst [vmem:[#allocation59_spill] sm:$0xff] %v14215_v13  ;;  %v3043_v19 = vld [vmem:[#allocation2 + $0x2d4] sm:$0x8] }
 0x364   :  { %v9847_v5 = vcombine.low %v3642_v20, %v3651_v17  ;;  %v9752_v35 = vcombine.low %v2381_v4, %v2390_v37  ;;  %v2408_v50 = vrot.slane %v2406_v59, 7  ;;  %v14217_v52 = vrot.slane %v2400_v39, 5  ;;  %v14229_v20 = vld [vmem:[#allocation2 + $0x2dc] sm:$0xf] }
 0x365   :  { %v2402_v48 = vor.u32 %v2400_v39, %v2399_v36  ;;  %v2404_v41 = vrot.slane %v2399_v36, 4  ;;  %v14219_v31 = vrot.slane %v2409_v27, 5  ;;  %v14221_v32 = vpop.f32.mrf.mxu0  ;;  %v14223_v11 = vrot.slane %v2406_v59, 4  ;;  %18966 = vst [vmem:[#allocation61_spill] sm:$0xff] %v14229_v20 }
 0x366   :  { %7972 = vmatprep.mubr.bf16.mxu0 %v9847_v5  ;;  %7692 = vmatmul.mubr.bf16.gmra.mxu1 %v9752_v35  ;;  %v2411_v63 = vor.u32 %v2409_v27, %v2408_v50  ;;  %v9785_v26 = vcombine.low %v1761_v6, %v1762_v51  ;;  %v14227_v34 = vadd.f32 %v13920_v62, %v13804_v54  ;;  %v2888_v6 = vshll.u32 %v2505_v45, 16  ;;  %v1760_v51 = vld [vmem:[#allocation2 + $0x2d4] sm:$0x8]  ;;  %v1764_v50 = vld [vmem:[#allocation2 + $0x2f0] sm:$0xf] }
 0x367   :  { %v14231_v17 = vpop.f32.mrf.mxu1  ;;  %v18967_v4 = vor.u32 %v14073_v44, %v14069_v7  ;;  %v18968_v59 = vor.u32 %v14077_v58, %v14075_v42  ;;  %v7824_v36 = vpop.f32.mrf.mxu0  ;;  %v3653_v62 = vshrl.u32 %v3043_v19, 16  ;;  %v18525_v5 = vshrl.u32 %v14215_v13, 16 }
 0x368   :  { %18965 = vst [vmem:[#allocation60_spill] sm:$0xff] %v14227_v34  ;;  %7699 = vmatprep.mubr.bf16.mxu1 %v9785_v26  ;;  %v18531_v35 = vshll.u32 %v14215_v13, 16  ;;  %v2890_v44 = vrot.slane %v2888_v6, 5  ;;  %v18530_v58 = vshrl.u32 %v14229_v20, 16  ;;  %v14256_v26 = vadd.f32 %v13949_v38, %v13835_v14  ;;  %v1765_v36 = vld [vmem:[#allocation2 + $0x2f4] sm:$0xf] }
 0x369   :  { %v2881_v37 = vrot.slane %v18967_v4, 4  ;;  %v2886_v27 = vrot.slane %v18968_v59, 4  ;;  %v7551_v39 = vpop.f32.mrf.mxu1  ;;  %v14250_v4 = vpop.f32.mrf.mxu0  ;;  %v9688_v59 = vrot.slane %v3653_v62, 11  ;;  %v3660_v19 = vrot.slane %v18525_v5, 7 }
 0x36a   :  { %18969 = vst [vmem:[#allocation62_spill] sm:$0xff] %v14256_v26  ;;  %v2392_v39 = vshrl.u32 %v1760_v51, 16  ;;  %v2412_v6 = vsel %vm11752_vm7, %v2404_v41, %v2411_v63  ;;  %v2419_v62 = vshrl.u32 %v1764_v50, 16  ;;  %v18970_v34 = vshll.u32 %v14229_v20, 16 }
 0x36b   :  { %v2883_v7 = vsel %vm11748_vm5, %v2881_v37, %v14075_v42  ;;  %v14258_v54 = vpop.f32.mrf.mxu1  ;;  %v2891_v42 = vsel %vm11748_vm5, %v2886_v27, %v2890_v44  ;;  %v3669_v37 = vrot.slane %v18530_v58, 7  ;;  %v7827_v45 = vpop.f32.mrf.mxu0  ;;  %v3663_v14 = vor.u32 %v18531_v35, %v3660_v19 }
 0x36c   :  { %v9815_v5 = vcombine.low %v2883_v7, %v2891_v42  ;;  %v3665_v38 = vrot.slane %v3660_v19, 4  ;;  %v9657_v51 = vrot.slane %v2392_v39, 11  ;;  %v2421_v30 = vrot.slane %v2419_v62, 7  ;;  %v2506_v39 = vld [vmem:[#allocation2 + $0x2c8] sm:$0x1] }
 0x36d   :  { %v7554_v26 = vpop.f32.mrf.mxu1  ;;  %v3672_v29 = vor.u32 %v18970_v34, %v3669_v37  ;;  %v2422_v27 = vshll.u32 %v1764_v50, 16  ;;  %v2428_v44 = vshrl.u32 %v1765_v36, 16  ;;  %v3664_v58 = vsel %vm11752_vm7, %v9688_v59, %v3663_v14  ;;  %v14280_v42 = vld [vmem:[#allocation2 + $0x2f0] sm:$0xf] }
 0x36e   :  { %7973 = vmatmul.mubr.bf16.gmra.mxu0 %v9815_v5  ;;  %v2403_v41 = vsel %vm11752_vm7, %v9657_v51, %v2402_v48  ;;  %v2431_v63 = vshll.u32 %v1765_v36, 16  ;;  %v14274_v7 = vrot.slane %v2419_v62, 4  ;;  %v2426_v34 = vrot.slane %v2421_v30, 4  ;;  %18971 = vst [vmem:[#allocation63_spill] sm:$0xff] %v14280_v42  ;;  %v3046_v62 = vld [vmem:[#allocation2 + $0x2ec] sm:$0x8] }
 0x36f   :  { %v3673_v45 = vsel %vm11752_vm7, %v3665_v38, %v3672_v29  ;;  %v9753_v19 = vcombine.low %v2403_v41, %v2412_v6  ;;  %v14278_v26 = vor.u32 %v2422_v27, %v2421_v30  ;;  %v14282_v5 = vpop.f32.mrf.mxu0  ;;  %v2430_v59 = vrot.slane %v2428_v44, 7  ;;  %v14297_v41 = vld [vmem:[#allocation2 + $0x2f4] sm:$0xf] }
 0x370   :  { %v9848_v37 = vcombine.low %v3664_v58, %v3673_v45  ;;  %v14284_v14 = vrot.slane %v2422_v27, 5  ;;  %v14286_v48 = vrot.slane %v2431_v63, 5  ;;  %v14288_v51 = vrot.slane %v2428_v44, 4  ;;  %18974 = vst [vmem:[#allocation65_spill] sm:$0xff] %v14297_v41 }
 0x371   :  { %7700 = vmatmul.mubr.bf16.gmra.mxu1 %v9753_v19  ;;  %v9786_v29 = vcombine.low %v1764_v50, %v1765_v36  ;;  %v14292_v6 = vadd.f32 %v13980_v28, %v13858_v49  ;;  %v18973_v30 = vor.u32 %v14150_v22, %v14146_v25  ;;  %v7832_v58 = vpop.f32.mrf.mxu0  ;;  %v14299_v27 = vpop.f32.mrf.mxu1  ;;  %v2433_v45 = vor.u32 %v2431_v63, %v2430_v59  ;;  %v1763_v28 = vld [vmem:[#allocation2 + $0x2ec] sm:$0x8] }
 0x372   :  { %7980 = vmatprep.mubr.bf16.mxu0 %v9848_v37  ;;  %v18975_v50 = vor.u32 %v14154_v15, %v14152_v53  ;;  %v2902_v49 = vshll.u32 %v2506_v39, 16  ;;  %v3675_v19 = vshrl.u32 %v3046_v62, 16  ;;  %v18532_v63 = vshrl.u32 %v14280_v42, 16  ;;  %v1767_v37 = vld [vmem:[#allocation2 + $0x308] sm:$0xf] }
 0x373   :  { %18972 = vst [vmem:[#allocation64_spill] sm:$0xff] %v14292_v6  ;;  %v2895_v38 = vrot.slane %v18973_v30, 4  ;;  %7707 = vmatprep.mubr.bf16.mxu1 %v9786_v29  ;;  %v14312_v59 = vpop.f32.mrf.mxu0  ;;  %v7559_v30 = vpop.f32.mrf.mxu1  ;;  %v18538_v15 = vshll.u32 %v14280_v42, 16  ;;  %v18537_v39 = vshrl.u32 %v14297_v41, 16  ;;  %v2414_v62 = vshrl.u32 %v1763_v28, 16 }
 0x374   :  { %v2900_v36 = vrot.slane %v18975_v50, 4  ;;  %v2904_v58 = vrot.slane %v2902_v49, 5  ;;  %v9689_v35 = vrot.slane %v3675_v19, 11  ;;  %v3682_v29 = vrot.slane %v18532_v63, 7 }
 0x375   :  { %v2897_v22 = vsel %vm11748_vm5, %v2895_v38, %v14152_v53  ;;  %v14321_v53 = vadd.f32 %v14004_v43, %v13890_v3  ;;  %v1768_v38 = vld [vmem:[#allocation2 + $0x30c] sm:$0xf]  ;;  %v7835_v25 = vpop.f32.mrf.mxu0  ;;  %v14323_v44 = vpop.f32.mrf.mxu1  ;;  %v3691_v30 = vrot.slane %v18537_v39, 7  ;;  %v2434_v19 = vsel %vm11752_vm7, %v2426_v34, %v2433_v45 }
 0x376   :  { %v2905_v49 = vsel %vm11748_vm5, %v2900_v36, %v2904_v58  ;;  %v2441_v50 = vshrl.u32 %v1767_v37, 16  ;;  %v3685_v3 = vor.u32 %v18538_v15, %v3682_v29  ;;  %v3687_v43 = vrot.slane %v3682_v29, 4 }
 0x377   :  { %18976 = vst [vmem:[#allocation66_spill] sm:$0xff] %v14321_v53  ;;  %v9816_v63 = vcombine.low %v2897_v22, %v2905_v49  ;;  %v9658_v28 = vrot.slane %v2414_v62, 11  ;;  %v7562_v53 = vpop.f32.mrf.mxu1  ;;  %v18977_v25 = vshll.u32 %v14297_v41, 16  ;;  %v2444_v13 = vshll.u32 %v1767_v37, 16 }
 0x378   :  { %v2443_v20 = vrot.slane %v2441_v50, 7  ;;  %v2450_v36 = vshrl.u32 %v1768_v38, 16  ;;  %v3686_v58 = vsel %vm11752_vm7, %v9689_v35, %v3685_v3  ;;  %v2453_v45 = vshll.u32 %v1768_v38, 16 }
 0x379   :  { %v3694_v6 = vor.u32 %v18977_v25, %v3691_v30  ;;  %7981 = vmatmul.mubr.bf16.gmra.mxu0 %v9816_v63  ;;  %v2425_v34 = vsel %vm11752_vm7, %v9658_v28, %v14278_v26  ;;  %v14340_v22 = vrot.slane %v2441_v50, 4  ;;  %v2507_v30 = vld [vmem:[#allocation2 + $0x2e0] sm:$0x1]  ;;  %v14346_v25 = vld [vmem:[#allocation2 + $0x308] sm:$0xf]  ;;  %v14350_v39 = vrot.slane %v2444_v13, 5 }
 0x37a   :  { %v9754_v53 = vcombine.low %v2425_v34, %v2434_v19  ;;  %v14344_v62 = vor.u32 %v2444_v13, %v2443_v20  ;;  %v2448_v49 = vrot.slane %v2443_v20, 4  ;;  %v14348_v63 = vpop.f32.mrf.mxu0  ;;  %v2452_v3 = vrot.slane %v2450_v36, 7  ;;  %v3049_v50 = vld [vmem:[#allocation2 + $0x304] sm:$0x8]  ;;  %v14365_v34 = vld [vmem:[#allocation2 + $0x30c] sm:$0xf] }
 0x37b   :  { %v3695_v29 = vsel %vm11752_vm7, %v3687_v43, %v3694_v6  ;;  %v14352_v26 = vrot.slane %v2453_v45, 5  ;;  %v14356_v6 = vrot.slane %v2450_v36, 4  ;;  %v9787_v19 = vcombine.low %v1767_v37, %v1768_v38  ;;  %18980 = vst [vmem:[#allocation68_spill] sm:$0xff] %v14365_v34 }
 0x37c   :  { %v9849_v35 = vcombine.low %v3686_v58, %v3695_v29  ;;  %v14354_v28 = vpop.f32.mrf.mxu1  ;;  %7708 = vmatmul.mubr.bf16.gmra.mxu1 %v9754_v53  ;;  %v14360_v20 = vadd.f32 %v14039_v23, %v13915_v18  ;;  %v18979_v43 = vor.u32 %v14217_v52, %v14213_v46  ;;  %v7840_v13 = vpop.f32.mrf.mxu0  ;;  %v2455_v29 = vor.u32 %v2453_v45, %v2452_v3  ;;  %v1766_v53 = vld [vmem:[#allocation2 + $0x304] sm:$0x8] }
 0x37d   :  { %v18981_v36 = vor.u32 %v14223_v11, %v14219_v31  ;;  %v2916_v38 = vshll.u32 %v2507_v30, 16  ;;  %7715 = vmatprep.mubr.bf16.mxu1 %v9787_v19  ;;  %v3697_v46 = vshrl.u32 %v3049_v50, 16  ;;  %v18539_v45 = vshrl.u32 %v14346_v25, 16 }
 0x37e   :  { %18978 = vst [vmem:[#allocation67_spill] sm:$0xff] %v14360_v20  ;;  %v2909_v58 = vrot.slane %v18979_v43, 4  ;;  %7988 = vmatprep.mubr.bf16.mxu0 %v9849_v35  ;;  %v7567_v18 = vpop.f32.mrf.mxu1  ;;  %v1770_v35 = vld [vmem:[#allocation2 + $0x320] sm:$0xf]  ;;  %v14378_v3 = vpop.f32.mrf.mxu0  ;;  %v18544_v30 = vshrl.u32 %v14365_v34, 16  ;;  %v2436_v50 = vshrl.u32 %v1766_v53, 16  ;;  %v2456_v13 = vsel %vm11752_vm7, %v2448_v49, %v2455_v29 }
 0x37f   :  { %v2914_v37 = vrot.slane %v18981_v36, 4  ;;  %v2918_v43 = vrot.slane %v2916_v38, 5  ;;  %v9690_v19 = vrot.slane %v3697_v46, 11  ;;  %v3704_v18 = vrot.slane %v18539_v45, 7 }
 0x380   :  { %v2911_v52 = vsel %vm11748_vm5, %v2909_v58, %v14219_v31  ;;  %v14383_v36 = vpop.f32.mrf.mxu1  ;;  %v14389_v31 = vadd.f32 %v14060_v9, %v13937_v1  ;;  %v1771_v58 = vld [vmem:[#allocation2 + $0x324] sm:$0xf]  ;;  %v7843_v23 = vpop.f32.mrf.mxu0  ;;  %v3713_v15 = vrot.slane %v18544_v30, 7  ;;  %v2463_v46 = vshrl.u32 %v1770_v35, 16 }
 0x381   :  { %v2919_v38 = vsel %vm11748_vm5, %v2914_v37, %v2918_v43  ;;  %v18983_v45 = vshll.u32 %v14346_v25, 16  ;;  %v3709_v1 = vrot.slane %v3704_v18, 4  ;;  %v9659_v9 = vrot.slane %v2436_v50, 11 }
 0x382   :  { %18982 = vst [vmem:[#allocation69_spill] sm:$0xff] %v14389_v31  ;;  %v7570_v11 = vpop.f32.mrf.mxu1  ;;  %v9817_v20 = vcombine.low %v2911_v52, %v2919_v38  ;;  %v18984_v53 = vshll.u32 %v14365_v34, 16  ;;  %v2465_v31 = vrot.slane %v2463_v46, 7  ;;  %v2466_v42 = vshll.u32 %v1770_v35, 16  ;;  %v14414_v38 = vld [vmem:[#allocation2 + $0x320] sm:$0xf] }
 0x383   :  { %v3707_v41 = vor.u32 %v18983_v45, %v3704_v18  ;;  %v2472_v37 = vshrl.u32 %v1771_v58, 16  ;;  %v2447_v49 = vsel %vm11752_vm7, %v9659_v9, %v14344_v62  ;;  %v2475_v29 = vshll.u32 %v1771_v58, 16 }
 0x384   :  { %v3716_v23 = vor.u32 %v18984_v53, %v3713_v15  ;;  %7989 = vmatmul.mubr.bf16.gmra.mxu0 %v9817_v20  ;;  %v14406_v52 = vrot.slane %v2463_v46, 4  ;;  %v14408_v45 = vpop.f32.mrf.mxu0  ;;  %v9755_v15 = vcombine.low %v2447_v49, %v2456_v13  ;;  %v14412_v18 = vor.u32 %v2466_v42, %v2465_v31  ;;  %v2508_v20 = vld [vmem:[#allocation2 + $0x2f8] sm:$0x1]  ;;  %v3052_v46 = vld [vmem:[#allocation2 + $0x31c] sm:$0x8] }
 0x385   :  { %v3708_v43 = vsel %vm11752_vm7, %v9690_v19, %v3707_v41  ;;  %v2470_v50 = vrot.slane %v2465_v31, 4  ;;  %v2474_v19 = vrot.slane %v2472_v37, 7  ;;  %v14416_v53 = vrot.slane %v2466_v42, 5  ;;  %v14431_v42 = vld [vmem:[#allocation2 + $0x324] sm:$0xf] }
 0x386   :  { %v3717_v11 = vsel %vm11752_vm7, %v3709_v1, %v3716_v23  ;;  %v14418_v62 = vrot.slane %v2475_v29, 5  ;;  %v7848_v9 = vpop.f32.mrf.mxu0  ;;  %v14420_v30 = vpop.f32.mrf.mxu1  ;;  %7716 = vmatmul.mubr.bf16.gmra.mxu1 %v9755_v15  ;;  %v14422_v34 = vrot.slane %v2472_v37, 4  ;;  %v9788_v13 = vcombine.low %v1770_v35, %v1771_v58  ;;  %v1769_v58 = vld [vmem:[#allocation2 + $0x31c] sm:$0x8] }
 0x387   :  { %v9850_v41 = vcombine.low %v3708_v43, %v3717_v11  ;;  %v14426_v31 = vadd.f32 %v14100_v47, %v13972_v55  ;;  %v18985_v1 = vor.u32 %v14284_v14, %v14274_v7  ;;  %v2477_v43 = vor.u32 %v2475_v29, %v2474_v19 }
 0x388   :  { %v2950_v49 = vor.u32 %v14416_v53, %v14406_v52  ;;  %v18986_v37 = vor.u32 %v14288_v51, %v14286_v48  ;;  %v2930_v35 = vshll.u32 %v2508_v20, 16  ;;  %v14438_v15 = vpop.f32.mrf.mxu0  ;;  %v7575_v55 = vpop.f32.mrf.mxu1  ;;  %7723 = vmatprep.mubr.bf16.mxu1 %v9788_v13  ;;  %v3719_v14 = vshrl.u32 %v3052_v46, 16 }
 0x389   :  { %v2923_v23 = vrot.slane %v18985_v1, 4  ;;  %7996 = vmatprep.mubr.bf16.mxu0 %v9850_v41  ;;  %v18547_v29 = vshrl.u32 %v14414_v38, 16  ;;  %v18550_v51 = vshll.u32 %v14414_v38, 16  ;;  %v18548_v20 = vshrl.u32 %v14431_v42, 16 }
 0x38a   :  { %v2928_v11 = vrot.slane %v18986_v37, 4  ;;  %v2932_v41 = vrot.slane %v2930_v35, 5  ;;  %v18549_v19 = vshll.u32 %v14431_v42, 16  ;;  %v7851_v9 = vpop.f32.mrf.mxu0  ;;  %v14449_v1 = vpop.f32.mrf.mxu1  ;;  %v9691_v37 = vrot.slane %v3719_v14, 11 }
 0x38b   :  { %v2925_v7 = vsel %vm11748_vm5, %v2923_v23, %v14286_v48  ;;  %v3726_v13 = vrot.slane %v18547_v29, 7  ;;  %v14455_v48 = vadd.f32 %v14128_v0, %v13998_v56  ;;  %v2458_v46 = vshrl.u32 %v1769_v58, 16  ;;  %v2509_v23 = vld [vmem:[#allocation2 + $0x310] sm:$0x1] }
 0x38c   :  { %v2933_v35 = vsel %vm11748_vm5, %v2928_v11, %v2932_v41  ;;  %v3735_v55 = vrot.slane %v18548_v20, 7  ;;  %v2478_v9 = vsel %vm11752_vm7, %v2470_v50, %v2477_v43  ;;  %v14465_v14 = vadd.f32 %v14160_v2, %v14032_v57  ;;  %v7578_v29 = vpop.f32.mrf.mxu1  ;;  %v3762_v2 = vld [vmem:[#allocation2 + $0x28] sm:$0x1] }
 0x38d   :  { %v9818_v47 = vcombine.low %v2925_v7, %v2933_v35  ;;  %v3729_v56 = vor.u32 %v18550_v51, %v3726_v13  ;;  %v3731_v0 = vrot.slane %v3726_v13, 4  ;;  %v9660_v58 = vrot.slane %v2458_v46, 11  ;;  %v3055_v35 = vld [vmem:[#allocation2 + $0x334] sm:$0x8] }
 0x38e   :  { %v3738_v11 = vor.u32 %v18549_v19, %v3735_v55  ;;  %v18987_v41 = vor.u32 %v14350_v39, %v14340_v22  ;;  %v18988_v50 = vor.u32 %v14356_v6, %v14352_v26  ;;  %v2944_v57 = vshll.u32 %v2509_v23, 16  ;;  %v14486_v55 = vld [vmem:[#allocation2 + $0x338] sm:$0xf]  ;;  %v14499_v19 = vld [vmem:[#allocation2 + $0x33c] sm:$0xf] }
 0x38f   :  { %7997 = vmatmul.mubr.bf16.gmra.mxu0 %v9818_v47  ;;  %v3730_v7 = vsel %vm11752_vm7, %v9691_v37, %v3729_v56  ;;  %v2469_v29 = vsel %vm11752_vm7, %v9660_v58, %v14412_v18  ;;  %v18989_v13 = vshrl.u32 %v12664_v24, 16  ;;  %v18990_v39 = vshll.u32 %v12664_v24, 16  ;;  %v14493_v56 = vpop.f32.mrf.mxu0 }
 0x390   :  { %v2937_v20 = vrot.slane %v18987_v41, 4  ;;  %v2942_v43 = vrot.slane %v18988_v50, 4  ;;  %v3739_v6 = vsel %vm11752_vm7, %v3731_v0, %v3738_v11  ;;  %v9756_v47 = vcombine.low %v2469_v29, %v2478_v9 }
 0x391   :  { %v3794_v46 = vrot.slane %v18989_v13, 4  ;;  %v3795_v22 = vrot.slane %v18990_v39, 5  ;;  %v2946_v23 = vrot.slane %v2944_v57, 5  ;;  %v9851_v18 = vcombine.low %v3730_v7, %v3739_v6  ;;  %v14501_v51 = vpop.f32.mrf.mxu1  ;;  %v7856_v11 = vpop.f32.mrf.mxu0 }
 0x392   :  { %v2939_v37 = vsel %vm11748_vm5, %v2937_v20, %v14352_v26  ;;  %v18991_v41 = vshll.u32 %v12668_v61, 16  ;;  %v18992_v13 = vshrl.u32 %v12668_v61, 16  ;;  %7724 = vmatmul.mubr.bf16.gmra.mxu1 %v9756_v47  ;;  %v3804_v26 = vshll.u32 %v3762_v2, 16 }
 0x393   :  { %v3796_v58 = vor.u32 %v3795_v22, %v3794_v46  ;;  %v2947_v9 = vsel %vm11748_vm5, %v2942_v43, %v2946_v23  ;;  %v3741_v20 = vshrl.u32 %v3055_v35, 16  ;;  %v18554_v0 = vshrl.u32 %v14486_v55, 16  ;;  %8004 = vmatprep.mubr.bf16.mxu0 %v9851_v18  ;;  %v7583_v22 = vpop.f32.mrf.mxu1  ;;  %v2510_v43 = vld [vmem:[#allocation2 + $0x328] sm:$0x1]  ;;  %v14510_v2 = vpop.f32.mrf.mxu0 }
 0x394   :  { %v3798_v50 = vrot.slane %v18991_v41, 5  ;;  %v3800_v39 = vrot.slane %v18992_v13, 4  ;;  %v9819_v57 = vcombine.low %v2939_v37, %v2947_v9  ;;  %v18552_v46 = vshll.u32 %v14486_v55, 16 }
 0x395   :  { %v3797_v7 = vrot.slane %v3796_v58, 4  ;;  %v3806_v6 = vrot.slane %v3804_v26, 5  ;;  %v9692_v41 = vrot.slane %v3741_v20, 11  ;;  %v3748_v47 = vrot.slane %v18554_v0, 7  ;;  %v14519_v58 = vpop.f32.mrf.mxu1  ;;  %v7859_v11 = vpop.f32.mrf.mxu0 }
 0x396   :  { %v3801_v29 = vor.u32 %v3800_v39, %v3798_v50  ;;  %v18551_v13 = vshrl.u32 %v14499_v19, 16  ;;  %v18553_v37 = vshll.u32 %v14499_v19, 16  ;;  %v14517_v18 = vadd.f32 %v14191_v60, %v14052_v16 }
 0x397   :  { %v3799_v35 = vsel %vm11748_vm5, %v3797_v7, %v3798_v50  ;;  %v3751_v39 = vor.u32 %v18552_v46, %v3748_v47  ;;  %v3753_v9 = vrot.slane %v3748_v47, 4  ;;  %v14527_v20 = vadd.f32 %v14221_v32, %v14093_v10  ;;  %v3763_v50 = vld [vmem:[#allocation2 + $0x40] sm:$0x1]  ;;  %8005 = vmatmul.mubr.bf16.gmra.mxu0 %v9819_v57  ;;  %v4243_v47 = vld [vmem:[#allocation2 + $0x34] sm:$0x8] }
 0x398   :  { %v3802_v23 = vrot.slane %v3801_v29, 4  ;;  %v3757_v26 = vrot.slane %v18551_v13, 7  ;;  %v2951_v60 = vrot.slane %v2950_v49, 4  ;;  %v18993_v7 = vor.u32 %v14422_v34, %v14418_v62  ;;  %v7586_v13 = vpop.f32.mrf.mxu1 }
 0x399   :  { %v2958_v22 = vshll.u32 %v2510_v43, 16  ;;  %v3752_v10 = vsel %vm11752_vm7, %v9692_v41, %v3751_v39  ;;  %v18994_v57 = vshrl.u32 %v12702_v21, 16  ;;  %v18995_v53 = vshll.u32 %v12702_v21, 16  ;;  %v18996_v13 = vld [vmem:[#allocation34_spill] sm:$0xff]  ;;  %v14553_v41 = vld [vmem:[%s18265_s4 + $0x230] sm:$0xff]   ;;  %v14555_v39 = vpop.f32.mrf.mxu0 }
 0x39a   :  { %v3807_v16 = vsel %vm11748_vm5, %v3802_v23, %v3806_v6  ;;  %v2956_v29 = vrot.slane %v18993_v7, 4  ;;  %v3760_v32 = vor.u32 %v18553_v37, %v3757_v26  ;;  %v4244_v23 = vld [vmem:[#allocation2 + $0x38] sm:$0xf]  ;;  %v2953_v52 = vsel %vm11748_vm5, %v2951_v60, %v14418_v62  ;;  %v14561_v21 = vld [vmem:[#allocation2 + $0x3c] sm:$0xf] }
 0x39b   :  { %v9885_v46 = vcombine.low %v3799_v35, %v3807_v16  ;;  %v3808_v6 = vrot.slane %v18994_v57, 4  ;;  %v2960_v34 = vrot.slane %v2958_v22, 5  ;;  %v3809_v49 = vrot.slane %v18995_v53, 5  ;;  %18999 = vst [vmem:[#allocation34_spill] sm:$0xff] %v14561_v21 }
 0x39c   :  { %v18997_v43 = vshll.u32 %v18996_v13, 16  ;;  %v3761_v26 = vsel %vm11752_vm7, %v3753_v9, %v3760_v32  ;;  %v18998_v62 = vshrl.u32 %v18996_v13, 16  ;;  %v3818_v16 = vshll.u32 %v3763_v50, 16  ;;  %v14571_v50 = vld [vmem:[%s18265_s4 + $0x238] sm:$0xff]  }
 0x39d   :  { %8053 = vmatprep.mubr.bf16.mxu1 %v9885_v46  ;;  %v4340_v60 = vshrl.u32 %v4243_v47, 16  ;;  %v9852_v7 = vcombine.low %v3752_v10, %v3761_v26  ;;  %v19000_v22 = vcombine.low %v12664_v24, %v12668_v61  ;;  %v2961_v57 = vsel %vm11748_vm5, %v2956_v29, %v2960_v34  ;;  %v14574_v47 = vpop.f32.mrf.mxu1 }
 0x39e   :  { %v3812_v35 = vrot.slane %v18997_v43, 5  ;;  %v3814_v11 = vrot.slane %v18998_v62, 4  ;;  %v3810_v53 = vor.u32 %v3809_v49, %v3808_v6  ;;  %v4345_v46 = vshrl.u32 %v4244_v23, 16  ;;  %v7864_v43 = vpop.f32.mrf.mxu0 }
 0x39f   :  { %8054 = vmatmul.mubr.bf16.vlgmr.msra.gmra.mxu1 %v19000_v22  ;;  %v9820_v37 = vcombine.low %v2953_v52, %v2961_v57  ;;  %v3820_v32 = vrot.slane %v3818_v16, 5  ;;  %v9693_v13 = vrot.slane %v4340_v60, 11  ;;  %8012 = vmatprep.mubr.bf16.mxu0 %v9852_v7  ;;  %v4348_v29 = vshll.u32 %v4244_v23, 16  ;;  %v14583_v52 = vld [vmem:[%s18265_s4 + $0x228] sm:$0xff]  }
 0x3a0   :  { %v3815_v9 = vor.u32 %v3814_v11, %v3812_v35  ;;  %10576 = vmatpush3.bf16.msra.mxu1 %v14571_v50  ;;  %v3811_v24 = vrot.slane %v3810_v53, 4  ;;  %v4347_v61 = vrot.slane %v4345_v46, 7  ;;  %v4354_v10 = vshrl.u32 %v14561_v21, 16  ;;  %v14577_v6 = vpop.f32.mrf.mxu0  ;;  %v7591_v11 = vpop.f32.mrf.mxu1 }
 0x3a1   :  { %10569 = vmatprep.subr.bf16.mxu1 %v14553_v41  ;;  %v18555_v49 = vshll.u32 %v14561_v21, 16  ;;  %v14586_v26 = vrot.slane %v4345_v46, 4  ;;  %v9949_v62 = vcombine.low %v4244_v23, %v14561_v21  ;;  %8013 = vmatmul.mubr.bf16.gmra.mxu0 %v9820_v37  ;;  %v14593_v43 = vrot.slane %v4348_v29, 5  ;;  %v3764_v37 = vld [vmem:[#allocation2 + $0x58] sm:$0x1] }
 0x3a2   :  { %v3816_v34 = vrot.slane %v3815_v9, 4  ;;  %v3813_v16 = vsel %vm11748_vm5, %v3811_v24, %v3812_v35  ;;  %v4350_v60 = vor.u32 %v4348_v29, %v4347_v61  ;;  %v4352_v7 = vrot.slane %v4347_v61, 4  ;;  %v7867_v57 = vpop.f32.mrf.mxu0  ;;  %v14601_v46 = vld [vmem:[#allocation2 + $0x50] sm:$0xf]  ;;  %v14603_v35 = vpop.f32.mrf.mxu1  ;;  %v10794_v29 = vld [vmem:[#allocation2 + $0x38] sm:$0xf] }
 0x3a3   :  { %19001 = vst [vmem:[#allocation70_spill] sm:$0xff] %v14586_v26  ;;  %v4356_v22 = vrot.slane %v4354_v10, 7  ;;  %19002 = vst [vmem:[#allocation71_spill] sm:$0xff] %v14593_v43  ;;  %v14595_v9 = vrot.slane %v4354_v10, 4  ;;  %8342 = vmatprep.mubr.bf16.mxu0 %v9949_v62  ;;  %v14599_v23 = vadd.f32 %v14250_v4, %v14123_v12  ;;  %v10795_v10 = vld [vmem:[#allocation2 + $0x3c] sm:$0xf]  ;;  %v14613_v12 = vadd.f32 %v14282_v5, %v14172_v40 }
 0x3a4   :  { %v3821_v53 = vsel %vm11748_vm5, %v3816_v34, %v3820_v32  ;;  %10577 = vmatpush3.bf16.msra.mxu1 %v14553_v41  ;;  %v4351_v32 = vsel %vm11752_vm7, %v9693_v13, %v4350_v60  ;;  %v9854_v34 = vcombine.low %v10794_v29, %v10795_v10  ;;  %v4248_v62 = vld [vmem:[#allocation2 + $0x54] sm:$0xf]  ;;  %v19006_v4 = vld [vmem:[#allocation26_spill] sm:$0xff]  ;;  %v19009_v13 = vld [vmem:[#allocation27_spill] sm:$0xff] }
 0x3a5   :  { %19003 = vst [vmem:[#allocation72_spill] sm:$0xff] %v14595_v9  ;;  %19004 = vst [vmem:[#allocation73_spill] sm:$0xff] %v14599_v23  ;;  %v9886_v24 = vcombine.low %v3813_v16, %v3821_v53  ;;  %v4359_v61 = vor.u32 %v18555_v49, %v4356_v22  ;;  %10570 = vmatprep.subr.bf16.mxu1 %v14583_v52  ;;  %v19007_v11 = vshrl.u32 %v19006_v4, 16  ;;  %v19008_v16 = vshll.u32 %v19006_v4, 16  ;;  %v7594_v22 = vpop.f32.mrf.mxu1  ;;  %v14624_v29 = vld [vmem:[%s18265_s4 + $0x220] sm:$0xff]   ;;  %v14632_v9 = vpop.f32.mrf.mxu0 }
 0x3a6   :  { %19005 = vst [vmem:[#allocation74_spill] sm:$0xff] %v14613_v12  ;;  %v19010_v60 = vshll.u32 %v19009_v13, 16  ;;  %v19011_v5 = vshrl.u32 %v19009_v13, 16  ;;  %v4367_v4 = vshrl.u32 %v14601_v46, 16  ;;  %v4376_v22 = vshrl.u32 %v4248_v62, 16 }
 0x3a7   :  { %v3822_v57 = vrot.slane %v19007_v11, 4  ;;  %v3823_v53 = vrot.slane %v19008_v16, 5  ;;  %8061 = vmatprep.mubr.bf16.mxu1 %v9886_v24  ;;  %v4360_v40 = vsel %vm11752_vm7, %v4352_v7, %v4359_v61  ;;  %v3832_v11 = vshll.u32 %v3764_v37, 16  ;;  %v5044_v13 = vld [vmem:[#allocation2 + $0x58] sm:$0x1]  ;;  %v7872_v12 = vpop.f32.mrf.mxu0 }
 0x3a8   :  { %v3826_v0 = vrot.slane %v19010_v60, 5  ;;  %v3828_v10 = vrot.slane %v19011_v5, 4  ;;  %v9917_v16 = vcombine.low %v4351_v32, %v4360_v40  ;;  %8062 = vmatmul.mubr.bf16.gmra.mxu1 %v9854_v34  ;;  %v4370_v60 = vshll.u32 %v14601_v46, 16  ;;  %v14638_v40 = vpop.f32.mrf.mxu1 }
 0x3a9   :  { %v3824_v49 = vor.u32 %v3823_v53, %v3822_v57  ;;  %v3834_v43 = vrot.slane %v3832_v11, 5  ;;  %v4369_v24 = vrot.slane %v4367_v4, 7  ;;  %v4379_v26 = vshll.u32 %v4248_v62, 16  ;;  %10578 = vmatpush3.bf16.msra.mxu1 %v14583_v52  ;;  %v14643_v23 = vpop.f32.mrf.mxu0 }
 0x3aa   :  { %v3829_v21 = vor.u32 %v3828_v10, %v3826_v0  ;;  %v4378_v61 = vrot.slane %v4376_v22, 7  ;;  %v5089_v37 = vrot.slane %v4367_v4, 4  ;;  %v5090_v5 = vrot.slane %v4370_v60, 5  ;;  %10571 = vmatprep.subr.bf16.mxu1 %v14624_v29  ;;  %8343 = vmatmul.mubr.bf16.vlgmr.msra.gmra.mxu0 %v9917_v16 }
 0x3ab   :  { %v3825_v7 = vrot.slane %v3824_v49, 4  ;;  %v14636_v34 = vor.u32 %v4370_v60, %v4369_v24  ;;  %v4374_v57 = vrot.slane %v4369_v24, 4  ;;  %v5093_v53 = vrot.slane %v4379_v26, 5  ;;  %10489 = vmatpush3.bf16.msra.mxu0 %v14571_v50  ;;  %v19012_v60 = vld [vmem:[#allocation58_spill] sm:$0xff] }
 0x3ac   :  { %v3830_v32 = vrot.slane %v3829_v21, 4  ;;  %v4381_v49 = vor.u32 %v4379_v26, %v4378_v61  ;;  %v5091_v11 = vor.u32 %v5090_v5, %v5089_v37  ;;  %v5095_v4 = vrot.slane %v4376_v22, 4  ;;  %10490 = vmatprep.subr.bf16.mxu0 %v14553_v41  ;;  %v10797_v61 = vld [vmem:[#allocation2 + $0x54] sm:$0xf]  ;;  %v3765_v5 = vld [vmem:[#allocation2 + $0x70] sm:$0x1] }
 0x3ad   :  { %v3827_v10 = vsel %vm11748_vm5, %v3825_v7, %v3826_v0  ;;  %v5099_v12 = vshll.u32 %v5044_v13, 16  ;;  %v9950_v16 = vcombine.low %v14601_v46, %v4248_v62  ;;  %v14650_v24 = vadd.f32 %v14312_v59, %v19012_v60  ;;  %v7599_v0 = vpop.f32.mrf.mxu1  ;;  %10579 = vmatpush3.bf16.msra.mxu1 %v14624_v29  ;;  %v10796_v7 = vld [vmem:[#allocation2 + $0x50] sm:$0xf]  ;;  %v7875_v13 = vpop.f32.mrf.mxu0  ;;  %v19015_v46 = vld [vmem:[#allocation28_spill] sm:$0xff] }
 0x3ae   :  { %v3835_v21 = vsel %vm11748_vm5, %v3830_v32, %v3834_v43  ;;  %v5092_v26 = vrot.slane %v5091_v11, 4  ;;  %v5096_v22 = vor.u32 %v5095_v4, %v5093_v53  ;;  %v9855_v37 = vcombine.low %v10796_v7, %v10797_v61  ;;  %v4246_v43 = vld [vmem:[#allocation2 + $0x4c] sm:$0x8]  ;;  %v4250_v11 = vld [vmem:[#allocation2 + $0x68] sm:$0xf] }
 0x3af   :  { %19013 = vst [vmem:[#allocation26_spill] sm:$0xff] %v14650_v24  ;;  %v9887_v50 = vcombine.low %v3827_v10, %v3835_v21  ;;  %v5101_v32 = vrot.slane %v5099_v12, 5  ;;  %8350 = vmatprep.mubr.bf16.mxu0 %v9950_v16  ;;  %v14656_v59 = vadd.f32 %v14348_v63, %v14231_v17  ;;  %v19016_v62 = vshrl.u32 %v19015_v46, 16  ;;  %v14662_v4 = vpop.f32.mrf.mxu1  ;;  %v19018_v12 = vld [vmem:[#allocation29_spill] sm:$0xff]  ;;  %10491 = vmatpush3.bf16.msra.mxu0 %v14553_v41  ;;  %v14671_v13 = vpop.f32.mrf.mxu0 }
 0x3b0   :  { %v19017_v0 = vshll.u32 %v19015_v46, 16  ;;  %v5094_v21 = vsel %vm11748_vm5, %v5092_v26, %v5093_v53  ;;  %v5097_v7 = vrot.slane %v5096_v22, 4  ;;  %v19019_v16 = vshll.u32 %v19018_v12, 16  ;;  %10492 = vmatprep.subr.bf16.mxu0 %v14583_v52 }
 0x3b1   :  { %19014 = vst [vmem:[#allocation27_spill] sm:$0xff] %v14656_v59  ;;  %v3836_v60 = vrot.slane %v19016_v62, 4  ;;  %8069 = vmatprep.mubr.bf16.mxu1 %v9887_v50  ;;  %v19020_v17 = vshrl.u32 %v19018_v12, 16  ;;  %v3846_v62 = vshll.u32 %v3765_v5, 16  ;;  %v4382_v50 = vsel %vm11752_vm7, %v4374_v57, %v4381_v49  ;;  %v14675_v59 = vld [vmem:[#allocation2 + $0x6c] sm:$0xf]  ;;  %v7602_v53 = vpop.f32.mrf.mxu1 }
 0x3b2   :  { %v3837_v10 = vrot.slane %v19017_v0, 5  ;;  %v3840_v61 = vrot.slane %v19019_v16, 5  ;;  %8070 = vmatmul.mubr.bf16.gmra.mxu1 %v9855_v37  ;;  %v4362_v0 = vshrl.u32 %v4246_v43, 16  ;;  %19021 = vst [vmem:[#allocation58_spill] sm:$0xff] %v14675_v59  ;;  %v5102_v26 = vsel %vm11748_vm5, %v5097_v7, %v5101_v32  ;;  %v7880_v16 = vpop.f32.mrf.mxu0  ;;  %v4249_v49 = vld [vmem:[#allocation2 + $0x64] sm:$0x8] }
 0x3b3   :  { %v3842_v63 = vrot.slane %v19020_v17, 4  ;;  %v4389_v12 = vshrl.u32 %v4250_v11, 16  ;;  %v4392_v41 = vshll.u32 %v4250_v11, 16  ;;  %v14680_v17 = vcombine.low %v5094_v21, %v5102_v26  ;;  %10493 = vmatpush3.bf16.msra.mxu0 %v14583_v52  ;;  %v14699_v52 = vld [vmem:[#allocation2 + $0x80] sm:$0xf] }
 0x3b4   :  { %v3838_v46 = vor.u32 %v3837_v10, %v3836_v60  ;;  %v3848_v5 = vrot.slane %v3846_v62, 5  ;;  %v9694_v43 = vrot.slane %v4362_v0, 11  ;;  %v4398_v57 = vshrl.u32 %v14675_v59, 16  ;;  %v14684_v53 = vpop.f32.mrf.mxu0  ;;  %10494 = vmatprep.subr.bf16.mxu0 %v14624_v29 }
 0x3b5   :  { %v3843_v22 = vor.u32 %v3842_v63, %v3840_v61  ;;  %19022 = vst [vmem:[#allocation28_spill] sm:$0xff] %v14680_v17  ;;  %v4391_v10 = vrot.slane %v4389_v12, 7  ;;  %v14692_v7 = vrot.slane %v4389_v12, 4  ;;  %v14694_v63 = vrot.slane %v4392_v41, 5  ;;  %v19032_v17 = vld [vmem:[#allocation31_spill] sm:$0xff] }
 0x3b6   :  { %v3839_v37 = vrot.slane %v3838_v46, 4  ;;  %v4373_v21 = vsel %vm11752_vm7, %v9694_v43, %v14636_v34  ;;  %v14703_v34 = vrot.slane %v4398_v57, 4  ;;  %v9951_v12 = vcombine.low %v4250_v11, %v14675_v59  ;;  %v3766_v43 = vld [vmem:[#allocation2 + $0x88] sm:$0x1] }
 0x3b7   :  { %v3844_v60 = vrot.slane %v3843_v22, 4  ;;  %19023 = vst [vmem:[#allocation29_spill] sm:$0xff] %v14692_v7  ;;  %19024 = vst [vmem:[#allocation75_spill] sm:$0xff] %v14694_v63  ;;  %v9918_v62 = vcombine.low %v4373_v21, %v4382_v50  ;;  %v4394_v0 = vor.u32 %v4392_v41, %v4391_v10  ;;  %v4396_v26 = vrot.slane %v4391_v10, 4  ;;  %v7883_v22 = vpop.f32.mrf.mxu0  ;;  %v10798_v50 = vld [vmem:[#allocation2 + $0x68] sm:$0xf]  ;;  %10495 = vmatpush3.bf16.msra.mxu0 %v14624_v29 }
 0x3b8   :  { %v3841_v32 = vsel %vm11748_vm5, %v3839_v37, %v3840_v61  ;;  %v14701_v61 = vpop.f32.mrf.mxu1  ;;  %v4400_v37 = vrot.slane %v4398_v57, 7  ;;  %19025 = vst [vmem:[#allocation76_spill] sm:$0xff] %v14703_v34  ;;  %v10799_v41 = vld [vmem:[#allocation2 + $0x6c] sm:$0xf]  ;;  %v14712_v10 = vadd.f32 %v14408_v45, %v14299_v27  ;;  %v19034_v27 = vshrl.u32 %v19032_v17, 16 }
 0x3b9   :  { %v3849_v46 = vsel %vm11748_vm5, %v3844_v60, %v3848_v5  ;;  %8351 = vmatmul.mubr.bf16.gmra.mxu0 %v9918_v62  ;;  %v14708_v5 = vadd.f32 %v14378_v3, %v14258_v54  ;;  %v9856_v60 = vcombine.low %v10798_v50, %v10799_v41  ;;  %v19030_v62 = vshll.u32 %v14675_v59, 16 }
 0x3ba   :  { %v9888_v16 = vcombine.low %v3841_v32, %v3849_v46  ;;  %19027 = vst [vmem:[#allocation78_spill] sm:$0xff] %v14712_v10  ;;  %v19028_v32 = vld [vmem:[#allocation30_spill] sm:$0xff]  ;;  %v14716_v46 = vld [vmem:[#allocation2 + $0x84] sm:$0xf]  ;;  %v7607_v11 = vpop.f32.mrf.mxu1  ;;  %8358 = vmatprep.mubr.bf16.mxu0 %v9951_v12  ;;  %v19033_v50 = vshll.u32 %v19032_v17, 16  ;;  %v3856_v45 = vrot.slane %v19034_v27, 4 }
 0x3bb   :  { %19026 = vst [vmem:[#allocation77_spill] sm:$0xff] %v14708_v5  ;;  %v19029_v21 = vshrl.u32 %v19028_v32, 16  ;;  %v4403_v22 = vor.u32 %v19030_v62, %v4400_v37  ;;  %v19031_v54 = vshll.u32 %v19028_v32, 16  ;;  %v3860_v11 = vshll.u32 %v3766_v43, 16 }
 0x3bc   :  { %8077 = vmatprep.mubr.bf16.mxu1 %v9888_v16  ;;  %v3854_v41 = vrot.slane %v19033_v50, 5  ;;  %v4384_v16 = vshrl.u32 %v4249_v49, 16  ;;  %v4411_v10 = vshrl.u32 %v14699_v52, 16  ;;  %v4414_v37 = vshll.u32 %v14699_v52, 16  ;;  %v14731_v12 = vpop.f32.mrf.mxu1 }
 0x3bd   :  { %v3850_v57 = vrot.slane %v19029_v21, 4  ;;  %v3851_v3 = vrot.slane %v19031_v54, 5  ;;  %v10756_v21 = vld [vmem:[%s18265_s4 + $0x218] sm:$0xff]   ;;  %8078 = vmatmul.mubr.bf16.gmra.mxu1 %v9856_v60  ;;  %v4404_v17 = vsel %vm11752_vm7, %v4396_v26, %v4403_v22  ;;  %v4420_v54 = vshrl.u32 %v14716_v46, 16 }
 0x3be   :  { %v3857_v62 = vor.u32 %v3856_v45, %v3854_v41  ;;  %10496 = vmatprep.subr.bf16.mxu0 %v10756_v21  ;;  %10572 = vmatprep.subr.bf16.mxu1 %v10756_v21  ;;  %v3862_v60 = vrot.slane %v3860_v11, 5  ;;  %v9695_v43 = vrot.slane %v4384_v16, 11  ;;  %v4413_v49 = vrot.slane %v4411_v10, 7  ;;  %v7610_v27 = vpop.f32.mrf.mxu1 }
 0x3bf   :  { %v3852_v32 = vor.u32 %v3851_v3, %v3850_v57  ;;  %v4423_v50 = vshll.u32 %v14716_v46, 16  ;;  %10580 = vmatpush3.bf16.msra.mxu1 %v10756_v21  ;;  %v4422_v59 = vrot.slane %v4420_v54, 7  ;;  %v14738_v29 = vrot.slane %v4411_v10, 4  ;;  %v14740_v57 = vpop.f32.mrf.mxu0  ;;  %10497 = vmatpush3.bf16.msra.mxu0 %v10756_v21 }
 0x3c0   :  { %v3858_v5 = vrot.slane %v3857_v62, 4  ;;  %v4395_v26 = vsel %vm11752_vm7, %v9695_v43, %v4394_v0  ;;  %v4416_v22 = vor.u32 %v4414_v37, %v4413_v49  ;;  %v4418_v3 = vrot.slane %v4413_v49, 4  ;;  %v4252_v43 = vld [vmem:[#allocation2 + $0x7c] sm:$0x8]  ;;  %v14756_v21 = vpop.f32.mrf.mxu1 }
 0x3c1   :  { %v3853_v34 = vrot.slane %v3852_v32, 4  ;;  %19035 = vst [vmem:[#allocation30_spill] sm:$0xff] %v14738_v29  ;;  %v14744_v45 = vrot.slane %v4414_v37, 5  ;;  %v9919_v32 = vcombine.low %v4395_v26, %v4404_v17  ;;  %v4425_v62 = vor.u32 %v4423_v50, %v4422_v59  ;;  %v7888_v10 = vpop.f32.mrf.mxu0  ;;  %v3767_v37 = vld [vmem:[#allocation2 + $0xa0] sm:$0x1] }
 0x3c2   :  { %v3863_v16 = vsel %vm11748_vm5, %v3858_v5, %v3862_v60  ;;  %v14752_v7 = vrot.slane %v4423_v50, 5  ;;  %v14754_v0 = vrot.slane %v4420_v54, 4  ;;  %v14762_v59 = vadd.f32 %v14438_v15, %v14323_v44  ;;  %v10800_v5 = vld [vmem:[#allocation2 + $0x80] sm:$0xf]  ;;  %v4256_v54 = vld [vmem:[#allocation2 + $0x98] sm:$0xf] }
 0x3c3   :  { %19036 = vst [vmem:[#allocation31_spill] sm:$0xff] %v14744_v45  ;;  %v3855_v11 = vsel %vm11748_vm5, %v3853_v34, %v3854_v41  ;;  %8359 = vmatmul.mubr.bf16.gmra.mxu0 %v9919_v32  ;;  %v9952_v34 = vcombine.low %v14699_v52, %v14716_v46  ;;  %v10801_v41 = vld [vmem:[#allocation2 + $0x84] sm:$0xf]  ;;  %v14766_v60 = vadd.f32 %v14493_v56, %v14354_v28  ;;  %v14768_v49 = vld [vmem:[#allocation2 + $0x9c] sm:$0xf]  ;;  %v14770_v50 = vpop.f32.mrf.mxu0  ;;  %v19042_v46 = vld [vmem:[#allocation32_spill] sm:$0xff]  ;;  %v7615_v28 = vpop.f32.mrf.mxu1 }
 0x3c4   :  { %v9889_v27 = vcombine.low %v3855_v11, %v3863_v16  ;;  %19037 = vst [vmem:[#allocation79_spill] sm:$0xff] %v14752_v7  ;;  %19038 = vst [vmem:[#allocation80_spill] sm:$0xff] %v14754_v0  ;;  %v9857_v17 = vcombine.low %v10800_v5, %v10801_v41  ;;  %v19043_v26 = vshrl.u32 %v19042_v46, 16  ;;  %v19044_v15 = vshll.u32 %v19042_v46, 16  ;;  %v19045_v16 = vld [vmem:[#allocation33_spill] sm:$0xff] }
 0x3c5   :  { %19039 = vst [vmem:[#allocation81_spill] sm:$0xff] %v14762_v59  ;;  %19040 = vst [vmem:[#allocation82_spill] sm:$0xff] %v14766_v60  ;;  %v19046_v32 = vshll.u32 %v19045_v16, 16  ;;  %8366 = vmatprep.mubr.bf16.mxu0 %v9952_v34  ;;  %v19047_v56 = vshrl.u32 %v19045_v16, 16  ;;  %v3874_v41 = vshll.u32 %v3767_v37, 16  ;;  %v4426_v52 = vsel %vm11752_vm7, %v4418_v3, %v4425_v62  ;;  %v7891_v63 = vpop.f32.mrf.mxu0 }
 0x3c6   :  { %19041 = vst [vmem:[#allocation83_spill] sm:$0xff] %v14768_v49  ;;  %8085 = vmatprep.mubr.bf16.mxu1 %v9889_v27  ;;  %v3864_v44 = vrot.slane %v19043_v26, 4  ;;  %v3865_v11 = vrot.slane %v19044_v15, 5  ;;  %v4406_v27 = vshrl.u32 %v4252_v43, 16  ;;  %v4433_v26 = vshrl.u32 %v4256_v54, 16  ;;  %v14785_v15 = vpop.f32.mrf.mxu1 }
 0x3c7   :  { %v3868_v10 = vrot.slane %v19046_v32, 5  ;;  %8086 = vmatmul.mubr.bf16.gmra.mxu1 %v9857_v17  ;;  %v3870_v5 = vrot.slane %v19047_v56, 4  ;;  %v4436_v59 = vshll.u32 %v4256_v54, 16  ;;  %v4442_v46 = vshrl.u32 %v14768_v49, 16  ;;  %v3768_v17 = vld [vmem:[#allocation2 + $0xb8] sm:$0x1] }
 0x3c8   :  { %v3866_v60 = vor.u32 %v3865_v11, %v3864_v44  ;;  %v3876_v28 = vrot.slane %v3874_v41, 5  ;;  %v9696_v34 = vrot.slane %v4406_v27, 11  ;;  %v4435_v56 = vrot.slane %v4433_v26, 7  ;;  %v7618_v7 = vpop.f32.mrf.mxu1  ;;  %v14796_v11 = vpop.f32.mrf.mxu0 }
 0x3c9   :  { %v3871_v32 = vor.u32 %v3870_v5, %v3868_v10  ;;  %v4444_v37 = vrot.slane %v4442_v46, 7  ;;  %v14788_v43 = vrot.slane %v4433_v26, 4  ;;  %v14792_v62 = vrot.slane %v4436_v59, 5 }
 0x3ca   :  { %v3867_v16 = vrot.slane %v3866_v60, 4  ;;  %v4417_v63 = vsel %vm11752_vm7, %v9696_v34, %v4416_v22  ;;  %v14794_v44 = vrot.slane %v4442_v46, 4  ;;  %v4438_v60 = vor.u32 %v4436_v59, %v4435_v56  ;;  %v4255_v34 = vld [vmem:[#allocation2 + $0x94] sm:$0x8]  ;;  %v10802_v59 = vld [vmem:[#allocation2 + $0x98] sm:$0xf] }
 0x3cb   :  { %19048 = vst [vmem:[#allocation32_spill] sm:$0xff] %v14788_v43  ;;  %v3872_v3 = vrot.slane %v3871_v32, 4  ;;  %19049 = vst [vmem:[#allocation33_spill] sm:$0xff] %v14792_v62  ;;  %v9920_v41 = vcombine.low %v4417_v63, %v4426_v52  ;;  %v4440_v27 = vrot.slane %v4435_v56, 4  ;;  %v19051_v26 = vshll.u32 %v14768_v49, 16 }
 0x3cc   :  { %19050 = vst [vmem:[#allocation84_spill] sm:$0xff] %v14794_v44  ;;  %v3869_v5 = vsel %vm11748_vm5, %v3867_v16, %v3868_v10  ;;  %v9953_v22 = vcombine.low %v4256_v54, %v14768_v49  ;;  %v14807_v46 = vadd.f32 %v14510_v2, %v14383_v36  ;;  %v14809_v44 = vld [vmem:[#allocation2 + $0xb0] sm:$0xf]  ;;  %v7896_v10 = vpop.f32.mrf.mxu0  ;;  %v10803_v16 = vld [vmem:[#allocation2 + $0x9c] sm:$0xf] }
 0x3cd   :  { %v3877_v7 = vsel %vm11748_vm5, %v3872_v3, %v3876_v28  ;;  %v4447_v32 = vor.u32 %v19051_v26, %v4444_v37  ;;  %8367 = vmatmul.mubr.bf16.gmra.mxu0 %v9920_v41  ;;  %v9858_v56 = vcombine.low %v10802_v59, %v10803_v16  ;;  %v14813_v28 = vadd.f32 %v14555_v39, %v14420_v30  ;;  %v19054_v37 = vld [vmem:[#allocation3_spill] sm:$0xff]  ;;  %v4260_v63 = vld [vmem:[#allocation2 + $0xb4] sm:$0xf]  ;;  %v14817_v26 = vpop.f32.mrf.mxu1  ;;  %v19057_v10 = vld [vmem:[#allocation54_spill] sm:$0xff] }
 0x3ce   :  { %19052 = vst [vmem:[#allocation85_spill] sm:$0xff] %v14807_v46  ;;  %v9890_v52 = vcombine.low %v3869_v5, %v3877_v7  ;;  %v19055_v3 = vshrl.u32 %v19054_v37, 16  ;;  %8374 = vmatprep.mubr.bf16.mxu0 %v9953_v22  ;;  %v19056_v36 = vshll.u32 %v19054_v37, 16  ;;  %v19058_v5 = vshll.u32 %v19057_v10, 16  ;;  %v14825_v46 = vpop.f32.mrf.mxu0 }
 0x3cf   :  { %19053 = vst [vmem:[#allocation86_spill] sm:$0xff] %v14813_v28  ;;  %v19059_v7 = vshrl.u32 %v19057_v10, 16  ;;  %v3888_v16 = vshll.u32 %v3768_v17, 16  ;;  %v4428_v30 = vshrl.u32 %v4255_v34, 16  ;;  %v4448_v39 = vsel %vm11752_vm7, %v4440_v27, %v4447_v32  ;;  %v7623_v37 = vpop.f32.mrf.mxu1 }
 0x3d0   :  { %v3878_v54 = vrot.slane %v19055_v3, 4  ;;  %v3879_v2 = vrot.slane %v19056_v36, 5  ;;  %v3882_v41 = vrot.slane %v19058_v5, 5  ;;  %8093 = vmatprep.mubr.bf16.mxu1 %v9890_v52  ;;  %v4455_v3 = vshrl.u32 %v14809_v44, 16  ;;  %v7899_v10 = vpop.f32.mrf.mxu0 }
 0x3d1   :  { %v3884_v59 = vrot.slane %v19059_v7, 4  ;;  %v4458_v22 = vshll.u32 %v14809_v44, 16  ;;  %8094 = vmatmul.mubr.bf16.gmra.mxu1 %v9858_v56  ;;  %v3890_v5 = vrot.slane %v3888_v16, 5  ;;  %v4464_v49 = vshrl.u32 %v4260_v63, 16  ;;  %v14833_v34 = vpop.f32.mrf.mxu1 }
 0x3d2   :  { %v3880_v36 = vor.u32 %v3879_v2, %v3878_v54  ;;  %v9697_v7 = vrot.slane %v4428_v30, 11  ;;  %v4457_v17 = vrot.slane %v4455_v3, 7  ;;  %v4467_v62 = vshll.u32 %v4260_v63, 16 }
 0x3d3   :  { %v3885_v28 = vor.u32 %v3884_v59, %v3882_v41  ;;  %v14831_v43 = vrot.slane %v4455_v3, 4  ;;  %v4466_v32 = vrot.slane %v4464_v49, 7  ;;  %v14835_v0 = vrot.slane %v4458_v22, 5  ;;  %v7626_v16 = vpop.f32.mrf.mxu1 }
 0x3d4   :  { %v3881_v52 = vrot.slane %v3880_v36, 4  ;;  %v4439_v56 = vsel %vm11752_vm7, %v9697_v7, %v4438_v60  ;;  %v4460_v54 = vor.u32 %v4458_v22, %v4457_v17  ;;  %v4462_v2 = vrot.slane %v4457_v17, 4  ;;  %v3769_v7 = vld [vmem:[#allocation2 + $0xd0] sm:$0x1]  ;;  %v4258_v17 = vld [vmem:[#allocation2 + $0xac] sm:$0x8]  ;;  %v14852_v16 = vpop.f32.mrf.mxu0 }
 0x3d5   :  { %19060 = vst [vmem:[#allocation3_spill] sm:$0xff] %v14831_v43  ;;  %v3886_v27 = vrot.slane %v3885_v28, 4  ;;  %19061 = vst [vmem:[#allocation54_spill] sm:$0xff] %v14835_v0  ;;  %v14839_v59 = vrot.slane %v4467_v62, 5  ;;  %v9921_v37 = vcombine.low %v4439_v56, %v4448_v39  ;;  %v4469_v36 = vor.u32 %v4467_v62, %v4466_v32  ;;  %v14845_v28 = vld [vmem:[#allocation2 + $0xc8] sm:$0xf] }
 0x3d6   :  { %v3883_v30 = vsel %vm11748_vm5, %v3881_v52, %v3882_v41  ;;  %v14849_v60 = vrot.slane %v4464_v49, 4  ;;  %v9954_v22 = vcombine.low %v14809_v44, %v4260_v63  ;;  %v14856_v41 = vadd.f32 %v14577_v6, %v14449_v1  ;;  %v10804_v62 = vld [vmem:[#allocation2 + $0xb0] sm:$0xf]  ;;  %v10805_v39 = vld [vmem:[#allocation2 + $0xb4] sm:$0xf]  ;;  %v19066_v49 = vld [vmem:[#allocation4_spill] sm:$0xff]  ;;  %v14877_v63 = vpop.f32.mrf.mxu1 }
 0x3d7   :  { %19062 = vst [vmem:[#allocation87_spill] sm:$0xff] %v14839_v59  ;;  %v3891_v3 = vsel %vm11748_vm5, %v3886_v27, %v3890_v5  ;;  %8375 = vmatmul.mubr.bf16.gmra.mxu0 %v9921_v37  ;;  %v9859_v5 = vcombine.low %v10804_v62, %v10805_v39  ;;  %v14860_v52 = vadd.f32 %v14632_v9, %v14501_v51  ;;  %v19067_v27 = vshrl.u32 %v19066_v49, 16  ;;  %v14864_v44 = vld [vmem:[#allocation2 + $0xcc] sm:$0xf]  ;;  %v19070_v56 = vld [vmem:[#allocation6_spill] sm:$0xff]  ;;  %v7904_v9 = vpop.f32.mrf.mxu0 }
 0x3d8   :  { %v9891_v10 = vcombine.low %v3883_v30, %v3891_v3  ;;  %19063 = vst [vmem:[#allocation88_spill] sm:$0xff] %v14849_v60  ;;  %19064 = vst [vmem:[#allocation89_spill] sm:$0xff] %v14856_v41  ;;  %8382 = vmatprep.mubr.bf16.mxu0 %v9954_v22  ;;  %v19069_v1 = vshll.u32 %v19066_v49, 16  ;;  %v19071_v30 = vshll.u32 %v19070_v56, 16  ;;  %v19072_v37 = vshrl.u32 %v19070_v56, 16 }
 0x3d9   :  { %19065 = vst [vmem:[#allocation90_spill] sm:$0xff] %v14860_v52  ;;  %v3892_v32 = vrot.slane %v19067_v27, 4  ;;  %19068 = vst [vmem:[#allocation4_spill] sm:$0xff] %v14864_v44  ;;  %v3902_v62 = vshll.u32 %v3769_v7, 16  ;;  %v4450_v39 = vshrl.u32 %v4258_v17, 16  ;;  %v4477_v27 = vshrl.u32 %v14845_v28, 16  ;;  %v14881_v29 = vpop.f32.mrf.mxu0  ;;  %v7631_v17 = vpop.f32.mrf.mxu1 }
 0x3da   :  { %8101 = vmatprep.mubr.bf16.mxu1 %v9891_v10  ;;  %v3893_v6 = vrot.slane %v19069_v1, 5  ;;  %v3896_v3 = vrot.slane %v19071_v30, 5  ;;  %v3898_v51 = vrot.slane %v19072_v37, 4  ;;  %v4470_v10 = vsel %vm11752_vm7, %v4462_v2, %v4469_v36 }
 0x3db   :  { %8102 = vmatmul.mubr.bf16.gmra.mxu1 %v9859_v5  ;;  %v4480_v1 = vshll.u32 %v14845_v28, 16  ;;  %v4486_v30 = vshrl.u32 %v14864_v44, 16  ;;  %v3904_v56 = vrot.slane %v3902_v62, 5  ;;  %v9698_v37 = vrot.slane %v4450_v39, 11  ;;  %v7907_v41 = vpop.f32.mrf.mxu0  ;;  %v14890_v60 = vpop.f32.mrf.mxu1 }
 0x3dc   :  { %v3894_v22 = vor.u32 %v3893_v6, %v3892_v32  ;;  %v3899_v49 = vor.u32 %v3898_v51, %v3896_v3  ;;  %v4479_v5 = vrot.slane %v4477_v27, 7  ;;  %v18566_v7 = vshll.u32 %v14864_v44, 16  ;;  %v3770_v41 = vld [vmem:[#allocation2 + $0xe8] sm:$0x1] }
 0x3dd   :  { %v4488_v36 = vrot.slane %v4486_v30, 7  ;;  %v14884_v52 = vrot.slane %v4477_v27, 4  ;;  %v4461_v32 = vsel %vm11752_vm7, %v9698_v37, %v4460_v54  ;;  %v14888_v59 = vrot.slane %v4480_v1, 5 }
 0x3de   :  { %v3895_v9 = vrot.slane %v3894_v22, 4  ;;  %v3900_v2 = vrot.slane %v3899_v49, 4  ;;  %v4482_v6 = vor.u32 %v4480_v1, %v4479_v5  ;;  %v4484_v51 = vrot.slane %v4479_v5, 4  ;;  %v4261_v49 = vld [vmem:[#allocation2 + $0xc4] sm:$0x8]  ;;  %v7634_v5 = vpop.f32.mrf.mxu1 }
 0x3df   :  { %19073 = vst [vmem:[#allocation6_spill] sm:$0xff] %v14884_v52  ;;  %19074 = vst [vmem:[#allocation91_spill] sm:$0xff] %v14888_v59  ;;  %v9922_v22 = vcombine.low %v4461_v32, %v4470_v10  ;;  %v4491_v27 = vor.u32 %v18566_v7, %v4488_v36  ;;  %v14898_v54 = vrot.slane %v4486_v30, 4  ;;  %v9955_v1 = vcombine.low %v14845_v28, %v14864_v44  ;;  %v10806_v10 = vld [vmem:[#allocation2 + $0xc8] sm:$0xf] }
 0x3e0   :  { %v3897_v62 = vsel %vm11748_vm5, %v3895_v9, %v3896_v3  ;;  %v3905_v39 = vsel %vm11748_vm5, %v3900_v2, %v3904_v56  ;;  %v14904_v37 = vadd.f32 %v14643_v23, %v14519_v58  ;;  %v14906_v3 = vld [vmem:[#allocation2 + $0xe0] sm:$0xf]  ;;  %v10807_v56 = vld [vmem:[#allocation2 + $0xcc] sm:$0xf]  ;;  %v14910_v2 = vadd.f32 %v14671_v13, %v14574_v47  ;;  %v14916_v58 = vpop.f32.mrf.mxu0  ;;  %v10765_v23 = vld [vmem:[%s18265_s4 + $0x210] sm:$0xff]   ;;  %v14929_v0 = vpop.f32.mrf.mxu1 }
 0x3e1   :  { %v9892_v17 = vcombine.low %v3897_v62, %v3905_v39  ;;  %19075 = vst [vmem:[#allocation92_spill] sm:$0xff] %v14898_v54  ;;  %8383 = vmatmul.mubr.bf16.gmra.mxu0 %v9922_v22  ;;  %v9860_v9 = vcombine.low %v10806_v10, %v10807_v56  ;;  %v19078_v30 = vld [vmem:[#allocation8_spill] sm:$0xff]  ;;  %v4266_v39 = vld [vmem:[#allocation2 + $0xe4] sm:$0xf]  ;;  %v19081_v22 = vld [vmem:[#allocation5_spill] sm:$0xff]  ;;  %v3916_v56 = vshll.u32 %v3770_v41, 16  ;;  %10498 = vmatprep.subr.bf16.mxu0 %v10765_v23 }
 0x3e2   :  { %19076 = vst [vmem:[#allocation93_spill] sm:$0xff] %v14904_v37  ;;  %19077 = vst [vmem:[#allocation94_spill] sm:$0xff] %v14910_v2  ;;  %v19079_v36 = vshrl.u32 %v19078_v30, 16  ;;  %v19080_v28 = vshll.u32 %v19078_v30, 16  ;;  %8390 = vmatprep.mubr.bf16.mxu0 %v9955_v1  ;;  %v19082_v5 = vshll.u32 %v19081_v22, 16  ;;  %v19083_v47 = vshrl.u32 %v19081_v22, 16  ;;  %v7912_v37 = vpop.f32.mrf.mxu0  ;;  %10499 = vmatpush3.bf16.msra.mxu0 %v10765_v23 }
 0x3e3   :  { %8109 = vmatprep.mubr.bf16.mxu1 %v9892_v17  ;;  %v4499_v7 = vshrl.u32 %v14906_v3, 16  ;;  %v4502_v2 = vshll.u32 %v14906_v3, 16  ;;  %v3918_v1 = vrot.slane %v3916_v56, 5  ;;  %10573 = vmatprep.subr.bf16.mxu1 %v10765_v23  ;;  %v5050_v22 = vld [vmem:[#allocation2 + $0xe8] sm:$0x1] }
 0x3e4   :  { %v3906_v32 = vrot.slane %v19079_v36, 4  ;;  %v3907_v62 = vrot.slane %v19080_v28, 5  ;;  %v3910_v10 = vrot.slane %v19082_v5, 5  ;;  %v3912_v13 = vrot.slane %v19083_v47, 4  ;;  %8110 = vmatmul.mubr.bf16.gmra.mxu1 %v9860_v9  ;;  %v3771_v52 = vld [vmem:[#allocation2 + $0x100] sm:$0x1] }
 0x3e5   :  { %v4472_v36 = vshrl.u32 %v4261_v49, 16  ;;  %v4492_v28 = vsel %vm11752_vm7, %v4484_v51, %v4491_v27  ;;  %v4508_v5 = vshrl.u32 %v4266_v39, 16  ;;  %v4501_v49 = vrot.slane %v4499_v7, 7  ;;  %10581 = vmatpush3.bf16.msra.mxu1 %v10765_v23 }
 0x3e6   :  { %v3908_v30 = vor.u32 %v3907_v62, %v3906_v32  ;;  %v3913_v17 = vor.u32 %v3912_v13, %v3910_v10  ;;  %v4511_v9 = vshll.u32 %v4266_v39, 16  ;;  %v5173_v32 = vrot.slane %v4499_v7, 4  ;;  %v14931_v62 = vpop.f32.mrf.mxu0  ;;  %v7639_v13 = vpop.f32.mrf.mxu1 }
 0x3e7   :  { %v9699_v43 = vrot.slane %v4472_v36, 11  ;;  %v4510_v37 = vrot.slane %v4508_v5, 7  ;;  %v5174_v47 = vrot.slane %v4502_v2, 5  ;;  %v4504_v45 = vor.u32 %v4502_v2, %v4501_v49 }
 0x3e8   :  { %v3909_v41 = vrot.slane %v3908_v30, 4  ;;  %v3914_v51 = vrot.slane %v3913_v17, 4  ;;  %v4506_v30 = vrot.slane %v4501_v49, 4  ;;  %v7915_v24 = vpop.f32.mrf.mxu0  ;;  %v5177_v17 = vrot.slane %v4511_v9, 5  ;;  %v14939_v44 = vpop.f32.mrf.mxu1  ;;  %v4264_v49 = vld [vmem:[#allocation2 + $0xdc] sm:$0x8] }
 0x3e9   :  { %v4483_v27 = vsel %vm11752_vm7, %v9699_v43, %v4482_v6  ;;  %v4513_v54 = vor.u32 %v4511_v9, %v4510_v37  ;;  %v5175_v23 = vor.u32 %v5174_v47, %v5173_v32  ;;  %v5179_v6 = vrot.slane %v4508_v5, 4  ;;  %v10808_v24 = vld [vmem:[#allocation2 + $0xe0] sm:$0xf] }
 0x3ea   :  { %v3911_v56 = vsel %vm11748_vm5, %v3909_v41, %v3910_v10  ;;  %v9923_v36 = vcombine.low %v4483_v27, %v4492_v28  ;;  %v3919_v7 = vsel %vm11748_vm5, %v3914_v51, %v3918_v1  ;;  %v5183_v59 = vshll.u32 %v5050_v22, 16  ;;  %v10809_v28 = vld [vmem:[#allocation2 + $0xe4] sm:$0xf]  ;;  %v7642_v9 = vpop.f32.mrf.mxu1  ;;  %v19089_v22 = vld [vmem:[#allocation10_spill] sm:$0xff] }
 0x3eb   :  { %v9893_v43 = vcombine.low %v3911_v56, %v3919_v7  ;;  %v9956_v13 = vcombine.low %v14906_v3, %v4266_v39  ;;  %v5176_v10 = vrot.slane %v5175_v23, 4  ;;  %v14944_v2 = vadd.f32 %v14684_v53, %v14603_v35  ;;  %v19086_v3 = vld [vmem:[#allocation7_spill] sm:$0xff]  ;;  %v4268_v53 = vld [vmem:[#allocation2 + $0xf8] sm:$0xf]  ;;  %v14962_v7 = vpop.f32.mrf.mxu0 }
 0x3ec   :  { %8391 = vmatmul.mubr.bf16.gmra.mxu0 %v9923_v36  ;;  %v9861_v1 = vcombine.low %v10808_v24, %v10809_v28  ;;  %v14948_v41 = vadd.f32 %v14740_v57, %v14638_v40  ;;  %v5180_v5 = vor.u32 %v5179_v6, %v5177_v17  ;;  %v5185_v32 = vrot.slane %v5183_v59, 5  ;;  %v14960_v59 = vld [vmem:[#allocation2 + $0xfc] sm:$0xf] }
 0x3ed   :  { %19084 = vst [vmem:[#allocation8_spill] sm:$0xff] %v14944_v2  ;;  %8117 = vmatprep.mubr.bf16.mxu1 %v9893_v43  ;;  %8398 = vmatprep.mubr.bf16.mxu0 %v9956_v13  ;;  %v19087_v39 = vshrl.u32 %v19086_v3, 16  ;;  %v19088_v27 = vshll.u32 %v19086_v3, 16  ;;  %v5178_v37 = vsel %vm11748_vm5, %v5176_v10, %v5177_v17  ;;  %v19090_v40 = vshll.u32 %v19089_v22, 16 }
 0x3ee   :  { %19085 = vst [vmem:[#allocation5_spill] sm:$0xff] %v14948_v41  ;;  %8118 = vmatmul.mubr.bf16.gmra.mxu1 %v9861_v1  ;;  %v19091_v47 = vshrl.u32 %v19089_v22, 16  ;;  %v3930_v36 = vshll.u32 %v3771_v52, 16  ;;  %v5181_v23 = vrot.slane %v5180_v5, 4  ;;  %v4494_v6 = vshrl.u32 %v4264_v49, 16  ;;  %v7920_v1 = vpop.f32.mrf.mxu0 }
 0x3ef   :  { %v3920_v51 = vrot.slane %v19087_v39, 4  ;;  %v3921_v35 = vrot.slane %v19088_v27, 5  ;;  %v3924_v57 = vrot.slane %v19090_v40, 5  ;;  %v4514_v13 = vsel %vm11752_vm7, %v4506_v30, %v4513_v54  ;;  %v14969_v27 = vpop.f32.mrf.mxu1 }
 0x3f0   :  { %v3926_v56 = vrot.slane %v19091_v47, 4  ;;  %v3932_v17 = vrot.slane %v3930_v36, 5  ;;  %v4521_v10 = vshrl.u32 %v4268_v53, 16  ;;  %v4524_v28 = vshll.u32 %v4268_v53, 16  ;;  %v14974_v30 = vpop.f32.mrf.mxu0 }
 0x3f1   :  { %v3922_v43 = vor.u32 %v3921_v35, %v3920_v51  ;;  %v5186_v9 = vsel %vm11748_vm5, %v5181_v23, %v5185_v32  ;;  %v9700_v52 = vrot.slane %v4494_v6, 11  ;;  %v4530_v39 = vshrl.u32 %v14960_v59, 16  ;;  %v7647_v47 = vpop.f32.mrf.mxu1 }
 0x3f2   :  { %v3927_v24 = vor.u32 %v3926_v56, %v3924_v57  ;;  %v14971_v5 = vcombine.low %v5178_v37, %v5186_v9  ;;  %v4523_v51 = vrot.slane %v4521_v10, 7  ;;  %v18571_v54 = vshll.u32 %v14960_v59, 16  ;;  %v7923_v6 = vpop.f32.mrf.mxu0  ;;  %v4267_v9 = vld [vmem:[#allocation2 + $0xf4] sm:$0x8] }
 0x3f3   :  { %v3923_v3 = vrot.slane %v3922_v43, 4  ;;  %v4505_v32 = vsel %vm11752_vm7, %v9700_v52, %v4504_v45  ;;  %v4532_v22 = vrot.slane %v4530_v39, 7  ;;  %v14980_v40 = vrot.slane %v4521_v10, 4  ;;  %v14984_v43 = vld [vmem:[#allocation2 + $0x110] sm:$0xf] }
 0x3f4   :  { %v3928_v49 = vrot.slane %v3927_v24, 4  ;;  %v9924_v56 = vcombine.low %v4505_v32, %v4514_v13  ;;  %v4526_v36 = vor.u32 %v4524_v28, %v4523_v51  ;;  %v4528_v23 = vrot.slane %v4523_v51, 4  ;;  %v3772_v10 = vld [vmem:[#allocation2 + $0x118] sm:$0x1] }
 0x3f5   :  { %v3925_v35 = vsel %vm11748_vm5, %v3923_v3, %v3924_v57  ;;  %v4535_v57 = vor.u32 %v18571_v54, %v4532_v22  ;;  %v14988_v1 = vrot.slane %v4524_v28, 5  ;;  %v14990_v45 = vrot.slane %v4530_v39, 4  ;;  %v14992_v3 = vpop.f32.mrf.mxu1  ;;  %v10810_v52 = vld [vmem:[#allocation2 + $0xf8] sm:$0xf]  ;;  %v4272_v39 = vld [vmem:[#allocation2 + $0x114] sm:$0xf] }
 0x3f6   :  { %v3933_v37 = vsel %vm11748_vm5, %v3928_v49, %v3932_v17  ;;  %8399 = vmatmul.mubr.bf16.gmra.mxu0 %v9924_v56  ;;  %v9957_v13 = vcombine.low %v4268_v53, %v14960_v59  ;;  %v14997_v17 = vadd.f32 %v14770_v50, %v14662_v4  ;;  %v10811_v49 = vld [vmem:[#allocation2 + $0xfc] sm:$0xf]  ;;  %v15001_v28 = vadd.f32 %v14796_v11, %v14701_v61 }
 0x3f7   :  { %v9894_v24 = vcombine.low %v3925_v35, %v3933_v37  ;;  %19092 = vst [vmem:[#allocation7_spill] sm:$0xff] %v14990_v45  ;;  %v9862_v51 = vcombine.low %v10810_v52, %v10811_v49  ;;  %v19095_v35 = vld [vmem:[#allocation12_spill] sm:$0xff]  ;;  %v19098_v53 = vld [vmem:[#allocation18_spill] sm:$0xff]  ;;  %v7650_v54 = vpop.f32.mrf.mxu1  ;;  %v3944_v52 = vshll.u32 %v3772_v10, 16  ;;  %v4516_v61 = vshrl.u32 %v4267_v9, 16  ;;  %v15014_v49 = vpop.f32.mrf.mxu0 }
 0x3f8   :  { %19093 = vst [vmem:[#allocation10_spill] sm:$0xff] %v14997_v17  ;;  %19094 = vst [vmem:[#allocation95_spill] sm:$0xff] %v15001_v28  ;;  %v19096_v32 = vshrl.u32 %v19095_v35, 16  ;;  %v19097_v47 = vshll.u32 %v19095_v35, 16  ;;  %v19099_v56 = vshll.u32 %v19098_v53, 16  ;;  %v19100_v4 = vshrl.u32 %v19098_v53, 16  ;;  %8406 = vmatprep.mubr.bf16.mxu0 %v9957_v13 }
 0x3f9   :  { %8125 = vmatprep.mubr.bf16.mxu1 %v9894_v24  ;;  %v4536_v11 = vsel %vm11752_vm7, %v4528_v23, %v4535_v57  ;;  %v4543_v24 = vshrl.u32 %v14984_v43, 16  ;;  %v3946_v28 = vrot.slane %v3944_v52, 5  ;;  %v9701_v53 = vrot.slane %v4516_v61, 11  ;;  %v7928_v13 = vpop.f32.mrf.mxu0  ;;  %v15019_v23 = vpop.f32.mrf.mxu1 }
 0x3fa   :  { %v3934_v22 = vrot.slane %v19096_v32, 4  ;;  %v3935_v37 = vrot.slane %v19097_v47, 5  ;;  %v3938_v6 = vrot.slane %v19099_v56, 5  ;;  %v3940_v50 = vrot.slane %v19100_v4, 4  ;;  %8126 = vmatmul.mubr.bf16.gmra.mxu1 %v9862_v51 }
 0x3fb   :  { %v4546_v47 = vshll.u32 %v14984_v43, 16  ;;  %v4552_v56 = vshrl.u32 %v4272_v39, 16  ;;  %v4545_v4 = vrot.slane %v4543_v24, 7  ;;  %v4555_v54 = vshll.u32 %v4272_v39, 16  ;;  %v15025_v41 = vpop.f32.mrf.mxu0 }
 0x3fc   :  { %v3936_v35 = vor.u32 %v3935_v37, %v3934_v22  ;;  %v3941_v32 = vor.u32 %v3940_v50, %v3938_v6  ;;  %v15017_v17 = vrot.slane %v4543_v24, 4  ;;  %v4527_v57 = vsel %vm11752_vm7, %v9701_v53, %v4526_v36 }
 0x3fd   :  { %v4554_v9 = vrot.slane %v4552_v56, 7  ;;  %v4548_v22 = vor.u32 %v4546_v47, %v4545_v4  ;;  %v4550_v37 = vrot.slane %v4545_v4, 4  ;;  %v15023_v50 = vrot.slane %v4546_v47, 5  ;;  %v3773_v47 = vld [vmem:[#allocation2 + $0x130] sm:$0x1]  ;;  %v7931_v45 = vpop.f32.mrf.mxu0 }
 0x3fe   :  { %v3937_v51 = vrot.slane %v3936_v35, 4  ;;  %v3942_v10 = vrot.slane %v3941_v32, 4  ;;  %19101 = vst [vmem:[#allocation12_spill] sm:$0xff] %v15017_v17  ;;  %v9925_v35 = vcombine.low %v4527_v57, %v4536_v11  ;;  %v7655_v32 = vpop.f32.mrf.mxu1  ;;  %v15033_v36 = vrot.slane %v4555_v54, 5  ;;  %v4270_v4 = vld [vmem:[#allocation2 + $0x10c] sm:$0x8] }
 0x3ff   :  { %19102 = vst [vmem:[#allocation18_spill] sm:$0xff] %v15023_v50  ;;  %v4557_v24 = vor.u32 %v4555_v54, %v4554_v9  ;;  %v15035_v53 = vrot.slane %v4552_v56, 4  ;;  %v10812_v11 = vld [vmem:[#allocation2 + $0x110] sm:$0xf]  ;;  %v15044_v9 = vadd.f32 %v14852_v16, %v14756_v21  ;;  %v4274_v54 = vld [vmem:[#allocation2 + $0x128] sm:$0xf] }
 0x400   :  { %v3939_v52 = vsel %vm11748_vm5, %v3937_v51, %v3938_v6  ;;  %v3947_v61 = vsel %vm11748_vm5, %v3942_v10, %v3946_v28  ;;  %19103 = vst [vmem:[#allocation96_spill] sm:$0xff] %v15033_v36  ;;  %8407 = vmatmul.mubr.bf16.gmra.mxu0 %v9925_v35  ;;  %v9958_v6 = vcombine.low %v14984_v43, %v4272_v39  ;;  %v10813_v51 = vld [vmem:[#allocation2 + $0x114] sm:$0xf]  ;;  %v15046_v56 = vld [vmem:[#allocation2 + $0x12c] sm:$0xf]  ;;  %v15048_v57 = vpop.f32.mrf.mxu1  ;;  %v19108_v45 = vld [vmem:[#allocation19_spill] sm:$0xff] }
 0x401   :  { %v9895_v13 = vcombine.low %v3939_v52, %v3947_v61  ;;  %19104 = vst [vmem:[#allocation97_spill] sm:$0xff] %v15035_v53  ;;  %v15040_v28 = vadd.f32 %v14825_v46, %v14731_v12  ;;  %v9863_v10 = vcombine.low %v10812_v11, %v10813_v51  ;;  %19106 = vst [vmem:[#allocation99_spill] sm:$0xff] %v15044_v9  ;;  %v19109_v39 = vshrl.u32 %v19108_v45, 16  ;;  %v19111_v61 = vld [vmem:[#allocation16_spill] sm:$0xff] }
 0x402   :  { %19107 = vst [vmem:[#allocation100_spill] sm:$0xff] %v15046_v56  ;;  %v19110_v46 = vshll.u32 %v19108_v45, 16  ;;  %v19112_v35 = vshll.u32 %v19111_v61, 16  ;;  %8414 = vmatprep.mubr.bf16.mxu0 %v9958_v6  ;;  %v19113_v21 = vshrl.u32 %v19111_v61, 16  ;;  %v3958_v11 = vshll.u32 %v3773_v47, 16  ;;  %v7658_v43 = vpop.f32.mrf.mxu1 }
 0x403   :  { %19105 = vst [vmem:[#allocation98_spill] sm:$0xff] %v15040_v28  ;;  %8133 = vmatprep.mubr.bf16.mxu1 %v9895_v13  ;;  %v3948_v12 = vrot.slane %v19109_v39, 4  ;;  %v4538_v51 = vshrl.u32 %v4270_v4, 16  ;;  %v4558_v13 = vsel %vm11752_vm7, %v4550_v37, %v4557_v24  ;;  %v4565_v9 = vshrl.u32 %v4274_v54, 16 }
 0x404   :  { %v3949_v52 = vrot.slane %v19110_v46, 5  ;;  %v3952_v32 = vrot.slane %v19112_v35, 5  ;;  %8134 = vmatmul.mubr.bf16.gmra.mxu1 %v9863_v10  ;;  %v3954_v16 = vrot.slane %v19113_v21, 4  ;;  %v4568_v39 = vshll.u32 %v4274_v54, 16  ;;  %v15064_v10 = vpop.f32.mrf.mxu0  ;;  %v15076_v6 = vpop.f32.mrf.mxu1 }
 0x405   :  { %v4574_v45 = vshrl.u32 %v15046_v56, 16  ;;  %v3960_v28 = vrot.slane %v3958_v11, 5  ;;  %v9702_v36 = vrot.slane %v4538_v51, 11  ;;  %v4567_v35 = vrot.slane %v4565_v9, 7 }
 0x406   :  { %v3950_v2 = vor.u32 %v3949_v52, %v3948_v12  ;;  %v3955_v46 = vor.u32 %v3954_v16, %v3952_v32  ;;  %v15066_v4 = vrot.slane %v4565_v9, 4  ;;  %v15070_v24 = vrot.slane %v4568_v39, 5  ;;  %v7936_v12 = vpop.f32.mrf.mxu0 }
 0x407   :  { %v4576_v47 = vrot.slane %v4574_v45, 7  ;;  %v4549_v37 = vsel %vm11752_vm7, %v9702_v36, %v4548_v22  ;;  %v15072_v43 = vrot.slane %v4574_v45, 4  ;;  %v4570_v11 = vor.u32 %v4568_v39, %v4567_v35  ;;  %v4273_v12 = vld [vmem:[#allocation2 + $0x124] sm:$0x8]  ;;  %v10774_v39 = vld [vmem:[%s18265_s4 + $0x208] sm:$0xff]  }
 0x408   :  { %v3951_v61 = vrot.slane %v3950_v2, 4  ;;  %19114 = vst [vmem:[#allocation19_spill] sm:$0xff] %v15066_v4  ;;  %v3956_v21 = vrot.slane %v3955_v46, 4  ;;  %19115 = vst [vmem:[#allocation16_spill] sm:$0xff] %v15070_v24  ;;  %v9926_v16 = vcombine.low %v4549_v37, %v4558_v13  ;;  %v4572_v51 = vrot.slane %v4567_v35, 4  ;;  %v15089_v13 = vpop.f32.mrf.mxu0  ;;  %10500 = vmatprep.subr.bf16.mxu0 %v10774_v39  ;;  %10574 = vmatprep.subr.bf16.mxu1 %v10774_v39 }
 0x409   :  { %19116 = vst [vmem:[#allocation101_spill] sm:$0xff] %v15072_v43  ;;  %v3774_v2 = vld [vmem:[#allocation2 + $0x148] sm:$0x1]  ;;  %v19117_v46 = vshll.u32 %v15046_v56, 16  ;;  %v9959_v36 = vcombine.low %v4274_v54, %v15046_v56  ;;  %v15085_v45 = vadd.f32 %v14881_v29, %v14785_v15  ;;  %v10815_v35 = vld [vmem:[#allocation2 + $0x12c] sm:$0xf]  ;;  %v15096_v54 = vadd.f32 %v14916_v58, %v14817_v26  ;;  %10501 = vmatpush3.bf16.msra.mxu0 %v10774_v39 }
 0x40a   :  { %v3953_v52 = vsel %vm11748_vm5, %v3951_v61, %v3952_v32  ;;  %v3961_v9 = vsel %vm11748_vm5, %v3956_v21, %v3960_v28  ;;  %v15087_v32 = vld [vmem:[#allocation2 + $0x140] sm:$0xf]  ;;  %8415 = vmatmul.mubr.bf16.gmra.mxu0 %v9926_v16  ;;  %v10814_v28 = vld [vmem:[#allocation2 + $0x128] sm:$0xf]  ;;  %v4278_v37 = vld [vmem:[#allocation2 + $0x144] sm:$0xf]  ;;  %10582 = vmatpush3.bf16.msra.mxu1 %v10774_v39 }
 0x40b   :  { %v4579_v22 = vor.u32 %v19117_v46, %v4576_v47  ;;  %19118 = vst [vmem:[#allocation102_spill] sm:$0xff] %v15085_v45  ;;  %v9896_v61 = vcombine.low %v3953_v52, %v3961_v9  ;;  %v9864_v47 = vcombine.low %v10814_v28, %v10815_v35  ;;  %19119 = vst [vmem:[#allocation103_spill] sm:$0xff] %v15096_v54  ;;  %v19120_v29 = vld [vmem:[#allocation20_spill] sm:$0xff]  ;;  %v7663_v46 = vpop.f32.mrf.mxu1  ;;  %8422 = vmatprep.mubr.bf16.mxu0 %v9959_v36  ;;  %v19123_v56 = vld [vmem:[#allocation21_spill] sm:$0xff]  ;;  %v7939_v35 = vpop.f32.mrf.mxu0 }
 0x40c   :  { %v19121_v15 = vshrl.u32 %v19120_v29, 16  ;;  %v19122_v45 = vshll.u32 %v19120_v29, 16  ;;  %v19124_v24 = vshll.u32 %v19123_v56, 16  ;;  %v19125_v16 = vshrl.u32 %v19123_v56, 16 }
 0x40d   :  { %v3972_v28 = vshll.u32 %v3774_v2, 16  ;;  %8141 = vmatprep.mubr.bf16.mxu1 %v9896_v61  ;;  %v4560_v26 = vshrl.u32 %v4273_v12, 16  ;;  %v4580_v58 = vsel %vm11752_vm7, %v4572_v51, %v4579_v22  ;;  %v4590_v36 = vshll.u32 %v15087_v32, 16  ;;  %v15110_v29 = vpop.f32.mrf.mxu1  ;;  %v15116_v53 = vpop.f32.mrf.mxu0 }
 0x40e   :  { %v3962_v21 = vrot.slane %v19121_v15, 4  ;;  %v3963_v43 = vrot.slane %v19122_v45, 5  ;;  %v3966_v52 = vrot.slane %v19124_v24, 5  ;;  %v3968_v9 = vrot.slane %v19125_v16, 4  ;;  %8142 = vmatmul.mubr.bf16.gmra.mxu1 %v9864_v47 }
 0x40f   :  { %v4587_v15 = vshrl.u32 %v15087_v32, 16  ;;  %v3974_v56 = vrot.slane %v3972_v28, 5  ;;  %v4596_v46 = vshrl.u32 %v4278_v37, 16  ;;  %v9703_v2 = vrot.slane %v4560_v26, 11  ;;  %v7666_v35 = vpop.f32.mrf.mxu1 }
 0x410   :  { %v3964_v24 = vor.u32 %v3963_v43, %v3962_v21  ;;  %v3969_v45 = vor.u32 %v3968_v9, %v3966_v52  ;;  %v4599_v61 = vshll.u32 %v4278_v37, 16  ;;  %v15114_v4 = vrot.slane %v4590_v36, 5 }
 0x411   :  { %v4589_v16 = vrot.slane %v4587_v15, 7  ;;  %v15112_v12 = vrot.slane %v4587_v15, 4  ;;  %v4598_v54 = vrot.slane %v4596_v46, 7  ;;  %v4571_v43 = vsel %vm11752_vm7, %v9703_v2, %v4570_v11  ;;  %v3775_v2 = vld [vmem:[#allocation2 + $0x160] sm:$0x1]  ;;  %v15133_v50 = vpop.f32.mrf.mxu1 }
 0x412   :  { %v3965_v51 = vrot.slane %v3964_v24, 4  ;;  %v3970_v22 = vrot.slane %v3969_v45, 4  ;;  %v15120_v9 = vrot.slane %v4599_v61, 5  ;;  %v9927_v26 = vcombine.low %v4571_v43, %v4580_v58  ;;  %v15126_v24 = vld [vmem:[#allocation2 + $0x158] sm:$0xf]  ;;  %v7944_v45 = vpop.f32.mrf.mxu0 }
 0x413   :  { %v4592_v47 = vor.u32 %v4590_v36, %v4589_v16  ;;  %v4594_v21 = vrot.slane %v4589_v16, 4  ;;  %v4601_v15 = vor.u32 %v4599_v61, %v4598_v54  ;;  %v15130_v11 = vrot.slane %v4596_v46, 4  ;;  %v4276_v16 = vld [vmem:[#allocation2 + $0x13c] sm:$0x8]  ;;  %v10816_v54 = vld [vmem:[#allocation2 + $0x140] sm:$0xf]  ;;  %v7671_v45 = vpop.f32.mrf.mxu1 }
 0x414   :  { %19126 = vst [vmem:[#allocation20_spill] sm:$0xff] %v15120_v9  ;;  %v3967_v28 = vsel %vm11748_vm5, %v3965_v51, %v3966_v52  ;;  %v3975_v39 = vsel %vm11748_vm5, %v3970_v22, %v3974_v56  ;;  %v9960_v36 = vcombine.low %v15087_v32, %v4278_v37  ;;  %8423 = vmatmul.mubr.bf16.gmra.mxu0 %v9927_v26  ;;  %v10817_v58 = vld [vmem:[#allocation2 + $0x144] sm:$0xf]  ;;  %v19129_v46 = vld [vmem:[#allocation22_spill] sm:$0xff]  ;;  %v15147_v37 = vpop.f32.mrf.mxu0 }
 0x415   :  { %v9897_v35 = vcombine.low %v3967_v28, %v3975_v39  ;;  %v15137_v52 = vadd.f32 %v14931_v62, %v14833_v34  ;;  %v9865_v56 = vcombine.low %v10816_v54, %v10817_v58  ;;  %v15141_v61 = vadd.f32 %v14962_v7, %v14877_v63  ;;  %v15145_v32 = vld [vmem:[#allocation2 + $0x15c] sm:$0xf]  ;;  %v19133_v28 = vld [vmem:[#allocation17_spill] sm:$0xff] }
 0x416   :  { %v19130_v51 = vshrl.u32 %v19129_v46, 16  ;;  %19131 = vst [vmem:[#allocation22_spill] sm:$0xff] %v15145_v32  ;;  %8430 = vmatprep.mubr.bf16.mxu0 %v9960_v36  ;;  %v19132_v34 = vshll.u32 %v19129_v46, 16  ;;  %v19134_v39 = vshll.u32 %v19133_v28, 16  ;;  %v19135_v63 = vshrl.u32 %v19133_v28, 16  ;;  %v7947_v43 = vpop.f32.mrf.mxu0 }
 0x417   :  { %19127 = vst [vmem:[#allocation21_spill] sm:$0xff] %v15137_v52  ;;  %19128 = vst [vmem:[#allocation104_spill] sm:$0xff] %v15141_v61  ;;  %8149 = vmatprep.mubr.bf16.mxu1 %v9897_v35  ;;  %v3986_v54 = vshll.u32 %v3775_v2, 16  ;;  %v4582_v58 = vshrl.u32 %v4276_v16, 16  ;;  %v4602_v35 = vsel %vm11752_vm7, %v4594_v21, %v4601_v15  ;;  %v4612_v46 = vshll.u32 %v15126_v24, 16 }
 0x418   :  { %v3976_v22 = vrot.slane %v19130_v51, 4  ;;  %v3977_v62 = vrot.slane %v19132_v34, 5  ;;  %v3980_v26 = vrot.slane %v19134_v39, 5  ;;  %v3982_v7 = vrot.slane %v19135_v63, 4  ;;  %8150 = vmatmul.mubr.bf16.gmra.mxu1 %v9865_v56  ;;  %v15162_v39 = vpop.f32.mrf.mxu1  ;;  %v4279_v52 = vld [vmem:[#allocation2 + $0x154] sm:$0x8] }
 0x419   :  { %v4609_v51 = vshrl.u32 %v15126_v24, 16  ;;  %v4618_v34 = vshrl.u32 %v15145_v32, 16  ;;  %v3988_v28 = vrot.slane %v3986_v54, 5  ;;  %v9704_v63 = vrot.slane %v4582_v58, 11 }
 0x41a   :  { %v3978_v36 = vor.u32 %v3977_v62, %v3976_v22  ;;  %v3983_v17 = vor.u32 %v3982_v7, %v3980_v26  ;;  %v7674_v15 = vpop.f32.mrf.mxu1  ;;  %v15169_v7 = vrot.slane %v4612_v46, 5 }
 0x41b   :  { %v4611_v45 = vrot.slane %v4609_v51, 7  ;;  %v4620_v61 = vrot.slane %v4618_v34, 7  ;;  %v15165_v21 = vrot.slane %v4609_v51, 4  ;;  %v4593_v22 = vsel %vm11752_vm7, %v9704_v63, %v4592_v47  ;;  %v3776_v51 = vld [vmem:[#allocation2 + $0x178] sm:$0x1]  ;;  %v15177_v15 = vpop.f32.mrf.mxu0 }
 0x41c   :  { %v3979_v16 = vrot.slane %v3978_v36, 4  ;;  %v3984_v56 = vrot.slane %v3983_v17, 4  ;;  %19137 = vst [vmem:[#allocation105_spill] sm:$0xff] %v15169_v7  ;;  %v9928_v2 = vcombine.low %v4593_v22, %v4602_v35  ;;  %v19138_v17 = vshll.u32 %v15145_v32, 16  ;;  %v15187_v63 = vld [vmem:[#allocation2 + $0x170] sm:$0xf] }
 0x41d   :  { %19136 = vst [vmem:[#allocation17_spill] sm:$0xff] %v15165_v21  ;;  %v4614_v43 = vor.u32 %v4612_v46, %v4611_v45  ;;  %v4616_v62 = vrot.slane %v4611_v45, 4  ;;  %v15179_v47 = vrot.slane %v4618_v34, 4  ;;  %v9961_v46 = vcombine.low %v15126_v24, %v15145_v32  ;;  %v10818_v35 = vld [vmem:[#allocation2 + $0x158] sm:$0xf] }
 0x41e   :  { %v3981_v54 = vsel %vm11748_vm5, %v3979_v16, %v3980_v26  ;;  %v3989_v58 = vsel %vm11748_vm5, %v3984_v56, %v3988_v28  ;;  %v4623_v36 = vor.u32 %v19138_v17, %v4620_v61  ;;  %v15185_v26 = vadd.f32 %v14974_v30, %v14890_v60  ;;  %8431 = vmatmul.mubr.bf16.gmra.mxu0 %v9928_v2  ;;  %v10819_v28 = vld [vmem:[#allocation2 + $0x15c] sm:$0xf]  ;;  %v19142_v16 = vld [vmem:[#allocation23_spill] sm:$0xff]  ;;  %v19145_v60 = vld [vmem:[#allocation24_spill] sm:$0xff] }
 0x41f   :  { %v9898_v21 = vcombine.low %v3981_v54, %v3989_v58  ;;  %19139 = vst [vmem:[#allocation106_spill] sm:$0xff] %v15179_v47  ;;  %v9866_v61 = vcombine.low %v10818_v35, %v10819_v28  ;;  %v15191_v45 = vadd.f32 %v15014_v49, %v14929_v0  ;;  %v19143_v34 = vshrl.u32 %v19142_v16, 16  ;;  %v4284_v54 = vld [vmem:[#allocation2 + $0x174] sm:$0xf]  ;;  %v7952_v58 = vpop.f32.mrf.mxu0  ;;  %8438 = vmatprep.mubr.bf16.mxu0 %v9961_v46  ;;  %v15201_v0 = vpop.f32.mrf.mxu1 }
 0x420   :  { %19140 = vst [vmem:[#allocation107_spill] sm:$0xff] %v15185_v26  ;;  %v19144_v22 = vshll.u32 %v19142_v16, 16  ;;  %v19146_v30 = vshll.u32 %v19145_v60, 16  ;;  %v19147_v17 = vshrl.u32 %v19145_v60, 16  ;;  %v4000_v28 = vshll.u32 %v3776_v51, 16 }
 0x421   :  { %19141 = vst [vmem:[#allocation108_spill] sm:$0xff] %v15191_v45  ;;  %v3990_v56 = vrot.slane %v19143_v34, 4  ;;  %8157 = vmatprep.mubr.bf16.mxu1 %v9898_v21  ;;  %v4604_v26 = vshrl.u32 %v4279_v52, 16  ;;  %v4624_v16 = vsel %vm11752_vm7, %v4616_v62, %v4623_v36  ;;  %v4631_v34 = vshrl.u32 %v15187_v63, 16  ;;  %v15207_v46 = vpop.f32.mrf.mxu0 }
 0x422   :  { %v3991_v24 = vrot.slane %v19144_v22, 5  ;;  %v3994_v2 = vrot.slane %v19146_v30, 5  ;;  %v3996_v35 = vrot.slane %v19147_v17, 4  ;;  %8158 = vmatmul.mubr.bf16.gmra.mxu1 %v9866_v61  ;;  %v4634_v21 = vshll.u32 %v15187_v63, 16  ;;  %v7679_v17 = vpop.f32.mrf.mxu1 }
 0x423   :  { %v4002_v58 = vrot.slane %v4000_v28, 5  ;;  %v9705_v30 = vrot.slane %v4604_v26, 11  ;;  %v4640_v60 = vshrl.u32 %v4284_v54, 16  ;;  %v4633_v52 = vrot.slane %v4631_v34, 7  ;;  %v7955_v61 = vpop.f32.mrf.mxu0 }
 0x424   :  { %v3992_v49 = vor.u32 %v3991_v24, %v3990_v56  ;;  %v3997_v22 = vor.u32 %v3996_v35, %v3994_v2  ;;  %v4643_v45 = vshll.u32 %v4284_v54, 16  ;;  %v15209_v47 = vrot.slane %v4631_v34, 4  ;;  %v15215_v32 = vpop.f32.mrf.mxu1 }
 0x425   :  { %v4615_v62 = vsel %vm11752_vm7, %v9705_v30, %v4614_v43  ;;  %v4642_v36 = vrot.slane %v4640_v60, 7  ;;  %v15213_v24 = vrot.slane %v4634_v21, 5  ;;  %v4636_v28 = vor.u32 %v4634_v21, %v4633_v52  ;;  %v3777_v43 = vld [vmem:[#allocation2 + $0x190] sm:$0x1]  ;;  %v4282_v21 = vld [vmem:[#allocation2 + $0x16c] sm:$0x8] }
 0x426   :  { %v3993_v51 = vrot.slane %v3992_v49, 4  ;;  %19148 = vst [vmem:[#allocation23_spill] sm:$0xff] %v15209_v47  ;;  %v3998_v56 = vrot.slane %v3997_v22, 4  ;;  %v9929_v35 = vcombine.low %v4615_v62, %v4624_v16  ;;  %v4638_v49 = vrot.slane %v4633_v52, 4  ;;  %v7682_v30 = vpop.f32.mrf.mxu1  ;;  %v10820_v52 = vld [vmem:[#allocation2 + $0x170] sm:$0xf] }
 0x427   :  { %v4645_v17 = vor.u32 %v4643_v45, %v4642_v36  ;;  %v15223_v61 = vrot.slane %v4643_v45, 5  ;;  %v15225_v9 = vrot.slane %v4640_v60, 4  ;;  %v15230_v16 = vadd.f32 %v15025_v41, %v14939_v44  ;;  %v10821_v45 = vld [vmem:[#allocation2 + $0x174] sm:$0xf]  ;;  %v15244_v44 = vld [vmem:[#allocation2 + $0x18c] sm:$0xf] }
 0x428   :  { %v3995_v26 = vsel %vm11748_vm5, %v3993_v51, %v3994_v2  ;;  %v4003_v34 = vsel %vm11748_vm5, %v3998_v56, %v4002_v58  ;;  %8439 = vmatmul.mubr.bf16.gmra.mxu0 %v9929_v35  ;;  %v9962_v2 = vcombine.low %v15187_v63, %v4284_v54  ;;  %v15232_v58 = vld [vmem:[#allocation2 + $0x188] sm:$0xf]  ;;  %v15234_v51 = vpop.f32.mrf.mxu0  ;;  %v9867_v56 = vcombine.low %v10820_v52, %v10821_v45  ;;  %v19153_v60 = vld [vmem:[#allocation25_spill] sm:$0xff] }
 0x429   :  { %19149 = vst [vmem:[#allocation24_spill] sm:$0xff] %v15223_v61  ;;  %v9899_v7 = vcombine.low %v3995_v26, %v4003_v34  ;;  %19150 = vst [vmem:[#allocation109_spill] sm:$0xff] %v15225_v9  ;;  %v15238_v62 = vadd.f32 %v15064_v10, %v14969_v27  ;;  %v19154_v36 = vshrl.u32 %v19153_v60, 16  ;;  %v19155_v63 = vshll.u32 %v19153_v60, 16  ;;  %v19157_v35 = vld [vmem:[#allocation9_spill] sm:$0xff] }
 0x42a   :  { %19151 = vst [vmem:[#allocation110_spill] sm:$0xff] %v15230_v16  ;;  %19156 = vst [vmem:[#allocation25_spill] sm:$0xff] %v15244_v44  ;;  %8446 = vmatprep.mubr.bf16.mxu0 %v9962_v2  ;;  %v19158_v34 = vshll.u32 %v19157_v35, 16  ;;  %v19159_v52 = vshrl.u32 %v19157_v35, 16  ;;  %v4014_v10 = vshll.u32 %v3777_v43, 16  ;;  %v7960_v45 = vpop.f32.mrf.mxu0  ;;  %v4626_v22 = vshrl.u32 %v4282_v21, 16  ;;  %v15259_v35 = vpop.f32.mrf.mxu1 }
 0x42b   :  { %19152 = vst [vmem:[#allocation111_spill] sm:$0xff] %v15238_v62  ;;  %v4004_v26 = vrot.slane %v19154_v36, 4  ;;  %v4005_v54 = vrot.slane %v19155_v63, 5  ;;  %8165 = vmatprep.mubr.bf16.mxu1 %v9899_v7  ;;  %v4646_v60 = vsel %vm11752_vm7, %v4638_v49, %v4645_v17  ;;  %v4653_v7 = vshrl.u32 %v15232_v58, 16 }
 0x42c   :  { %v4008_v30 = vrot.slane %v19158_v34, 5  ;;  %v4010_v27 = vrot.slane %v19159_v52, 4  ;;  %8166 = vmatmul.mubr.bf16.gmra.mxu1 %v9867_v56  ;;  %v4016_v62 = vrot.slane %v4014_v10, 5  ;;  %v4656_v2 = vshll.u32 %v15232_v58, 16  ;;  %v15257_v34 = vpop.f32.mrf.mxu0  ;;  %v7687_v10 = vpop.f32.mrf.mxu1 }
 0x42d   :  { %v4006_v36 = vor.u32 %v4005_v54, %v4004_v26  ;;  %v4662_v41 = vshrl.u32 %v15244_v44, 16  ;;  %v9706_v52 = vrot.slane %v4626_v22, 11  ;;  %v4655_v56 = vrot.slane %v4653_v7, 7 }
 0x42e   :  { %v4011_v63 = vor.u32 %v4010_v27, %v4008_v30  ;;  %v15262_v49 = vrot.slane %v4653_v7, 4  ;;  %v15264_v17 = vrot.slane %v4656_v2, 5  ;;  %v7963_v27 = vpop.f32.mrf.mxu0  ;;  %v15276_v10 = vpop.f32.mrf.mxu1 }
 0x42f   :  { %v4007_v43 = vrot.slane %v4006_v36, 4  ;;  %v4664_v54 = vrot.slane %v4662_v41, 7  ;;  %v4637_v16 = vsel %vm11752_vm7, %v9706_v52, %v4636_v28  ;;  %v4658_v61 = vor.u32 %v4656_v2, %v4655_v56  ;;  %v4285_v27 = vld [vmem:[#allocation2 + $0x184] sm:$0x8]  ;;  %v10822_v2 = vld [vmem:[#allocation2 + $0x188] sm:$0xf] }
 0x430   :  { %v4012_v26 = vrot.slane %v4011_v63, 4  ;;  %19160 = vst [vmem:[#allocation9_spill] sm:$0xff] %v15262_v49  ;;  %19161 = vst [vmem:[#allocation112_spill] sm:$0xff] %v15264_v17  ;;  %v4660_v36 = vrot.slane %v4655_v56, 4  ;;  %v9930_v21 = vcombine.low %v4637_v16, %v4646_v60  ;;  %v19162_v63 = vshll.u32 %v15244_v44, 16 }
 0x431   :  { %v4009_v45 = vsel %vm11748_vm5, %v4007_v43, %v4008_v30  ;;  %v15274_v49 = vrot.slane %v4662_v41, 4  ;;  %v3778_v17 = vld [vmem:[#allocation2 + $0x1d8] sm:$0x1]  ;;  %v9963_v30 = vcombine.low %v15232_v58, %v15244_v44  ;;  %v15282_v28 = vadd.f32 %v15089_v13, %v14992_v3  ;;  %v15284_v60 = vld [vmem:[#allocation2 + $0x1a0] sm:$0xf]  ;;  %v7690_v13 = vpop.f32.mrf.mxu1 }
 0x432   :  { %v4017_v22 = vsel %vm11748_vm5, %v4012_v26, %v4016_v62  ;;  %v4667_v7 = vor.u32 %v19162_v63, %v4664_v54  ;;  %v10823_v62 = vld [vmem:[#allocation2 + $0x18c] sm:$0xf]  ;;  %8447 = vmatmul.mubr.bf16.gmra.mxu0 %v9930_v21  ;;  %v15288_v41 = vadd.f32 %v15116_v53, %v15019_v23  ;;  %v19166_v43 = vld [vmem:[#allocation11_spill] sm:$0xff]  ;;  %v19169_v54 = vld [vmem:[#allocation14_spill] sm:$0xff]  ;;  %v4028_v53 = vshll.u32 %v3778_v17, 16 }
 0x433   :  { %19163 = vst [vmem:[#allocation113_spill] sm:$0xff] %v15274_v49  ;;  %v9900_v9 = vcombine.low %v4009_v45, %v4017_v22  ;;  %19164 = vst [vmem:[#allocation114_spill] sm:$0xff] %v15282_v28  ;;  %v9868_v16 = vcombine.low %v10822_v2, %v10823_v62  ;;  %v19167_v52 = vshrl.u32 %v19166_v43, 16  ;;  %v19168_v26 = vshll.u32 %v19166_v43, 16  ;;  %v10783_v22 = vld [vmem:[%s18265_s4 + $0x200] sm:$0xff]   ;;  %8454 = vmatprep.mubr.bf16.mxu0 %v9963_v30  ;;  %v15303_v43 = vpop.f32.mrf.mxu0 }
 0x434   :  { %19165 = vst [vmem:[#allocation115_spill] sm:$0xff] %v15288_v41  ;;  %v19170_v45 = vshll.u32 %v19169_v54, 16  ;;  %v19171_v21 = vshrl.u32 %v19169_v54, 16  ;;  %v4648_v63 = vshrl.u32 %v4285_v27, 16  ;;  %v4668_v2 = vsel %vm11752_vm7, %v4660_v36, %v4667_v7  ;;  %v4290_v62 = vld [vmem:[#allocation2 + $0x1a4] sm:$0xf]  ;;  %10502 = vmatprep.subr.bf16.mxu0 %v10783_v22  ;;  %10575 = vmatprep.subr.bf16.mxu1 %v10783_v22 }
 0x435   :  { %v4018_v56 = vrot.slane %v19167_v52, 4  ;;  %v4019_v58 = vrot.slane %v19168_v26, 5  ;;  %8173 = vmatprep.mubr.bf16.mxu1 %v9900_v9  ;;  %v15307_v26 = vadd.f32 %v15147_v37, %v15048_v57  ;;  %v10825_v9 = vld [vmem:[#allocation2 + $0x1d4] sm:$0xf]  ;;  %v4675_v54 = vshrl.u32 %v15284_v60, 16  ;;  %v7968_v7 = vpop.f32.mrf.mxu0  ;;  %10503 = vmatpush3.bf16.msra.mxu0 %v10783_v22 }
 0x436   :  { %v4022_v3 = vrot.slane %v19170_v45, 5  ;;  %v4024_v23 = vrot.slane %v19171_v21, 4  ;;  %8174 = vmatmul.mubr.bf16.gmra.mxu1 %v9868_v16  ;;  %v10824_v45 = vld [vmem:[#allocation2 + $0x1d0] sm:$0xf]  ;;  %v4030_v27 = vrot.slane %v4028_v53, 5  ;;  %v9707_v13 = vrot.slane %v4648_v63, 11  ;;  %v15319_v53 = vpop.f32.mrf.mxu1 }
 0x437   :  { %v4020_v52 = vor.u32 %v4019_v58, %v4018_v56  ;;  %19172 = vst [vmem:[#allocation11_spill] sm:$0xff] %v15307_v26  ;;  %v9869_v30 = vcombine.low %v10824_v45, %v10825_v9  ;;  %v4678_v36 = vshll.u32 %v15284_v60, 16  ;;  %v4677_v56 = vrot.slane %v4675_v54, 7  ;;  %10583 = vmatpush3.bf16.msra.mxu1 %v10783_v22  ;;  %v4288_v41 = vld [vmem:[#allocation2 + $0x19c] sm:$0x8] }
 0x438   :  { %v4025_v17 = vor.u32 %v4024_v23, %v4022_v3  ;;  %v4684_v58 = vshrl.u32 %v4290_v62, 16  ;;  %v4687_v21 = vshll.u32 %v4290_v62, 16  ;;  %v4659_v37 = vsel %vm11752_vm7, %v9707_v13, %v4658_v61  ;;  %v15317_v23 = vpop.f32.mrf.mxu0  ;;  %v3779_v13 = vld [vmem:[#allocation2 + $0x1f0] sm:$0x1]  ;;  %v7695_v49 = vpop.f32.mrf.mxu1 }
 0x439   :  { %v4021_v16 = vrot.slane %v4020_v52, 4  ;;  %v15313_v45 = vrot.slane %v4675_v54, 4  ;;  %v15315_v9 = vrot.slane %v4678_v36, 5  ;;  %v9931_v52 = vcombine.low %v4659_v37, %v4668_v2 }
 0x43a   :  { %v4026_v57 = vrot.slane %v4025_v17, 4  ;;  %v4680_v7 = vor.u32 %v4678_v36, %v4677_v56  ;;  %v4682_v26 = vrot.slane %v4677_v56, 4  ;;  %v4686_v17 = vrot.slane %v4684_v58, 7  ;;  %v7971_v28 = vpop.f32.mrf.mxu0 }
 0x43b   :  { %19173 = vst [vmem:[#allocation14_spill] sm:$0xff] %v15313_v45  ;;  %v4023_v63 = vsel %vm11748_vm5, %v4021_v16, %v4022_v3  ;;  %v15327_v54 = vrot.slane %v4687_v21, 5  ;;  %8455 = vmatmul.mubr.bf16.gmra.mxu0 %v9931_v52  ;;  %v15329_v47 = vrot.slane %v4684_v58, 4  ;;  %v9964_v3 = vcombine.low %v15284_v60, %v4290_v62  ;;  %v19175_v16 = vld [vmem:[#allocation15_spill] sm:$0xff]  ;;  %v19178_v28 = vld [vmem:[#allocation13_spill] sm:$0xff]  ;;  %v15344_v58 = vpop.f32.mrf.mxu1 }
 0x43c   :  { %v4031_v22 = vsel %vm11748_vm5, %v4026_v57, %v4030_v27  ;;  %v15334_v2 = vadd.f32 %v15177_v15, %v15076_v6  ;;  %v4292_v27 = vld [vmem:[#allocation2 + $0x1e8] sm:$0xf]  ;;  %v4689_v36 = vor.u32 %v4687_v21, %v4686_v17  ;;  %v19176_v56 = vshrl.u32 %v19175_v16, 16  ;;  %v15342_v52 = vld [vmem:[#allocation2 + $0x1ec] sm:$0xf] }
 0x43d   :  { %v9901_v44 = vcombine.low %v4023_v63, %v4031_v22  ;;  %v19177_v37 = vshll.u32 %v19175_v16, 16  ;;  %v19179_v49 = vshll.u32 %v19178_v28, 16  ;;  %19180 = vst [vmem:[#allocation15_spill] sm:$0xff] %v15342_v52  ;;  %8462 = vmatprep.mubr.bf16.mxu0 %v9964_v3  ;;  %v19181_v15 = vshrl.u32 %v19178_v28, 16 }
 0x43e   :  { %19174 = vst [vmem:[#allocation116_spill] sm:$0xff] %v15334_v2  ;;  %v4032_v57 = vrot.slane %v19176_v56, 4  ;;  %v4042_v62 = vshll.u32 %v3779_v13, 16  ;;  %v4670_v21 = vshrl.u32 %v4288_v41, 16  ;;  %v4690_v17 = vsel %vm11752_vm7, %v4682_v26, %v4689_v36  ;;  %v15356_v41 = vpop.f32.mrf.mxu0 }
 0x43f   :  { %v4033_v61 = vrot.slane %v19177_v37, 5  ;;  %v4036_v63 = vrot.slane %v19179_v49, 5  ;;  %8181 = vmatprep.mubr.bf16.mxu1 %v9901_v44  ;;  %v4038_v60 = vrot.slane %v19181_v15, 4  ;;  %v4697_v16 = vshrl.u32 %v4292_v27, 16  ;;  %v7698_v37 = vpop.f32.mrf.mxu1 }
 0x440   :  { %8182 = vmatmul.mubr.bf16.gmra.mxu1 %v9869_v30  ;;  %v4700_v56 = vshll.u32 %v4292_v27, 16  ;;  %v4044_v2 = vrot.slane %v4042_v62, 5  ;;  %v9708_v44 = vrot.slane %v4670_v21, 11  ;;  %v4706_v45 = vshrl.u32 %v15342_v52, 16  ;;  %v15364_v21 = vld [vmem:[#allocation2 + $0x200] sm:$0xf] }
 0x441   :  { %v4034_v22 = vor.u32 %v4033_v61, %v4032_v57  ;;  %v4039_v49 = vor.u32 %v4038_v60, %v4036_v63  ;;  %v4699_v3 = vrot.slane %v4697_v16, 7  ;;  %v18587_v28 = vshll.u32 %v15342_v52, 16 }
 0x442   :  { %v15354_v15 = vrot.slane %v4697_v16, 4  ;;  %v4681_v26 = vsel %vm11752_vm7, %v9708_v44, %v4680_v7  ;;  %v4708_v61 = vrot.slane %v4706_v45, 7  ;;  %v15360_v13 = vrot.slane %v4700_v56, 5  ;;  %v3780_v44 = vld [vmem:[#allocation2 + $0x208] sm:$0x1] }
 0x443   :  { %v4035_v6 = vrot.slane %v4034_v22, 4  ;;  %v4040_v30 = vrot.slane %v4039_v49, 4  ;;  %v9932_v57 = vcombine.low %v4681_v26, %v4690_v17  ;;  %v4702_v60 = vor.u32 %v4700_v56, %v4699_v3  ;;  %v7976_v22 = vpop.f32.mrf.mxu0  ;;  %v10826_v17 = vld [vmem:[#allocation2 + $0x1e8] sm:$0xf]  ;;  %v10827_v56 = vld [vmem:[#allocation2 + $0x1ec] sm:$0xf] }
 0x444   :  { %19182 = vst [vmem:[#allocation13_spill] sm:$0xff] %v15354_v15  ;;  %19183 = vst [vmem:[#allocation117_spill] sm:$0xff] %v15360_v13  ;;  %v4704_v62 = vrot.slane %v4699_v3, 4  ;;  %v4711_v37 = vor.u32 %v18587_v28, %v4708_v61  ;;  %v15370_v49 = vrot.slane %v4706_v45, 4  ;;  %v9965_v7 = vcombine.low %v4292_v27, %v15342_v52  ;;  %v4291_v13 = vld [vmem:[#allocation2 + $0x1e4] sm:$0x8]  ;;  %v15373_v15 = vpop.f32.mrf.mxu1 }
 0x445   :  { %v4037_v36 = vsel %vm11748_vm5, %v4035_v6, %v4036_v63  ;;  %v4045_v16 = vsel %vm11748_vm5, %v4040_v30, %v4044_v2  ;;  %8463 = vmatmul.mubr.bf16.gmra.mxu0 %v9932_v57  ;;  %v15377_v6 = vadd.f32 %v15207_v46, %v15110_v29  ;;  %v9870_v2 = vcombine.low %v10826_v17, %v10827_v56  ;;  %v4296_v45 = vld [vmem:[#allocation2 + $0x204] sm:$0xf]  ;;  %v15383_v30 = vpop.f32.mrf.mxu0  ;;  %v19187_v27 = vld [vmem:[#allocation38_spill] sm:$0xff]  ;;  %v19190_v22 = vld [vmem:[#allocation36_spill] sm:$0xff] }
 0x446   :  { %19184 = vst [vmem:[#allocation118_spill] sm:$0xff] %v15370_v49  ;;  %v9902_v63 = vcombine.low %v4037_v36, %v4045_v16  ;;  %v15381_v3 = vadd.f32 %v15234_v51, %v15133_v50  ;;  %8470 = vmatprep.mubr.bf16.mxu0 %v9965_v7  ;;  %v19188_v26 = vshrl.u32 %v19187_v27, 16  ;;  %v19189_v36 = vshll.u32 %v19187_v27, 16  ;;  %v7703_v56 = vpop.f32.mrf.mxu1 }
 0x447   :  { %19185 = vst [vmem:[#allocation119_spill] sm:$0xff] %v15377_v6  ;;  %v19191_v29 = vshll.u32 %v19190_v22, 16  ;;  %v19192_v16 = vshrl.u32 %v19190_v22, 16  ;;  %v4056_v50 = vshll.u32 %v3780_v44, 16  ;;  %v4692_v51 = vshrl.u32 %v4291_v13, 16 }
 0x448   :  { %19186 = vst [vmem:[#allocation120_spill] sm:$0xff] %v15381_v3  ;;  %v4046_v61 = vrot.slane %v19188_v26, 4  ;;  %v4047_v57 = vrot.slane %v19189_v36, 5  ;;  %8189 = vmatprep.mubr.bf16.mxu1 %v9902_v63  ;;  %v4712_v28 = vsel %vm11752_vm7, %v4704_v62, %v4711_v37  ;;  %v4719_v7 = vshrl.u32 %v15364_v21, 16  ;;  %v7979_v3 = vpop.f32.mrf.mxu0 }
 0x449   :  { %v4050_v46 = vrot.slane %v19191_v29, 5  ;;  %v4052_v17 = vrot.slane %v19192_v16, 4  ;;  %8190 = vmatmul.mubr.bf16.gmra.mxu1 %v9870_v2  ;;  %v4722_v36 = vshll.u32 %v15364_v21, 16  ;;  %v4728_v6 = vshrl.u32 %v4296_v45, 16  ;;  %v15397_v29 = vpop.f32.mrf.mxu1 }
 0x44a   :  { %v4048_v26 = vor.u32 %v4047_v57, %v4046_v61  ;;  %v4058_v22 = vrot.slane %v4056_v50, 5  ;;  %v9709_v16 = vrot.slane %v4692_v51, 11  ;;  %v4721_v56 = vrot.slane %v4719_v7, 7 }
 0x44b   :  { %v4053_v27 = vor.u32 %v4052_v17, %v4050_v46  ;;  %v4731_v63 = vshll.u32 %v4296_v45, 16  ;;  %v4730_v49 = vrot.slane %v4728_v6, 7  ;;  %v15399_v52 = vrot.slane %v4719_v7, 4  ;;  %v7706_v62 = vpop.f32.mrf.mxu1 }
 0x44c   :  { %v4049_v44 = vrot.slane %v4048_v26, 4  ;;  %v4703_v37 = vsel %vm11752_vm7, %v9709_v16, %v4702_v60  ;;  %v4724_v2 = vor.u32 %v4722_v36, %v4721_v56  ;;  %v4726_v3 = vrot.slane %v4721_v56, 4  ;;  %v15409_v26 = vpop.f32.mrf.mxu0  ;;  %v4294_v16 = vld [vmem:[#allocation2 + $0x1fc] sm:$0x8] }
 0x44d   :  { %v4054_v13 = vrot.slane %v4053_v27, 4  ;;  %19193 = vst [vmem:[#allocation38_spill] sm:$0xff] %v15399_v52  ;;  %v15403_v61 = vrot.slane %v4722_v36, 5  ;;  %v9933_v50 = vcombine.low %v4703_v37, %v4712_v28  ;;  %v4733_v51 = vor.u32 %v4731_v63, %v4730_v49  ;;  %v3781_v36 = vld [vmem:[#allocation2 + $0x220] sm:$0x1] }
 0x44e   :  { %v4051_v57 = vsel %vm11748_vm5, %v4049_v44, %v4050_v46  ;;  %v15413_v62 = vrot.slane %v4731_v63, 5  ;;  %v15415_v60 = vrot.slane %v4728_v6, 4  ;;  %v9966_v46 = vcombine.low %v15364_v21, %v4296_v45  ;;  %v10828_v28 = vld [vmem:[#allocation2 + $0x200] sm:$0xf]  ;;  %v10829_v49 = vld [vmem:[#allocation2 + $0x204] sm:$0xf]  ;;  %v7984_v6 = vpop.f32.mrf.mxu0 }
 0x44f   :  { %19194 = vst [vmem:[#allocation36_spill] sm:$0xff] %v15403_v61  ;;  %v4059_v17 = vsel %vm11748_vm5, %v4054_v13, %v4058_v22  ;;  %8471 = vmatmul.mubr.bf16.gmra.mxu0 %v9933_v50  ;;  %v15420_v22 = vadd.f32 %v15257_v34, %v15162_v39  ;;  %v9871_v56 = vcombine.low %v10828_v28, %v10829_v49  ;;  %v4298_v63 = vld [vmem:[#allocation2 + $0x218] sm:$0xf]  ;;  %v15426_v13 = vld [vmem:[#allocation2 + $0x21c] sm:$0xf]  ;;  %v19200_v21 = vld [vmem:[#allocation39_spill] sm:$0xff]  ;;  %v15436_v49 = vpop.f32.mrf.mxu1 }
 0x450   :  { %v9903_v7 = vcombine.low %v4051_v57, %v4059_v17  ;;  %19195 = vst [vmem:[#allocation121_spill] sm:$0xff] %v15413_v62  ;;  %19196 = vst [vmem:[#allocation122_spill] sm:$0xff] %v15415_v60  ;;  %v15424_v44 = vadd.f32 %v15303_v43, %v15201_v0  ;;  %v19201_v45 = vshrl.u32 %v19200_v21, 16  ;;  %v19202_v39 = vshll.u32 %v19200_v21, 16  ;;  %v19203_v17 = vld [vmem:[#allocation37_spill] sm:$0xff]  ;;  %8478 = vmatprep.mubr.bf16.mxu0 %v9966_v46  ;;  %v15442_v27 = vpop.f32.mrf.mxu0 }
 0x451   :  { %19197 = vst [vmem:[#allocation123_spill] sm:$0xff] %v15420_v22  ;;  %19199 = vst [vmem:[#allocation125_spill] sm:$0xff] %v15426_v13  ;;  %v19204_v50 = vshll.u32 %v19203_v17, 16  ;;  %v19205_v0 = vshrl.u32 %v19203_v17, 16  ;;  %v4714_v6 = vshrl.u32 %v4294_v16, 16  ;;  %v4734_v37 = vsel %vm11752_vm7, %v4726_v3, %v4733_v51 }
 0x452   :  { %19198 = vst [vmem:[#allocation124_spill] sm:$0xff] %v15424_v44  ;;  %8197 = vmatprep.mubr.bf16.mxu1 %v9903_v7  ;;  %v4060_v57 = vrot.slane %v19201_v45, 4  ;;  %v4061_v34 = vrot.slane %v19202_v39, 5  ;;  %v4070_v7 = vshll.u32 %v3781_v36, 16  ;;  %v4741_v21 = vshrl.u32 %v4298_v63, 16  ;;  %v7987_v17 = vpop.f32.mrf.mxu0 }
 0x453   :  { %v4064_v28 = vrot.slane %v19204_v50, 5  ;;  %8198 = vmatmul.mubr.bf16.gmra.mxu1 %v9871_v56  ;;  %v4066_v43 = vrot.slane %v19205_v0, 4  ;;  %v4744_v39 = vshll.u32 %v4298_v63, 16  ;;  %v4750_v44 = vshrl.u32 %v15426_v13, 16  ;;  %v7711_v50 = vpop.f32.mrf.mxu1  ;;  %v3782_v17 = vld [vmem:[#allocation2 + $0x238] sm:$0x1] }
 0x454   :  { %v4062_v45 = vor.u32 %v4061_v34, %v4060_v57  ;;  %v4072_v62 = vrot.slane %v4070_v7, 5  ;;  %v9710_v46 = vrot.slane %v4714_v6, 11  ;;  %v4743_v36 = vrot.slane %v4741_v21, 7  ;;  %v15503_v52 = vld [vmem:[#allocation2 + $0x248] sm:$0xf] }
 0x455   :  { %v4067_v22 = vor.u32 %v4066_v43, %v4064_v28  ;;  %v4752_v16 = vrot.slane %v4750_v44, 7  ;;  %v15446_v60 = vrot.slane %v4741_v21, 4  ;;  %v15448_v3 = vpop.f32.mrf.mxu1  ;;  %v15452_v34 = vrot.slane %v4744_v39, 5 }
 0x456   :  { %v4063_v0 = vrot.slane %v4062_v45, 4  ;;  %v4725_v57 = vsel %vm11752_vm7, %v9710_v46, %v4724_v2  ;;  %v15454_v50 = vrot.slane %v4750_v44, 4  ;;  %v4746_v6 = vor.u32 %v4744_v39, %v4743_v36  ;;  %v4297_v46 = vld [vmem:[#allocation2 + $0x214] sm:$0x8]  ;;  %v10831_v39 = vld [vmem:[#allocation2 + $0x21c] sm:$0xf] }
 0x457   :  { %19206 = vst [vmem:[#allocation39_spill] sm:$0xff] %v15446_v60  ;;  %v4068_v51 = vrot.slane %v4067_v22, 4  ;;  %19207 = vst [vmem:[#allocation37_spill] sm:$0xff] %v15452_v34  ;;  %v9934_v7 = vcombine.low %v4725_v57, %v4734_v37  ;;  %v4748_v45 = vrot.slane %v4743_v36, 4  ;;  %v7714_v56 = vpop.f32.mrf.mxu1  ;;  %v19209_v22 = vshll.u32 %v15426_v13, 16  ;;  %v19215_v57 = vld [vmem:[#allocation40_spill] sm:$0xff] }
 0x458   :  { %19208 = vst [vmem:[#allocation126_spill] sm:$0xff] %v15454_v50  ;;  %v4065_v43 = vsel %vm11748_vm5, %v4063_v0, %v4064_v28  ;;  %v9967_v2 = vcombine.low %v4298_v63, %v15426_v13  ;;  %v15465_v44 = vadd.f32 %v15317_v23, %v15215_v32  ;;  %v15467_v50 = vld [vmem:[#allocation2 + $0x230] sm:$0xf]  ;;  %v10830_v28 = vld [vmem:[#allocation2 + $0x218] sm:$0xf] }
 0x459   :  { %v4073_v21 = vsel %vm11748_vm5, %v4068_v51, %v4072_v62  ;;  %v4755_v60 = vor.u32 %v19209_v22, %v4752_v16  ;;  %8479 = vmatmul.mubr.bf16.gmra.mxu0 %v9934_v7  ;;  %v9872_v56 = vcombine.low %v10830_v28, %v10831_v39  ;;  %v15471_v62 = vadd.f32 %v15356_v41, %v15259_v35  ;;  %v19212_v0 = vld [vmem:[#allocation41_spill] sm:$0xff]  ;;  %v15475_v51 = vpop.f32.mrf.mxu0 }
 0x45a   :  { %19210 = vst [vmem:[#allocation127_spill] sm:$0xff] %v15465_v44  ;;  %v9904_v37 = vcombine.low %v4065_v43, %v4073_v21  ;;  %v19213_v36 = vshrl.u32 %v19212_v0, 16  ;;  %v4302_v63 = vld [vmem:[#allocation2 + $0x234] sm:$0xf]  ;;  %8486 = vmatprep.mubr.bf16.mxu0 %v9967_v2  ;;  %v19214_v32 = vshll.u32 %v19212_v0, 16  ;;  %v19216_v43 = vshll.u32 %v19215_v57, 16 }
 0x45b   :  { %19211 = vst [vmem:[#allocation128_spill] sm:$0xff] %v15471_v62  ;;  %v19217_v21 = vshrl.u32 %v19215_v57, 16  ;;  %v4084_v28 = vshll.u32 %v3782_v17, 16  ;;  %v4736_v35 = vshrl.u32 %v4297_v46, 16  ;;  %v4756_v41 = vsel %vm11752_vm7, %v4748_v45, %v4755_v60  ;;  %v7992_v2 = vpop.f32.mrf.mxu0 }
 0x45c   :  { %v4074_v16 = vrot.slane %v19213_v36, 4  ;;  %v4075_v23 = vrot.slane %v19214_v32, 5  ;;  %v4078_v7 = vrot.slane %v19216_v43, 5  ;;  %8205 = vmatprep.mubr.bf16.mxu1 %v9904_v37  ;;  %v4763_v39 = vshrl.u32 %v15467_v50, 16  ;;  %v15487_v43 = vpop.f32.mrf.mxu1 }
 0x45d   :  { %v4080_v22 = vrot.slane %v19217_v21, 4  ;;  %v4766_v36 = vshll.u32 %v15467_v50, 16  ;;  %8206 = vmatmul.mubr.bf16.gmra.mxu1 %v9872_v56  ;;  %v4086_v62 = vrot.slane %v4084_v28, 5  ;;  %v4772_v44 = vshrl.u32 %v4302_v63, 16  ;;  %v15491_v46 = vpop.f32.mrf.mxu0 }
 0x45e   :  { %v4076_v0 = vor.u32 %v4075_v23, %v4074_v16  ;;  %v9711_v57 = vrot.slane %v4736_v35, 11  ;;  %v4765_v21 = vrot.slane %v4763_v39, 7  ;;  %v4775_v17 = vshll.u32 %v4302_v63, 16  ;;  %v7719_v2 = vpop.f32.mrf.mxu1 }
 0x45f   :  { %v4081_v32 = vor.u32 %v4080_v22, %v4078_v7  ;;  %v15489_v37 = vrot.slane %v4763_v39, 4  ;;  %v4774_v13 = vrot.slane %v4772_v44, 7  ;;  %v15493_v34 = vrot.slane %v4766_v36, 5  ;;  %v7995_v28 = vpop.f32.mrf.mxu0 }
 0x460   :  { %v4077_v60 = vrot.slane %v4076_v0, 4  ;;  %v4747_v56 = vsel %vm11752_vm7, %v9711_v57, %v4746_v6  ;;  %v4768_v16 = vor.u32 %v4766_v36, %v4765_v21  ;;  %v4770_v23 = vrot.slane %v4765_v21, 4  ;;  %v15505_v61 = vpop.f32.mrf.mxu1  ;;  %v3783_v21 = vld [vmem:[#allocation2 + $0x250] sm:$0x1]  ;;  %v4300_v28 = vld [vmem:[#allocation2 + $0x22c] sm:$0x8] }
 0x461   :  { %19218 = vst [vmem:[#allocation41_spill] sm:$0xff] %v15489_v37  ;;  %v4082_v45 = vrot.slane %v4081_v32, 4  ;;  %19219 = vst [vmem:[#allocation40_spill] sm:$0xff] %v15493_v34  ;;  %v15497_v22 = vrot.slane %v4775_v17, 5  ;;  %v9935_v0 = vcombine.low %v4747_v56, %v4756_v41  ;;  %v4777_v32 = vor.u32 %v4775_v17, %v4774_v13  ;;  %v10832_v13 = vld [vmem:[#allocation2 + $0x230] sm:$0xf] }
 0x462   :  { %v4079_v35 = vsel %vm11748_vm5, %v4077_v60, %v4078_v7  ;;  %v15509_v36 = vrot.slane %v4772_v44, 4  ;;  %v9968_v57 = vcombine.low %v15467_v50, %v4302_v63  ;;  %v10833_v7 = vld [vmem:[#allocation2 + $0x234] sm:$0xf]  ;;  %v15518_v17 = vadd.f32 %v15409_v26, %v15319_v53  ;;  %v19224_v60 = vld [vmem:[#allocation35_spill] sm:$0xff]  ;;  %v15522_v56 = vld [vmem:[#allocation2 + $0x24c] sm:$0xf]  ;;  %v7722_v50 = vpop.f32.mrf.mxu1 }
 0x463   :  { %19220 = vst [vmem:[#allocation129_spill] sm:$0xff] %v15497_v22  ;;  %v4087_v39 = vsel %vm11748_vm5, %v4082_v45, %v4086_v62  ;;  %8487 = vmatmul.mubr.bf16.gmra.mxu0 %v9935_v0  ;;  %v15514_v62 = vadd.f32 %v15383_v30, %v15276_v10  ;;  %v9873_v41 = vcombine.low %v10832_v13, %v10833_v7  ;;  %v19225_v45 = vshrl.u32 %v19224_v60, 16  ;;  %v15535_v50 = vpop.f32.mrf.mxu0 }
 0x464   :  { %v9905_v2 = vcombine.low %v4079_v35, %v4087_v39  ;;  %19221 = vst [vmem:[#allocation130_spill] sm:$0xff] %v15509_v36  ;;  %19223 = vst [vmem:[#allocation132_spill] sm:$0xff] %v15518_v17  ;;  %8494 = vmatprep.mubr.bf16.mxu0 %v9968_v57  ;;  %v19227_v10 = vshll.u32 %v19224_v60, 16  ;;  %v19228_v35 = vld [vmem:[#allocation44_spill] sm:$0xff]  ;;  %v4098_v13 = vshll.u32 %v3783_v21, 16  ;;  %v4758_v7 = vshrl.u32 %v4300_v28, 16 }
 0x465   :  { %19222 = vst [vmem:[#allocation131_spill] sm:$0xff] %v15514_v62  ;;  %v4088_v44 = vrot.slane %v19225_v45, 4  ;;  %19226 = vst [vmem:[#allocation35_spill] sm:$0xff] %v15522_v56  ;;  %v19229_v39 = vshll.u32 %v19228_v35, 16  ;;  %v19230_v53 = vshrl.u32 %v19228_v35, 16  ;;  %v4778_v45 = vsel %vm11752_vm7, %v4770_v23, %v4777_v32  ;;  %v8000_v21 = vpop.f32.mrf.mxu0  ;;  %v15542_v32 = vpop.f32.mrf.mxu1 }
 0x466   :  { %8213 = vmatprep.mubr.bf16.mxu1 %v9905_v2  ;;  %v4089_v30 = vrot.slane %v19227_v10, 5  ;;  %v4785_v2 = vshrl.u32 %v15503_v52, 16  ;;  %v4788_v60 = vshll.u32 %v15503_v52, 16  ;;  %v4794_v10 = vshrl.u32 %v15522_v56, 16  ;;  %v3784_v21 = vld [vmem:[#allocation2 + $0x268] sm:$0x1] }
 0x467   :  { %v4092_v0 = vrot.slane %v19229_v39, 5  ;;  %v4094_v26 = vrot.slane %v19230_v53, 4  ;;  %8214 = vmatmul.mubr.bf16.gmra.mxu1 %v9873_v41  ;;  %v4100_v39 = vrot.slane %v4098_v13, 5  ;;  %v9712_v6 = vrot.slane %v4758_v7, 11  ;;  %v15548_v13 = vpop.f32.mrf.mxu0  ;;  %v7727_v22 = vpop.f32.mrf.mxu1 }
 0x468   :  { %v4090_v57 = vor.u32 %v4089_v30, %v4088_v44  ;;  %v4787_v35 = vrot.slane %v4785_v2, 7  ;;  %v18597_v41 = vshll.u32 %v15522_v56, 16  ;;  %v4796_v17 = vrot.slane %v4794_v10, 7 }
 0x469   :  { %v4095_v63 = vor.u32 %v4094_v26, %v4092_v0  ;;  %v15540_v23 = vrot.slane %v4785_v2, 4  ;;  %v4769_v44 = vsel %vm11752_vm7, %v9712_v6, %v4768_v16  ;;  %v15546_v62 = vrot.slane %v4788_v60, 5 }
 0x46a   :  { %v4091_v28 = vrot.slane %v4090_v57, 4  ;;  %v4790_v30 = vor.u32 %v4788_v60, %v4787_v35  ;;  %v4792_v26 = vrot.slane %v4787_v35, 4  ;;  %v9936_v57 = vcombine.low %v4769_v44, %v4778_v45  ;;  %v10834_v45 = vld [vmem:[#allocation2 + $0x248] sm:$0xf] }
 0x46b   :  { %v4096_v53 = vrot.slane %v4095_v63, 4  ;;  %19231 = vst [vmem:[#allocation44_spill] sm:$0xff] %v15540_v23  ;;  %19232 = vst [vmem:[#allocation133_spill] sm:$0xff] %v15546_v62  ;;  %v4799_v2 = vor.u32 %v18597_v41, %v4796_v17  ;;  %v4303_v23 = vld [vmem:[#allocation2 + $0x244] sm:$0x8]  ;;  %v15556_v6 = vrot.slane %v4794_v10, 4  ;;  %v9969_v60 = vcombine.low %v15503_v52, %v15522_v56 }
 0x46c   :  { %v4093_v7 = vsel %vm11748_vm5, %v4091_v28, %v4092_v0  ;;  %v15562_v35 = vadd.f32 %v15442_v27, %v15344_v58  ;;  %v15564_v0 = vld [vmem:[#allocation2 + $0x260] sm:$0xf]  ;;  %8495 = vmatmul.mubr.bf16.gmra.mxu0 %v9936_v57  ;;  %v10835_v28 = vld [vmem:[#allocation2 + $0x24c] sm:$0xf]  ;;  %v15568_v22 = vadd.f32 %v15475_v51, %v15373_v15  ;;  %v19236_v10 = vld [vmem:[#allocation42_spill] sm:$0xff]  ;;  %v15574_v58 = vpop.f32.mrf.mxu1  ;;  %v4112_v41 = vshll.u32 %v3784_v21, 16 }
 0x46d   :  { %v4101_v63 = vsel %vm11748_vm5, %v4096_v53, %v4100_v39  ;;  %19233 = vst [vmem:[#allocation134_spill] sm:$0xff] %v15556_v6  ;;  %v8003_v39 = vpop.f32.mrf.mxu0  ;;  %v9874_v17 = vcombine.low %v10834_v45, %v10835_v28  ;;  %v19237_v53 = vshrl.u32 %v19236_v10, 16  ;;  %v19238_v52 = vshll.u32 %v19236_v10, 16  ;;  %8502 = vmatprep.mubr.bf16.mxu0 %v9969_v60  ;;  %v19239_v27 = vld [vmem:[#allocation43_spill] sm:$0xff] }
 0x46e   :  { %v9906_v16 = vcombine.low %v4093_v7, %v4101_v63  ;;  %19234 = vst [vmem:[#allocation135_spill] sm:$0xff] %v15562_v35  ;;  %19235 = vst [vmem:[#allocation136_spill] sm:$0xff] %v15568_v22  ;;  %v4308_v63 = vld [vmem:[#allocation2 + $0x264] sm:$0xf]  ;;  %v19240_v57 = vshll.u32 %v19239_v27, 16  ;;  %v19241_v45 = vshrl.u32 %v19239_v27, 16  ;;  %v4800_v10 = vsel %vm11752_vm7, %v4792_v26, %v4799_v2  ;;  %v7730_v60 = vpop.f32.mrf.mxu1 }
 0x46f   :  { %v4102_v44 = vrot.slane %v19237_v53, 4  ;;  %v4103_v7 = vrot.slane %v19238_v52, 5  ;;  %v4780_v15 = vshrl.u32 %v4303_v23, 16  ;;  %v15580_v51 = vpop.f32.mrf.mxu0  ;;  %v4807_v52 = vshrl.u32 %v15564_v0, 16 }
 0x470   :  { %8221 = vmatprep.mubr.bf16.mxu1 %v9906_v16  ;;  %v4106_v39 = vrot.slane %v19240_v57, 5  ;;  %v4108_v28 = vrot.slane %v19241_v45, 4  ;;  %v4810_v16 = vshll.u32 %v15564_v0, 16  ;;  %v4114_v35 = vrot.slane %v4112_v41, 5  ;;  %v15594_v60 = vpop.f32.mrf.mxu1 }
 0x471   :  { %8222 = vmatmul.mubr.bf16.gmra.mxu1 %v9874_v17  ;;  %v4104_v53 = vor.u32 %v4103_v7, %v4102_v44  ;;  %v9713_v57 = vrot.slane %v4780_v15, 11  ;;  %v4816_v6 = vshrl.u32 %v4308_v63, 16  ;;  %v8008_v27 = vpop.f32.mrf.mxu0  ;;  %v4809_v21 = vrot.slane %v4807_v52, 7 }
 0x472   :  { %v4109_v22 = vor.u32 %v4108_v28, %v4106_v39  ;;  %v4819_v23 = vshll.u32 %v4308_v63, 16  ;;  %v15586_v56 = vrot.slane %v4807_v52, 4  ;;  %v15590_v2 = vrot.slane %v4810_v16, 5  ;;  %v3785_v27 = vld [vmem:[#allocation2 + $0x280] sm:$0x1]  ;;  %v8057_v36 = vpop.f32.mrf.mxu1 }
 0x473   :  { %v4105_v45 = vrot.slane %v4104_v53, 4  ;;  %v4791_v44 = vsel %vm11752_vm7, %v9713_v57, %v4790_v30  ;;  %v4818_v26 = vrot.slane %v4816_v6, 7  ;;  %v15592_v7 = vpop.f32.mrf.mxu0  ;;  %v4812_v15 = vor.u32 %v4810_v16, %v4809_v21  ;;  %v15611_v16 = vld [vmem:[#allocation2 + $0x278] sm:$0xf]  ;;  %v19248_v36 = vld [vmem:[#allocation47_spill] sm:$0xff] }
 0x474   :  { %19242 = vst [vmem:[#allocation42_spill] sm:$0xff] %v15586_v56  ;;  %v4110_v17 = vrot.slane %v4109_v22, 4  ;;  %19243 = vst [vmem:[#allocation43_spill] sm:$0xff] %v15590_v2  ;;  %v9937_v28 = vcombine.low %v4791_v44, %v4800_v10  ;;  %v4814_v53 = vrot.slane %v4809_v21, 4  ;;  %v15602_v57 = vrot.slane %v4819_v23, 5 }
 0x475   :  { %v4107_v41 = vsel %vm11748_vm5, %v4105_v45, %v4106_v39  ;;  %v4821_v22 = vor.u32 %v4819_v23, %v4818_v26  ;;  %v8011_v62 = vpop.f32.mrf.mxu0  ;;  %v15604_v34 = vrot.slane %v4816_v6, 4  ;;  %v9970_v39 = vcombine.low %v15564_v0, %v4308_v63  ;;  %v10836_v45 = vld [vmem:[#allocation2 + $0x260] sm:$0xf]  ;;  %v10837_v21 = vld [vmem:[#allocation2 + $0x264] sm:$0xf] }
 0x476   :  { %v4115_v52 = vsel %vm11748_vm5, %v4110_v17, %v4114_v35  ;;  %19244 = vst [vmem:[#allocation137_spill] sm:$0xff] %v15602_v57  ;;  %8503 = vmatmul.mubr.bf16.gmra.mxu0 %v9937_v28  ;;  %v15609_v10 = vadd.f32 %v15491_v46, %v15397_v29  ;;  %v4306_v35 = vld [vmem:[#allocation2 + $0x25c] sm:$0x8]  ;;  %v9875_v23 = vcombine.low %v10836_v45, %v10837_v21  ;;  %v19249_v17 = vshrl.u32 %v19248_v36, 16  ;;  %v15625_v46 = vpop.f32.mrf.mxu1  ;;  %v4309_v57 = vld [vmem:[#allocation2 + $0x274] sm:$0x8] }
 0x477   :  { %v9907_v37 = vcombine.low %v4107_v41, %v4115_v52  ;;  %19245 = vst [vmem:[#allocation138_spill] sm:$0xff] %v15604_v34  ;;  %v15615_v62 = vadd.f32 %v15535_v50, %v15436_v49  ;;  %v19250_v44 = vshll.u32 %v19248_v36, 16  ;;  %v15621_v63 = vld [vmem:[#allocation2 + $0x27c] sm:$0xf]  ;;  %v15623_v29 = vpop.f32.mrf.mxu0  ;;  %8510 = vmatprep.mubr.bf16.mxu0 %v9970_v39  ;;  %v4126_v45 = vshll.u32 %v3785_v27, 16 }
 0x478   :  { %19246 = vst [vmem:[#allocation139_spill] sm:$0xff] %v15609_v10  ;;  %v4116_v6 = vrot.slane %v19249_v17, 4  ;;  %19251 = vst [vmem:[#allocation47_spill] sm:$0xff] %v15621_v63  ;;  %v19252_v41 = vld [vmem:[#allocation46_spill] sm:$0xff]  ;;  %v4802_v36 = vshrl.u32 %v4306_v35, 16  ;;  %v4822_v17 = vsel %vm11752_vm7, %v4814_v53, %v4821_v22  ;;  %v8060_v30 = vpop.f32.mrf.mxu1  ;;  %v4832_v39 = vshll.u32 %v15611_v16, 16 }
 0x479   :  { %19247 = vst [vmem:[#allocation140_spill] sm:$0xff] %v15615_v62  ;;  %v4117_v0 = vrot.slane %v19250_v44, 5  ;;  %8229 = vmatprep.mubr.bf16.mxu1 %v9907_v37  ;;  %v19253_v49 = vshll.u32 %v19252_v41, 16  ;;  %v19254_v28 = vshrl.u32 %v19252_v41, 16  ;;  %v4829_v44 = vshrl.u32 %v15611_v16, 16  ;;  %v8016_v37 = vpop.f32.mrf.mxu0 }
 0x47a   :  { %8230 = vmatmul.mubr.bf16.gmra.mxu1 %v9875_v23  ;;  %v4128_v26 = vrot.slane %v4126_v45, 5  ;;  %v9714_v41 = vrot.slane %v4802_v36, 11  ;;  %v18606_v27 = vshll.u32 %v15621_v63, 16  ;;  %v15643_v22 = vrot.slane %v4832_v39, 5  ;;  %v15645_v30 = vpop.f32.mrf.mxu1 }
 0x47b   :  { %v4120_v50 = vrot.slane %v19253_v49, 5  ;;  %v4122_v52 = vrot.slane %v19254_v28, 4  ;;  %v4118_v21 = vor.u32 %v4117_v0, %v4116_v6  ;;  %v4838_v49 = vshrl.u32 %v15621_v63, 16  ;;  %v15639_v23 = vpop.f32.mrf.mxu0 }
 0x47c   :  { %v4831_v28 = vrot.slane %v4829_v44, 7  ;;  %v15641_v53 = vrot.slane %v4829_v44, 4  ;;  %19256 = vst [vmem:[#allocation141_spill] sm:$0xff] %v15643_v22  ;;  %v3786_v22 = vld [vmem:[#allocation2 + $0x298] sm:$0x1]  ;;  %v8065_v34 = vpop.f32.mrf.mxu1 }
 0x47d   :  { %v4123_v62 = vor.u32 %v4122_v52, %v4120_v50  ;;  %v4119_v10 = vrot.slane %v4118_v21, 4  ;;  %v4840_v6 = vrot.slane %v4838_v49, 7  ;;  %v4813_v52 = vsel %vm11752_vm7, %v9714_v41, %v4812_v15  ;;  %v8019_v36 = vpop.f32.mrf.mxu0  ;;  %v4314_v41 = vld [vmem:[#allocation2 + $0x294] sm:$0xf] }
 0x47e   :  { %19255 = vst [vmem:[#allocation46_spill] sm:$0xff] %v15641_v53  ;;  %v4834_v45 = vor.u32 %v4832_v39, %v4831_v28  ;;  %v4836_v21 = vrot.slane %v4831_v28, 4  ;;  %v15655_v53 = vrot.slane %v4838_v49, 4  ;;  %v15661_v15 = vadd.f32 %v15548_v13, %v15448_v3  ;;  %v10839_v39 = vld [vmem:[#allocation2 + $0x27c] sm:$0xf]  ;;  %v19260_v49 = vld [vmem:[#allocation45_spill] sm:$0xff]  ;;  %v15677_v36 = vpop.f32.mrf.mxu1 }
 0x47f   :  { %v4124_v35 = vrot.slane %v4123_v62, 4  ;;  %v4121_v0 = vsel %vm11748_vm5, %v4119_v10, %v4120_v50  ;;  %v9938_v62 = vcombine.low %v4813_v52, %v4822_v17  ;;  %v4843_v44 = vor.u32 %v18606_v27, %v4840_v6  ;;  %v10838_v50 = vld [vmem:[#allocation2 + $0x278] sm:$0xf]  ;;  %v15663_v17 = vld [vmem:[#allocation2 + $0x290] sm:$0xf]  ;;  %v15665_v28 = vpop.f32.mrf.mxu0 }
 0x480   :  { %19257 = vst [vmem:[#allocation142_spill] sm:$0xff] %v15655_v53  ;;  %v9971_v10 = vcombine.low %v15611_v16, %v15621_v63  ;;  %19258 = vst [vmem:[#allocation143_spill] sm:$0xff] %v15661_v15  ;;  %v15669_v34 = vadd.f32 %v15580_v51, %v15487_v43  ;;  %v19262_v6 = vshll.u32 %v19260_v49, 16  ;;  %v19263_v13 = vld [vmem:[#allocation50_spill] sm:$0xff]  ;;  %v8068_v27 = vpop.f32.mrf.mxu1  ;;  %v4863_v15 = vshll.u32 %v4314_v41, 16 }
 0x481   :  { %v4129_v37 = vsel %vm11748_vm5, %v4124_v35, %v4128_v26  ;;  %v9876_v26 = vcombine.low %v10838_v50, %v10839_v39  ;;  %8511 = vmatmul.mubr.bf16.gmra.mxu0 %v9938_v62  ;;  %v19261_v35 = vshrl.u32 %v19260_v49, 16  ;;  %v4140_v50 = vshll.u32 %v3786_v22, 16  ;;  %v8346_v51 = vpop.f32.mrf.mxu0 }
 0x482   :  { %v9908_v56 = vcombine.low %v4121_v0, %v4129_v37  ;;  %19259 = vst [vmem:[#allocation144_spill] sm:$0xff] %v15669_v34  ;;  %v4131_v3 = vrot.slane %v19262_v6, 5  ;;  %v19264_v0 = vshll.u32 %v19263_v13, 16  ;;  %8518 = vmatprep.mubr.bf16.mxu0 %v9971_v10  ;;  %v19265_v37 = vshrl.u32 %v19263_v13, 16 }
 0x483   :  { %v4130_v16 = vrot.slane %v19261_v35, 4  ;;  %v4824_v39 = vshrl.u32 %v4309_v57, 16  ;;  %v4844_v43 = vsel %vm11752_vm7, %v4836_v21, %v4843_v44  ;;  %v4851_v49 = vshrl.u32 %v15663_v17, 16  ;;  %v15685_v13 = vpop.f32.mrf.mxu0 }
 0x484   :  { %v4134_v52 = vrot.slane %v19264_v0, 5  ;;  %8237 = vmatprep.mubr.bf16.mxu1 %v9908_v56  ;;  %v4136_v62 = vrot.slane %v19265_v37, 4  ;;  %v4854_v6 = vshll.u32 %v15663_v17, 16  ;;  %v4860_v0 = vshrl.u32 %v4314_v41, 16 }
 0x485   :  { %8238 = vmatmul.mubr.bf16.gmra.mxu1 %v9876_v26  ;;  %v4132_v35 = vor.u32 %v4131_v3, %v4130_v16  ;;  %v4142_v56 = vrot.slane %v4140_v50, 5  ;;  %v9715_v10 = vrot.slane %v4824_v39, 11  ;;  %v4853_v57 = vrot.slane %v4851_v49, 7  ;;  %v8349_v27 = vpop.f32.mrf.mxu0  ;;  %v15695_v3 = vpop.f32.mrf.mxu1 }
 0x486   :  { %v4137_v34 = vor.u32 %v4136_v62, %v4134_v52  ;;  %v4862_v37 = vrot.slane %v4860_v0, 7  ;;  %v15687_v53 = vrot.slane %v4851_v49, 4  ;;  %v15691_v26 = vrot.slane %v4854_v6, 5 }
 0x487   :  { %v4133_v22 = vrot.slane %v4132_v35, 4  ;;  %v4835_v44 = vsel %vm11752_vm7, %v9715_v10, %v4834_v45  ;;  %v15693_v16 = vrot.slane %v4863_v15, 5  ;;  %v4856_v39 = vor.u32 %v4854_v6, %v4853_v57  ;;  %v3787_v10 = vld [vmem:[#allocation2 + $0x2b0] sm:$0x1]  ;;  %v8073_v63 = vpop.f32.mrf.mxu1 }
 0x488   :  { %19266 = vst [vmem:[#allocation45_spill] sm:$0xff] %v15687_v53  ;;  %v4138_v21 = vrot.slane %v4137_v34, 4  ;;  %v9939_v50 = vcombine.low %v4835_v44, %v4844_v43  ;;  %v4858_v51 = vrot.slane %v4853_v57, 4  ;;  %v4865_v34 = vor.u32 %v4863_v15, %v4862_v37  ;;  %v19270_v43 = vld [vmem:[#allocation53_spill] sm:$0xff]  ;;  %v4312_v15 = vld [vmem:[#allocation2 + $0x28c] sm:$0x8] }
 0x489   :  { %19267 = vst [vmem:[#allocation50_spill] sm:$0xff] %v15693_v16  ;;  %v4135_v62 = vsel %vm11748_vm5, %v4133_v22, %v4134_v52  ;;  %v15703_v49 = vrot.slane %v4860_v0, 4  ;;  %v9972_v2 = vcombine.low %v15663_v17, %v4314_v41  ;;  %v15708_v52 = vadd.f32 %v15592_v7, %v15505_v61  ;;  %v10840_v22 = vld [vmem:[#allocation2 + $0x290] sm:$0xf]  ;;  %v10841_v63 = vld [vmem:[#allocation2 + $0x294] sm:$0xf] }
 0x48a   :  { %v4143_v35 = vsel %vm11748_vm5, %v4138_v21, %v4142_v56  ;;  %8519 = vmatmul.mubr.bf16.gmra.mxu0 %v9939_v50  ;;  %v15712_v6 = vadd.f32 %v15594_v60, %v19270_v43  ;;  %v15714_v56 = vld [vmem:[#allocation2 + $0x2a8] sm:$0xf]  ;;  %v9877_v57 = vcombine.low %v10840_v22, %v10841_v63  ;;  %v15720_v17 = vadd.f32 %v15623_v29, %v15542_v32  ;;  %v15724_v37 = vld [vmem:[#allocation2 + $0x2ac] sm:$0xf]  ;;  %v15726_v60 = vpop.f32.mrf.mxu1 }
 0x48b   :  { %19268 = vst [vmem:[#allocation145_spill] sm:$0xff] %v15703_v49  ;;  %v9909_v27 = vcombine.low %v4135_v62, %v4143_v35  ;;  %19269 = vst [vmem:[#allocation146_spill] sm:$0xff] %v15708_v52  ;;  %v19272_v41 = vld [vmem:[#allocation48_spill] sm:$0xff]  ;;  %8526 = vmatprep.mubr.bf16.mxu0 %v9972_v2  ;;  %v19276_v62 = vld [vmem:[#allocation49_spill] sm:$0xff]  ;;  %v4154_v32 = vshll.u32 %v3787_v10, 16  ;;  %v4846_v29 = vshrl.u32 %v4312_v15, 16  ;;  %v4866_v63 = vsel %vm11752_vm7, %v4858_v51, %v4865_v34 }
 0x48c   :  { %19271 = vst [vmem:[#allocation53_spill] sm:$0xff] %v15720_v17  ;;  %v19273_v61 = vshrl.u32 %v19272_v41, 16  ;;  %19274 = vst [vmem:[#allocation48_spill] sm:$0xff] %v15724_v37  ;;  %v19275_v21 = vshll.u32 %v19272_v41, 16  ;;  %v19277_v50 = vshll.u32 %v19276_v62, 16  ;;  %v19278_v43 = vshrl.u32 %v19276_v62, 16  ;;  %v8076_v2 = vpop.f32.mrf.mxu1 }
 0x48d   :  { %8245 = vmatprep.mubr.bf16.mxu1 %v9909_v27  ;;  %v4876_v27 = vshll.u32 %v15714_v56, 16  ;;  %v4882_v45 = vshrl.u32 %v15724_v37, 16  ;;  %v9716_v62 = vrot.slane %v4846_v29, 11  ;;  %v18611_v10 = vshll.u32 %v15724_v37, 16 }
 0x48e   :  { %v4144_v7 = vrot.slane %v19273_v61, 4  ;;  %v4145_v44 = vrot.slane %v19275_v21, 5  ;;  %v4148_v35 = vrot.slane %v19277_v50, 5  ;;  %v4150_v22 = vrot.slane %v19278_v43, 4  ;;  %8246 = vmatmul.mubr.bf16.gmra.mxu1 %v9877_v57  ;;  %v15739_v50 = vpop.f32.mrf.mxu0  ;;  %v15746_v2 = vpop.f32.mrf.mxu1 }
 0x48f   :  { %v4873_v61 = vshrl.u32 %v15714_v56, 16  ;;  %v4156_v21 = vrot.slane %v4154_v32, 5  ;;  %v4884_v34 = vrot.slane %v4882_v45, 7  ;;  %v15744_v17 = vrot.slane %v4876_v27, 5 }
 0x490   :  { %v4146_v0 = vor.u32 %v4145_v44, %v4144_v7  ;;  %v4151_v41 = vor.u32 %v4150_v22, %v4148_v35  ;;  %v8354_v52 = vpop.f32.mrf.mxu0  ;;  %v4857_v7 = vsel %vm11752_vm7, %v9716_v62, %v4856_v39  ;;  %v15750_v32 = vrot.slane %v4882_v45, 4  ;;  %v19282_v45 = vld [vmem:[#allocation51_spill] sm:$0xff]  ;;  %v19284_v62 = vld [vmem:[#allocation56_spill] sm:$0xff] }
 0x491   :  { %v4875_v43 = vrot.slane %v4873_v61, 7  ;;  %v15742_v15 = vrot.slane %v4873_v61, 4  ;;  %19280 = vst [vmem:[#allocation147_spill] sm:$0xff] %v15744_v17  ;;  %v9940_v61 = vcombine.low %v4857_v7, %v4866_v63  ;;  %v3788_v52 = vld [vmem:[#allocation2 + $0x2c8] sm:$0x1]  ;;  %v9973_v39 = vcombine.low %v15714_v56, %v15724_v37 }
 0x492   :  { %v4147_v57 = vrot.slane %v4146_v0, 4  ;;  %v4152_v51 = vrot.slane %v4151_v41, 4  ;;  %19281 = vst [vmem:[#allocation148_spill] sm:$0xff] %v15750_v32  ;;  %v4887_v41 = vor.u32 %v18611_v10, %v4884_v34  ;;  %v15758_v17 = vpop.f32.mrf.mxu0  ;;  %v15768_v63 = vld [vmem:[#allocation2 + $0x2c0] sm:$0xf]  ;;  %v19285_v34 = vld [vmem:[#allocation52_spill] sm:$0xff] }
 0x493   :  { %19279 = vst [vmem:[#allocation49_spill] sm:$0xff] %v15742_v15  ;;  %v4878_v44 = vor.u32 %v4876_v27, %v4875_v43  ;;  %v4880_v22 = vrot.slane %v4875_v43, 4  ;;  %v8081_v15 = vpop.f32.mrf.mxu1  ;;  %v8059_v27 = vadd.f32 %v15625_v46, %v19282_v45  ;;  %8527 = vmatmul.mubr.bf16.gmra.mxu0 %v9940_v61  ;;  %v15772_v43 = vadd.f32 %v15645_v30, %v19284_v62  ;;  %v19288_v61 = vld [vmem:[#allocation55_spill] sm:$0xff] }
 0x494   :  { %v4149_v29 = vsel %vm11748_vm5, %v4147_v57, %v4148_v35  ;;  %v4157_v0 = vsel %vm11748_vm5, %v4152_v51, %v4156_v21  ;;  %v15766_v35 = vadd.f32 %v15639_v23, %v15574_v58  ;;  %v4315_v21 = vld [vmem:[#allocation2 + $0x2a4] sm:$0x8]  ;;  %v10842_v15 = vld [vmem:[#allocation2 + $0x2a8] sm:$0xf]  ;;  %v10843_v57 = vld [vmem:[#allocation2 + $0x2ac] sm:$0xf]  ;;  %v8357_v58 = vpop.f32.mrf.mxu0  ;;  %8534 = vmatprep.mubr.bf16.mxu0 %v9973_v39 }
 0x495   :  { %v9910_v16 = vcombine.low %v4149_v29, %v4157_v0  ;;  %v9878_v51 = vcombine.low %v10842_v15, %v10843_v57  ;;  %v19286_v56 = vshrl.u32 %v19285_v34, 16  ;;  %v19287_v46 = vshll.u32 %v19285_v34, 16  ;;  %v4320_v0 = vld [vmem:[#allocation2 + $0x2c4] sm:$0xf]  ;;  %v15778_v23 = vpop.f32.mrf.mxu1 }
 0x496   :  { %19283 = vst [vmem:[#allocation51_spill] sm:$0xff] %v15766_v35  ;;  %v19289_v45 = vshll.u32 %v19288_v61, 16  ;;  %v19290_v30 = vshrl.u32 %v19288_v61, 16  ;;  %v4168_v35 = vshll.u32 %v3788_v52, 16  ;;  %v15786_v15 = vadd.f32 %v15665_v28, %v15712_v6 }
 0x497   :  { %v4158_v7 = vrot.slane %v19286_v56, 4  ;;  %v4159_v29 = vrot.slane %v19287_v46, 5  ;;  %8253 = vmatprep.mubr.bf16.mxu1 %v9910_v16  ;;  %v4868_v34 = vshrl.u32 %v4315_v21, 16  ;;  %v4888_v56 = vsel %vm11752_vm7, %v4880_v22, %v4887_v41  ;;  %v8084_v39 = vpop.f32.mrf.mxu1 }
 0x498   :  { %v4162_v10 = vrot.slane %v19289_v45, 5  ;;  %v4164_v62 = vrot.slane %v19290_v30, 4  ;;  %19291 = vst [vmem:[#allocation56_spill] sm:$0xff] %v15786_v15  ;;  %8254 = vmatmul.mubr.bf16.gmra.mxu1 %v9878_v51  ;;  %v4895_v16 = vshrl.u32 %v15768_v63, 16  ;;  %v4170_v58 = vrot.slane %v4168_v35, 5  ;;  %v15792_v30 = vpop.f32.mrf.mxu0 }
 0x499   :  { %v4160_v57 = vor.u32 %v4159_v29, %v4158_v7  ;;  %v4898_v45 = vshll.u32 %v15768_v63, 16  ;;  %v4904_v61 = vshrl.u32 %v4320_v0, 16  ;;  %v9717_v32 = vrot.slane %v4868_v34, 11  ;;  %v15798_v41 = vpop.f32.mrf.mxu1 }
 0x49a   :  { %v4165_v46 = vor.u32 %v4164_v62, %v4162_v10  ;;  %v4897_v28 = vrot.slane %v4895_v16, 7  ;;  %v4907_v6 = vshll.u32 %v4320_v0, 16  ;;  %v15794_v21 = vrot.slane %v4895_v16, 4  ;;  %v8362_v22 = vpop.f32.mrf.mxu0 }
 0x49b   :  { %v4161_v52 = vrot.slane %v4160_v57, 4  ;;  %v4906_v7 = vrot.slane %v4904_v61, 7  ;;  %v15796_v29 = vrot.slane %v4898_v45, 5  ;;  %v4879_v62 = vsel %vm11752_vm7, %v9717_v32, %v4878_v44  ;;  %v8089_v22 = vpop.f32.mrf.mxu1  ;;  %v3789_v32 = vld [vmem:[#allocation2 + $0x2e0] sm:$0x1] }
 0x49c   :  { %v4166_v51 = vrot.slane %v4165_v46, 4  ;;  %19292 = vst [vmem:[#allocation52_spill] sm:$0xff] %v15794_v21  ;;  %v4900_v39 = vor.u32 %v4898_v45, %v4897_v28  ;;  %v4902_v57 = vrot.slane %v4897_v28, 4  ;;  %v9941_v46 = vcombine.low %v4879_v62, %v4888_v56  ;;  %v15808_v37 = vpop.f32.mrf.mxu0  ;;  %v4318_v45 = vld [vmem:[#allocation2 + $0x2bc] sm:$0x8]  ;;  %v19297_v28 = vld [vmem:[#allocation60_spill] sm:$0xff] }
 0x49d   :  { %v4163_v35 = vsel %vm11748_vm5, %v4161_v52, %v4162_v10  ;;  %v4909_v15 = vor.u32 %v4907_v6, %v4906_v7  ;;  %v15810_v53 = vrot.slane %v4907_v6, 5  ;;  %v15812_v10 = vrot.slane %v4904_v61, 4  ;;  %v19295_v52 = vld [vmem:[#allocation57_spill] sm:$0xff]  ;;  %v10844_v7 = vld [vmem:[#allocation2 + $0x2c0] sm:$0xf] }
 0x49e   :  { %v4171_v34 = vsel %vm11748_vm5, %v4166_v51, %v4170_v58  ;;  %v9974_v44 = vcombine.low %v15768_v63, %v4320_v0  ;;  %8535 = vmatmul.mubr.bf16.gmra.mxu0 %v9941_v46  ;;  %v8067_v56 = vadd.f32 %v15677_v36, %v19295_v52  ;;  %v15818_v58 = vadd.f32 %v15685_v13, %v8059_v27  ;;  %v10845_v6 = vld [vmem:[#allocation2 + $0x2c4] sm:$0xf]  ;;  %v4322_v61 = vld [vmem:[#allocation2 + $0x2d8] sm:$0xf]  ;;  %v8365_v62 = vpop.f32.mrf.mxu0 }
 0x49f   :  { %v9911_v49 = vcombine.low %v4163_v35, %v4171_v34  ;;  %19293 = vst [vmem:[#allocation55_spill] sm:$0xff] %v15810_v53  ;;  %19294 = vst [vmem:[#allocation149_spill] sm:$0xff] %v15812_v10  ;;  %v15822_v51 = vadd.f32 %v15695_v3, %v19297_v28  ;;  %v9879_v35 = vcombine.low %v10844_v7, %v10845_v6  ;;  %v15824_v34 = vpop.f32.mrf.mxu1  ;;  %v19298_v36 = vld [vmem:[#allocation59_spill] sm:$0xff]  ;;  %v19301_v3 = vld [vmem:[#allocation61_spill] sm:$0xff]  ;;  %v4920_v16 = vshll.u32 %v4322_v61, 16 }
 0x4a0   :  { %19296 = vst [vmem:[#allocation57_spill] sm:$0xff] %v15818_v58  ;;  %8542 = vmatprep.mubr.bf16.mxu0 %v9974_v44  ;;  %v19299_v0 = vshrl.u32 %v19298_v36, 16  ;;  %v19300_v27 = vshll.u32 %v19298_v36, 16  ;;  %v19302_v22 = vshll.u32 %v19301_v3, 16  ;;  %v15834_v28 = vld [vmem:[#allocation2 + $0x2dc] sm:$0xf]  ;;  %v15840_v62 = vadd.f32 %v15739_v50, %v15772_v43 }
 0x4a1   :  { %8261 = vmatprep.mubr.bf16.mxu1 %v9911_v49  ;;  %19303 = vst [vmem:[#allocation60_spill] sm:$0xff] %v15834_v28  ;;  %v19304_v7 = vshrl.u32 %v19301_v3, 16  ;;  %v4182_v49 = vshll.u32 %v3789_v32, 16  ;;  %v4890_v44 = vshrl.u32 %v4318_v45, 16  ;;  %v8092_v63 = vpop.f32.mrf.mxu1  ;;  %v4910_v36 = vsel %vm11752_vm7, %v4902_v57, %v4909_v15 }
 0x4a2   :  { %v4172_v13 = vrot.slane %v19299_v0, 4  ;;  %v4173_v46 = vrot.slane %v19300_v27, 5  ;;  %v4176_v52 = vrot.slane %v19302_v22, 5  ;;  %8262 = vmatmul.mubr.bf16.gmra.mxu1 %v9879_v35  ;;  %19305 = vst [vmem:[#allocation59_spill] sm:$0xff] %v15840_v62  ;;  %v4917_v27 = vshrl.u32 %v4322_v61, 16  ;;  %v15844_v22 = vpop.f32.mrf.mxu0 }
 0x4a3   :  { %v4178_v6 = vrot.slane %v19304_v7, 4  ;;  %v4184_v35 = vrot.slane %v4182_v49, 5  ;;  %v9718_v10 = vrot.slane %v4890_v44, 11  ;;  %v4926_v3 = vshrl.u32 %v15834_v28, 16 }
 0x4a4   :  { %v4174_v0 = vor.u32 %v4173_v46, %v4172_v13  ;;  %v4919_v7 = vrot.slane %v4917_v27, 7  ;;  %v18618_v50 = vshll.u32 %v15834_v28, 16  ;;  %v15848_v43 = vrot.slane %v4917_v27, 4  ;;  %v8370_v45 = vpop.f32.mrf.mxu0  ;;  %v15854_v46 = vpop.f32.mrf.mxu1 }
 0x4a5   :  { %v4179_v58 = vor.u32 %v4178_v6, %v4176_v52  ;;  %v4901_v15 = vsel %vm11752_vm7, %v9718_v10, %v4900_v39  ;;  %v4928_v57 = vrot.slane %v4926_v3, 7  ;;  %v15852_v13 = vrot.slane %v4920_v16, 5  ;;  %v3790_v45 = vld [vmem:[#allocation2 + $0x2f8] sm:$0x1] }
 0x4a6   :  { %v4175_v32 = vrot.slane %v4174_v0, 4  ;;  %19306 = vst [vmem:[#allocation61_spill] sm:$0xff] %v15848_v43  ;;  %v9942_v49 = vcombine.low %v4901_v15, %v4910_v36  ;;  %v4922_v44 = vor.u32 %v4920_v16, %v4919_v7  ;;  %v4924_v0 = vrot.slane %v4919_v7, 4  ;;  %v15858_v62 = vpop.f32.mrf.mxu0  ;;  %v8097_v43 = vpop.f32.mrf.mxu1  ;;  %v15876_v7 = vld [vmem:[#allocation2 + $0x2f0] sm:$0xf] }
 0x4a7   :  { %v4180_v63 = vrot.slane %v4179_v58, 4  ;;  %19307 = vst [vmem:[#allocation150_spill] sm:$0xff] %v15852_v13  ;;  %v4931_v58 = vor.u32 %v18618_v50, %v4928_v57  ;;  %v15864_v39 = vrot.slane %v4926_v3, 4  ;;  %v9975_v10 = vcombine.low %v4322_v61, %v15834_v28  ;;  %v4321_v13 = vld [vmem:[#allocation2 + $0x2d4] sm:$0x8]  ;;  %v19312_v43 = vld [vmem:[#allocation63_spill] sm:$0xff] }
 0x4a8   :  { %v4177_v6 = vsel %vm11748_vm5, %v4175_v32, %v4176_v52  ;;  %8543 = vmatmul.mubr.bf16.gmra.mxu0 %v9942_v49  ;;  %v19309_v52 = vld [vmem:[#allocation62_spill] sm:$0xff]  ;;  %v15870_v36 = vadd.f32 %v15758_v17, %v8067_v56  ;;  %v19311_v32 = vld [vmem:[#allocation64_spill] sm:$0xff]  ;;  %v8373_v3 = vpop.f32.mrf.mxu0  ;;  %v19313_v57 = vshrl.u32 %v19312_v43, 16  ;;  %v19314_v49 = vshll.u32 %v19312_v43, 16  ;;  %v15884_v50 = vpop.f32.mrf.mxu1 }
 0x4a9   :  { %v4185_v27 = vsel %vm11748_vm5, %v4180_v63, %v4184_v35  ;;  %19308 = vst [vmem:[#allocation151_spill] sm:$0xff] %v15864_v39  ;;  %v8075_v16 = vadd.f32 %v15726_v60, %v19309_v52  ;;  %v15874_v35 = vadd.f32 %v15746_v2, %v19311_v32  ;;  %8550 = vmatprep.mubr.bf16.mxu0 %v9975_v10  ;;  %v10846_v61 = vld [vmem:[#allocation2 + $0x2d8] sm:$0xf]  ;;  %v10847_v63 = vld [vmem:[#allocation2 + $0x2dc] sm:$0xf]  ;;  %v4196_v10 = vshll.u32 %v3790_v45, 16 }
 0x4aa   :  { %v9912_v53 = vcombine.low %v4177_v6, %v4185_v27  ;;  %19310 = vst [vmem:[#allocation62_spill] sm:$0xff] %v15870_v36  ;;  %v9880_v15 = vcombine.low %v10846_v61, %v10847_v63  ;;  %v4186_v6 = vrot.slane %v19313_v57, 4  ;;  %v4187_v60 = vrot.slane %v19314_v49, 5  ;;  %v19315_v27 = vld [vmem:[#allocation65_spill] sm:$0xff] }
 0x4ab   :  { %v19316_v17 = vshll.u32 %v19315_v27, 16  ;;  %v4326_v52 = vld [vmem:[#allocation2 + $0x2f4] sm:$0xf]  ;;  %v19317_v2 = vshrl.u32 %v19315_v27, 16  ;;  %v15890_v3 = vadd.f32 %v15792_v30, %v15822_v51  ;;  %v4912_v61 = vshrl.u32 %v4321_v13, 16 }
 0x4ac   :  { %8269 = vmatprep.mubr.bf16.mxu1 %v9912_v53  ;;  %v4188_v63 = vor.u32 %v4187_v60, %v4186_v6  ;;  %v4932_v43 = vsel %vm11752_vm7, %v4924_v0, %v4931_v58  ;;  %v4939_v57 = vshrl.u32 %v15876_v7, 16  ;;  %v4942_v49 = vshll.u32 %v15876_v7, 16  ;;  %v8100_v53 = vpop.f32.mrf.mxu1 }
 0x4ad   :  { %v4190_v56 = vrot.slane %v19316_v17, 5  ;;  %v4192_v32 = vrot.slane %v19317_v2, 4  ;;  %19318 = vst [vmem:[#allocation64_spill] sm:$0xff] %v15890_v3  ;;  %8270 = vmatmul.mubr.bf16.gmra.mxu1 %v9880_v15  ;;  %v15896_v17 = vpop.f32.mrf.mxu0  ;;  %v4198_v2 = vrot.slane %v4196_v10, 5  ;;  %v9719_v45 = vrot.slane %v4912_v61, 11 }
 0x4ae   :  { %v4948_v36 = vshrl.u32 %v4326_v52, 16  ;;  %v4189_v39 = vrot.slane %v4188_v63, 4  ;;  %v4941_v30 = vrot.slane %v4939_v57, 7  ;;  %v4951_v51 = vshll.u32 %v4326_v52, 16  ;;  %v15900_v6 = vpop.f32.mrf.mxu1 }
 0x4af   :  { %v4193_v27 = vor.u32 %v4192_v32, %v4190_v56  ;;  %v15898_v13 = vrot.slane %v4939_v57, 4  ;;  %v8378_v15 = vpop.f32.mrf.mxu0  ;;  %v4923_v58 = vsel %vm11752_vm7, %v9719_v45, %v4922_v44  ;;  %v15904_v3 = vrot.slane %v4942_v49, 5 }
 0x4b0   :  { %v4950_v60 = vrot.slane %v4948_v36, 7  ;;  %v4191_v32 = vsel %vm11748_vm5, %v4189_v39, %v4190_v56  ;;  %v9943_v10 = vcombine.low %v4923_v58, %v4932_v43  ;;  %v4944_v61 = vor.u32 %v4942_v49, %v4941_v30  ;;  %v8105_v57 = vpop.f32.mrf.mxu1  ;;  %v19322_v56 = vld [vmem:[#allocation66_spill] sm:$0xff]  ;;  %v3791_v49 = vld [vmem:[#allocation2 + $0x310] sm:$0x1] }
 0x4b1   :  { %19319 = vst [vmem:[#allocation63_spill] sm:$0xff] %v15898_v13  ;;  %v4194_v0 = vrot.slane %v4193_v27, 4  ;;  %v4946_v63 = vrot.slane %v4941_v30, 4  ;;  %v15908_v53 = vpop.f32.mrf.mxu0  ;;  %v15914_v44 = vrot.slane %v4951_v51, 5  ;;  %v15916_v21 = vrot.slane %v4948_v36, 4 }
 0x4b2   :  { %v4953_v28 = vor.u32 %v4951_v51, %v4950_v60  ;;  %8551 = vmatmul.mubr.bf16.gmra.mxu0 %v9943_v10  ;;  %v9976_v39 = vcombine.low %v15876_v7, %v4326_v52  ;;  %v8083_v43 = vadd.f32 %v15778_v23, %v19322_v56  ;;  %v4324_v30 = vld [vmem:[#allocation2 + $0x2ec] sm:$0x8]  ;;  %v15921_v57 = vpop.f32.mrf.mxu1  ;;  %v10848_v60 = vld [vmem:[#allocation2 + $0x2f0] sm:$0xf]  ;;  %v10849_v36 = vld [vmem:[#allocation2 + $0x2f4] sm:$0xf] }
 0x4b3   :  { %v4199_v15 = vsel %vm11748_vm5, %v4194_v0, %v4198_v2  ;;  %19320 = vst [vmem:[#allocation65_spill] sm:$0xff] %v15914_v44  ;;  %19321 = vst [vmem:[#allocation152_spill] sm:$0xff] %v15916_v21  ;;  %v8381_v58 = vpop.f32.mrf.mxu0  ;;  %v15924_v2 = vadd.f32 %v15808_v37, %v8075_v16  ;;  %v19324_v0 = vld [vmem:[#allocation67_spill] sm:$0xff]  ;;  %v19325_v7 = vshrl.u32 %v14346_v25, 16  ;;  %v4328_v10 = vld [vmem:[#allocation2 + $0x308] sm:$0xf] }
 0x4b4   :  { %v9913_v45 = vcombine.low %v4191_v32, %v4199_v15  ;;  %v15928_v51 = vadd.f32 %v15798_v41, %v19324_v0  ;;  %v9881_v32 = vcombine.low %v10848_v60, %v10849_v36  ;;  %8558 = vmatprep.mubr.bf16.mxu0 %v9976_v39  ;;  %v19326_v15 = vshll.u32 %v14346_v25, 16  ;;  %v19327_v16 = vld [vmem:[#allocation68_spill] sm:$0xff]  ;;  %v8108_v60 = vpop.f32.mrf.mxu1 }
 0x4b5   :  { %19323 = vst [vmem:[#allocation66_spill] sm:$0xff] %v15924_v2  ;;  %v4200_v52 = vrot.slane %v19325_v7, 4  ;;  %v19328_v56 = vshll.u32 %v19327_v16, 16  ;;  %v19329_v41 = vshrl.u32 %v19327_v16, 16  ;;  %v15940_v27 = vld [vmem:[#allocation2 + $0x30c] sm:$0xf]  ;;  %v4954_v25 = vsel %vm11752_vm7, %v4946_v63, %v4953_v28  ;;  %v15948_v39 = vpop.f32.mrf.mxu0 }
 0x4b6   :  { %8277 = vmatprep.mubr.bf16.mxu1 %v9913_v45  ;;  %v4201_v37 = vrot.slane %v19326_v15, 5  ;;  %19330 = vst [vmem:[#allocation67_spill] sm:$0xff] %v15940_v27  ;;  %v4210_v36 = vshll.u32 %v3791_v49, 16  ;;  %v15944_v45 = vadd.f32 %v15844_v22, %v15874_v35  ;;  %v4934_v7 = vshrl.u32 %v4324_v30, 16  ;;  %v15952_v21 = vpop.f32.mrf.mxu1 }
 0x4b7   :  { %v4204_v58 = vrot.slane %v19328_v56, 5  ;;  %v4206_v0 = vrot.slane %v19329_v41, 4  ;;  %8278 = vmatmul.mubr.bf16.gmra.mxu1 %v9881_v32  ;;  %v4961_v23 = vshrl.u32 %v4328_v10, 16  ;;  %v4964_v16 = vshll.u32 %v4328_v10, 16  ;;  %v8386_v32 = vpop.f32.mrf.mxu0 }
 0x4b8   :  { %19331 = vst [vmem:[#allocation68_spill] sm:$0xff] %v15944_v45  ;;  %v4202_v15 = vor.u32 %v4201_v37, %v4200_v52  ;;  %v4212_v41 = vrot.slane %v4210_v36, 5  ;;  %v9720_v2 = vrot.slane %v4934_v7, 11  ;;  %v4970_v60 = vshrl.u32 %v15940_v27, 16  ;;  %v8113_v36 = vpop.f32.mrf.mxu1 }
 0x4b9   :  { %v4207_v56 = vor.u32 %v4206_v0, %v4204_v58  ;;  %v4963_v30 = vrot.slane %v4961_v23, 7  ;;  %v15954_v45 = vrot.slane %v4961_v23, 4  ;;  %v15958_v52 = vrot.slane %v4964_v16, 5  ;;  %v15962_v0 = vpop.f32.mrf.mxu0  ;;  %v19336_v36 = vld [vmem:[#allocation69_spill] sm:$0xff] }
 0x4ba   :  { %v4203_v22 = vrot.slane %v4202_v15, 4  ;;  %v4945_v28 = vsel %vm11752_vm7, %v9720_v2, %v4944_v61  ;;  %v4972_v63 = vrot.slane %v4970_v60, 7  ;;  %v15960_v37 = vrot.slane %v4970_v60, 4  ;;  %v3792_v60 = vld [vmem:[#allocation2 + $0x328] sm:$0x1]  ;;  %v15971_v44 = vpop.f32.mrf.mxu1 }
 0x4bb   :  { %v4208_v35 = vrot.slane %v4207_v56, 4  ;;  %19332 = vst [vmem:[#allocation153_spill] sm:$0xff] %v15954_v45  ;;  %19333 = vst [vmem:[#allocation154_spill] sm:$0xff] %v15958_v52  ;;  %v9944_v56 = vcombine.low %v4945_v28, %v4954_v25  ;;  %v4966_v23 = vor.u32 %v4964_v16, %v4963_v30  ;;  %v4968_v49 = vrot.slane %v4963_v30, 4  ;;  %v8389_v45 = vpop.f32.mrf.mxu0  ;;  %v10850_v16 = vld [vmem:[#allocation2 + $0x308] sm:$0xf] }
 0x4bc   :  { %19334 = vst [vmem:[#allocation155_spill] sm:$0xff] %v15960_v37  ;;  %v4205_v7 = vsel %vm11748_vm5, %v4203_v22, %v4204_v58  ;;  %v19335_v61 = vshll.u32 %v15940_v27, 16  ;;  %v9977_v52 = vcombine.low %v4328_v10, %v15940_v27  ;;  %v4327_v37 = vld [vmem:[#allocation2 + $0x304] sm:$0x8]  ;;  %v8091_v58 = vadd.f32 %v15824_v34, %v19336_v36  ;;  %v10851_v22 = vld [vmem:[#allocation2 + $0x30c] sm:$0xf] }
 0x4bd   :  { %v4213_v15 = vsel %vm11748_vm5, %v4208_v35, %v4212_v41  ;;  %8559 = vmatmul.mubr.bf16.gmra.mxu0 %v9944_v56  ;;  %v15976_v41 = vadd.f32 %v15858_v62, %v8083_v43  ;;  %v15980_v25 = vadd.f32 %v15854_v46, %v14426_v31  ;;  %v9882_v35 = vcombine.low %v10850_v16, %v10851_v22  ;;  %v4331_v10 = vld [vmem:[#allocation2 + $0x320] sm:$0xf]  ;;  %v4332_v31 = vld [vmem:[#allocation2 + $0x324] sm:$0xf]  ;;  %v15990_v46 = vpop.f32.mrf.mxu0 }
 0x4be   :  { %v9914_v32 = vcombine.low %v4205_v7, %v4213_v15  ;;  %v4975_v2 = vor.u32 %v19335_v61, %v4972_v63  ;;  %8566 = vmatprep.mubr.bf16.mxu0 %v9977_v52  ;;  %v19338_v45 = vshrl.u32 %v14414_v38, 16  ;;  %v19339_v28 = vshll.u32 %v14414_v38, 16  ;;  %v8116_v15 = vpop.f32.mrf.mxu1 }
 0x4bf   :  { %19337 = vst [vmem:[#allocation69_spill] sm:$0xff] %v15976_v41  ;;  %v19340_v34 = vshll.u32 %v14431_v42, 16  ;;  %v19341_v43 = vshrl.u32 %v14431_v42, 16  ;;  %v4224_v56 = vshll.u32 %v3792_v60, 16  ;;  %v15994_v52 = vadd.f32 %v15896_v17, %v15928_v51  ;;  %v8394_v42 = vpop.f32.mrf.mxu0 }
 0x4c0   :  { %8285 = vmatprep.mubr.bf16.mxu1 %v9914_v32  ;;  %v4214_v30 = vrot.slane %v19338_v45, 4  ;;  %v4215_v63 = vrot.slane %v19339_v28, 5  ;;  %v4956_v32 = vshrl.u32 %v4327_v37, 16  ;;  %v4976_v38 = vsel %vm11752_vm7, %v4968_v49, %v4975_v2  ;;  %v15998_v15 = vpop.f32.mrf.mxu1 }
 0x4c1   :  { %v4218_v62 = vrot.slane %v19340_v34, 5  ;;  %v4220_v7 = vrot.slane %v19341_v43, 4  ;;  %8286 = vmatmul.mubr.bf16.gmra.mxu1 %v9882_v35  ;;  %19342 = vst [vmem:[#allocation156_spill] sm:$0xff] %v15994_v52  ;;  %v4983_v16 = vshrl.u32 %v4331_v10, 16  ;;  %v4986_v22 = vshll.u32 %v4331_v10, 16  ;;  %v16002_v51 = vpop.f32.mrf.mxu0 }
 0x4c2   :  { %v4216_v61 = vor.u32 %v4215_v63, %v4214_v30  ;;  %v4226_v45 = vrot.slane %v4224_v56, 5  ;;  %v9721_v28 = vrot.slane %v4956_v32, 11  ;;  %v4992_v34 = vshrl.u32 %v4332_v31, 16  ;;  %v8121_v63 = vpop.f32.mrf.mxu1 }
 0x4c3   :  { %v4221_v36 = vor.u32 %v4220_v7, %v4218_v62  ;;  %v4995_v43 = vshll.u32 %v4332_v31, 16  ;;  %v4985_v41 = vrot.slane %v4983_v16, 7  ;;  %v16000_v17 = vrot.slane %v4983_v16, 4 }
 0x4c4   :  { %v4217_v60 = vrot.slane %v4216_v61, 4  ;;  %v4967_v49 = vsel %vm11752_vm7, %v9721_v28, %v4966_v23  ;;  %v4994_v37 = vrot.slane %v4992_v34, 7  ;;  %v16006_v2 = vrot.slane %v4986_v22, 5  ;;  %v3793_v28 = vld [vmem:[#allocation2 + $0x340] sm:$0x1]  ;;  %v16016_v27 = vpop.f32.mrf.mxu1 }
 0x4c5   :  { %v4222_v35 = vrot.slane %v4221_v36, 4  ;;  %v16008_v30 = vrot.slane %v4995_v43, 5  ;;  %v9945_v32 = vcombine.low %v4967_v49, %v4976_v38  ;;  %v4988_v61 = vor.u32 %v4986_v22, %v4985_v41  ;;  %v8397_v36 = vpop.f32.mrf.mxu0  ;;  %v4330_v22 = vld [vmem:[#allocation2 + $0x31c] sm:$0x8] }
 0x4c6   :  { %v4219_v7 = vsel %vm11748_vm5, %v4217_v60, %v4218_v62  ;;  %v4990_v42 = vrot.slane %v4985_v41, 4  ;;  %v4997_v52 = vor.u32 %v4995_v43, %v4994_v37  ;;  %v16018_v63 = vrot.slane %v4992_v34, 4  ;;  %v10853_v43 = vld [vmem:[#allocation2 + $0x324] sm:$0xf]  ;;  %v8124_v37 = vpop.f32.mrf.mxu1 }
 0x4c7   :  { %v4227_v56 = vsel %vm11748_vm5, %v4222_v35, %v4226_v45  ;;  %8567 = vmatmul.mubr.bf16.gmra.mxu0 %v9945_v32  ;;  %v9978_v13 = vcombine.low %v4331_v10, %v4332_v31  ;;  %v8099_v62 = vadd.f32 %v15884_v50, %v14455_v48  ;;  %v16023_v38 = vadd.f32 %v15908_v53, %v8091_v58  ;;  %v10852_v45 = vld [vmem:[#allocation2 + $0x320] sm:$0xf]  ;;  %v4334_v31 = vld [vmem:[#allocation2 + $0x338] sm:$0xf] }
 0x4c8   :  { %v9915_v16 = vcombine.low %v4219_v7, %v4227_v56  ;;  %v8104_v41 = vadd.f32 %v15900_v6, %v14465_v14  ;;  %v9883_v60 = vcombine.low %v10852_v45, %v10853_v43  ;;  %v19343_v35 = vshrl.u32 %v14486_v55, 16  ;;  %v16037_v7 = vld [vmem:[#allocation2 + $0x33c] sm:$0xf] }
 0x4c9   :  { %v19344_v34 = vshll.u32 %v14486_v55, 16  ;;  %8574 = vmatprep.mubr.bf16.mxu0 %v9978_v13  ;;  %v19345_v50 = vshll.u32 %v14499_v19, 16  ;;  %v19346_v14 = vshrl.u32 %v14499_v19, 16  ;;  %v4238_v58 = vshll.u32 %v3793_v28, 16  ;;  %v16045_v13 = vpop.f32.mrf.mxu0 }
 0x4ca   :  { %8293 = vmatprep.mubr.bf16.mxu1 %v9915_v16  ;;  %v4228_v49 = vrot.slane %v19343_v35, 4  ;;  %v16041_v55 = vadd.f32 %v15948_v39, %v15980_v25  ;;  %v4978_v32 = vshrl.u32 %v4330_v22, 16  ;;  %v4998_v36 = vsel %vm11752_vm7, %v4990_v42, %v4997_v52 }
 0x4cb   :  { %v4229_v10 = vrot.slane %v19344_v34, 5  ;;  %v4232_v53 = vrot.slane %v19345_v50, 5  ;;  %v4234_v6 = vrot.slane %v19346_v14, 4  ;;  %8294 = vmatmul.mubr.bf16.gmra.mxu1 %v9883_v60  ;;  %v4240_v45 = vrot.slane %v4238_v58, 5 }
 0x4cc   :  { %v5005_v43 = vshrl.u32 %v4334_v31, 16  ;;  %v5008_v19 = vshll.u32 %v4334_v31, 16  ;;  %v9722_v28 = vrot.slane %v4978_v32, 11  ;;  %v5014_v34 = vshrl.u32 %v16037_v7, 16 }
 0x4cd   :  { %v4230_v56 = vor.u32 %v4229_v10, %v4228_v49  ;;  %v4235_v16 = vor.u32 %v4234_v6, %v4232_v53  ;;  %v18626_v60 = vshll.u32 %v16037_v7, 16  ;;  %v8402_v49 = vpop.f32.mrf.mxu0  ;;  %v16049_v10 = vpop.f32.mrf.mxu1 }
 0x4ce   :  { %v5007_v25 = vrot.slane %v5005_v43, 7  ;;  %v16051_v22 = vrot.slane %v5005_v43, 4  ;;  %v16053_v52 = vrot.slane %v5008_v19, 5  ;;  %v4989_v37 = vsel %vm11752_vm7, %v9722_v28, %v4988_v61  ;;  %v4333_v49 = vld [vmem:[#allocation2 + $0x334] sm:$0x8] }
 0x4cf   :  { %v4231_v35 = vrot.slane %v4230_v56, 4  ;;  %v4236_v39 = vrot.slane %v4235_v16, 4  ;;  %v5016_v50 = vrot.slane %v5014_v34, 7  ;;  %v16059_v14 = vrot.slane %v5014_v34, 4  ;;  %v16061_v6 = vpop.f32.mrf.mxu0  ;;  %v8129_v58 = vpop.f32.mrf.mxu1  ;;  %v5049_v28 = vld [vmem:[#allocation2 + $0xd0] sm:$0x1] }
 0x4d0   :  { %v9946_v32 = vcombine.low %v4989_v37, %v4998_v36  ;;  %v5010_v16 = vor.u32 %v5008_v19, %v5007_v25  ;;  %v5012_v43 = vrot.slane %v5007_v25, 4  ;;  %v8107_v61 = vadd.f32 %v15921_v57, %v14517_v18  ;;  %v10854_v19 = vld [vmem:[#allocation2 + $0x338] sm:$0xf] }
 0x4d1   :  { %v4233_v42 = vsel %vm11748_vm5, %v4231_v35, %v4232_v53  ;;  %v4241_v56 = vsel %vm11748_vm5, %v4236_v39, %v4240_v45  ;;  %v5019_v53 = vor.u32 %v18626_v60, %v5016_v50  ;;  %v9979_v35 = vcombine.low %v4334_v31, %v16037_v7  ;;  %v8405_v34 = vpop.f32.mrf.mxu0  ;;  %v16070_v23 = vpop.f32.mrf.mxu1  ;;  %v10855_v39 = vld [vmem:[#allocation2 + $0x33c] sm:$0xf]  ;;  %v4337_v31 = vld [vmem:[#allocation2 + $0x350] sm:$0xf]  ;;  %v19350_v50 = vld [vmem:[#allocation91_spill] sm:$0xff] }
 0x4d2   :  { %v9916_v48 = vcombine.low %v4233_v42, %v4241_v56  ;;  %8575 = vmatmul.mubr.bf16.gmra.mxu0 %v9946_v32  ;;  %v16073_v45 = vadd.f32 %v15962_v0, %v8099_v62  ;;  %v8112_v36 = vadd.f32 %v15952_v21, %v14527_v20  ;;  %v9884_v25 = vcombine.low %v10854_v19, %v10855_v39  ;;  %v19349_v37 = vld [vmem:[#allocation6_spill] sm:$0xff]  ;;  %v19351_v62 = vld [vmem:[#allocation4_spill] sm:$0xff]  ;;  %v4338_v20 = vld [vmem:[#allocation2 + $0x354] sm:$0xf] }
 0x4d3   :  { %v16078_v42 = vadd.f32 %v15990_v46, %v8104_v41  ;;  %8582 = vmatprep.mubr.bf16.mxu0 %v9979_v35  ;;  %v5000_v18 = vshrl.u32 %v4333_v49, 16  ;;  %v5020_v57 = vsel %vm11752_vm7, %v5012_v43, %v5019_v53  ;;  %v5161_v0 = vor.u32 %v19350_v50, %v19349_v37  ;;  %v8132_v21 = vpop.f32.mrf.mxu1  ;;  %v19353_v34 = vld [vmem:[#allocation73_spill] sm:$0xff]  ;;  %v16097_v49 = vpop.f32.mrf.mxu0  ;;  %v19356_v19 = vld [vmem:[#allocation92_spill] sm:$0xff] }
 0x4d4   :  { %19347 = vst [vmem:[#allocation157_spill] sm:$0xff] %v16073_v45  ;;  %8301 = vmatprep.mubr.bf16.mxu1 %v9916_v48  ;;  %v19352_v58 = vshll.u32 %v19351_v62, 16  ;;  %v5169_v32 = vshll.u32 %v5049_v28, 16  ;;  %v16088_v46 = vadd.f32 %v15971_v44, %v19353_v34  ;;  %v16091_v41 = vadd.f32 %v16002_v51, %v8107_v61  ;;  %v19355_v48 = vld [vmem:[#allocation74_spill] sm:$0xff] }
 0x4d5   :  { %19348 = vst [vmem:[#allocation158_spill] sm:$0xff] %v16078_v42  ;;  %8302 = vmatmul.mubr.bf16.gmra.mxu1 %v9884_v25  ;;  %v16095_v43 = vadd.f32 %v15998_v15, %v19355_v48  ;;  %v9723_v53 = vrot.slane %v5000_v18, 11  ;;  %v5162_v35 = vrot.slane %v5161_v0, 4  ;;  %v5027_v37 = vshrl.u32 %v4337_v31, 16  ;;  %v8410_v44 = vpop.f32.mrf.mxu0 }
 0x4d6   :  { %v5163_v56 = vrot.slane %v19352_v58, 5  ;;  %19354 = vst [vmem:[#allocation6_spill] sm:$0xff] %v16091_v41  ;;  %v5171_v25 = vrot.slane %v5169_v32, 5  ;;  %v5030_v28 = vshll.u32 %v4337_v31, 16  ;;  %v5036_v50 = vshrl.u32 %v4338_v20, 16  ;;  %v16100_v58 = vpop.f32.mrf.mxu1 }
 0x4d7   :  { %v5039_v62 = vshll.u32 %v4338_v20, 16  ;;  %v5011_v51 = vsel %vm11752_vm7, %v9723_v53, %v5010_v16  ;;  %v5029_v21 = vrot.slane %v5027_v37, 7  ;;  %v16106_v34 = vrot.slane %v5027_v37, 4  ;;  %v4336_v32 = vld [vmem:[#allocation2 + $0x34c] sm:$0x8] }
 0x4d8   :  { %v5166_v39 = vor.u32 %v19356_v19, %v5163_v56  ;;  %v5164_v15 = vsel %vm11748_vm5, %v5162_v35, %v5163_v56  ;;  %v9947_v18 = vcombine.low %v5011_v51, %v5020_v57  ;;  %v5038_v0 = vrot.slane %v5036_v50, 7  ;;  %v16110_v19 = vpop.f32.mrf.mxu0  ;;  %v8137_v44 = vpop.f32.mrf.mxu1  ;;  %v5051_v56 = vld [vmem:[#allocation2 + $0x100] sm:$0x1] }
 0x4d9   :  { %v16108_v48 = vrot.slane %v5030_v28, 5  ;;  %v5032_v41 = vor.u32 %v5030_v28, %v5029_v21  ;;  %v5034_v16 = vrot.slane %v5029_v21, 4  ;;  %v16114_v53 = vrot.slane %v5039_v62, 5 }
 0x4da   :  { %v5167_v61 = vrot.slane %v5166_v39, 4  ;;  %8583 = vmatmul.mubr.bf16.gmra.mxu0 %v9947_v18  ;;  %v5041_v57 = vor.u32 %v5039_v62, %v5038_v0  ;;  %v16118_v37 = vrot.slane %v5036_v50, 4  ;;  %v8413_v51 = vpop.f32.mrf.mxu0  ;;  %v16120_v42 = vpop.f32.mrf.mxu1  ;;  %v9980_v44 = vcombine.low %v4337_v31, %v4338_v20  ;;  %v19358_v20 = vld [vmem:[#allocation70_spill] sm:$0xff] }
 0x4db   :  { %v16123_v45 = vadd.f32 %v16045_v13, %v8112_v36  ;;  %v5189_v28 = vor.u32 %v14988_v1, %v14980_v40  ;;  %v19357_v62 = vshll.u32 %v14960_v59, 16  ;;  %v5197_v21 = vshll.u32 %v5051_v56, 16  ;;  %v19359_v40 = vld [vmem:[#allocation71_spill] sm:$0xff]  ;;  %v19360_v18 = vld [vmem:[#allocation34_spill] sm:$0xff] }
 0x4dc   :  { %v5172_v60 = vsel %vm11748_vm5, %v5167_v61, %v5171_v25  ;;  %v5022_v25 = vshrl.u32 %v4336_v32, 16  ;;  %v5043_v61 = vld [vmem:[#allocation2 + $0x40] sm:$0x1]  ;;  %v5042_v50 = vsel %vm11752_vm7, %v5034_v16, %v5041_v57  ;;  %v8140_v31 = vpop.f32.mrf.mxu1  ;;  %8590 = vmatprep.mubr.bf16.mxu0 %v9980_v44  ;;  %v5077_v1 = vor.u32 %v19359_v40, %v19358_v20  ;;  %v5052_v20 = vld [vmem:[#allocation2 + $0x118] sm:$0x1] }
 0x4dd   :  { %v9987_v35 = vcombine.low %v5164_v15, %v5172_v60  ;;  %v5191_v15 = vrot.slane %v19357_v62, 5  ;;  %v5190_v36 = vrot.slane %v5189_v28, 4  ;;  %v19361_v0 = vshll.u32 %v19360_v18, 16  ;;  %v19362_v51 = vld [vmem:[#allocation7_spill] sm:$0xff]  ;;  %v19363_v62 = vld [vmem:[#allocation26_spill] sm:$0xff]  ;;  %v19364_v28 = vld [vmem:[#allocation72_spill] sm:$0xff] }
 0x4de   :  { %v9724_v13 = vrot.slane %v5022_v25, 11  ;;  %v5199_v57 = vrot.slane %v5197_v21, 5  ;;  %v5085_v59 = vshll.u32 %v5043_v61, 16  ;;  %v8123_v56 = vadd.f32 %v16016_v27, %v19363_v62  ;;  %v16152_v21 = vpop.f32.mrf.mxu1 }
 0x4df   :  { %10516 = vmatprep.mubr.bf16.mxu1 %v9987_v35  ;;  %v5079_v32 = vrot.slane %v19361_v0, 5  ;;  %v16138_v35 = vpop.f32.mrf.mxu0  ;;  %v5194_v16 = vor.u32 %v19362_v51, %v5191_v15  ;;  %v5192_v44 = vsel %vm11748_vm5, %v5190_v36, %v5191_v15  ;;  %v5078_v25 = vrot.slane %v5077_v1, 4  ;;  %v19367_v36 = vld [vmem:[#allocation12_spill] sm:$0xff] }
 0x4e0   :  { %10517 = vmatmul.mubr.bf16.vlgmr.msra.gmra.mxu1 %v14971_v5  ;;  %v5033_v5 = vsel %vm11752_vm7, %v9724_v13, %v5032_v41  ;;  %v5087_v60 = vrot.slane %v5085_v59, 5  ;;  %v16150_v61 = vadd.f32 %v16061_v6, %v16088_v46  ;;  %v19365_v41 = vld [vmem:[#allocation27_spill] sm:$0xff]  ;;  %v19366_v13 = vld [vmem:[#allocation18_spill] sm:$0xff]  ;;  %v19369_v46 = vld [vmem:[#allocation97_spill] sm:$0xff] }
 0x4e1   :  { %v5082_v31 = vor.u32 %v19364_v28, %v5079_v32  ;;  %v8418_v40 = vpop.f32.mrf.mxu0  ;;  %v9948_v18 = vcombine.low %v5033_v5, %v5042_v50  ;;  %v5195_v0 = vrot.slane %v5194_v16, 4  ;;  %v5080_v8 = vsel %vm11748_vm5, %v5078_v25, %v5079_v32  ;;  %v5053_v50 = vld [vmem:[#allocation2 + $0x130] sm:$0x1]  ;;  %v19370_v59 = vld [vmem:[#allocation96_spill] sm:$0xff]  ;;  %v8145_v28 = vpop.f32.mrf.mxu1 }
 0x4e2   :  { %v8128_v15 = vadd.f32 %v16049_v10, %v19365_v41  ;;  %v19368_v1 = vor.u32 %v19366_v13, %v19367_v36  ;;  %v19371_v62 = vor.u32 %v19369_v46, %v19370_v59  ;;  %v5211_v32 = vshll.u32 %v5052_v20, 16  ;;  %v5045_v10 = vld [vmem:[#allocation2 + $0x70] sm:$0x1]  ;;  %v19378_v28 = vld [vmem:[#allocation58_spill] sm:$0xff] }
 0x4e3   :  { %v5083_v27 = vrot.slane %v5082_v31, 4  ;;  %v16161_v16 = vpop.f32.mrf.mxu0  ;;  %8591 = vmatmul.mubr.bf16.gmra.mxu0 %v9948_v18  ;;  %v5200_v6 = vsel %vm11748_vm5, %v5195_v0, %v5199_v57  ;;  %v16170_v25 = vadd.f32 %v16097_v49, %v16095_v43  ;;  %v19372_v57 = vld [vmem:[#allocation19_spill] sm:$0xff]  ;;  %v19373_v0 = vld [vmem:[#allocation16_spill] sm:$0xff]  ;;  %v5225_v49 = vshll.u32 %v5053_v50, 16 }
 0x4e4   :  { %v5204_v51 = vrot.slane %v19368_v1, 4  ;;  %v5209_v5 = vrot.slane %v19371_v62, 4  ;;  %v9989_v31 = vcombine.low %v5192_v44, %v5200_v6  ;;  %v5217_v41 = vor.u32 %v19373_v0, %v19372_v57  ;;  %v19374_v1 = vld [vmem:[#allocation100_spill] sm:$0xff]  ;;  %v16181_v62 = vpop.f32.mrf.mxu1  ;;  %v19376_v6 = vld [vmem:[#allocation29_spill] sm:$0xff] }
 0x4e5   :  { %v5088_v40 = vsel %vm11748_vm5, %v5083_v27, %v5087_v60  ;;  %v8421_v13 = vpop.f32.mrf.mxu0  ;;  %v5213_v20 = vrot.slane %v5211_v32, 5  ;;  %v19375_v46 = vshll.u32 %v19374_v1, 16  ;;  %v19377_v60 = vld [vmem:[#allocation75_spill] sm:$0xff]  ;;  %v19379_v39 = vshll.u32 %v19378_v28, 16  ;;  %v19380_v32 = vld [vmem:[#allocation101_spill] sm:$0xff] }
 0x4e6   :  { %v5206_v18 = vsel %vm11748_vm5, %v5204_v51, %v19370_v59  ;;  %v9981_v36 = vcombine.low %v5080_v8, %v5088_v40  ;;  %10520 = vmatprep.mubr.bf16.mxu1 %v9989_v31  ;;  %v5218_v44 = vrot.slane %v5217_v41, 4  ;;  %v5105_v27 = vor.u32 %v19377_v60, %v19376_v6  ;;  %v19381_v0 = vld [vmem:[#allocation77_spill] sm:$0xff]  ;;  %v8148_v41 = vpop.f32.mrf.mxu1 }
 0x4e7   :  { %v5219_v43 = vrot.slane %v19375_v46, 5  ;;  %v5107_v51 = vrot.slane %v19379_v39, 5  ;;  %v5113_v59 = vshll.u32 %v5045_v10, 16  ;;  %v5214_v8 = vsel %vm11748_vm5, %v5209_v5, %v5213_v20  ;;  %v16194_v31 = vpop.f32.mrf.mxu0  ;;  %v19382_v10 = vld [vmem:[#allocation76_spill] sm:$0xff]  ;;  %v19390_v41 = vld [vmem:[#allocation30_spill] sm:$0xff] }
 0x4e8   :  { %10504 = vmatprep.mubr.bf16.mxu0 %v9981_v36  ;;  %v5227_v57 = vrot.slane %v5225_v49, 5  ;;  %v16192_v50 = vadd.f32 %v16070_v23, %v19381_v0  ;;  %v9990_v13 = vcombine.low %v5206_v18, %v5214_v8  ;;  %v5106_v39 = vrot.slane %v5105_v27, 4  ;;  %v5054_v46 = vld [vmem:[#allocation2 + $0x148] sm:$0x1]  ;;  %v19383_v49 = vld [vmem:[#allocation78_spill] sm:$0xff]  ;;  %v16206_v28 = vpop.f32.mrf.mxu1 }
 0x4e9   :  { %v5222_v40 = vor.u32 %v19380_v32, %v5219_v43  ;;  %v5220_v1 = vsel %vm11748_vm5, %v5218_v44, %v5219_v43  ;;  %v5110_v36 = vor.u32 %v19382_v10, %v5107_v51  ;;  %v5115_v5 = vrot.slane %v5113_v59, 5  ;;  %v8426_v60 = vpop.f32.mrf.mxu0  ;;  %v19385_v59 = vld [vmem:[#allocation20_spill] sm:$0xff] }
 0x4ea   :  { %v16200_v20 = vadd.f32 %v16110_v19, %v8123_v56  ;;  %v16204_v23 = vadd.f32 %v16100_v58, %v19383_v49  ;;  %10521 = vmatmul.mubr.bf16.gmra.mxu1 %v9990_v13  ;;  %v5108_v18 = vsel %vm11748_vm5, %v5106_v39, %v5107_v51  ;;  %v19384_v44 = vor.u32 %v15114_v4, %v15112_v12  ;;  %v5046_v8 = vld [vmem:[#allocation2 + $0x88] sm:$0x1]  ;;  %v19389_v51 = vld [vmem:[#allocation31_spill] sm:$0xff]  ;;  %v8153_v10 = vpop.f32.mrf.mxu1 }
 0x4eb   :  { %v5223_v6 = vrot.slane %v5222_v40, 4  ;;  %v5111_v43 = vrot.slane %v5110_v36, 4  ;;  %v19386_v19 = vor.u32 %v15130_v11, %v19385_v59  ;;  %v19387_v32 = vld [vmem:[#allocation28_spill] sm:$0xff]  ;;  %v5239_v40 = vshll.u32 %v5054_v46, 16  ;;  %v5055_v4 = vld [vmem:[#allocation2 + $0x160] sm:$0x1]  ;;  %v16225_v12 = vpop.f32.mrf.mxu0 }
 0x4ec   :  { %v5232_v27 = vrot.slane %v19384_v44, 4  ;;  %10505 = vmatmul.mubr.bf16.vlgmr.msra.gmra.mxu0 %v19387_v32  ;;  %v16220_v0 = vadd.f32 %v16138_v35, %v8128_v15  ;;  %v19391_v13 = vor.u32 %v19389_v51, %v19390_v41  ;;  %v19392_v46 = vld [vmem:[#allocation80_spill] sm:$0xff]  ;;  %v5047_v49 = vld [vmem:[#allocation2 + $0xa0] sm:$0x1]  ;;  %v5127_v32 = vshll.u32 %v5046_v8, 16 }
 0x4ed   :  { %v5237_v56 = vrot.slane %v19386_v19, 4  ;;  %v5228_v58 = vsel %vm11748_vm5, %v5223_v6, %v5227_v57  ;;  %v5116_v36 = vsel %vm11748_vm5, %v5111_v43, %v5115_v5  ;;  %v19393_v6 = vld [vmem:[#allocation79_spill] sm:$0xff]  ;;  %v5241_v44 = vrot.slane %v5239_v40, 5  ;;  %v19395_v5 = vld [vmem:[#allocation17_spill] sm:$0xff]  ;;  %v19399_v10 = vld [vmem:[#allocation32_spill] sm:$0xff] }
 0x4ee   :  { %19388 = vst [vmem:[#allocation91_spill] sm:$0xff] %v16220_v0  ;;  %v5120_v39 = vrot.slane %v19391_v13, 4  ;;  %v9991_v11 = vcombine.low %v5220_v1, %v5228_v58  ;;  %v5234_v57 = vsel %vm11748_vm5, %v5232_v27, %v19385_v59  ;;  %v19394_v35 = vor.u32 %v19392_v46, %v19393_v6  ;;  %v8429_v1 = vpop.f32.mrf.mxu0  ;;  %v16238_v58 = vpop.f32.mrf.mxu1  ;;  %v19396_v43 = vld [vmem:[#allocation105_spill] sm:$0xff]  ;;  %v19397_v27 = vld [vmem:[#allocation22_spill] sm:$0xff]  ;;  %v19401_v8 = vld [vmem:[#allocation83_spill] sm:$0xff] }
 0x4ef   :  { %v9983_v60 = vcombine.low %v5108_v18, %v5116_v36  ;;  %v5245_v51 = vor.u32 %v19396_v43, %v19395_v5  ;;  %v19398_v59 = vshll.u32 %v19397_v27, 16  ;;  %v5253_v13 = vshll.u32 %v5055_v4, 16  ;;  %v19400_v46 = vld [vmem:[#allocation33_spill] sm:$0xff]  ;;  %v19403_v5 = vld [vmem:[#allocation106_spill] sm:$0xff] }
 0x4f0   :  { %v5125_v15 = vrot.slane %v19394_v35, 4  ;;  %v5122_v19 = vsel %vm11748_vm5, %v5120_v39, %v19393_v6  ;;  %10524 = vmatprep.mubr.bf16.mxu1 %v9991_v11  ;;  %v5133_v18 = vor.u32 %v19400_v46, %v19399_v10  ;;  %v5242_v40 = vsel %vm11748_vm5, %v5237_v56, %v5241_v44  ;;  %v8156_v11 = vpop.f32.mrf.mxu1  ;;  %v19404_v10 = vld [vmem:[#allocation84_spill] sm:$0xff]  ;;  %v5056_v44 = vld [vmem:[#allocation2 + $0x178] sm:$0x1] }
 0x4f1   :  { %v5247_v41 = vrot.slane %v19398_v59, 5  ;;  %10508 = vmatprep.mubr.bf16.mxu0 %v9983_v60  ;;  %v5129_v39 = vrot.slane %v5127_v32, 5  ;;  %v19402_v36 = vshll.u32 %v19401_v8, 16  ;;  %v5141_v35 = vshll.u32 %v5047_v49, 16  ;;  %v16251_v59 = vpop.f32.mrf.mxu0  ;;  %v19409_v11 = vld [vmem:[#allocation109_spill] sm:$0xff] }
 0x4f2   :  { %v9992_v1 = vcombine.low %v5234_v57, %v5242_v40  ;;  %v5246_v0 = vrot.slane %v5245_v51, 4  ;;  %v5255_v27 = vrot.slane %v5253_v13, 5  ;;  %v5134_v60 = vrot.slane %v5133_v18, 4  ;;  %v19405_v51 = vld [vmem:[#allocation81_spill] sm:$0xff]  ;;  %v16260_v8 = vpop.f32.mrf.mxu1 }
 0x4f3   :  { %v5135_v6 = vrot.slane %v19402_v36, 5  ;;  %v5250_v43 = vor.u32 %v19403_v5, %v5247_v41  ;;  %v5130_v4 = vsel %vm11748_vm5, %v5125_v15, %v5129_v39  ;;  %v5143_v56 = vrot.slane %v5141_v35, 5  ;;  %v8434_v13 = vpop.f32.mrf.mxu0  ;;  %v19406_v36 = vld [vmem:[#allocation82_spill] sm:$0xff] }
 0x4f4   :  { %10525 = vmatmul.mubr.bf16.gmra.mxu1 %v9992_v1  ;;  %v9984_v32 = vcombine.low %v5122_v19, %v5130_v4  ;;  %v5248_v49 = vsel %vm11748_vm5, %v5246_v0, %v5247_v41  ;;  %v8139_v40 = vadd.f32 %v16120_v42, %v19405_v51  ;;  %v16266_v39 = vadd.f32 %v16161_v16, %v16192_v50  ;;  %v19407_v42 = vld [vmem:[#allocation23_spill] sm:$0xff]  ;;  %v19410_v1 = vld [vmem:[#allocation24_spill] sm:$0xff]  ;;  %v5048_v4 = vld [vmem:[#allocation2 + $0xb8] sm:$0x1]  ;;  %v8161_v16 = vpop.f32.mrf.mxu1 }
 0x4f5   :  { %v5138_v46 = vor.u32 %v19404_v10, %v5135_v6  ;;  %v5251_v57 = vrot.slane %v5250_v43, 4  ;;  %v5136_v15 = vsel %vm11748_vm5, %v5134_v60, %v5135_v6  ;;  %v8144_v19 = vadd.f32 %v16152_v21, %v19406_v36  ;;  %v8435_v60 = vpop.f32.mrf.mxu0  ;;  %v19415_v36 = vld [vmem:[#allocation88_spill] sm:$0xff] }
 0x4f6   :  { %10509 = vmatmul.mubr.bf16.gmra.mxu0 %v9984_v32  ;;  %v19408_v41 = vor.u32 %v15213_v24, %v19407_v42  ;;  %v19411_v5 = vor.u32 %v19409_v11, %v19410_v1  ;;  %v5267_v43 = vshll.u32 %v5056_v44, 16  ;;  %v16282_v10 = vadd.f32 %v16194_v31, %v16204_v23 }
 0x4f7   :  { %v5139_v18 = vrot.slane %v5138_v46, 4  ;;  %v5256_v0 = vsel %vm11748_vm5, %v5251_v57, %v5255_v27  ;;  %v19412_v27 = vld [vmem:[#allocation54_spill] sm:$0xff]  ;;  %v19413_v46 = vld [vmem:[#allocation3_spill] sm:$0xff]  ;;  %v5057_v57 = vld [vmem:[#allocation2 + $0x190] sm:$0x1]  ;;  %v5155_v23 = vshll.u32 %v5048_v4, 16 }
 0x4f8   :  { %v5260_v35 = vrot.slane %v19408_v41, 4  ;;  %v5265_v6 = vrot.slane %v19411_v5, 4  ;;  %v9993_v50 = vcombine.low %v5248_v49, %v5256_v0  ;;  %v19414_v24 = vor.u32 %v19412_v27, %v19413_v46  ;;  %v19416_v49 = vld [vmem:[#allocation87_spill] sm:$0xff]  ;;  %v19418_v41 = vld [vmem:[#allocation9_spill] sm:$0xff]  ;;  %v5058_v46 = vld [vmem:[#allocation2 + $0x1a8] sm:$0x1] }
 0x4f9   :  { %v5144_v21 = vsel %vm11748_vm5, %v5139_v18, %v5143_v56  ;;  %v5269_v13 = vrot.slane %v5267_v43, 5  ;;  %v19417_v0 = vor.u32 %v19415_v36, %v19416_v49  ;;  %v8437_v56 = vpop.f32.mrf.mxu0  ;;  %v16293_v18 = vpop.f32.mrf.mxu1  ;;  %v19420_v5 = vld [vmem:[#allocation25_spill] sm:$0xff]  ;;  %v5281_v43 = vshll.u32 %v5057_v57, 16 }
 0x4fa   :  { %v5148_v32 = vrot.slane %v19414_v24, 4  ;;  %v9985_v51 = vcombine.low %v5136_v15, %v5144_v21  ;;  %v5262_v44 = vsel %vm11748_vm5, %v5260_v35, %v19410_v1  ;;  %10528 = vmatprep.mubr.bf16.mxu1 %v9993_v50  ;;  %v19419_v15 = vld [vmem:[#allocation112_spill] sm:$0xff]  ;;  %v19421_v16 = vshll.u32 %v19420_v5, 16  ;;  %v19422_v21 = vld [vmem:[#allocation85_spill] sm:$0xff] }
 0x4fb   :  { %v5153_v42 = vrot.slane %v19417_v0, 4  ;;  %v5273_v11 = vor.u32 %v19419_v15, %v19418_v41  ;;  %v5270_v1 = vsel %vm11748_vm5, %v5265_v6, %v5269_v13  ;;  %v8147_v27 = vadd.f32 %v16181_v62, %v19422_v21  ;;  %v8440_v24 = vpop.f32.mrf.mxu0  ;;  %v8164_v4 = vpop.f32.mrf.mxu1  ;;  %v19423_v0 = vld [vmem:[#allocation113_spill] sm:$0xff]  ;;  %v19425_v6 = vld [vmem:[#allocation14_spill] sm:$0xff] }
 0x4fc   :  { %v5150_v31 = vsel %vm11748_vm5, %v5148_v32, %v19416_v49  ;;  %v5275_v35 = vrot.slane %v19421_v16, 5  ;;  %10512 = vmatprep.mubr.bf16.mxu0 %v9985_v51  ;;  %v16307_v50 = vadd.f32 %v16225_v12, %v8139_v40  ;;  %v9994_v32 = vcombine.low %v5262_v44, %v5270_v1  ;;  %v19424_v51 = vld [vmem:[#allocation86_spill] sm:$0xff]  ;;  %v5059_v40 = vld [vmem:[#allocation2 + $0x1f0] sm:$0x1] }
 0x4fd   :  { %v5157_v36 = vrot.slane %v5155_v23, 5  ;;  %v5274_v49 = vrot.slane %v5273_v11, 4  ;;  %v5283_v41 = vrot.slane %v5281_v43, 5  ;;  %v8152_v15 = vadd.f32 %v16206_v28, %v19424_v51  ;;  %v8442_v5 = vpop.f32.mrf.mxu0  ;;  %v8167_v28 = vpop.f32.mrf.mxu1  ;;  %v19428_v43 = vld [vmem:[#allocation13_spill] sm:$0xff] }
 0x4fe   :  { %v5278_v56 = vor.u32 %v19423_v0, %v5275_v35  ;;  %v19426_v57 = vor.u32 %v15315_v9, %v19425_v6  ;;  %v19427_v62 = vor.u32 %v15329_v47, %v15327_v54  ;;  %10529 = vmatmul.mubr.bf16.gmra.mxu1 %v9994_v32  ;;  %v5295_v16 = vshll.u32 %v5058_v46, 16  ;;  %v19429_v21 = vld [vmem:[#allocation117_spill] sm:$0xff]  ;;  %v5060_v6 = vld [vmem:[#allocation2 + $0x208] sm:$0x1] }
 0x4ff   :  { %v5158_v44 = vsel %vm11748_vm5, %v5153_v42, %v5157_v36  ;;  %v5276_v23 = vsel %vm11748_vm5, %v5274_v49, %v5275_v35  ;;  %v16326_v47 = vadd.f32 %v16251_v59, %v8144_v19  ;;  %v5301_v4 = vor.u32 %v19429_v21, %v19428_v43  ;;  %v8443_v32 = vpop.f32.mrf.mxu0  ;;  %v19430_v35 = vld [vmem:[#allocation15_spill] sm:$0xff]  ;;  %v19438_v21 = vld [vmem:[#allocation122_spill] sm:$0xff] }
 0x500   :  { %v5288_v13 = vrot.slane %v19426_v57, 4  ;;  %v5293_v12 = vrot.slane %v19427_v62, 4  ;;  %v5279_v11 = vrot.slane %v5278_v56, 4  ;;  %v9986_v1 = vcombine.low %v5150_v31, %v5158_v44  ;;  %v8169_v31 = vpop.f32.mrf.mxu1  ;;  %v19434_v44 = vld [vmem:[#allocation90_spill] sm:$0xff] }
 0x501   :  { %v5297_v36 = vrot.slane %v5295_v16, 5  ;;  %v19431_v49 = vshll.u32 %v19430_v35, 16  ;;  %v5309_v0 = vshll.u32 %v5059_v40, 16  ;;  %v5302_v51 = vrot.slane %v5301_v4, 4  ;;  %v8445_v57 = vpop.f32.mrf.mxu0  ;;  %v19439_v4 = vld [vmem:[#allocation121_spill] sm:$0xff] }
 0x502   :  { %v5290_v9 = vsel %vm11748_vm5, %v5288_v13, %v15327_v54  ;;  %v5284_v42 = vsel %vm11748_vm5, %v5279_v11, %v5283_v41  ;;  %10513 = vmatmul.mubr.bf16.gmra.mxu0 %v9986_v1  ;;  %v19432_v54 = vld [vmem:[#allocation89_spill] sm:$0xff]  ;;  %v16336_v19 = vadd.f32 %v8435_v60, %v8147_v27  ;;  %v19433_v41 = vld [vmem:[#allocation118_spill] sm:$0xff]  ;;  %v8160_v40 = vadd.f32 %v16260_v8, %v19434_v44  ;;  %v5061_v11 = vld [vmem:[#allocation2 + $0x220] sm:$0x1]  ;;  %v8170_v16 = vpop.f32.mrf.mxu1 }
 0x503   :  { %v5303_v46 = vrot.slane %v19431_v49, 5  ;;  %v9995_v56 = vcombine.low %v5276_v23, %v5284_v42  ;;  %v8155_v59 = vadd.f32 %v16238_v58, %v19432_v54  ;;  %v5298_v13 = vsel %vm11748_vm5, %v5293_v12, %v5297_v36  ;;  %v19435_v60 = vld [vmem:[#allocation36_spill] sm:$0xff]  ;;  %v19436_v27 = vld [vmem:[#allocation38_spill] sm:$0xff]  ;;  %v19441_v8 = vld [vmem:[#allocation39_spill] sm:$0xff]  ;;  %v8448_v44 = vpop.f32.mrf.mxu0 }
 0x504   :  { %v5311_v5 = vrot.slane %v5309_v0, 5  ;;  %v9996_v23 = vcombine.low %v5290_v9, %v5298_v13  ;;  %v19437_v1 = vor.u32 %v19435_v60, %v19436_v27  ;;  %v19440_v12 = vor.u32 %v19438_v21, %v19439_v4  ;;  %v19442_v0 = vld [vmem:[#allocation37_spill] sm:$0xff]  ;;  %v5062_v60 = vld [vmem:[#allocation2 + $0x238] sm:$0x1] }
 0x505   :  { %v5306_v62 = vor.u32 %v19433_v41, %v5303_v46  ;;  %10532 = vmatprep.mubr.bf16.mxu1 %v9995_v56  ;;  %v5304_v58 = vsel %vm11748_vm5, %v5302_v51, %v5303_v46  ;;  %v5323_v35 = vshll.u32 %v5060_v6, 16  ;;  %v16351_v49 = vadd.f32 %v8440_v24, %v8152_v15  ;;  %v8172_v56 = vpop.f32.mrf.mxu1  ;;  %v19443_v46 = vld [vmem:[#allocation125_spill] sm:$0xff] }
 0x506   :  { %v5316_v43 = vrot.slane %v19437_v1, 4  ;;  %v5321_v42 = vrot.slane %v19440_v12, 4  ;;  %v5329_v31 = vor.u32 %v19442_v0, %v19441_v8  ;;  %v19444_v51 = vshll.u32 %v19443_v46, 16  ;;  %v19445_v13 = vld [vmem:[#allocation93_spill] sm:$0xff]  ;;  %10533 = vmatmul.mubr.bf16.gmra.mxu1 %v9996_v23  ;;  %v19446_v1 = vld [vmem:[#allocation126_spill] sm:$0xff]  ;;  %v8450_v8 = vpop.f32.mrf.mxu0  ;;  %v19448_v23 = vld [vmem:[#allocation40_spill] sm:$0xff] }
 0x507   :  { %v5307_v36 = vrot.slane %v5306_v62, 4  ;;  %v5337_v57 = vshll.u32 %v5061_v11, 16  ;;  %v8163_v41 = vadd.f32 %v16293_v18, %v19445_v13  ;;  %v5325_v15 = vrot.slane %v5323_v35, 5  ;;  %v5063_v11 = vld [vmem:[#allocation2 + $0x250] sm:$0x1]  ;;  %v8175_v0 = vpop.f32.mrf.mxu1  ;;  %v19451_v35 = vld [vmem:[#allocation130_spill] sm:$0xff] }
 0x508   :  { %v5318_v9 = vsel %vm11748_vm5, %v5316_v43, %v19439_v4  ;;  %v5331_v54 = vrot.slane %v19444_v51, 5  ;;  %v5330_v6 = vrot.slane %v5329_v31, 4  ;;  %v16364_v62 = vadd.f32 %v8443_v32, %v8155_v59  ;;  %v19447_v4 = vld [vmem:[#allocation94_spill] sm:$0xff]  ;;  %v8451_v13 = vpop.f32.mrf.mxu0 }
 0x509   :  { %v5312_v24 = vsel %vm11748_vm5, %v5307_v36, %v5311_v5  ;;  %v5339_v21 = vrot.slane %v5337_v57, 5  ;;  %v8168_v12 = vadd.f32 %v8167_v28, %v19447_v4  ;;  %v5326_v18 = vsel %vm11748_vm5, %v5321_v42, %v5325_v15  ;;  %v19449_v36 = vld [vmem:[#allocation41_spill] sm:$0xff] }
 0x50a   :  { %v9997_v27 = vcombine.low %v5304_v58, %v5312_v24  ;;  %v5334_v43 = vor.u32 %v19446_v1, %v5331_v54  ;;  %v5332_v5 = vsel %vm11748_vm5, %v5330_v6, %v5331_v54  ;;  %v19450_v32 = vor.u32 %v19448_v23, %v19449_v36  ;;  %v19452_v58 = vld [vmem:[#allocation129_spill] sm:$0xff]  ;;  %v8177_v24 = vpop.f32.mrf.mxu1  ;;  %v19454_v54 = vld [vmem:[#allocation44_spill] sm:$0xff]  ;;  %v19456_v1 = vld [vmem:[#allocation35_spill] sm:$0xff] }
 0x50b   :  { %v19453_v31 = vor.u32 %v19451_v35, %v19452_v58  ;;  %v9998_v46 = vcombine.low %v5318_v9, %v5326_v18  ;;  %v5351_v51 = vshll.u32 %v5062_v60, 16  ;;  %v16378_v57 = vadd.f32 %v8448_v44, %v8160_v40  ;;  %v19455_v15 = vld [vmem:[#allocation133_spill] sm:$0xff]  ;;  %v19458_v60 = vld [vmem:[#allocation8_spill] sm:$0xff]  ;;  %v19459_v35 = vld [vmem:[#allocation134_spill] sm:$0xff] }
 0x50c   :  { %v5344_v59 = vrot.slane %v19450_v32, 4  ;;  %10536 = vmatprep.mubr.bf16.mxu1 %v9997_v27  ;;  %v5335_v28 = vrot.slane %v5334_v43, 4  ;;  %v5357_v6 = vor.u32 %v19455_v15, %v19454_v54  ;;  %v19457_v4 = vshll.u32 %v19456_v1, 16  ;;  %v8453_v43 = vpop.f32.mrf.mxu0  ;;  %v5064_v18 = vld [vmem:[#allocation2 + $0x268] sm:$0x1]  ;;  %v8178_v36 = vpop.f32.mrf.mxu1  ;;  %v19461_v15 = vld [vmem:[#allocation43_spill] sm:$0xff] }
 0x50d   :  { %v5349_v56 = vrot.slane %v19453_v31, 4  ;;  %v5365_v23 = vshll.u32 %v5063_v11, 16  ;;  %v5353_v27 = vrot.slane %v5351_v51, 5  ;;  %v8171_v40 = vadd.f32 %v8170_v16, %v19458_v60  ;;  %v19460_v11 = vld [vmem:[#allocation5_spill] sm:$0xff]  ;;  %v19464_v16 = vld [vmem:[#allocation138_spill] sm:$0xff] }
 0x50e   :  { %v5346_v42 = vsel %vm11748_vm5, %v5344_v59, %v19452_v58  ;;  %v5359_v8 = vrot.slane %v19457_v4, 5  ;;  %v5340_v9 = vsel %vm11748_vm5, %v5335_v28, %v5339_v21  ;;  %v16390_v44 = vadd.f32 %v8451_v13, %v8163_v41  ;;  %v19462_v21 = vld [vmem:[#allocation42_spill] sm:$0xff]  ;;  %v19465_v41 = vld [vmem:[#allocation137_spill] sm:$0xff]  ;;  %v8456_v4 = vpop.f32.mrf.mxu0  ;;  %v5065_v60 = vld [vmem:[#allocation2 + $0x280] sm:$0x1]  ;;  %10537 = vmatmul.mubr.bf16.gmra.mxu1 %v9998_v46 }
 0x50f   :  { %v9999_v32 = vcombine.low %v5332_v5, %v5340_v9  ;;  %v5358_v59 = vrot.slane %v5357_v6, 4  ;;  %v5367_v31 = vrot.slane %v5365_v23, 5  ;;  %v5354_v24 = vsel %vm11748_vm5, %v5349_v56, %v5353_v27  ;;  %v8180_v5 = vpop.f32.mrf.mxu1  ;;  %v19467_v43 = vld [vmem:[#allocation46_spill] sm:$0xff] }
 0x510   :  { %v5362_v58 = vor.u32 %v19459_v35, %v5359_v8  ;;  %v8176_v54 = vadd.f32 %v8175_v0, %v19460_v11  ;;  %v19463_v28 = vor.u32 %v19461_v15, %v19462_v21  ;;  %v19466_v13 = vor.u32 %v19464_v16, %v19465_v41  ;;  %v19468_v35 = vld [vmem:[#allocation141_spill] sm:$0xff]  ;;  %v19469_v15 = vld [vmem:[#allocation47_spill] sm:$0xff]  ;;  %v8458_v46 = vpop.f32.mrf.mxu0  ;;  %v5066_v5 = vld [vmem:[#allocation2 + $0x298] sm:$0x1] }
 0x511   :  { %v10000_v6 = vcombine.low %v5346_v42, %v5354_v24  ;;  %v5360_v23 = vsel %vm11748_vm5, %v5358_v59, %v5359_v8  ;;  %v5379_v56 = vshll.u32 %v5064_v18, 16  ;;  %10540 = vmatprep.mubr.bf16.mxu1 %v9999_v32  ;;  %v16407_v27 = vadd.f32 %v8456_v4, %v8168_v12  ;;  %v19471_v18 = vld [vmem:[#allocation10_spill] sm:$0xff] }
 0x512   :  { %v5372_v51 = vrot.slane %v19463_v28, 4  ;;  %v5377_v1 = vrot.slane %v19466_v13, 4  ;;  %v5363_v9 = vrot.slane %v5362_v58, 4  ;;  %v5385_v11 = vor.u32 %v19468_v35, %v19467_v43  ;;  %v8183_v58 = vpop.f32.mrf.mxu1  ;;  %v19473_v13 = vld [vmem:[#allocation95_spill] sm:$0xff] }
 0x513   :  { %v19470_v21 = vshll.u32 %v19469_v15, 16  ;;  %v5381_v8 = vrot.slane %v5379_v56, 5  ;;  %v5393_v59 = vshll.u32 %v5065_v60, 16  ;;  %v8179_v32 = vadd.f32 %v8178_v36, %v19471_v18  ;;  %v19477_v18 = vld [vmem:[#allocation50_spill] sm:$0xff] }
 0x514   :  { %v5374_v0 = vsel %vm11748_vm5, %v5372_v51, %v19465_v41  ;;  %v5368_v42 = vsel %vm11748_vm5, %v5363_v9, %v5367_v31  ;;  %v5386_v16 = vrot.slane %v5385_v11, 4  ;;  %v19472_v51 = vld [vmem:[#allocation142_spill] sm:$0xff]  ;;  %v8459_v41 = vpop.f32.mrf.mxu0  ;;  %v16418_v4 = vadd.f32 %v8183_v58, %v19473_v13  ;;  %v19474_v31 = vld [vmem:[#allocation45_spill] sm:$0xff] }
 0x515   :  { %v5387_v28 = vrot.slane %v19470_v21, 5  ;;  %v10001_v24 = vcombine.low %v5360_v23, %v5368_v42  ;;  %v5382_v43 = vsel %vm11748_vm5, %v5377_v1, %v5381_v8  ;;  %v5395_v35 = vrot.slane %v5393_v59, 5  ;;  %v5067_v9 = vld [vmem:[#allocation2 + $0x2b0] sm:$0x1]  ;;  %v8185_v23 = vpop.f32.mrf.mxu1 }
 0x516   :  { %v16422_v15 = vadd.f32 %v8459_v41, %v8171_v40  ;;  %v19475_v60 = vor.u32 %v15691_v26, %v19474_v31  ;;  %v10002_v56 = vcombine.low %v5374_v0, %v5382_v43  ;;  %v8461_v46 = vpop.f32.mrf.mxu0  ;;  %v19476_v42 = vld [vmem:[#allocation145_spill] sm:$0xff]  ;;  %v5407_v1 = vshll.u32 %v5066_v5, 16  ;;  %v19480_v26 = vld [vmem:[#allocation147_spill] sm:$0xff]  ;;  %v19481_v41 = vld [vmem:[#allocation48_spill] sm:$0xff]  ;;  %10541 = vmatmul.mubr.bf16.gmra.mxu1 %v10000_v6 }
 0x517   :  { %v5390_v12 = vor.u32 %v19472_v51, %v5387_v28  ;;  %v5388_v11 = vsel %vm11748_vm5, %v5386_v16, %v5387_v28  ;;  %v19478_v58 = vor.u32 %v19476_v42, %v19477_v18  ;;  %v19479_v8 = vld [vmem:[#allocation49_spill] sm:$0xff]  ;;  %v19482_v13 = vshll.u32 %v19481_v41, 16  ;;  %v8186_v43 = vpop.f32.mrf.mxu1  ;;  %v19484_v23 = vld [vmem:[#allocation52_spill] sm:$0xff]  ;;  %10544 = vmatprep.mubr.bf16.mxu1 %v10001_v24 }
 0x518   :  { %v5400_v36 = vrot.slane %v19475_v60, 4  ;;  %v5413_v59 = vor.u32 %v19480_v26, %v19479_v8  ;;  %v5421_v16 = vshll.u32 %v5067_v9, 16  ;;  %v5068_v60 = vld [vmem:[#allocation2 + $0x2c8] sm:$0x1]  ;;  %v19485_v46 = vor.u32 %v15796_v29, %v19484_v23  ;;  %v19490_v23 = vld [vmem:[#allocation61_spill] sm:$0xff] }
 0x519   :  { %v5391_v21 = vrot.slane %v5390_v12, 4  ;;  %v5405_v51 = vrot.slane %v19478_v58, 4  ;;  %v5415_v0 = vrot.slane %v19482_v13, 5  ;;  %v19483_v12 = vld [vmem:[#allocation98_spill] sm:$0xff]  ;;  %v5409_v42 = vrot.slane %v5407_v1, 5  ;;  %v19486_v8 = vld [vmem:[#allocation148_spill] sm:$0xff]  ;;  %v8188_v41 = vpop.f32.mrf.mxu1 }
 0x51a   :  { %v5402_v40 = vsel %vm11748_vm5, %v5400_v36, %v19477_v18  ;;  %v16442_v31 = vadd.f32 %v8186_v43, %v19483_v12  ;;  %v5428_v36 = vrot.slane %v19485_v46, 4  ;;  %v8464_v18 = vpop.f32.mrf.mxu0  ;;  %v5414_v58 = vrot.slane %v5413_v59, 4  ;;  %v5069_v13 = vld [vmem:[#allocation2 + $0x2e0] sm:$0x1]  ;;  %v19488_v12 = vld [vmem:[#allocation149_spill] sm:$0xff]  ;;  %v19491_v46 = vld [vmem:[#allocation150_spill] sm:$0xff] }
 0x51b   :  { %v5396_v28 = vsel %vm11748_vm5, %v5391_v21, %v5395_v35  ;;  %v5418_v26 = vor.u32 %v19486_v8, %v5415_v0  ;;  %v16448_v35 = vadd.f32 %v8464_v18, %v8176_v54  ;;  %v5423_v9 = vrot.slane %v5421_v16, 5  ;;  %v19487_v21 = vld [vmem:[#allocation55_spill] sm:$0xff]  ;;  %v8191_v16 = vpop.f32.mrf.mxu1 }
 0x51c   :  { %v10003_v5 = vcombine.low %v5388_v11, %v5396_v28  ;;  %v5430_v43 = vsel %vm11748_vm5, %v5428_v36, %v19487_v21  ;;  %v19489_v29 = vor.u32 %v19488_v12, %v19487_v21  ;;  %v5410_v11 = vsel %vm11748_vm5, %v5405_v51, %v5409_v42  ;;  %v8466_v28 = vpop.f32.mrf.mxu0  ;;  %v19492_v36 = vld [vmem:[#allocation60_spill] sm:$0xff]  ;;  %v19494_v42 = vld [vmem:[#allocation99_spill] sm:$0xff] }
 0x51d   :  { %v5416_v1 = vsel %vm11748_vm5, %v5414_v58, %v5415_v0  ;;  %v5419_v59 = vrot.slane %v5418_v26, 4  ;;  %v5435_v24 = vshll.u32 %v5068_v60, 16  ;;  %v16460_v54 = vcombine.low %v5402_v40, %v5410_v11  ;;  %v5070_v58 = vld [vmem:[#allocation2 + $0x2f8] sm:$0x1]  ;;  %v19495_v40 = vld [vmem:[#allocation63_spill] sm:$0xff] }
 0x51e   :  { %v5433_v6 = vrot.slane %v19489_v29, 4  ;;  %v5441_v18 = vor.u32 %v19491_v46, %v19490_v23  ;;  %v19493_v8 = vshll.u32 %v19492_v36, 16  ;;  %v5449_v21 = vshll.u32 %v5069_v13, 16  ;;  %v8467_v51 = vpop.f32.mrf.mxu0  ;;  %v19498_v46 = vld [vmem:[#allocation151_spill] sm:$0xff]  ;;  %v8193_v36 = vpop.f32.mrf.mxu1  ;;  %10545 = vmatmul.mubr.bf16.gmra.mxu1 %v10002_v56 }
 0x51f   :  { %v5424_v12 = vsel %vm11748_vm5, %v5419_v59, %v5423_v9  ;;  %v16469_v29 = vadd.f32 %v8191_v16, %v19494_v42  ;;  %v5437_v0 = vrot.slane %v5435_v24, 5  ;;  %v19496_v60 = vor.u32 %v15904_v3, %v19495_v40  ;;  %v19499_v24 = vld [vmem:[#allocation65_spill] sm:$0xff]  ;;  %v19500_v3 = vld [vmem:[#allocation152_spill] sm:$0xff]  ;;  %10548 = vmatprep.mubr.bf16.mxu1 %v10003_v5  ;;  %v19509_v5 = vld [vmem:[#allocation155_spill] sm:$0xff] }
 0x520   :  { %v5443_v41 = vrot.slane %v19493_v8, 5  ;;  %v16474_v11 = vcombine.low %v5416_v1, %v5424_v12  ;;  %v16476_v28 = vadd.f32 %v8467_v51, %v8179_v32  ;;  %v5442_v23 = vrot.slane %v5441_v18, 4  ;;  %v5071_v8 = vld [vmem:[#allocation2 + $0x310] sm:$0x1]  ;;  %v8469_v9 = vpop.f32.mrf.mxu0  ;;  %v8194_v40 = vpop.f32.mrf.mxu1 }
 0x521   :  { %v5456_v26 = vrot.slane %v19496_v60, 4  ;;  %v5438_v59 = vsel %vm11748_vm5, %v5433_v6, %v5437_v0  ;;  %v5451_v16 = vrot.slane %v5449_v21, 5  ;;  %v19501_v1 = vor.u32 %v19500_v3, %v19499_v24  ;;  %v19503_v21 = vld [vmem:[#allocation153_spill] sm:$0xff]  ;;  %v19504_v0 = vld [vmem:[#allocation154_spill] sm:$0xff]  ;;  %v5072_v3 = vld [vmem:[#allocation2 + $0x328] sm:$0x1] }
 0x522   :  { %19497 = vst [vmem:[#allocation4_spill] sm:$0xff] %v16476_v28  ;;  %v5446_v13 = vor.u32 %v19498_v46, %v5443_v41  ;;  %v16487_v32 = vcombine.low %v5430_v43, %v5438_v59  ;;  %v5444_v18 = vsel %vm11748_vm5, %v5442_v23, %v5443_v41  ;;  %v5463_v60 = vshll.u32 %v5070_v58, 16  ;;  %v19502_v46 = vld [vmem:[#allocation102_spill] sm:$0xff]  ;;  %v8472_v43 = vpop.f32.mrf.mxu0  ;;  %v8196_v23 = vpop.f32.mrf.mxu1 }
 0x523   :  { %v5458_v42 = vsel %vm11748_vm5, %v5456_v26, %v19499_v24  ;;  %v5461_v12 = vrot.slane %v19501_v1, 4  ;;  %v16492_v6 = vadd.f32 %v8194_v40, %v19502_v46  ;;  %v5469_v36 = vor.u32 %v19504_v0, %v19503_v21  ;;  %v19505_v26 = vld [vmem:[#allocation67_spill] sm:$0xff] }
 0x524   :  { %v5447_v51 = vrot.slane %v5446_v13, 4  ;;  %v19506_v9 = vshll.u32 %v19505_v26, 16  ;;  %v5477_v24 = vshll.u32 %v5071_v8, 16  ;;  %v5465_v13 = vrot.slane %v5463_v60, 5  ;;  %v5073_v0 = vld [vmem:[#allocation2 + $0x340] sm:$0x1]  ;;  %v8474_v26 = vpop.f32.mrf.mxu0 }
 0x525   :  { %v19507_v56 = vor.u32 %v16006_v2, %v16000_v17  ;;  %v19508_v59 = vor.u32 %v16018_v63, %v16008_v30  ;;  %v16507_v40 = vadd.f32 %v8472_v43, %v16418_v4  ;;  %v5470_v46 = vrot.slane %v5469_v36, 4  ;;  %v19510_v63 = vld [vmem:[#allocation103_spill] sm:$0xff] }
 0x526   :  { %v5471_v28 = vrot.slane %v19506_v9, 5  ;;  %v5452_v41 = vsel %vm11748_vm5, %v5447_v51, %v5451_v16  ;;  %v8199_v16 = vpop.f32.mrf.mxu1  ;;  %v5466_v51 = vsel %vm11748_vm5, %v5461_v12, %v5465_v13  ;;  %v5479_v60 = vrot.slane %v5477_v24, 5  ;;  %v8475_v43 = vpop.f32.mrf.mxu0  ;;  %10549 = vmatmul.mubr.bf16.gmra.mxu1 %v16460_v54 }
 0x527   :  { %v5484_v58 = vrot.slane %v19507_v56, 4  ;;  %v5489_v1 = vrot.slane %v19508_v59, 4  ;;  %v10007_v8 = vcombine.low %v5444_v18, %v5452_v41  ;;  %v5491_v2 = vshll.u32 %v5072_v3, 16  ;;  %v5074_v3 = vld [vmem:[#allocation2 + $0x358] sm:$0x1]  ;;  %10552 = vmatprep.mubr.bf16.mxu1 %v16474_v11 }
 0x528   :  { %v5474_v21 = vor.u32 %v19509_v5, %v5471_v28  ;;  %v8200_v9 = vadd.f32 %v8199_v16, %v19510_v63  ;;  %v10008_v4 = vcombine.low %v5458_v42, %v5466_v51  ;;  %v5472_v18 = vsel %vm11748_vm5, %v5470_v46, %v5471_v28  ;;  %v8201_v41 = vpop.f32.mrf.mxu1  ;;  %v8477_v59 = vpop.f32.mrf.mxu0 }
 0x529   :  { %v5486_v17 = vsel %vm11748_vm5, %v5484_v58, %v16008_v30  ;;  %v5493_v23 = vrot.slane %v5491_v2, 5  ;;  %v5497_v56 = vor.u32 %v16053_v52, %v16051_v22  ;;  %v19511_v12 = vshll.u32 %v16037_v7, 16 }
 0x52a   :  { %v5475_v36 = vrot.slane %v5474_v21, 4  ;;  %v5505_v13 = vshll.u32 %v5073_v0, 16  ;;  %v16523_v30 = vadd.f32 %v8475_v43, %v16442_v31  ;;  %v19512_v28 = vor.u32 %v16108_v48, %v16106_v34  ;;  %v8202_v5 = vpop.f32.mrf.mxu1  ;;  %v19513_v31 = vld [vmem:[#allocation21_spill] sm:$0xff] }
 0x52b   :  { %v5499_v24 = vrot.slane %v19511_v12, 5  ;;  %v5494_v22 = vsel %vm11748_vm5, %v5489_v1, %v5493_v23  ;;  %v5498_v7 = vrot.slane %v5497_v56, 4  ;;  %v8203_v21 = vadd.f32 %v8202_v5, %v19513_v31  ;;  %v19515_v23 = vld [vmem:[#allocation104_spill] sm:$0xff] }
 0x52c   :  { %v5480_v42 = vsel %vm11748_vm5, %v5475_v36, %v5479_v60  ;;  %v5512_v58 = vrot.slane %v19512_v28, 4  ;;  %v10010_v0 = vcombine.low %v5486_v17, %v5494_v22  ;;  %v5507_v26 = vrot.slane %v5505_v13, 5  ;;  %v8204_v48 = vpop.f32.mrf.mxu1  ;;  %v8480_v60 = vpop.f32.mrf.mxu0  ;;  %v19516_v13 = vld [vmem:[#allocation107_spill] sm:$0xff]  ;;  %v19517_v5 = vld [vmem:[#allocation108_spill] sm:$0xff] }
 0x52d   :  { %v10009_v46 = vcombine.low %v5472_v18, %v5480_v42  ;;  %v5502_v52 = vor.u32 %v16059_v14, %v5499_v24  ;;  %v5500_v16 = vsel %vm11748_vm5, %v5498_v7, %v5499_v24  ;;  %v19514_v14 = vor.u32 %v16118_v37, %v16114_v53 }
 0x52e   :  { %v5514_v34 = vsel %vm11748_vm5, %v5512_v58, %v16114_v53  ;;  %v5519_v54 = vshll.u32 %v5074_v3, 16  ;;  %v16545_v17 = vadd.f32 %v8480_v60, %v16469_v29  ;;  %v8482_v18 = vpop.f32.mrf.mxu0  ;;  %v8207_v36 = vpop.f32.mrf.mxu1  ;;  %10553 = vmatmul.mubr.bf16.gmra.mxu1 %v16487_v32 }
 0x52f   :  { %v5503_v1 = vrot.slane %v5502_v52, 4  ;;  %v5517_v51 = vrot.slane %v19514_v14, 4  ;;  %v8208_v56 = vadd.f32 %v8207_v36, %v19515_v23  ;;  %10556 = vmatprep.mubr.bf16.mxu1 %v10007_v8  ;;  %v19518_v8 = vld [vmem:[#allocation110_spill] sm:$0xff]  ;;  %v19519_v14 = vld [vmem:[#allocation111_spill] sm:$0xff] }
 0x530   :  { %v5521_v63 = vrot.slane %v5519_v54, 5  ;;  %v8483_v41 = vpop.f32.mrf.mxu0  ;;  %v8209_v12 = vpop.f32.mrf.mxu1 }
 0x531   :  { %v5508_v2 = vsel %vm11748_vm5, %v5503_v1, %v5507_v26  ;;  %v16553_v37 = vadd.f32 %v8483_v41, %v16492_v6  ;;  %v19521_v12 = vld [vmem:[#allocation115_spill] sm:$0xff] }
 0x532   :  { %v10011_v11 = vcombine.low %v5500_v16, %v5508_v2  ;;  %v5522_v43 = vsel %vm11748_vm5, %v5517_v51, %v5521_v63  ;;  %v8485_v29 = vpop.f32.mrf.mxu0  ;;  %v8210_v24 = vpop.f32.mrf.mxu1  ;;  %v19520_v2 = vld [vmem:[#allocation114_spill] sm:$0xff] }
 0x533   :  { %v10012_v53 = vcombine.low %v5514_v34, %v5522_v43  ;;  %v8211_v42 = vadd.f32 %v8210_v24, %v19516_v13 }
 0x534   :  { %v8488_v3 = vpop.f32.mrf.mxu0  ;;  %v8212_v28 = vpop.f32.mrf.mxu1 }
 0x535   :  { %v16557_v58 = vadd.f32 %v8488_v3, %v8200_v9 }
 0x536   :  { %v8490_v33 = vpop.f32.mrf.mxu0  ;;  %v8215_v59 = vpop.f32.mrf.mxu1  ;;  %10557 = vmatmul.mubr.bf16.gmra.mxu1 %v10008_v4 }
 0x537   :  { %v8216_v22 = vadd.f32 %v8215_v59, %v19517_v5  ;;  %10560 = vmatprep.mubr.bf16.mxu1 %v10009_v46 }
 0x538   :  { %v8491_v7 = vpop.f32.mrf.mxu0  ;;  %v8217_v52 = vpop.f32.mrf.mxu1 }
 0x539   :  { %v16560_v6 = vadd.f32 %v8491_v7, %v8203_v21  ;;  %v19523_v7 = vld [vmem:[#allocation116_spill] sm:$0xff] }
 0x53a   :  { %v8493_v32 = vpop.f32.mrf.mxu0  ;;  %v8218_v31 = vpop.f32.mrf.mxu1 }
 0x53b   :  { %v8219_v26 = vadd.f32 %v8218_v31, %v19518_v8 }
 0x53c   :  { %v8220_v34 = vpop.f32.mrf.mxu1  ;;  %v8496_v48 = vpop.f32.mrf.mxu0 }
 0x53d   :  { %v16563_v16 = vadd.f32 %v8496_v48, %v8208_v56  ;;  %v19524_v34 = vld [vmem:[#allocation119_spill] sm:$0xff] }
 0x53e   :  { %v8498_v9 = vpop.f32.mrf.mxu0  ;;  %v8223_v1 = vpop.f32.mrf.mxu1  ;;  %10561 = vmatmul.mubr.bf16.gmra.mxu1 %v10010_v0 }
 0x53f   :  { %v8224_v51 = vadd.f32 %v8223_v1, %v19519_v14  ;;  %10564 = vmatprep.mubr.bf16.mxu1 %v10011_v11 }
 0x540   :  { %v8499_v54 = vpop.f32.mrf.mxu0  ;;  %v8225_v60 = vpop.f32.mrf.mxu1 }
 0x541   :  { %v16566_v4 = vadd.f32 %v8499_v54, %v8211_v42  ;;  %v19522_v42 = vld [vmem:[#allocation11_spill] sm:$0xff] }
 0x542   :  { %v8501_v21 = vpop.f32.mrf.mxu0  ;;  %v8226_v46 = vpop.f32.mrf.mxu1 }
 0x543   :  { %v8227_v63 = vadd.f32 %v8226_v46, %v19520_v2  ;;  %v19526_v21 = vld [vmem:[#allocation120_spill] sm:$0xff] }
 0x544   :  { %v8504_v18 = vpop.f32.mrf.mxu0  ;;  %v8228_v36 = vpop.f32.mrf.mxu1 }
 0x545   :  { %v16569_v43 = vadd.f32 %v8504_v18, %v8216_v22 }
 0x546   :  { %v8506_v41 = vpop.f32.mrf.mxu0  ;;  %v8231_v23 = vpop.f32.mrf.mxu1  ;;  %10565 = vmatmul.mubr.bf16.gmra.mxu1 %v10012_v53 }
 0x547   :  { %v8232_v29 = vadd.f32 %v8231_v23, %v19521_v12 }
 0x548   :  { %v8507_v56 = vpop.f32.mrf.mxu0  ;;  %v8233_v24 = vpop.f32.mrf.mxu1 }
 0x549   :  { %v16572_v0 = vadd.f32 %v8507_v56, %v8219_v26 }
 0x54a   :  { %v8509_v11 = vpop.f32.mrf.mxu0  ;;  %v8234_v13 = vpop.f32.mrf.mxu1 }
 0x54b   :  { %v8235_v3 = vadd.f32 %v8234_v13, %v19522_v42 }
 0x54c   :  { %v8236_v28 = vpop.f32.mrf.mxu1  ;;  %v8512_v33 = vpop.f32.mrf.mxu0 }
 0x54d   :  { %v16575_v59 = vadd.f32 %v8512_v33, %v8224_v51 }
 0x54e   :  { %v8514_v5 = vpop.f32.mrf.mxu0  ;;  %v8239_v22 = vpop.f32.mrf.mxu1 }
 0x54f   :  { %v8240_v52 = vadd.f32 %v8239_v22, %v19523_v7  ;;  %v19532_v7 = vld [vmem:[#allocation127_spill] sm:$0xff] }
 0x550   :  { %v8515_v32 = vpop.f32.mrf.mxu0  ;;  %v8241_v53 = vpop.f32.mrf.mxu1 }
 0x551   :  { %v16578_v31 = vadd.f32 %v8515_v32, %v8227_v63  ;;  %v19528_v63 = vld [vmem:[#allocation123_spill] sm:$0xff] }
 0x552   :  { %v8517_v8 = vpop.f32.mrf.mxu0  ;;  %v8242_v26 = vpop.f32.mrf.mxu1 }
 0x553   :  { %v8243_v48 = vadd.f32 %v8242_v26, %v19524_v34 }
 0x554   :  { %v8520_v9 = vpop.f32.mrf.mxu0  ;;  %v8244_v1 = vpop.f32.mrf.mxu1 }
 0x555   :  { %v16581_v14 = vadd.f32 %v8520_v9, %v8232_v29  ;;  %v19530_v29 = vld [vmem:[#allocation124_spill] sm:$0xff] }
 0x556   :  { %v8522_v54 = vpop.f32.mrf.mxu0  ;;  %v8247_v60 = vpop.f32.mrf.mxu1 }
 0x557   :  { %19525 = vst [vmem:[#allocation73_spill] sm:$0xff] %v16581_v14  ;;  %v8248_v46 = vadd.f32 %v8247_v60, %v19526_v21 }
 0x558   :  { %v8523_v51 = vpop.f32.mrf.mxu0  ;;  %v8249_v18 = vpop.f32.mrf.mxu1 }
 0x559   :  { %v16584_v2 = vadd.f32 %v8523_v51, %v8235_v3 }
 0x55a   :  { %v8525_v36 = vpop.f32.mrf.mxu0  ;;  %v8250_v41 = vpop.f32.mrf.mxu1 }
 0x55b   :  { %19527 = vst [vmem:[#allocation74_spill] sm:$0xff] %v16584_v2  ;;  %v8251_v23 = vadd.f32 %v8250_v41, %v19528_v63 }
 0x55c   :  { %v8252_v56 = vpop.f32.mrf.mxu1  ;;  %v8528_v12 = vpop.f32.mrf.mxu0 }
 0x55d   :  { %v16587_v24 = vadd.f32 %v8528_v12, %v8240_v52  ;;  %v19534_v52 = vld [vmem:[#allocation128_spill] sm:$0xff] }
 0x55e   :  { %v8530_v11 = vpop.f32.mrf.mxu0  ;;  %v8255_v13 = vpop.f32.mrf.mxu1 }
 0x55f   :  { %19529 = vst [vmem:[#allocation92_spill] sm:$0xff] %v16587_v24  ;;  %v8256_v42 = vadd.f32 %v8255_v13, %v19530_v29  ;;  %v19538_v13 = vld [vmem:[#allocation132_spill] sm:$0xff] }
 0x560   :  { %v8531_v28 = vpop.f32.mrf.mxu0  ;;  %v8257_v33 = vpop.f32.mrf.mxu1 }
 0x561   :  { %v16590_v5 = vadd.f32 %v8531_v28, %v8243_v48  ;;  %v19536_v48 = vld [vmem:[#allocation131_spill] sm:$0xff] }
 0x562   :  { %v8533_v22 = vpop.f32.mrf.mxu0  ;;  %v8258_v3 = vpop.f32.mrf.mxu1 }
 0x563   :  { %19531 = vst [vmem:[#allocation70_spill] sm:$0xff] %v16590_v5  ;;  %v8259_v32 = vadd.f32 %v8258_v3, %v19532_v7 }
 0x564   :  { %v8260_v53 = vpop.f32.mrf.mxu1  ;;  %v8536_v8 = vpop.f32.mrf.mxu0 }
 0x565   :  { %v16593_v26 = vadd.f32 %v8536_v8, %v8248_v46 }
 0x566   :  { %v8538_v34 = vpop.f32.mrf.mxu0  ;;  %v8263_v9 = vpop.f32.mrf.mxu1 }
 0x567   :  { %19533 = vst [vmem:[#allocation71_spill] sm:$0xff] %v16593_v26  ;;  %v8264_v1 = vadd.f32 %v8263_v9, %v19534_v52 }
 0x568   :  { %v8539_v54 = vpop.f32.mrf.mxu0  ;;  %v8265_v60 = vpop.f32.mrf.mxu1 }
 0x569   :  { %v16596_v51 = vadd.f32 %v8539_v54, %v8251_v23  ;;  %v19540_v23 = vld [vmem:[#allocation135_spill] sm:$0xff]  ;;  %v19542_v54 = vld [vmem:[#allocation136_spill] sm:$0xff] }
 0x56a   :  { %v8541_v21 = vpop.f32.mrf.mxu0  ;;  %v8266_v18 = vpop.f32.mrf.mxu1 }
 0x56b   :  { %19535 = vst [vmem:[#allocation34_spill] sm:$0xff] %v16596_v51  ;;  %v8267_v36 = vadd.f32 %v8266_v18, %v19536_v48 }
 0x56c   :  { %v8268_v41 = vpop.f32.mrf.mxu1  ;;  %v8544_v63 = vpop.f32.mrf.mxu0 }
 0x56d   :  { %v16599_v56 = vadd.f32 %v8544_v63, %v8256_v42  ;;  %v19544_v41 = vld [vmem:[#allocation139_spill] sm:$0xff] }
 0x56e   :  { %v8546_v12 = vpop.f32.mrf.mxu0  ;;  %v8271_v11 = vpop.f32.mrf.mxu1 }
 0x56f   :  { %19537 = vst [vmem:[#allocation7_spill] sm:$0xff] %v16599_v56  ;;  %v8272_v29 = vadd.f32 %v8271_v11, %v19538_v13 }
 0x570   :  { %v8547_v46 = vpop.f32.mrf.mxu0  ;;  %v8273_v33 = vpop.f32.mrf.mxu1 }
 0x571   :  { %v16602_v28 = vadd.f32 %v8547_v46, %v8259_v32 }
 0x572   :  { %v8549_v22 = vpop.f32.mrf.mxu0  ;;  %v8274_v3 = vpop.f32.mrf.mxu1 }
 0x573   :  { %19539 = vst [vmem:[#allocation26_spill] sm:$0xff] %v16602_v28  ;;  %v8275_v7 = vadd.f32 %v8274_v3, %v19540_v23 }
 0x574   :  { %v8552_v53 = vpop.f32.mrf.mxu0  ;;  %v8276_v8 = vpop.f32.mrf.mxu1 }
 0x575   :  { %v16605_v34 = vadd.f32 %v8552_v53, %v8264_v1  ;;  %v19546_v1 = vld [vmem:[#allocation140_spill] sm:$0xff] }
 0x576   :  { %v8554_v9 = vpop.f32.mrf.mxu0 }
 0x577   :  { %19541 = vst [vmem:[#allocation72_spill] sm:$0xff] %v16605_v34  ;;  %v8279_v52 = vpop.f32.mrf.mxu1  ;;  %v19548_v9 = vld [vmem:[#allocation143_spill] sm:$0xff] }
 0x578   :  { %v8555_v42 = vpop.f32.mrf.mxu0  ;;  %v8280_v60 = vadd.f32 %v8279_v52, %v19542_v54 }
 0x579   :  { %v16608_v21 = vadd.f32 %v8555_v42, %v8267_v36  ;;  %v8281_v18 = vpop.f32.mrf.mxu1 }
 0x57a   :  { %v8557_v48 = vpop.f32.mrf.mxu0 }
 0x57b   :  { %19543 = vst [vmem:[#allocation27_spill] sm:$0xff] %v16608_v21  ;;  %v8282_v32 = vpop.f32.mrf.mxu1 }
 0x57c   :  { %v8283_v63 = vadd.f32 %v8282_v32, %v19544_v41  ;;  %v19550_v41 = vld [vmem:[#allocation144_spill] sm:$0xff] }
 0x57d   :  { %v8284_v12 = vpop.f32.mrf.mxu1  ;;  %v8560_v11 = vpop.f32.mrf.mxu0 }
 0x57e   :  { %v16611_v46 = vadd.f32 %v8560_v11, %v8272_v29 }
 0x57f   :  { %v8562_v13 = vpop.f32.mrf.mxu0 }
 0x580   :  { %19545 = vst [vmem:[#allocation18_spill] sm:$0xff] %v16611_v46 }
 0x581   :  { %v8287_v33 = vpop.f32.mrf.mxu1  ;;  %v8563_v3 = vpop.f32.mrf.mxu0 }
 0x582   :  { %v8288_v22 = vadd.f32 %v8287_v33, %v19546_v1  ;;  %v16614_v53 = vadd.f32 %v8563_v3, %v8275_v7  ;;  %v19552_v7 = vld [vmem:[#allocation146_spill] sm:$0xff] }
 0x583   :  { %v8289_v23 = vpop.f32.mrf.mxu1  ;;  %v8565_v8 = vpop.f32.mrf.mxu0 }
 0x584   :  { %19547 = vst [vmem:[#allocation12_spill] sm:$0xff] %v16614_v53 }
 0x585   :  { %v8290_v36 = vpop.f32.mrf.mxu1 }
 0x586   :  { %v8291_v52 = vadd.f32 %v8290_v36, %v19548_v9 }
 0x587   :  { %v8292_v42 = vpop.f32.mrf.mxu1  ;;  %v8568_v54 = vpop.f32.mrf.mxu0 }
 0x588   :  { %v16617_v18 = vadd.f32 %v8568_v54, %v8280_v60  ;;  %v19554_v60 = vld [vmem:[#allocation53_spill] sm:$0xff] }
 0x589   :  { %v8570_v48 = vpop.f32.mrf.mxu0 }
 0x58a   :  { %19549 = vst [vmem:[#allocation97_spill] sm:$0xff] %v16617_v18 }
 0x58b   :  { %v8295_v32 = vpop.f32.mrf.mxu1  ;;  %v8571_v29 = vpop.f32.mrf.mxu0 }
 0x58c   :  { %v8296_v12 = vadd.f32 %v8295_v32, %v19550_v41  ;;  %v16620_v11 = vadd.f32 %v8571_v29, %v8283_v63  ;;  %v19556_v29 = vld [vmem:[#allocation51_spill] sm:$0xff] }
 0x58d   :  { %v8297_v13 = vpop.f32.mrf.mxu1  ;;  %v8573_v33 = vpop.f32.mrf.mxu0 }
 0x58e   :  { %19551 = vst [vmem:[#allocation96_spill] sm:$0xff] %v16620_v11 }
 0x58f   :  { %v8298_v1 = vpop.f32.mrf.mxu1 }
 0x590   :  { %v8299_v3 = vadd.f32 %v8298_v1, %v19552_v7 }
 0x591   :  { %v8300_v23 = vpop.f32.mrf.mxu1 }
 0x592   :  { %v8576_v8 = vpop.f32.mrf.mxu0 }
 0x593   :  { %v16623_v53 = vadd.f32 %v8576_v8, %v8288_v22 }
 0x594   :  { %v8578_v36 = vpop.f32.mrf.mxu0 }
 0x595   :  { %19553 = vst [vmem:[#allocation19_spill] sm:$0xff] %v16623_v53  ;;  %v8303_v9 = vpop.f32.mrf.mxu1  ;;  %v19567_v53 = vld [vmem:[#allocation62_spill] sm:$0xff] }
 0x596   :  { %v8304_v42 = vadd.f32 %v8303_v9, %v19554_v60  ;;  %v8579_v54 = vpop.f32.mrf.mxu0 }
 0x597   :  { %v8305_v48 = vpop.f32.mrf.mxu1  ;;  %v16626_v18 = vadd.f32 %v8579_v54, %v8291_v52 }
 0x598   :  { %v8581_v32 = vpop.f32.mrf.mxu0 }
 0x599   :  { %19555 = vst [vmem:[#allocation16_spill] sm:$0xff] %v16626_v18  ;;  %v8306_v63 = vpop.f32.mrf.mxu1 }
 0x59a   :  { %v8307_v41 = vadd.f32 %v8306_v63, %v19556_v29  ;;  %v8584_v13 = vpop.f32.mrf.mxu0 }
 0x59b   :  { %v8308_v33 = vpop.f32.mrf.mxu1  ;;  %v16629_v11 = vadd.f32 %v8584_v13, %v8296_v12 }
 0x59c   :  { %v8586_v1 = vpop.f32.mrf.mxu0 }
 0x59d   :  { %19557 = vst [vmem:[#allocation100_spill] sm:$0xff] %v16629_v11  ;;  %v19561_v11 = vld [vmem:[#allocation56_spill] sm:$0xff] }
 0x59e   :  { %v8587_v22 = vpop.f32.mrf.mxu0 }
 0x59f   :  { %v16633_v23 = vadd.f32 %v8587_v22, %v8299_v3 }
 0x5a0   :  { %v16631_v7 = vpop.f32.mrf.mxu1  ;;  %v8589_v36 = vpop.f32.mrf.mxu0 }
 0x5a1   :  { %19558 = vst [vmem:[#allocation29_spill] sm:$0xff] %v16633_v23 }
 0x5a2   :  { %v8681_v8 = vpop.f32.mrf.mxu1 }
 0x5a3   :  { %v8592_v52 = vpop.f32.mrf.mxu0 }
 0x5a4   :  { %v16635_v9 = vpop.f32.mrf.mxu1  ;;  %v16637_v60 = vadd.f32 %v8592_v52, %v8304_v42  ;;  %v19563_v42 = vld [vmem:[#allocation57_spill] sm:$0xff] }
 0x5a5   :  { %v8594_v54 = vpop.f32.mrf.mxu0 }
 0x5a6   :  { %19559 = vst [vmem:[#allocation75_spill] sm:$0xff] %v16637_v60  ;;  %v8684_v48 = vpop.f32.mrf.mxu1 }
 0x5a7   :  { %v8595_v32 = vpop.f32.mrf.mxu0 }
 0x5a8   :  { %v16639_v63 = vadd.f32 %v8595_v32, %v8307_v41  ;;  %v19565_v41 = vld [vmem:[#allocation59_spill] sm:$0xff] }
 0x5a9   :  { %v8597_v12 = vpop.f32.mrf.mxu0 }
 0x5aa   :  { %19560 = vst [vmem:[#allocation58_spill] sm:$0xff] %v16639_v63  ;;  %v16641_v29 = vpop.f32.mrf.mxu1 }
 0x5ac   :  { %v10506_v13 = vpop.f32.mrf.mxu0  ;;  %v8697_v33 = vpop.f32.mrf.mxu1 }
 0x5ad   :  { %v16654_v32 = vadd.f32 %v10506_v13, %v19565_v41 }
 0x5ae   :  { %v8633_v1 = vpop.f32.mrf.mxu0  ;;  %v16643_v3 = vpop.f32.mrf.mxu1 }
 0x5af   :  { %v16646_v18 = vadd.f32 %v8633_v1, %v19561_v11  ;;  %19566 = vst [vmem:[#allocation76_spill] sm:$0xff] %v16654_v32 }
 0x5b0   :  { %v10507_v22 = vpop.f32.mrf.mxu0  ;;  %v8700_v36 = vpop.f32.mrf.mxu1 }
 0x5b1   :  { %19562 = vst [vmem:[#allocation101_spill] sm:$0xff] %v16646_v18  ;;  %v16659_v46 = vadd.f32 %v10507_v22, %v19567_v53  ;;  %v19573_v22 = vld [vmem:[#allocation68_spill] sm:$0xff] }
 0x5b2   :  { %v8636_v23 = vpop.f32.mrf.mxu0 }
 0x5b3   :  { %v16649_v52 = vadd.f32 %v8636_v23, %v19563_v42  ;;  %19568 = vst [vmem:[#allocation78_spill] sm:$0xff] %v16659_v46  ;;  %v19569_v23 = vld [vmem:[#allocation64_spill] sm:$0xff] }
 0x5b4   :  { %v16651_v54 = vpop.f32.mrf.mxu1 }
 0x5b5   :  { %19564 = vst [vmem:[#allocation77_spill] sm:$0xff] %v16649_v52  ;;  %v8888_v12 = vadd.f32 %v16649_v52, %v16646_v18  ;;  %v19571_v18 = vld [vmem:[#allocation66_spill] sm:$0xff] }
 0x5b6   :  { %v10510_v63 = vpop.f32.mrf.mxu0  ;;  %v8713_v60 = vpop.f32.mrf.mxu1 }
 0x5b7   :  { %v8889_v21 = vadd.f32 %v8888_v12, %v16654_v32  ;;  %v16675_v12 = vadd.f32 %v10510_v63, %v19573_v22 }
 0x5b8   :  { %v8649_v11 = vpop.f32.mrf.mxu0  ;;  %v16662_v1 = vpop.f32.mrf.mxu1 }
 0x5b9   :  { %v16665_v42 = vadd.f32 %v8649_v11, %v19569_v23  ;;  %v8890_v34 = vadd.f32 %v8889_v21, %v16659_v46  ;;  %19574 = vst [vmem:[#allocation31_spill] sm:$0xff] %v16675_v12  ;;  %v19575_v23 = vld [vmem:[#allocation69_spill] sm:$0xff] }
 0x5ba   :  { %v10511_v13 = vpop.f32.mrf.mxu0  ;;  %v8716_v41 = vpop.f32.mrf.mxu1 }
 0x5bb   :  { %19570 = vst [vmem:[#allocation20_spill] sm:$0xff] %v16665_v42  ;;  %v8891_v28 = vadd.f32 %v8890_v34, %v16665_v42  ;;  %v16679_v26 = vadd.f32 %v10511_v13, %v19575_v23  ;;  %v19577_v42 = vld [vmem:[#allocation156_spill] sm:$0xff] }
 0x5bc   :  { %v8652_v52 = vpop.f32.mrf.mxu0 }
 0x5bd   :  { %v16670_v56 = vadd.f32 %v8652_v52, %v19571_v18  ;;  %19576 = vst [vmem:[#allocation30_spill] sm:$0xff] %v16679_v26 }
 0x5be   :  { %v16672_v53 = vpop.f32.mrf.mxu1 }
 0x5bf   :  { %19572 = vst [vmem:[#allocation28_spill] sm:$0xff] %v16670_v56  ;;  %v8892_v32 = vadd.f32 %v8891_v28, %v16670_v56 }
 0x5c0   :  { %v8729_v51 = vpop.f32.mrf.mxu1 }
 0x5c1   :  { %v8893_v21 = vadd.f32 %v8892_v32, %v16675_v12 }
 0x5c2   :  { %v10514_v11 = vpop.f32.mrf.mxu0  ;;  %v10531_v46 = vpop.f32.mrf.mxu1 }
 0x5c3   :  { %v8894_v18 = vadd.f32 %v8893_v21, %v16679_v26  ;;  %v16693_v32 = vadd.f32 %v10514_v11, %v16041_v55 }
 0x5c4   :  { %v8665_v34 = vpop.f32.mrf.mxu0  ;;  %v8732_v52 = vpop.f32.mrf.mxu1 }
 0x5c5   :  { %v16683_v5 = vadd.f32 %v8665_v34, %v19577_v42  ;;  %v19579_v34 = vld [vmem:[#allocation157_spill] sm:$0xff] }
 0x5c6   :  { %v10515_v24 = vpop.f32.mrf.mxu0  ;;  %v16687_v22 = vpop.f32.mrf.mxu1 }
 0x5c7   :  { %19578 = vst [vmem:[#allocation80_spill] sm:$0xff] %v16683_v5  ;;  %v8895_v63 = vadd.f32 %v8894_v18, %v16683_v5  ;;  %v16697_v12 = vadd.f32 %v10515_v24, %v19579_v34  ;;  %v19580_v18 = vld [vmem:[#allocation158_spill] sm:$0xff] }
 0x5c8   :  { %v8668_v28 = vpop.f32.mrf.mxu0  ;;  %v8745_v13 = vpop.f32.mrf.mxu1  ;;  %v16701_v5 = vadd.f32 %v8681_v8, %v19580_v18  ;;  %v16715_v8 = vadd.f32 %v16635_v9, %v16150_v61 }
 0x5c9   :  { %v16690_v56 = vadd.f32 %v8668_v28, %v16023_v38  ;;  %v19581_v28 = vld [vmem:[#allocation6_spill] sm:$0xff] }
 0x5ca   :  { %v10535_v42 = vpop.f32.mrf.mxu1  ;;  %v16705_v14 = vadd.f32 %v8684_v48, %v19581_v28  ;;  %v16719_v48 = vadd.f32 %v8697_v33, %v16170_v25  ;;  %v16723_v28 = vadd.f32 %v8700_v36, %v16200_v20  ;;  %v16733_v25 = vadd.f32 %v16643_v3, %v16266_v39 }
 0x5cb   :  { %v8896_v23 = vadd.f32 %v8895_v63, %v16690_v56  ;;  %v16710_v63 = vadd.f32 %v16631_v7, %v16123_v45  ;;  %v16737_v20 = vadd.f32 %v8713_v60, %v16282_v10  ;;  %v16751_v10 = vadd.f32 %v16662_v1, %v16336_v19 }
 0x5cc   :  { %v8748_v26 = vpop.f32.mrf.mxu1  ;;  %19582 = vst [vmem:[#allocation79_spill] sm:$0xff] %v16705_v14 }
 0x5cd   :  { %v8897_v21 = vadd.f32 %v8896_v23, %v16693_v32 }
 0x5ce   :  { %v10538_v38 = vpop.f32.mrf.mxu1 }
 0x5cf   :  { %v8898_v2 = vadd.f32 %v8897_v21, %v16697_v12 }
 0x5d0   :  { %v8761_v11 = vpop.f32.mrf.mxu1 }
 0x5d1   :  { %v8899_v55 = vadd.f32 %v8898_v2, %v16701_v5 }
 0x5d2   :  { %v10539_v23 = vpop.f32.mrf.mxu1 }
 0x5d3   :  { %v8900_v24 = vadd.f32 %v8899_v55, %v16705_v14  ;;  %v19583_v55 = vld [vmem:[#allocation91_spill] sm:$0xff] }
 0x5d4   :  { %v8764_v21 = vpop.f32.mrf.mxu1  ;;  %v16728_v14 = vadd.f32 %v16641_v29, %v19583_v55  ;;  %v16746_v55 = vadd.f32 %v16651_v54, %v16326_v47 }
 0x5d5   :  { %v8901_v34 = vadd.f32 %v8900_v24, %v16710_v63 }
 0x5d6   :  { %v10542_v18 = vpop.f32.mrf.mxu1 }
 0x5d7   :  { %v8902_v2 = vadd.f32 %v8901_v34, %v16715_v8 }
 0x5d8   :  { %v8777_v7 = vpop.f32.mrf.mxu1 }
 0x5d9   :  { %v8903_v45 = vadd.f32 %v8902_v2, %v16719_v48  ;;  %v16741_v2 = vadd.f32 %v8716_v41, %v16307_v50  ;;  %v16755_v50 = vadd.f32 %v8729_v51, %v16351_v49 }
 0x5da   :  { %v10543_v9 = vpop.f32.mrf.mxu1 }
 0x5db   :  { %v8904_v61 = vadd.f32 %v8903_v45, %v16723_v28 }
 0x5dc   :  { %v8780_v24 = vpop.f32.mrf.mxu1 }
 0x5dd   :  { %v8905_v33 = vadd.f32 %v8904_v61, %v16728_v14 }
 0x5de   :  { %v10546_v34 = vpop.f32.mrf.mxu1 }
 0x5df   :  { %v8906_v36 = vadd.f32 %v8905_v33, %v16733_v25 }
 0x5e0   :  { %v8793_v45 = vpop.f32.mrf.mxu1 }
 0x5e1   :  { %v8907_v29 = vadd.f32 %v8906_v36, %v16737_v20  ;;  %v16759_v36 = vadd.f32 %v8732_v52, %v16364_v62 }
 0x5e2   :  { %v10547_v3 = vpop.f32.mrf.mxu1 }
 0x5e3   :  { %v8908_v39 = vadd.f32 %v8907_v29, %v16741_v2  ;;  %v16764_v29 = vadd.f32 %v16672_v53, %v16378_v57  ;;  %v16781_v53 = vadd.f32 %v16687_v22, %v16448_v35  ;;  %v16797_v22 = vadd.f32 %v10538_v38, %v16545_v17 }
 0x5e4   :  { %v8796_v61 = vpop.f32.mrf.mxu1  ;;  %v16813_v38 = vadd.f32 %v10542_v18, %v16563_v16  ;;  %v16829_v18 = vadd.f32 %v10546_v34, %v16575_v59  ;;  %v19598_v59 = vld [vmem:[#allocation92_spill] sm:$0xff] }
 0x5e5   :  { %v8909_v60 = vadd.f32 %v8908_v39, %v16746_v55  ;;  %v16768_v39 = vadd.f32 %v10531_v46, %v16390_v44  ;;  %v19584_v46 = vld [vmem:[#allocation4_spill] sm:$0xff]  ;;  %19585 = vst [vmem:[#allocation17_spill] sm:$0xff] %v16797_v22 }
 0x5e6   :  { %v10550_v33 = vpop.f32.mrf.mxu1  ;;  %19589 = vst [vmem:[#allocation33_spill] sm:$0xff] %v16813_v38  ;;  %19593 = vst [vmem:[#allocation81_spill] sm:$0xff] %v16829_v18 }
 0x5e7   :  { %v8910_v41 = vadd.f32 %v8909_v60, %v16751_v10  ;;  %v16772_v60 = vadd.f32 %v8745_v13, %v16407_v27  ;;  %v8818_v34 = vadd.f32 %v10550_v33, %v19598_v59  ;;  %v19604_v33 = vld [vmem:[#allocation72_spill] sm:$0xff] }
 0x5e8   :  { %v8809_v54 = vpop.f32.mrf.mxu1 }
 0x5e9   :  { %v8911_v47 = vadd.f32 %v8910_v41, %v16755_v50  ;;  %v16777_v41 = vadd.f32 %v8748_v26, %v16422_v15  ;;  %v16794_v26 = vadd.f32 %v8764_v21, %v16523_v30  ;;  %v16810_v21 = vadd.f32 %v8780_v24, %v16560_v6 }
 0x5ea   :  { %v10551_v1 = vpop.f32.mrf.mxu1  ;;  %v16826_v24 = vadd.f32 %v8796_v61, %v16572_v0  ;;  %v19597_v61 = vld [vmem:[#allocation74_spill] sm:$0xff] }
 0x5eb   :  { %v8912_v19 = vadd.f32 %v8911_v47, %v16759_v36  ;;  %v16785_v47 = vadd.f32 %v10535_v42, %v19584_v46  ;;  %19588 = vst [vmem:[#allocation32_spill] sm:$0xff] %v16810_v21 }
 0x5ec   :  { %v8812_v51 = vpop.f32.mrf.mxu1  ;;  %19592 = vst [vmem:[#allocation84_spill] sm:$0xff] %v16826_v24 }
 0x5ed   :  { %v8913_v49 = vadd.f32 %v8912_v19, %v16764_v29  ;;  %v16789_v19 = vadd.f32 %v8761_v11, %v16507_v40  ;;  %v16805_v11 = vadd.f32 %v8777_v7, %v16557_v58  ;;  %v16821_v7 = vadd.f32 %v8793_v45, %v16569_v43  ;;  %v19595_v45 = vld [vmem:[#allocation73_spill] sm:$0xff] }
 0x5ee   :  { %v10554_v57 = vpop.f32.mrf.mxu1 }
 0x5ef   :  { %v8914_v62 = vadd.f32 %v8913_v49, %v16768_v39  ;;  %19587 = vst [vmem:[#allocation22_spill] sm:$0xff] %v16805_v11  ;;  %19591 = vst [vmem:[#allocation106_spill] sm:$0xff] %v16821_v7 }
 0x5f0   :  { %v8825_v13 = vpop.f32.mrf.mxu1 }
 0x5f1   :  { %v8915_v52 = vadd.f32 %v8914_v62, %v16772_v60  ;;  %v16801_v62 = vadd.f32 %v10539_v23, %v16553_v37  ;;  %v16817_v23 = vadd.f32 %v10543_v9, %v16566_v4  ;;  %v16833_v9 = vadd.f32 %v10547_v3, %v16578_v31 }
 0x5f2   :  { %v10555_v35 = vpop.f32.mrf.mxu1 }
 0x5f3   :  { %v8916_v44 = vadd.f32 %v8915_v52, %v16777_v41  ;;  %19586 = vst [vmem:[#allocation105_spill] sm:$0xff] %v16801_v62  ;;  %19590 = vst [vmem:[#allocation83_spill] sm:$0xff] %v16817_v23 }
 0x5f4   :  { %v8828_v40 = vpop.f32.mrf.mxu1  ;;  %19594 = vst [vmem:[#allocation82_spill] sm:$0xff] %v16833_v9 }
 0x5f5   :  { %v8917_v27 = vadd.f32 %v8916_v44, %v16781_v53 }
 0x5f6   :  { %v10558_v17 = vpop.f32.mrf.mxu1 }
 0x5f7   :  { %v8918_v49 = vadd.f32 %v8917_v27, %v16785_v47 }
 0x5f8   :  { %v8841_v58 = vpop.f32.mrf.mxu1 }
 0x5f9   :  { %v8919_v15 = vadd.f32 %v8918_v49, %v16789_v19 }
 0x5fa   :  { %v10559_v16 = vpop.f32.mrf.mxu1 }
 0x5fb   :  { %v8920_v42 = vadd.f32 %v8919_v15, %v16794_v26  ;;  %v16837_v15 = vadd.f32 %v8809_v54, %v19595_v45  ;;  %v19601_v54 = vld [vmem:[#allocation34_spill] sm:$0xff] }
 0x5fc   :  { %v8844_v43 = vpop.f32.mrf.mxu1  ;;  %v8829_v45 = vadd.f32 %v8828_v40, %v19601_v54 }
 0x5fd   :  { %v8921_v52 = vadd.f32 %v8920_v42, %v16797_v22  ;;  %19596 = vst [vmem:[#allocation23_spill] sm:$0xff] %v16837_v15 }
 0x5ff   :  { %v8922_v44 = vadd.f32 %v8921_v52, %v16801_v62  ;;  %v8813_v52 = vadd.f32 %v8812_v51, %v19597_v61  ;;  %v19614_v62 = vld [vmem:[#allocation75_spill] sm:$0xff] }
 0x601   :  { %v8923_v30 = vadd.f32 %v8922_v44, %v16805_v11  ;;  %v10562_v44 = vpop.f32.mrf.mxu1 }
 0x603   :  { %v8924_v37 = vadd.f32 %v8923_v30, %v16810_v21  ;;  %v8857_v3 = vpop.f32.mrf.mxu1 }
 0x605   :  { %v8925_v46 = vadd.f32 %v8924_v37, %v16813_v38  ;;  %v19599_v37 = vld [vmem:[#allocation70_spill] sm:$0xff] }
 0x607   :  { %v8926_v27 = vadd.f32 %v8925_v46, %v16817_v23  ;;  %v8821_v46 = vadd.f32 %v10551_v1, %v19599_v37 }
 0x609   :  { %v8927_v6 = vadd.f32 %v8926_v27, %v16821_v7  ;;  %v19600_v27 = vld [vmem:[#allocation71_spill] sm:$0xff] }
 0x60b   :  { %v8928_v4 = vadd.f32 %v8927_v6, %v16826_v24  ;;  %v8826_v6 = vadd.f32 %v8825_v13, %v19600_v27  ;;  %v10563_v24 = vpop.f32.mrf.mxu1  ;;  %v19606_v13 = vld [vmem:[#allocation18_spill] sm:$0xff] }
 0x60d   :  { %v8929_v49 = vadd.f32 %v8928_v4, %v16829_v18  ;;  %v8860_v7 = vpop.f32.mrf.mxu1 }
 0x60f   :  { %v8930_v42 = vadd.f32 %v8929_v49, %v16833_v9  ;;  %v19602_v49 = vld [vmem:[#allocation7_spill] sm:$0xff]  ;;  %v10566_v23 = vpop.f32.mrf.mxu1 }
 0x610   :  { %v8834_v9 = vadd.f32 %v10554_v57, %v19602_v49  ;;  %v19608_v57 = vld [vmem:[#allocation97_spill] sm:$0xff] }
 0x611   :  { %v8931_v0 = vadd.f32 %v8930_v42, %v16837_v15  ;;  %v19603_v15 = vld [vmem:[#allocation26_spill] sm:$0xff]  ;;  %v8873_v38 = vpop.f32.mrf.mxu1 }
 0x612   :  { %v8837_v51 = vadd.f32 %v10555_v35, %v19603_v15  ;;  %v19609_v15 = vld [vmem:[#allocation96_spill] sm:$0xff] }
 0x613   :  { %v8932_v30 = vadd.f32 %v8931_v0, %v8813_v52  ;;  %v8842_v0 = vadd.f32 %v8841_v58, %v19604_v33  ;;  %v10567_v21 = vpop.f32.mrf.mxu1  ;;  %v19610_v58 = vld [vmem:[#allocation19_spill] sm:$0xff] }
 0x615   :  { %v8933_v31 = vadd.f32 %v8932_v30, %v8818_v34  ;;  %v19605_v30 = vld [vmem:[#allocation27_spill] sm:$0xff]  ;;  %v8876_v11 = vpop.f32.mrf.mxu1 }
 0x616   :  { %v8845_v37 = vadd.f32 %v8844_v43, %v19605_v30 }
 0x617   :  { %v8934_v4 = vadd.f32 %v8933_v31, %v8821_v46  ;;  %v8850_v31 = vadd.f32 %v10558_v17, %v19606_v13  ;;  %v19612_v17 = vld [vmem:[#allocation100_spill] sm:$0xff] }
 0x619   :  { %v8935_v18 = vadd.f32 %v8934_v4, %v8826_v6  ;;  %v19607_v4 = vld [vmem:[#allocation12_spill] sm:$0xff] }
 0x61a   :  { %v8853_v40 = vadd.f32 %v10559_v16, %v19607_v4 }
 0x61b   :  { %v8936_v42 = vadd.f32 %v8935_v18, %v8829_v45  ;;  %v8858_v18 = vadd.f32 %v8857_v3, %v19608_v57  ;;  %v8882_v3 = vadd.f32 %v10566_v23, %v19614_v62  ;;  %v19615_v57 = vld [vmem:[#allocation58_spill] sm:$0xff] }
 0x61d   :  { %v8937_v61 = vadd.f32 %v8936_v42, %v8834_v9  ;;  %v8861_v42 = vadd.f32 %v8860_v7, %v19609_v15 }
 0x61f   :  { %v8938_v59 = vadd.f32 %v8937_v61, %v8837_v51  ;;  %v8866_v61 = vadd.f32 %v10562_v44, %v19610_v58 }
 0x621   :  { %v8939_v1 = vadd.f32 %v8938_v59, %v8842_v0  ;;  %v19611_v59 = vld [vmem:[#allocation16_spill] sm:$0xff] }
 0x622   :  { %v8869_v43 = vadd.f32 %v10563_v24, %v19611_v59 }
 0x623   :  { %v8940_v27 = vadd.f32 %v8939_v1, %v8845_v37  ;;  %v8874_v1 = vadd.f32 %v8873_v38, %v19612_v17 }
 0x625   :  { %v8941_v54 = vadd.f32 %v8940_v27, %v8850_v31  ;;  %v19613_v27 = vld [vmem:[#allocation29_spill] sm:$0xff] }
 0x626   :  { %v8877_v4 = vadd.f32 %v8876_v11, %v19613_v27 }
 0x627   :  { %v8942_v49 = vadd.f32 %v8941_v54, %v8853_v40 }
 0x629   :  { %v8943_v35 = vadd.f32 %v8942_v49, %v8858_v18  ;;  %v8885_v49 = vadd.f32 %v10567_v21, %v19615_v57 }
 0x62b   :  { %v8944_v33 = vadd.f32 %v8943_v35, %v8861_v42 }
 0x62d   :  { %v8945_v30 = vadd.f32 %v8944_v33, %v8866_v61 }
 0x62f   :  { %v8946_v13 = vadd.f32 %v8945_v30, %v8869_v43 }
 0x631   :  { %v8947_v16 = vadd.f32 %v8946_v13, %v8874_v1 }
 0x633   :  { %v8948_v54 = vadd.f32 %v8947_v16, %v8877_v4 }
 0x635   :  { %v8949_v7 = vadd.f32 %v8948_v54, %v8882_v3  ;;  %v19625_v54 = vld [vmem:[#allocation20_spill] sm:$0xff] }
 0x637   :  { %v8950_v15 = vadd.f32 %v8949_v7, %v8885_v49 }
 0x639   :  { %v8951_v22 = vrot.slane %v8950_v15, 4 }
 0x63b   :  { %v8952_v44 = vadd.f32 %v8951_v22, %v8950_v15  ;;  %v19626_v15 = vld [vmem:[#allocation28_spill] sm:$0xff] }
 0x63d   :  { %v8953_v35 = vrot.slane %v8952_v44, 2 }
 0x63f   :  { %v8954_v58 = vadd.f32 %v8953_v35, %v8952_v44 }
 0x641   :  { %v8955_v24 = vrot.slane %v8954_v58, 1 }
 0x643   :  { %v8956_v33 = vadd.f32 %v8955_v24, %v8954_v58  ;;  %v19627_v24 = vld [vmem:[#allocation31_spill] sm:$0xff] }
 0x645   :  { %v16860_v59 = vmul.f32 0.001953125, %v8956_v33 }
 0x647   :  { %v16863_v38 = vsub.f32 %v8813_v52, %v16860_v59  ;;  %v16866_v11 = vsub.f32 %v8818_v34, %v16860_v59  ;;  %v16869_v62 = vsub.f32 %v8821_v46, %v16860_v59  ;;  %v16872_v21 = vsub.f32 %v8826_v6, %v16860_v59 }
 0x648   :  { %v16875_v22 = vsub.f32 %v8829_v45, %v16860_v59  ;;  %v16878_v23 = vsub.f32 %v8834_v9, %v16860_v59  ;;  %v16881_v30 = vsub.f32 %v8837_v51, %v16860_v59  ;;  %v16884_v52 = vsub.f32 %v8842_v0, %v16860_v59 }
 0x649   :  { %v16887_v34 = vsub.f32 %v8845_v37, %v16860_v59  ;;  %v16890_v46 = vsub.f32 %v8850_v31, %v16860_v59  ;;  %v16893_v6 = vsub.f32 %v8853_v40, %v16860_v59  ;;  %v16896_v45 = vsub.f32 %v8858_v18, %v16860_v59 }
 0x64a   :  { %v16899_v9 = vsub.f32 %v8861_v42, %v16860_v59  ;;  %v16902_v51 = vsub.f32 %v8866_v61, %v16860_v59  ;;  %v16905_v0 = vsub.f32 %v8869_v43, %v16860_v59  ;;  %v16908_v37 = vsub.f32 %v8874_v1, %v16860_v59  ;;  %v19621_v42 = vld [vmem:[#allocation101_spill] sm:$0xff]  ;;  %v19623_v1 = vld [vmem:[#allocation76_spill] sm:$0xff] }
 0x64b   :  { %v16911_v31 = vsub.f32 %v8877_v4, %v16860_v59  ;;  %v16914_v40 = vsub.f32 %v8882_v3, %v16860_v59  ;;  %v16917_v18 = vsub.f32 %v8885_v49, %v16860_v59  ;;  %v16921_v17 = vsub.f32 %v19621_v42, %v16860_v59  ;;  %v19622_v61 = vld [vmem:[#allocation77_spill] sm:$0xff]  ;;  %v19624_v4 = vld [vmem:[#allocation78_spill] sm:$0xff] }
 0x64c   :  { %19616 = vst [vmem:[#allocation109_spill] sm:$0xff] %v16899_v9  ;;  %19617 = vst [vmem:[#allocation24_spill] sm:$0xff] %v16902_v51  ;;  %v16925_v43 = vsub.f32 %v19622_v61, %v16860_v59  ;;  %v16929_v13 = vsub.f32 %v19623_v1, %v16860_v59  ;;  %v16937_v3 = vsub.f32 %v19624_v4, %v16860_v59  ;;  %v19628_v1 = vld [vmem:[#allocation30_spill] sm:$0xff] }
 0x64d   :  { %19618 = vst [vmem:[#allocation54_spill] sm:$0xff] %v16905_v0  ;;  %19619 = vst [vmem:[#allocation3_spill] sm:$0xff] %v16908_v37  ;;  %v9022_v16 = vmul.f32 %v16921_v17, %v16921_v17  ;;  %v16941_v57 = vsub.f32 %v19625_v54, %v16860_v59  ;;  %v16947_v44 = vsub.f32 %v19626_v15, %v16860_v59  ;;  %v19629_v54 = vld [vmem:[#allocation80_spill] sm:$0xff] }
 0x64e   :  { %19620 = vst [vmem:[#allocation88_spill] sm:$0xff] %v16911_v31  ;;  %v9023_v27 = vmul.f32 %v16925_v43, %v16925_v43  ;;  %v9024_v49 = vmul.f32 %v16929_v13, %v16929_v13  ;;  %v9025_v35 = vmul.f32 %v16937_v3, %v16937_v3  ;;  %v16953_v33 = vsub.f32 %v19627_v24, %v16860_v59 }
 0x64f   :  { %v9026_v42 = vmul.f32 %v16941_v57, %v16941_v57  ;;  %v16959_v4 = vsub.f32 %v19628_v1, %v16860_v59  ;;  %v16965_v15 = vsub.f32 %v19629_v54, %v16860_v59  ;;  %v16971_v24 = vsub.f32 %v16690_v56, %v16860_v59 }
 0x650   :  { %v9086_v7 = vadd.f32 %v9023_v27, %v9022_v16  ;;  %v9027_v16 = vmul.f32 %v16947_v44, %v16947_v44  ;;  %v16977_v1 = vsub.f32 %v16693_v32, %v16860_v59  ;;  %v16983_v54 = vsub.f32 %v16697_v12, %v16860_v59 }
 0x651   :  { %19630 = vst [vmem:[#allocation87_spill] sm:$0xff] %v16965_v15  ;;  %v9031_v56 = vmul.f32 %v16971_v24, %v16971_v24 }
 0x652   :  { %v9087_v58 = vadd.f32 %v9086_v7, %v9024_v49  ;;  %v9028_v49 = vmul.f32 %v16953_v33, %v16953_v33  ;;  %v9032_v32 = vmul.f32 %v16977_v1, %v16977_v1  ;;  %v9033_v12 = vmul.f32 %v16983_v54, %v16983_v54 }
 0x654   :  { %v9088_v61 = vadd.f32 %v9087_v58, %v9025_v35  ;;  %v9029_v35 = vmul.f32 %v16959_v4, %v16959_v4 }
 0x656   :  { %v9089_v27 = vadd.f32 %v9088_v61, %v9026_v42  ;;  %v9030_v42 = vmul.f32 %v16965_v15, %v16965_v15 }
 0x658   :  { %v9090_v7 = vadd.f32 %v9089_v27, %v9027_v16  ;;  %v16989_v27 = vsub.f32 %v16701_v5, %v16860_v59 }
 0x65a   :  { %v9091_v58 = vadd.f32 %v9090_v7, %v9028_v49  ;;  %v19631_v7 = vld [vmem:[#allocation79_spill] sm:$0xff]  ;;  %v9034_v5 = vmul.f32 %v16989_v27, %v16989_v27 }
 0x65b   :  { %v16995_v15 = vsub.f32 %v19631_v7, %v16860_v59  ;;  %v17013_v7 = vsub.f32 %v16719_v48, %v16860_v59 }
 0x65c   :  { %v9092_v61 = vadd.f32 %v9091_v58, %v9029_v35  ;;  %v17001_v58 = vsub.f32 %v16710_v63, %v16860_v59 }
 0x65d   :  { %v9038_v48 = vmul.f32 %v17013_v7, %v17013_v7 }
 0x65e   :  { %v9093_v16 = vadd.f32 %v9092_v61, %v9030_v42  ;;  %v17007_v61 = vsub.f32 %v16715_v8, %v16860_v59  ;;  %v9036_v63 = vmul.f32 %v17001_v58, %v17001_v58 }
 0x660   :  { %v9094_v49 = vadd.f32 %v9093_v16, %v9031_v56  ;;  %v9035_v56 = vmul.f32 %v16995_v15, %v16995_v15  ;;  %v9037_v8 = vmul.f32 %v17007_v61, %v17007_v61 }
 0x662   :  { %v9095_v35 = vadd.f32 %v9094_v49, %v9032_v32  ;;  %v17019_v49 = vsub.f32 %v16723_v28, %v16860_v59 }
 0x664   :  { %v9096_v42 = vadd.f32 %v9095_v35, %v9033_v12  ;;  %v17025_v35 = vsub.f32 %v16728_v14, %v16860_v59  ;;  %v9039_v28 = vmul.f32 %v17019_v49, %v17019_v49 }
 0x666   :  { %v9097_v16 = vadd.f32 %v9096_v42, %v9034_v5  ;;  %v17031_v42 = vsub.f32 %v16733_v25, %v16860_v59  ;;  %v9040_v14 = vmul.f32 %v17025_v35, %v17025_v35 }
 0x668   :  { %v9098_v32 = vadd.f32 %v9097_v16, %v9035_v56  ;;  %v17037_v16 = vsub.f32 %v16737_v20, %v16860_v59  ;;  %v9041_v25 = vmul.f32 %v17031_v42, %v17031_v42 }
 0x66a   :  { %v9099_v12 = vadd.f32 %v9098_v32, %v9036_v63  ;;  %v17043_v32 = vsub.f32 %v16741_v2, %v16860_v59  ;;  %v9042_v20 = vmul.f32 %v17037_v16, %v17037_v16 }
 0x66c   :  { %v9100_v5 = vadd.f32 %v9099_v12, %v9037_v8  ;;  %v17049_v12 = vsub.f32 %v16746_v55, %v16860_v59  ;;  %v9043_v2 = vmul.f32 %v17043_v32, %v17043_v32 }
 0x66e   :  { %v9101_v56 = vadd.f32 %v9100_v5, %v9038_v48  ;;  %v17055_v5 = vsub.f32 %v16751_v10, %v16860_v59  ;;  %v9044_v55 = vmul.f32 %v17049_v12, %v17049_v12 }
 0x670   :  { %v9102_v63 = vadd.f32 %v9101_v56, %v9039_v28  ;;  %v17061_v56 = vsub.f32 %v16755_v50, %v16860_v59  ;;  %v9045_v10 = vmul.f32 %v17055_v5, %v17055_v5 }
 0x672   :  { %v9103_v8 = vadd.f32 %v9102_v63, %v9040_v14  ;;  %v17067_v63 = vsub.f32 %v16759_v36, %v16860_v59  ;;  %v9046_v50 = vmul.f32 %v17061_v56, %v17061_v56 }
 0x674   :  { %v9104_v48 = vadd.f32 %v9103_v8, %v9041_v25  ;;  %v17073_v8 = vsub.f32 %v16764_v29, %v16860_v59  ;;  %v9047_v36 = vmul.f32 %v17067_v63, %v17067_v63 }
 0x676   :  { %v9105_v28 = vadd.f32 %v9104_v48, %v9042_v20  ;;  %v17079_v48 = vsub.f32 %v16768_v39, %v16860_v59  ;;  %v9048_v29 = vmul.f32 %v17073_v8, %v17073_v8 }
 0x678   :  { %v9106_v14 = vadd.f32 %v9105_v28, %v9043_v2  ;;  %v17085_v28 = vsub.f32 %v16772_v60, %v16860_v59  ;;  %v9049_v39 = vmul.f32 %v17079_v48, %v17079_v48 }
 0x67a   :  { %v9107_v25 = vadd.f32 %v9106_v14, %v9044_v55  ;;  %v17091_v14 = vsub.f32 %v16777_v41, %v16860_v59  ;;  %v9050_v60 = vmul.f32 %v17085_v28, %v17085_v28 }
 0x67c   :  { %v9108_v20 = vadd.f32 %v9107_v25, %v9045_v10  ;;  %19632 = vst [vmem:[#allocation9_spill] sm:$0xff] %v17091_v14  ;;  %v17097_v25 = vsub.f32 %v16781_v53, %v16860_v59  ;;  %v9051_v41 = vmul.f32 %v17091_v14, %v17091_v14 }
 0x67e   :  { %v9109_v2 = vadd.f32 %v9108_v20, %v9046_v50  ;;  %19633 = vst [vmem:[#allocation112_spill] sm:$0xff] %v17097_v25  ;;  %v17103_v20 = vsub.f32 %v16785_v47, %v16860_v59  ;;  %v9052_v53 = vmul.f32 %v17097_v25, %v17097_v25 }
 0x680   :  { %v9110_v55 = vadd.f32 %v9109_v2, %v9047_v36  ;;  %19634 = vst [vmem:[#allocation25_spill] sm:$0xff] %v17103_v20  ;;  %v17109_v2 = vsub.f32 %v16789_v19, %v16860_v59  ;;  %v9053_v47 = vmul.f32 %v17103_v20, %v17103_v20 }
 0x682   :  { %v9111_v10 = vadd.f32 %v9110_v55, %v9048_v29  ;;  %19635 = vst [vmem:[#allocation85_spill] sm:$0xff] %v17109_v2  ;;  %v17115_v55 = vsub.f32 %v16794_v26, %v16860_v59  ;;  %v9054_v19 = vmul.f32 %v17109_v2, %v17109_v2 }
 0x684   :  { %v9112_v50 = vadd.f32 %v9111_v10, %v9049_v39  ;;  %19636 = vst [vmem:[#allocation113_spill] sm:$0xff] %v17115_v55  ;;  %v19637_v10 = vld [vmem:[#allocation17_spill] sm:$0xff]  ;;  %v9055_v26 = vmul.f32 %v17115_v55, %v17115_v55 }
 0x685   :  { %v17121_v14 = vsub.f32 %v19637_v10, %v16860_v59  ;;  %v19643_v10 = vld [vmem:[#allocation32_spill] sm:$0xff] }
 0x686   :  { %v9113_v36 = vadd.f32 %v9112_v50, %v9050_v60  ;;  %v19639_v50 = vld [vmem:[#allocation105_spill] sm:$0xff]  ;;  %v17139_v2 = vsub.f32 %v19643_v10, %v16860_v59  ;;  %v19649_v10 = vld [vmem:[#allocation106_spill] sm:$0xff] }
 0x687   :  { %19638 = vst [vmem:[#allocation86_spill] sm:$0xff] %v17121_v14  ;;  %v17127_v25 = vsub.f32 %v19639_v50, %v16860_v59  ;;  %v19645_v50 = vld [vmem:[#allocation33_spill] sm:$0xff] }
 0x688   :  { %v9114_v29 = vadd.f32 %v9113_v36, %v9051_v41  ;;  %v19641_v36 = vld [vmem:[#allocation22_spill] sm:$0xff]  ;;  %19644 = vst [vmem:[#allocation117_spill] sm:$0xff] %v17139_v2  ;;  %v17145_v55 = vsub.f32 %v19645_v50, %v16860_v59  ;;  %v19650_v50 = vld [vmem:[#allocation84_spill] sm:$0xff] }
 0x689   :  { %19640 = vst [vmem:[#allocation14_spill] sm:$0xff] %v17127_v25  ;;  %v17133_v20 = vsub.f32 %v19641_v36, %v16860_v59  ;;  %v19647_v36 = vld [vmem:[#allocation83_spill] sm:$0xff] }
 0x68a   :  { %v9115_v39 = vadd.f32 %v9114_v29, %v9052_v53  ;;  %v9056_v53 = vmul.f32 %v17121_v14, %v17121_v14  ;;  %19646 = vst [vmem:[#allocation15_spill] sm:$0xff] %v17145_v55  ;;  %v17151_v14 = vsub.f32 %v19647_v36, %v16860_v59  ;;  %v19652_v36 = vld [vmem:[#allocation81_spill] sm:$0xff] }
 0x68b   :  { %19642 = vst [vmem:[#allocation13_spill] sm:$0xff] %v17133_v20 }
 0x68c   :  { %v9116_v60 = vadd.f32 %v9115_v39, %v9053_v47  ;;  %v9057_v47 = vmul.f32 %v17127_v25, %v17127_v25  ;;  %19648 = vst [vmem:[#allocation89_spill] sm:$0xff] %v17151_v14  ;;  %v17157_v25 = vsub.f32 %v19649_v10, %v16860_v59  ;;  %v19653_v10 = vld [vmem:[#allocation82_spill] sm:$0xff] }
 0x68e   :  { %v9117_v41 = vadd.f32 %v9116_v60, %v9054_v19  ;;  %v9058_v19 = vmul.f32 %v17133_v20, %v17133_v20  ;;  %v17163_v20 = vsub.f32 %v19650_v50, %v16860_v59  ;;  %v19654_v50 = vld [vmem:[#allocation23_spill] sm:$0xff] }
 0x690   :  { %v9118_v29 = vadd.f32 %v9117_v41, %v9055_v26  ;;  %v9059_v26 = vmul.f32 %v17139_v2, %v17139_v2  ;;  %19651 = vst [vmem:[#allocation118_spill] sm:$0xff] %v17163_v20  ;;  %v17169_v2 = vsub.f32 %v19652_v36, %v16860_v59 }
 0x692   :  { %v9119_v39 = vadd.f32 %v9118_v29, %v9056_v53  ;;  %v9060_v53 = vmul.f32 %v17145_v55, %v17145_v55  ;;  %v17175_v55 = vsub.f32 %v19653_v10, %v16860_v59 }
 0x694   :  { %v9120_v60 = vadd.f32 %v9119_v39, %v9057_v47  ;;  %v9061_v47 = vmul.f32 %v17151_v14, %v17151_v14  ;;  %v17181_v14 = vsub.f32 %v19654_v50, %v16860_v59  ;;  %v9065_v36 = vmul.f32 %v17175_v55, %v17175_v55 }
 0x695   :  { %v9068_v59 = vmul.f32 %v16866_v11, %v16866_v11  ;;  %v9069_v50 = vmul.f32 %v16869_v62, %v16869_v62 }
 0x696   :  { %v9121_v41 = vadd.f32 %v9120_v60, %v9058_v19  ;;  %v9062_v19 = vmul.f32 %v17157_v25, %v17157_v25 }
 0x698   :  { %v9122_v29 = vadd.f32 %v9121_v41, %v9059_v26  ;;  %v9063_v26 = vmul.f32 %v17163_v20, %v17163_v20  ;;  %v9067_v20 = vmul.f32 %v16863_v38, %v16863_v38 }
 0x69a   :  { %v9123_v39 = vadd.f32 %v9122_v29, %v9060_v53  ;;  %v9064_v53 = vmul.f32 %v17169_v2, %v17169_v2 }
 0x69c   :  { %v9124_v60 = vadd.f32 %v9123_v39, %v9061_v47  ;;  %v9066_v39 = vmul.f32 %v17181_v14, %v17181_v14 }
 0x69e   :  { %v9125_v41 = vadd.f32 %v9124_v60, %v9062_v19 }
 0x6a0   :  { %v9126_v29 = vadd.f32 %v9125_v41, %v9063_v26  ;;  %v9070_v41 = vmul.f32 %v16872_v21, %v16872_v21 }
 0x6a2   :  { %v9127_v47 = vadd.f32 %v9126_v29, %v9064_v53  ;;  %v9071_v29 = vmul.f32 %v16875_v22, %v16875_v22 }
 0x6a4   :  { %v9128_v10 = vadd.f32 %v9127_v47, %v9065_v36  ;;  %v9072_v47 = vmul.f32 %v16878_v23, %v16878_v23 }
 0x6a6   :  { %v9129_v19 = vadd.f32 %v9128_v10, %v9066_v39  ;;  %v9073_v10 = vmul.f32 %v16881_v30, %v16881_v30 }
 0x6a8   :  { %v9130_v60 = vadd.f32 %v9129_v19, %v9067_v20  ;;  %v9074_v19 = vmul.f32 %v16884_v52, %v16884_v52 }
 0x6aa   :  { %v9131_v26 = vadd.f32 %v9130_v60, %v9068_v59  ;;  %v9075_v60 = vmul.f32 %v16887_v34, %v16887_v34 }
 0x6ac   :  { %v9132_v53 = vadd.f32 %v9131_v26, %v9069_v50  ;;  %v9076_v26 = vmul.f32 %v16890_v46, %v16890_v46 }
 0x6ae   :  { %v9133_v36 = vadd.f32 %v9132_v53, %v9070_v41  ;;  %v9077_v53 = vmul.f32 %v16893_v6, %v16893_v6 }
 0x6b0   :  { %v9134_v39 = vadd.f32 %v9133_v36, %v9071_v29  ;;  %v9078_v36 = vmul.f32 %v16896_v45, %v16896_v45 }
 0x6b2   :  { %v9135_v20 = vadd.f32 %v9134_v39, %v9072_v47  ;;  %v9079_v39 = vmul.f32 %v16899_v9, %v16899_v9 }
 0x6b4   :  { %v9136_v59 = vadd.f32 %v9135_v20, %v9073_v10  ;;  %v9080_v20 = vmul.f32 %v16902_v51, %v16902_v51 }
 0x6b6   :  { %v9137_v50 = vadd.f32 %v9136_v59, %v9074_v19  ;;  %v9081_v59 = vmul.f32 %v16905_v0, %v16905_v0 }
 0x6b8   :  { %v9138_v41 = vadd.f32 %v9137_v50, %v9075_v60  ;;  %v9082_v50 = vmul.f32 %v16908_v37, %v16908_v37 }
 0x6ba   :  { %v9139_v29 = vadd.f32 %v9138_v41, %v9076_v26  ;;  %v9083_v41 = vmul.f32 %v16911_v31, %v16911_v31 }
 0x6bc   :  { %v9140_v47 = vadd.f32 %v9139_v29, %v9077_v53  ;;  %v9084_v29 = vmul.f32 %v16914_v40, %v16914_v40 }
 0x6be   :  { %v9141_v10 = vadd.f32 %v9140_v47, %v9078_v36  ;;  %v9085_v47 = vmul.f32 %v16917_v18, %v16917_v18 }
 0x6c0   :  { %v9142_v19 = vadd.f32 %v9141_v10, %v9079_v39 }
 0x6c2   :  { %v9143_v60 = vadd.f32 %v9142_v19, %v9080_v20 }
 0x6c4   :  { %v9144_v26 = vadd.f32 %v9143_v60, %v9081_v59 }
 0x6c6   :  { %v9145_v53 = vadd.f32 %v9144_v26, %v9082_v50 }
 0x6c8   :  { %v9146_v36 = vadd.f32 %v9145_v53, %v9083_v41  ;;  %v19656_v53 = vld [vmem:[#allocation9_spill] sm:$0xff] }
 0x6ca   :  { %v9147_v39 = vadd.f32 %v9146_v36, %v9084_v29  ;;  %v19657_v29 = vld [vmem:[#allocation112_spill] sm:$0xff]  ;;  %v19658_v36 = vld [vmem:[#allocation25_spill] sm:$0xff] }
 0x6cc   :  { %v9148_v10 = vadd.f32 %v9147_v39, %v9085_v47  ;;  %v19659_v47 = vld [vmem:[#allocation85_spill] sm:$0xff] }
 0x6cd   :  { %v19660_v39 = vld [vmem:[#allocation113_spill] sm:$0xff] }
 0x6ce   :  { %v9149_v51 = vrot.slane %v9148_v10, 4 }
 0x6d0   :  { %v9150_v0 = vadd.f32 %v9149_v51, %v9148_v10  ;;  %v19661_v10 = vld [vmem:[#allocation86_spill] sm:$0xff] }
 0x6d2   :  { %v9151_v20 = vrot.slane %v9150_v0, 2 }
 0x6d4   :  { %v9152_v19 = vadd.f32 %v9151_v20, %v9150_v0 }
 0x6d6   :  { %v9153_v9 = vrot.slane %v9152_v19, 1 }
 0x6d8   :  { %v9154_v37 = vadd.f32 %v9153_v9, %v9152_v19  ;;  %v19662_v19 = vld [vmem:[#allocation14_spill] sm:$0xff] }
 0x6da   :  { %v9155_v59 = vmul.f32 0.001953125, %v9154_v37 }
 0x6dc   :  { %v9156_v60 = vadd.f32 1e-05, %v9155_v59 }
 0x6de   :  { %10791 = vrsqrt.f32 %v9156_v60  ;;  %v19664_v60 = vld [vmem:[#allocation13_spill] sm:$0xff] }
 0x6eb   :  { %v17227_v31 = vpop.eup %10791 }
 0x6ec   :  { %v17231_v50 = vmul.f32 %v17227_v31, %v16921_v17  ;;  %v17235_v26 = vmul.f32 %v17227_v31, %v16925_v43  ;;  %v17239_v51 = vmul.f32 %v17227_v31, %v16929_v13  ;;  %v17243_v9 = vmul.f32 %v17227_v31, %v16937_v3  ;;  %v19655_v13 = vld [vmem:[#allocation87_spill] sm:$0xff] }
 0x6ed   :  { %v17247_v0 = vmul.f32 %v17227_v31, %v16941_v57  ;;  %v17251_v37 = vmul.f32 %v17227_v31, %v16947_v44  ;;  %v17255_v17 = vmul.f32 %v17227_v31, %v16953_v33  ;;  %v17259_v43 = vmul.f32 %v17227_v31, %v16959_v4 }
 0x6ee   :  { %v17263_v3 = vmul.f32 %v17227_v31, %v19655_v13  ;;  %v17267_v57 = vmul.f32 %v17227_v31, %v16971_v24  ;;  %v17271_v44 = vmul.f32 %v17227_v31, %v16977_v1  ;;  %v17275_v33 = vmul.f32 %v17227_v31, %v16983_v54 }
 0x6ef   :  { %v17279_v4 = vmul.f32 %v17227_v31, %v16989_v27  ;;  %v17283_v41 = vmul.f32 %v17227_v31, %v16995_v15  ;;  %v17287_v24 = vmul.f32 %v17227_v31, %v17001_v58  ;;  %v17291_v1 = vmul.f32 %v17227_v31, %v17007_v61 }
 0x6f0   :  { %v17295_v54 = vmul.f32 %v17227_v31, %v17013_v7  ;;  %v17299_v27 = vmul.f32 %v17227_v31, %v17019_v49  ;;  %v17303_v15 = vmul.f32 %v17227_v31, %v17025_v35  ;;  %v17307_v58 = vmul.f32 %v17227_v31, %v17031_v42 }
 0x6f1   :  { %v17311_v61 = vmul.f32 %v17227_v31, %v17037_v16  ;;  %v17315_v7 = vmul.f32 %v17227_v31, %v17043_v32  ;;  %v17319_v49 = vmul.f32 %v17227_v31, %v17049_v12  ;;  %v17323_v35 = vmul.f32 %v17227_v31, %v17055_v5 }
 0x6f2   :  { %v17327_v42 = vmul.f32 %v17227_v31, %v17061_v56  ;;  %v17331_v16 = vmul.f32 %v17227_v31, %v17067_v63  ;;  %v17335_v32 = vmul.f32 %v17227_v31, %v17073_v8  ;;  %v17339_v12 = vmul.f32 %v17227_v31, %v17079_v48 }
 0x6f3   :  { %v17343_v5 = vmul.f32 %v17227_v31, %v17085_v28  ;;  %v17347_v56 = vmul.f32 %v17227_v31, %v19656_v53  ;;  %v17351_v63 = vmul.f32 %v17227_v31, %v19657_v29  ;;  %v17355_v8 = vmul.f32 %v17227_v31, %v19658_v36  ;;  %v19665_v53 = vld [vmem:[#allocation117_spill] sm:$0xff]  ;;  %v19666_v36 = vld [vmem:[#allocation15_spill] sm:$0xff] }
 0x6f4   :  { %v17359_v48 = vmul.f32 %v17227_v31, %v19659_v47  ;;  %v17363_v28 = vmul.f32 %v17227_v31, %v19660_v39  ;;  %v17367_v20 = vmul.f32 %v17227_v31, %v19661_v10  ;;  %v17371_v59 = vmul.f32 %v17227_v31, %v19662_v19  ;;  %v19667_v39 = vld [vmem:[#allocation89_spill] sm:$0xff] }
 0x6f5   :  { %v17375_v13 = vmul.f32 %v17227_v31, %v19664_v60  ;;  %v17379_v29 = vmul.f32 %v17227_v31, %v19665_v53  ;;  %v17383_v47 = vmul.f32 %v17227_v31, %v19666_v36  ;;  %v17387_v10 = vmul.f32 %v17227_v31, %v19667_v39 }
 0x6f6   :  { %19663 = vst [vmem:[#allocation90_spill] sm:$0xff] %v17371_v59  ;;  %v17391_v19 = vmul.f32 %v17227_v31, %v17157_v25  ;;  %v19668_v59 = vld [vmem:[#allocation118_spill] sm:$0xff]  ;;  %v17399_v53 = vmul.f32 %v17227_v31, %v17169_v2  ;;  %v17403_v36 = vmul.f32 %v17227_v31, %v17175_v55  ;;  %v17407_v39 = vmul.f32 %v17227_v31, %v17181_v14 }
 0x6f7   :  { %v17395_v60 = vmul.f32 %v17227_v31, %v19668_v59  ;;  %v17411_v25 = vmul.f32 %v17227_v31, %v16863_v38  ;;  %v17415_v59 = vmul.f32 %v17227_v31, %v16866_v11  ;;  %v17419_v2 = vmul.f32 %v17227_v31, %v16869_v62 }
 0x6f8   :  { %v17423_v55 = vmul.f32 %v17227_v31, %v16872_v21  ;;  %v17427_v14 = vmul.f32 %v17227_v31, %v16875_v22  ;;  %v17431_v38 = vmul.f32 %v17227_v31, %v16878_v23  ;;  %v17435_v11 = vmul.f32 %v17227_v31, %v16881_v30  ;;  %v17456_v30 = vld [vmem:[%s18268_s5] ss:$0 sm:$0xff] }
 0x6f9   :  { %v17439_v62 = vmul.f32 %v17227_v31, %v16884_v52  ;;  %v17443_v21 = vmul.f32 %v17227_v31, %v16887_v34  ;;  %v17447_v22 = vmul.f32 %v17227_v31, %v16890_v46  ;;  %v17451_v23 = vmul.f32 %v17227_v31, %v16893_v6 }
 0x6fa   :  { %19669 = vst [vmem:[#allocation36_spill] sm:$0xff] %v17431_v38  ;;  %19670 = vst [vmem:[#allocation38_spill] sm:$0xff] %v17435_v11  ;;  %v17460_v52 = vmul.f32 %v17227_v31, %v16896_v45  ;;  %v19679_v38 = vld [vmem:[#allocation88_spill] sm:$0xff] }
 0x6fb   :  { %19671 = vst [vmem:[#allocation122_spill] sm:$0xff] %v17439_v62  ;;  %19672 = vst [vmem:[#allocation121_spill] sm:$0xff] %v17443_v21  ;;  %v19675_v62 = vld [vmem:[#allocation109_spill] sm:$0xff]  ;;  %v19676_v21 = vld [vmem:[#allocation24_spill] sm:$0xff]  ;;  %v17480_v45 = vmul.f32 %v17227_v31, %v19679_v38  ;;  %v17500_v38 = vmul.f32 %v17456_v30, %v17239_v51  ;;  %v17524_v51 = vmul.f32 %v17456_v30, %v17263_v3 }
 0x6fc   :  { %19673 = vst [vmem:[#allocation39_spill] sm:$0xff] %v17447_v22  ;;  %19674 = vst [vmem:[#allocation37_spill] sm:$0xff] %v17451_v23  ;;  %v17464_v34 = vmul.f32 %v17227_v31, %v19675_v62  ;;  %v17468_v46 = vmul.f32 %v17227_v31, %v19676_v21  ;;  %v19677_v22 = vld [vmem:[#allocation54_spill] sm:$0xff]  ;;  %v19678_v23 = vld [vmem:[#allocation3_spill] sm:$0xff]  ;;  %v17484_v62 = vmul.f32 %v17227_v31, %v16914_v40 }
 0x6fd   :  { %v17472_v6 = vmul.f32 %v17227_v31, %v19677_v22  ;;  %v17476_v11 = vmul.f32 %v17227_v31, %v19678_v23  ;;  %v17488_v21 = vmul.f32 %v17227_v31, %v16917_v18  ;;  %v17492_v22 = vmul.f32 %v17456_v30, %v17231_v50 }
 0x6fe   :  { %v17496_v23 = vmul.f32 %v17456_v30, %v17235_v26  ;;  %v17504_v40 = vmul.f32 %v17456_v30, %v17243_v9  ;;  %v17508_v31 = vmul.f32 %v17456_v30, %v17247_v0  ;;  %v17512_v18 = vmul.f32 %v17456_v30, %v17251_v37 }
 0x6ff   :  { %v17516_v50 = vmul.f32 %v17456_v30, %v17255_v17  ;;  %v17520_v26 = vmul.f32 %v17456_v30, %v17259_v43  ;;  %v17528_v9 = vmul.f32 %v17456_v30, %v17267_v57  ;;  %v17532_v0 = vmul.f32 %v17456_v30, %v17271_v44 }
 0x700   :  { %v17536_v37 = vmul.f32 %v17456_v30, %v17275_v33  ;;  %v17540_v17 = vmul.f32 %v17456_v30, %v17279_v4  ;;  %v17544_v43 = vmul.f32 %v17456_v30, %v17283_v41  ;;  %v17548_v3 = vmul.f32 %v17456_v30, %v17287_v24 }
 0x701   :  { %v17552_v57 = vmul.f32 %v17456_v30, %v17291_v1  ;;  %v17556_v44 = vmul.f32 %v17456_v30, %v17295_v54  ;;  %v17560_v33 = vmul.f32 %v17456_v30, %v17299_v27  ;;  %v17564_v4 = vmul.f32 %v17456_v30, %v17303_v15 }
 0x702   :  { %v17568_v41 = vmul.f32 %v17456_v30, %v17307_v58  ;;  %v17572_v24 = vmul.f32 %v17456_v30, %v17311_v61  ;;  %v17576_v1 = vmul.f32 %v17456_v30, %v17315_v7  ;;  %v17580_v54 = vmul.f32 %v17456_v30, %v17319_v49 }
 0x703   :  { %v17584_v27 = vmul.f32 %v17456_v30, %v17323_v35  ;;  %v17588_v15 = vmul.f32 %v17456_v30, %v17327_v42  ;;  %v17592_v58 = vmul.f32 %v17456_v30, %v17331_v16  ;;  %v17596_v61 = vmul.f32 %v17456_v30, %v17335_v32 }
 0x704   :  { %v17600_v7 = vmul.f32 %v17456_v30, %v17339_v12  ;;  %v17604_v49 = vmul.f32 %v17456_v30, %v17343_v5  ;;  %v17608_v35 = vmul.f32 %v17456_v30, %v17347_v56  ;;  %v17612_v42 = vmul.f32 %v17456_v30, %v17351_v63  ;;  %v19680_v56 = vld [vmem:[#allocation90_spill] sm:$0xff] }
 0x705   :  { %v17616_v16 = vmul.f32 %v17456_v30, %v17355_v8  ;;  %v17620_v32 = vmul.f32 %v17456_v30, %v17359_v48  ;;  %v17624_v12 = vmul.f32 %v17456_v30, %v17363_v28  ;;  %v17628_v5 = vmul.f32 %v17456_v30, %v17367_v20 }
 0x706   :  { %v17632_v63 = vmul.f32 %v17456_v30, %v19680_v56  ;;  %v17636_v8 = vmul.f32 %v17456_v30, %v17375_v13  ;;  %v17640_v48 = vmul.f32 %v17456_v30, %v17379_v29  ;;  %v17644_v28 = vmul.f32 %v17456_v30, %v17383_v47 }
 0x707   :  { %v17648_v20 = vmul.f32 %v17456_v30, %v17387_v10  ;;  %v17652_v56 = vmul.f32 %v17456_v30, %v17391_v19  ;;  %v17656_v13 = vmul.f32 %v17456_v30, %v17395_v60  ;;  %v17660_v29 = vmul.f32 %v17456_v30, %v17399_v53 }
 0x708   :  { %v17664_v47 = vmul.f32 %v17456_v30, %v17403_v36  ;;  %v17668_v10 = vmul.f32 %v17456_v30, %v17407_v39  ;;  %v17672_v19 = vmul.f32 %v17456_v30, %v17411_v25  ;;  %v17676_v60 = vmul.f32 %v17456_v30, %v17415_v59 }
 0x709   :  { %v17680_v53 = vmul.f32 %v17456_v30, %v17419_v2  ;;  %v17684_v36 = vmul.f32 %v17456_v30, %v17423_v55  ;;  %v17688_v39 = vmul.f32 %v17456_v30, %v17427_v14 }
 0x70a   :  { %19681 = vst [vmem:[#allocation125_spill] sm:$0xff] %v17668_v10  ;;  %19682 = vst [vmem:[#allocation93_spill] sm:$0xff] %v17672_v19  ;;  %v19687_v10 = vld [vmem:[#allocation36_spill] sm:$0xff]  ;;  %v19688_v19 = vld [vmem:[#allocation38_spill] sm:$0xff] }
 0x70b   :  { %19683 = vst [vmem:[#allocation126_spill] sm:$0xff] %v17676_v60  ;;  %19684 = vst [vmem:[#allocation94_spill] sm:$0xff] %v17680_v53  ;;  %v17692_v25 = vmul.f32 %v17456_v30, %v19687_v10  ;;  %v17696_v59 = vmul.f32 %v17456_v30, %v19688_v19  ;;  %v19689_v60 = vld [vmem:[#allocation122_spill] sm:$0xff]  ;;  %v19690_v53 = vld [vmem:[#allocation121_spill] sm:$0xff] }
 0x70c   :  { %19685 = vst [vmem:[#allocation40_spill] sm:$0xff] %v17684_v36  ;;  %19686 = vst [vmem:[#allocation41_spill] sm:$0xff] %v17688_v39  ;;  %v17700_v2 = vmul.f32 %v17456_v30, %v19689_v60  ;;  %v17704_v55 = vmul.f32 %v17456_v30, %v19690_v53  ;;  %v19691_v36 = vld [vmem:[#allocation39_spill] sm:$0xff]  ;;  %v19692_v39 = vld [vmem:[#allocation37_spill] sm:$0xff]  ;;  %v17721_v60 = vmul.f32 %v17456_v30, %v17460_v52 }
 0x70d   :  { %v17708_v14 = vmul.f32 %v17456_v30, %v19691_v36  ;;  %v17712_v10 = vmul.f32 %v17456_v30, %v19692_v39  ;;  %v17717_v19 = vld [vmem:[%s18269_s6] ss:$0 sm:$0xff]  ;;  %v17725_v53 = vmul.f32 %v17456_v30, %v17464_v34  ;;  %v17729_v36 = vmul.f32 %v17456_v30, %v17468_v46 }
 0x70e   :  { %v17733_v39 = vmul.f32 %v17456_v30, %v17472_v6  ;;  %v17741_v52 = vmul.f32 %v17456_v30, %v17480_v45  ;;  %v17745_v34 = vmul.f32 %v17456_v30, %v17484_v62  ;;  %v17749_v46 = vmul.f32 %v17456_v30, %v17488_v21 }
 0x70f   :  { %19693 = vst [vmem:[#allocation130_spill] sm:$0xff] %v17712_v10  ;;  %v17737_v10 = vmul.f32 %v17456_v30, %v17476_v11  ;;  %v17753_v6 = vadd.f32 %v17717_v19, %v17492_v22  ;;  %v17757_v11 = vadd.f32 %v17717_v19, %v17496_v23  ;;  %v17761_v45 = vadd.f32 %v17717_v19, %v17500_v38 }
 0x710   :  { %v17765_v62 = vadd.f32 %v17717_v19, %v17504_v40  ;;  %v17769_v30 = vadd.f32 %v17717_v19, %v17508_v31  ;;  %v17773_v21 = vadd.f32 %v17717_v19, %v17512_v18  ;;  %v17777_v22 = vadd.f32 %v17717_v19, %v17516_v50 }
 0x711   :  { %v17781_v23 = vadd.f32 %v17717_v19, %v17520_v26  ;;  %v17785_v38 = vadd.f32 %v17717_v19, %v17524_v51  ;;  %v17789_v40 = vadd.f32 %v17717_v19, %v17528_v9  ;;  %v17793_v31 = vadd.f32 %v17717_v19, %v17532_v0 }
 0x712   :  { %v17797_v18 = vadd.f32 %v17717_v19, %v17536_v37  ;;  %v17801_v50 = vadd.f32 %v17717_v19, %v17540_v17  ;;  %v17805_v26 = vadd.f32 %v17717_v19, %v17544_v43  ;;  %v17809_v51 = vadd.f32 %v17717_v19, %v17548_v3 }
 0x713   :  { %v17813_v9 = vadd.f32 %v17717_v19, %v17552_v57  ;;  %v17817_v0 = vadd.f32 %v17717_v19, %v17556_v44  ;;  %v17821_v37 = vadd.f32 %v17717_v19, %v17560_v33  ;;  %v17825_v17 = vadd.f32 %v17717_v19, %v17564_v4 }
 0x714   :  { %v17829_v43 = vadd.f32 %v17717_v19, %v17568_v41  ;;  %v17833_v3 = vadd.f32 %v17717_v19, %v17572_v24  ;;  %v17837_v57 = vadd.f32 %v17717_v19, %v17576_v1  ;;  %v17841_v44 = vadd.f32 %v17717_v19, %v17580_v54 }
 0x715   :  { %v17845_v33 = vadd.f32 %v17717_v19, %v17584_v27  ;;  %v17849_v4 = vadd.f32 %v17717_v19, %v17588_v15  ;;  %v17853_v41 = vadd.f32 %v17717_v19, %v17592_v58  ;;  %v17857_v24 = vadd.f32 %v17717_v19, %v17596_v61 }
 0x716   :  { %v17861_v1 = vadd.f32 %v17717_v19, %v17600_v7  ;;  %v17865_v54 = vadd.f32 %v17717_v19, %v17604_v49  ;;  %v17869_v27 = vadd.f32 %v17717_v19, %v17608_v35  ;;  %v17873_v15 = vadd.f32 %v17717_v19, %v17612_v42 }
 0x717   :  { %v17877_v58 = vadd.f32 %v17717_v19, %v17616_v16  ;;  %v17881_v61 = vadd.f32 %v17717_v19, %v17620_v32  ;;  %v17885_v7 = vadd.f32 %v17717_v19, %v17624_v12  ;;  %v17889_v49 = vadd.f32 %v17717_v19, %v17628_v5 }
 0x718   :  { %v17893_v35 = vadd.f32 %v17717_v19, %v17632_v63  ;;  %v17897_v42 = vadd.f32 %v17717_v19, %v17636_v8  ;;  %v17901_v16 = vadd.f32 %v17717_v19, %v17640_v48  ;;  %v17905_v32 = vadd.f32 %v17717_v19, %v17644_v28  ;;  %v19699_v28 = vld [vmem:[#allocation125_spill] sm:$0xff] }
 0x719   :  { %v17909_v12 = vadd.f32 %v17717_v19, %v17648_v20  ;;  %v17913_v5 = vadd.f32 %v17717_v19, %v17652_v56  ;;  %v17917_v63 = vadd.f32 %v17717_v19, %v17656_v13  ;;  %v17921_v8 = vadd.f32 %v17717_v19, %v17660_v29 }
 0x71a   :  { %v17925_v48 = vadd.f32 %v17717_v19, %v17664_v47  ;;  %v17929_v20 = vadd.f32 %v17717_v19, %v19699_v28 }
 0x71b   :  { %19694 = vst [vmem:[#allocation129_spill] sm:$0xff] %v17909_v12  ;;  %19695 = vst [vmem:[#allocation44_spill] sm:$0xff] %v17913_v5  ;;  %v19700_v12 = vld [vmem:[#allocation93_spill] sm:$0xff]  ;;  %v19701_v5 = vld [vmem:[#allocation126_spill] sm:$0xff] }
 0x71c   :  { %19696 = vst [vmem:[#allocation133_spill] sm:$0xff] %v17917_v63  ;;  %19697 = vst [vmem:[#allocation35_spill] sm:$0xff] %v17921_v8  ;;  %v17933_v56 = vadd.f32 %v17717_v19, %v19700_v12  ;;  %v17937_v13 = vadd.f32 %v17717_v19, %v19701_v5  ;;  %v19702_v63 = vld [vmem:[#allocation94_spill] sm:$0xff]  ;;  %v19703_v8 = vld [vmem:[#allocation40_spill] sm:$0xff]  ;;  %v17953_v12 = vadd.f32 %v17717_v19, %v17692_v25 }
 0x71d   :  { %19698 = vst [vmem:[#allocation8_spill] sm:$0xff] %v17925_v48  ;;  %v17941_v29 = vadd.f32 %v17717_v19, %v19702_v63  ;;  %v17945_v47 = vadd.f32 %v17717_v19, %v19703_v8  ;;  %v19704_v48 = vld [vmem:[#allocation41_spill] sm:$0xff]  ;;  %v17957_v5 = vadd.f32 %v17717_v19, %v17696_v59  ;;  %v17961_v63 = vadd.f32 %v17717_v19, %v17700_v2 }
 0x71e   :  { %v17949_v28 = vadd.f32 %v17717_v19, %v19704_v48  ;;  %v17965_v8 = vadd.f32 %v17717_v19, %v17704_v55  ;;  %v17969_v48 = vadd.f32 %v17717_v19, %v17708_v14  ;;  %v17977_v59 = vadd.f32 %v17717_v19, %v17721_v60 }
 0x71f   :  { %v17981_v2 = vadd.f32 %v17717_v19, %v17725_v53  ;;  %v17985_v55 = vadd.f32 %v17717_v19, %v17729_v36  ;;  %v17989_v14 = vadd.f32 %v17717_v19, %v17733_v39  ;;  %v17997_v60 = vadd.f32 %v17717_v19, %v17741_v52 }
 0x720   :  { %19705 = vst [vmem:[#allocation134_spill] sm:$0xff] %v17949_v28  ;;  %v19706_v28 = vld [vmem:[#allocation130_spill] sm:$0xff]  ;;  %v18001_v53 = vadd.f32 %v17717_v19, %v17745_v34  ;;  %v18005_v36 = vadd.f32 %v17717_v19, %v17749_v46  ;;  %v9365_v39 = vmax.f32 %v17757_v11, 0.0  ;;  %v9369_v52 = vmax.f32 %v17773_v21, 0.0 }
 0x721   :  { %v17973_v25 = vadd.f32 %v17717_v19, %v19706_v28  ;;  %19707 = vst [vmem:[#allocation5_spill] sm:$0xff] %v17985_v55  ;;  %19708 = vst [vmem:[#allocation43_spill] sm:$0xff] %v17989_v14  ;;  %v17993_v28 = vadd.f32 %v17717_v19, %v17737_v10  ;;  %v9364_v55 = vmax.f32 %v17753_v6, 0.0  ;;  %v9366_v14 = vmax.f32 %v17761_v45, 0.0 }
 0x722   :  { %19710 = vst [vmem:[#allocation138_spill] sm:$0xff] %v17997_v60  ;;  %19711 = vst [vmem:[#allocation137_spill] sm:$0xff] %v18001_v53  ;;  %v9367_v10 = vmax.f32 %v17765_v62, 0.0  ;;  %v9370_v60 = vmax.f32 %v17777_v22, 0.0  ;;  %v9371_v34 = vmax.f32 %v17781_v23, 0.0  ;;  %v9372_v53 = vmax.f32 %v17785_v38, 0.0 }
 0x723   :  { %19709 = vst [vmem:[#allocation42_spill] sm:$0xff] %v17993_v28  ;;  %v9368_v28 = vmax.f32 %v17769_v30, 0.0  ;;  %v9373_v19 = vmax.f32 %v17789_v40, 0.0  ;;  %v9374_v46 = vmax.f32 %v17793_v31, 0.0  ;;  %v9375_v6 = vmax.f32 %v17797_v18, 0.0  ;;  %9428 = vst [vmem:[%s18270_s7] sm:$0xff] %v9364_v55 }
 0x724   :  { %9429 = vst [vmem:[%s18270_s7 + $0x8] sm:$0xff] %v9365_v39  ;;  %9430 = vst [vmem:[%s18270_s7 + $0x10] sm:$0xff] %v9366_v14  ;;  %v9376_v11 = vmax.f32 %v17801_v50, 0.0  ;;  %v9377_v45 = vmax.f32 %v17805_v26, 0.0  ;;  %v9378_v62 = vmax.f32 %v17809_v51, 0.0  ;;  %v9379_v30 = vmax.f32 %v17813_v9, 0.0 }
 0x725   :  { %9431 = vst [vmem:[%s18270_s7 + $0x18] sm:$0xff] %v9367_v10  ;;  %9432 = vst [vmem:[%s18270_s7 + $0x20] sm:$0xff] %v9368_v28  ;;  %v9380_v21 = vmax.f32 %v17817_v0, 0.0  ;;  %v9381_v22 = vmax.f32 %v17821_v37, 0.0  ;;  %v9382_v23 = vmax.f32 %v17825_v17, 0.0  ;;  %v9383_v38 = vmax.f32 %v17829_v43, 0.0 }
 0x726   :  { %9433 = vst [vmem:[%s18270_s7 + $0x28] sm:$0xff] %v9369_v52  ;;  %9434 = vst [vmem:[%s18270_s7 + $0x30] sm:$0xff] %v9370_v60  ;;  %v9384_v40 = vmax.f32 %v17833_v3, 0.0  ;;  %v9385_v31 = vmax.f32 %v17837_v57, 0.0  ;;  %v9386_v18 = vmax.f32 %v17841_v44, 0.0  ;;  %v9387_v50 = vmax.f32 %v17845_v33, 0.0 }
 0x727   :  { %9435 = vst [vmem:[%s18270_s7 + $0x38] sm:$0xff] %v9371_v34  ;;  %9436 = vst [vmem:[%s18270_s7 + $0x40] sm:$0xff] %v9372_v53  ;;  %v9388_v26 = vmax.f32 %v17849_v4, 0.0  ;;  %v9389_v51 = vmax.f32 %v17853_v41, 0.0  ;;  %v9390_v9 = vmax.f32 %v17857_v24, 0.0  ;;  %v9391_v0 = vmax.f32 %v17861_v1, 0.0 }
 0x728   :  { %9437 = vst [vmem:[%s18270_s7 + $0x48] sm:$0xff] %v9373_v19  ;;  %9438 = vst [vmem:[%s18270_s7 + $0x50] sm:$0xff] %v9374_v46  ;;  %v9392_v37 = vmax.f32 %v17865_v54, 0.0  ;;  %v9393_v17 = vmax.f32 %v17869_v27, 0.0  ;;  %v9394_v43 = vmax.f32 %v17873_v15, 0.0  ;;  %v9395_v3 = vmax.f32 %v17877_v58, 0.0 }
 0x729   :  { %9439 = vst [vmem:[%s18270_s7 + $0x58] sm:$0xff] %v9375_v6  ;;  %9440 = vst [vmem:[%s18270_s7 + $0x60] sm:$0xff] %v9376_v11  ;;  %v9396_v57 = vmax.f32 %v17881_v61, 0.0  ;;  %v9397_v44 = vmax.f32 %v17885_v7, 0.0  ;;  %v9398_v33 = vmax.f32 %v17889_v49, 0.0  ;;  %v9399_v4 = vmax.f32 %v17893_v35, 0.0 }
 0x72a   :  { %9441 = vst [vmem:[%s18270_s7 + $0x68] sm:$0xff] %v9377_v45  ;;  %9442 = vst [vmem:[%s18270_s7 + $0x70] sm:$0xff] %v9378_v62  ;;  %v9400_v41 = vmax.f32 %v17897_v42, 0.0  ;;  %v9401_v24 = vmax.f32 %v17901_v16, 0.0  ;;  %v9402_v1 = vmax.f32 %v17905_v32, 0.0  ;;  %v19712_v54 = vld [vmem:[#allocation129_spill] sm:$0xff] }
 0x72b   :  { %9443 = vst [vmem:[%s18270_s7 + $0x78] sm:$0xff] %v9379_v30  ;;  %9444 = vst [vmem:[%s18270_s7 + $0x80] sm:$0xff] %v9380_v21  ;;  %v9403_v27 = vmax.f32 %v19712_v54, 0.0  ;;  %v19713_v15 = vld [vmem:[#allocation44_spill] sm:$0xff]  ;;  %v19714_v61 = vld [vmem:[#allocation133_spill] sm:$0xff]  ;;  %v9408_v32 = vmax.f32 %v17929_v20, 0.0 }
 0x72c   :  { %9445 = vst [vmem:[%s18270_s7 + $0x88] sm:$0xff] %v9381_v22  ;;  %9446 = vst [vmem:[%s18270_s7 + $0x90] sm:$0xff] %v9382_v23  ;;  %v9404_v58 = vmax.f32 %v19713_v15, 0.0  ;;  %v9405_v7 = vmax.f32 %v19714_v61, 0.0  ;;  %v19715_v49 = vld [vmem:[#allocation35_spill] sm:$0xff]  ;;  %v19716_v42 = vld [vmem:[#allocation8_spill] sm:$0xff] }
 0x72d   :  { %9447 = vst [vmem:[%s18270_s7 + $0x98] sm:$0xff] %v9383_v38  ;;  %9448 = vst [vmem:[%s18270_s7 + $0xa0] sm:$0xff] %v9384_v40  ;;  %v9406_v35 = vmax.f32 %v19715_v49, 0.0  ;;  %v9407_v16 = vmax.f32 %v19716_v42, 0.0  ;;  %v9409_v55 = vmax.f32 %v17933_v56, 0.0  ;;  %v9410_v14 = vmax.f32 %v17937_v13, 0.0 }
 0x72e   :  { %9449 = vst [vmem:[%s18270_s7 + $0xa8] sm:$0xff] %v9385_v31  ;;  %9450 = vst [vmem:[%s18270_s7 + $0xb0] sm:$0xff] %v9386_v18  ;;  %v9411_v28 = vmax.f32 %v17941_v29, 0.0  ;;  %v9412_v20 = vmax.f32 %v17945_v47, 0.0  ;;  %v19717_v56 = vld [vmem:[#allocation134_spill] sm:$0xff]  ;;  %v9414_v29 = vmax.f32 %v17953_v12, 0.0 }
 0x72f   :  { %9451 = vst [vmem:[%s18270_s7 + $0xb8] sm:$0xff] %v9387_v50  ;;  %9452 = vst [vmem:[%s18270_s7 + $0xc0] sm:$0xff] %v9388_v26  ;;  %v9413_v13 = vmax.f32 %v19717_v56, 0.0  ;;  %v9415_v60 = vmax.f32 %v17957_v5, 0.0  ;;  %v9416_v47 = vmax.f32 %v17961_v63, 0.0  ;;  %v9417_v12 = vmax.f32 %v17965_v8, 0.0 }
 0x730   :  { %9453 = vst [vmem:[%s18270_s7 + $0xc8] sm:$0xff] %v9389_v51  ;;  %9454 = vst [vmem:[%s18270_s7 + $0xd0] sm:$0xff] %v9390_v9  ;;  %v9418_v5 = vmax.f32 %v17969_v48, 0.0  ;;  %v9419_v53 = vmax.f32 %v17973_v25, 0.0  ;;  %v9420_v63 = vmax.f32 %v17977_v59, 0.0  ;;  %v9421_v8 = vmax.f32 %v17981_v2, 0.0 }
 0x731   :  { %9455 = vst [vmem:[%s18270_s7 + $0xd8] sm:$0xff] %v9391_v0  ;;  %9456 = vst [vmem:[%s18270_s7 + $0xe0] sm:$0xff] %v9392_v37  ;;  %v19718_v48 = vld [vmem:[#allocation5_spill] sm:$0xff]  ;;  %v19719_v39 = vld [vmem:[#allocation43_spill] sm:$0xff]  ;;  %v9427_v6 = vmax.f32 %v18005_v36, 0.0 }
 0x732   :  { %9457 = vst [vmem:[%s18270_s7 + $0xe8] sm:$0xff] %v9393_v17  ;;  %9458 = vst [vmem:[%s18270_s7 + $0xf0] sm:$0xff] %v9394_v43  ;;  %v9422_v25 = vmax.f32 %v19718_v48, 0.0  ;;  %v9423_v10 = vmax.f32 %v19719_v39, 0.0  ;;  %v19720_v59 = vld [vmem:[#allocation42_spill] sm:$0xff]  ;;  %v19722_v19 = vld [vmem:[#allocation137_spill] sm:$0xff] }
 0x733   :  { %9459 = vst [vmem:[%s18270_s7 + $0xf8] sm:$0xff] %v9395_v3  ;;  %9460 = vst [vmem:[%s18270_s7 + $0x100] sm:$0xff] %v9396_v57  ;;  %v9424_v2 = vmax.f32 %v19720_v59, 0.0  ;;  %v19721_v52 = vld [vmem:[#allocation138_spill] sm:$0xff]  ;;  %v9426_v46 = vmax.f32 %v19722_v19, 0.0 }
 0x734   :  { %9461 = vst [vmem:[%s18270_s7 + $0x108] sm:$0xff] %v9397_v44  ;;  %9462 = vst [vmem:[%s18270_s7 + $0x110] sm:$0xff] %v9398_v33  ;;  %v9425_v34 = vmax.f32 %v19721_v52, 0.0 }
 0x735   :  { %9463 = vst [vmem:[%s18270_s7 + $0x118] sm:$0xff] %v9399_v4  ;;  %9464 = vst [vmem:[%s18270_s7 + $0x120] sm:$0xff] %v9400_v41 }
 0x736   :  { %9465 = vst [vmem:[%s18270_s7 + $0x128] sm:$0xff] %v9401_v24  ;;  %9466 = vst [vmem:[%s18270_s7 + $0x130] sm:$0xff] %v9402_v1 }
 0x737   :  { %9467 = vst [vmem:[%s18270_s7 + $0x138] sm:$0xff] %v9403_v27  ;;  %9468 = vst [vmem:[%s18270_s7 + $0x140] sm:$0xff] %v9404_v58 }
 0x738   :  { %9469 = vst [vmem:[%s18270_s7 + $0x148] sm:$0xff] %v9405_v7  ;;  %9470 = vst [vmem:[%s18270_s7 + $0x150] sm:$0xff] %v9406_v35 }
 0x739   :  { %9471 = vst [vmem:[%s18270_s7 + $0x158] sm:$0xff] %v9407_v16  ;;  %9472 = vst [vmem:[%s18270_s7 + $0x160] sm:$0xff] %v9408_v32 }
 0x73a   :  { %9473 = vst [vmem:[%s18270_s7 + $0x168] sm:$0xff] %v9409_v55  ;;  %9474 = vst [vmem:[%s18270_s7 + $0x170] sm:$0xff] %v9410_v14 }
 0x73b   :  { %9475 = vst [vmem:[%s18270_s7 + $0x178] sm:$0xff] %v9411_v28  ;;  %9476 = vst [vmem:[%s18270_s7 + $0x180] sm:$0xff] %v9412_v20 }
 0x73c   :  { %9477 = vst [vmem:[%s18270_s7 + $0x188] sm:$0xff] %v9413_v13  ;;  %9478 = vst [vmem:[%s18270_s7 + $0x190] sm:$0xff] %v9414_v29 }
 0x73d   :  { %9479 = vst [vmem:[%s18270_s7 + $0x198] sm:$0xff] %v9415_v60  ;;  %9480 = vst [vmem:[%s18270_s7 + $0x1a0] sm:$0xff] %v9416_v47 }
 0x73e   :  { %9481 = vst [vmem:[%s18270_s7 + $0x1a8] sm:$0xff] %v9417_v12  ;;  %9482 = vst [vmem:[%s18270_s7 + $0x1b0] sm:$0xff] %v9418_v5 }
 0x73f   :  { %9483 = vst [vmem:[%s18270_s7 + $0x1b8] sm:$0xff] %v9419_v53  ;;  %9484 = vst [vmem:[%s18270_s7 + $0x1c0] sm:$0xff] %v9420_v63 }
 0x740   :  { %9485 = vst [vmem:[%s18270_s7 + $0x1c8] sm:$0xff] %v9421_v8  ;;  %9486 = vst [vmem:[%s18270_s7 + $0x1d0] sm:$0xff] %v9422_v25 }
 0x741   :  { %9487 = vst [vmem:[%s18270_s7 + $0x1d8] sm:$0xff] %v9423_v10  ;;  %9488 = vst [vmem:[%s18270_s7 + $0x1e0] sm:$0xff] %v9424_v2 }
 0x742   :  { %9489 = vst [vmem:[%s18270_s7 + $0x1e8] sm:$0xff] %v9425_v34  ;;  %9490 = vst [vmem:[%s18270_s7 + $0x1f0] sm:$0xff] %v9426_v46 }
 0x743   :  { %9491 = vst [vmem:[%s18270_s7 + $0x1f8] sm:$0xff] %v9427_v6 }

</bundles_post_ra>
